<compile_context>
chip_gen: v7x
topology: tpu7x:2x2x1
jax: 0.10.0
libtpu: 0.0.40
codegen_flags: <defaults>
</compile_context>

<pallas_src>
import functools
import math

import jax
import jax.numpy as jnp
import numpy as np
from jax.experimental import pallas as pl
from jax.experimental.pallas import tpu as pltpu

ESM_DIM = 1280
H1, H2 = 512, 256
HIDDEN = 32          # config.hidden_dim
LEGAL = 20
CIN = HIDDEN + LEGAL  # conv1 input channels
EPS = 1e-5
SLOPE = 0.01          # LeakyReLU default negative_slope


def _leaky_relu(x):
    return jnp.where(x > 0, x, SLOPE * x)


def repr_kernel(node_s_ref, legal_ref,
                w1_ref, b1_ref, w2_ref, b2_ref, w3_ref, b3_ref,
                cw1_ref, cb1_ref, cw2_ref, cb2_ref,
                out_ref, *, seq_len):
    # One grid step == one slab of TM rows containing whole graphs.
    x = node_s_ref[...]                                   # (TM, 1280) f32
    tm = x.shape[0]

    # ---- LayerNorm stats (affine folded into w1/b1 on host), one-pass var ----
    mu = jnp.mean(x, axis=-1, keepdims=True)
    ex2 = jnp.mean(x * x, axis=-1, keepdims=True)
    var = ex2 - mu * mu
    xh = (x - mu) * jax.lax.rsqrt(var + EPS)

    # ---- MLP: bf16 MXU operands, f32 accumulation; elementwise stays f32 ----
    h = jnp.dot(xh.astype(jnp.bfloat16), w1_ref[...],
                preferred_element_type=jnp.float32) + b1_ref[...]
    h = _leaky_relu(h)
    h = jnp.dot(h.astype(jnp.bfloat16), w2_ref[...],
                preferred_element_type=jnp.float32) + b2_ref[...]
    h = _leaky_relu(h)
    h = jnp.dot(h.astype(jnp.bfloat16), w3_ref[...],
                preferred_element_type=jnp.float32) + b3_ref[...]   # (TM, 32) f32

    # ---- concat with legal_onehot ----
    feat = jnp.concatenate([h, legal_ref[...]], axis=-1)  # (TM, CIN)

    # Graph-boundary masks: the tile holds whole graphs, so the rows that must
    # drop the left/right conv tap are exactly (row % seq_len == 0 / seq_len-1),
    # which also covers the roll wrap-around rows at the tile edges.
    rows = jax.lax.broadcasted_iota(jnp.int32, (tm, 1), 0)
    not_first = (rows % seq_len) != 0
    not_last = (rows % seq_len) != (seq_len - 1)

    def conv3(f, w_ref, b_ref):
        # k=3, pad=1 conv as 3 shifted matmuls; shifts via XLU roll + masks
        # instead of padded concat + misaligned slices.
        prev = jnp.where(not_first, pltpu.roll(f, 1, axis=0), 0.0)
        nxt = jnp.where(not_last, pltpu.roll(f, f.shape[0] - 1, axis=0), 0.0)
        return (jnp.dot(prev, w_ref[0], preferred_element_type=jnp.float32) +
                jnp.dot(f,    w_ref[1], preferred_element_type=jnp.float32) +
                jnp.dot(nxt,  w_ref[2], preferred_element_type=jnp.float32) +
                b_ref[...])

    y = jnp.maximum(conv3(feat, cw1_ref, cb1_ref), 0.0)   # (TM, HIDDEN)
    z = jnp.maximum(conv3(y, cw2_ref, cb2_ref), 0.0)      # (TM, HIDDEN)
    # HIDDEN=32 < 128 lanes -> masked stores; TM is kept large so the writeback
    # tail is amortized (output traffic is ~2% of the 1280-wide input traffic).
    out_ref[...] = z


def _choose_row_tile(n_rows, seq_len, target):
    """Largest row tile <= target that holds whole graphs, is sublane-aligned,
    divides n_rows, and (when possible) leaves >= 2 grid steps for v7x."""
    unit = (seq_len * 8) // math.gcd(seq_len, 8)   # lcm(seq_len, 8)
    if n_rows % unit != 0:
        return n_rows                              # full-extent block, grid of 1
    if n_rows >= 2 * unit:
        target = min(target, n_rows // 2)
    best = unit
    t = unit
    while t <= min(target, n_rows):
        if n_rows % t == 0:
            best = t
        t += unit
    return best


def representation_network(node_s, legal_onehot, params, *, num_graphs, seq_len,
                           row_tile=512):
    """node_s: (B*L, 1280) f32, legal_onehot: (B*L, 20) f32 -> (B*L, HIDDEN) f32."""
    (ln_g, ln_b, w1, b1, w2, b2, w3, b3, cw1, cb1, cw2, cb2) = params
    N = num_graphs * seq_len
    assert node_s.shape == (N, ESM_DIM)
    assert legal_onehot.shape == (N, LEGAL)

    # Fold LayerNorm affine into the first linear (host side, once):
    #   (xh*g + b) @ w1 + b1 == xh @ (g[:,None]*w1) + (b1 + b @ w1)
    g = ln_g.reshape(ESM_DIM, 1).astype(jnp.float32)
    w1_eff = (g * w1).astype(jnp.bfloat16)
    b1_eff = (b1 + ln_b.reshape(1, ESM_DIM) @ w1).astype(jnp.float32)
    w2_bf = w2.astype(jnp.bfloat16)
    w3_bf = w3.astype(jnp.bfloat16)

    tm = _choose_row_tile(N, seq_len, row_tile)
    grid = (N // tm,)

    def const_spec(shape):
        nd = len(shape)
        # TODO(synk): these weight blocks are identical every grid step; once
        # pipeline_mode=pl.Buffered(1) is stable in this JAX version it would
        # halve their VMEM (valuable on v7x's 64 MiB).
        return pl.BlockSpec(shape, lambda b, _nd=nd: (0,) * _nd)

    in_specs = [
        pl.BlockSpec((tm, ESM_DIM), lambda b: (b, 0)),   # node_s row slab
        pl.BlockSpec((tm, LEGAL),   lambda b: (b, 0)),   # legal_onehot row slab
        const_spec((ESM_DIM, H1)),       # w1 (LN-folded, bf16)
        const_spec((1, H1)),             # b1 (LN-folded)
        const_spec((H1, H2)),            # w2 (bf16)
        const_spec((1, H2)),             # b2
        const_spec((H2, HIDDEN)),        # w3 (bf16)
        const_spec((1, HIDDEN)),         # b3
        const_spec((3, CIN, HIDDEN)),    # conv1 weight (tap, Cin, Cout)
        const_spec((1, HIDDEN)),         # conv1 bias
        const_spec((3, HIDDEN, HIDDEN)), # conv2 weight
        const_spec((1, HIDDEN)),         # conv2 bias
    ]

    kernel = functools.partial(repr_kernel, seq_len=seq_len)

    out = pl.pallas_call(
        kernel,
        out_shape=jax.ShapeDtypeStruct((N, HIDDEN), jnp.float32),
        grid_spec=pltpu.PrefetchScalarGridSpec(
            num_scalar_prefetch=0,
            grid=grid,
            in_specs=in_specs,
            out_specs=pl.BlockSpec((tm, HIDDEN), lambda b: (b, 0)),
        ),
        compiler_params=pltpu.CompilerParams(
            dimension_semantics=("parallel",),
            vmem_limit_bytes=32 * 1024 * 1024,
        ),
    )(node_s, legal_onehot,
      w1_eff, b1_eff, w2_bf, b2, w3_bf, b3, cw1, cb1, cw2, cb2)
    return out


def make_params(key):
    """Deterministic synthetic parameters (same shapes as the PyTorch module)."""
    ks = jax.random.split(key, 10)

    def lin(k, din, dout):
        # stored as (din, dout) == PyTorch weight.T
        return jax.random.normal(k, (din, dout), jnp.float32) * (1.0 / np.sqrt(din))

    ln_g = jnp.ones((1, ESM_DIM), jnp.float32)
    ln_b = jnp.zeros((1, ESM_DIM), jnp.float32)
    w1 = lin(ks[0], ESM_DIM, H1);  b1 = jax.random.normal(ks[1], (1, H1), jnp.float32) * 0.01
    w2 = lin(ks[2], H1, H2);       b2 = jax.random.normal(ks[3], (1, H2), jnp.float32) * 0.01
    w3 = lin(ks[4], H2, HIDDEN);   b3 = jax.random.normal(ks[5], (1, HIDDEN), jnp.float32) * 0.01
    # Conv1d weights: PyTorch shape (Cout, Cin, 3); stored here as (3, Cin, Cout)
    cw1 = jax.random.normal(ks[6], (3, CIN, HIDDEN), jnp.float32) * (1.0 / np.sqrt(3 * CIN))
    cb1 = jax.random.normal(ks[7], (1, HIDDEN), jnp.float32) * 0.01
    cw2 = jax.random.normal(ks[8], (3, HIDDEN, HIDDEN), jnp.float32) * (1.0 / np.sqrt(3 * HIDDEN))
    cb2 = jax.random.normal(ks[9], (1, HIDDEN), jnp.float32) * 0.01
    return (ln_g, ln_b, w1, b1, w2, b2, w3, b3, cw1, cb1, cw2, cb2)


def reference(node_s, legal, params, num_graphs, seq_len, *, matmul_dtype=jnp.float32):
    """Pure-JAX reference mirroring the PyTorch forward.
    matmul_dtype=bf16 reproduces the kernel's MXU input precision for a tight check."""
    (ln_g, ln_b, w1, b1, w2, b2, w3, b3, cw1, cb1, cw2, cb2) = params

    def mm(a, w):
        return jnp.dot(a.astype(matmul_dtype), w.astype(matmul_dtype),
                       preferred_element_type=jnp.float32)

    mu = node_s.mean(-1, keepdims=True)
    var = ((node_s - mu) ** 2).mean(-1, keepdims=True)
    x = (node_s - mu) / jnp.sqrt(var + EPS) * ln_g + ln_b
    h = mm(x, w1) + b1; h = jnp.where(h > 0, h, SLOPE * h)
    h = mm(h, w2) + b2; h = jnp.where(h > 0, h, SLOPE * h)
    h = mm(h, w3) + b3
    feat = jnp.concatenate([h, legal], axis=-1).reshape(num_graphs, seq_len, CIN)

    def conv1d(f, cw, cb):  # f: (B, L, Cin), cw: (3, Cin, Cout)
        fp = jnp.pad(f, ((0, 0), (1, 1), (0, 0)))
        L = f.shape[1]
        return (jnp.einsum("blc,cd->bld", fp[:, 0:L], cw[0]) +
                jnp.einsum("blc,cd->bld", fp[:, 1:L + 1], cw[1]) +
                jnp.einsum("blc,cd->bld", fp[:, 2:L + 2], cw[2]) + cb)

    y = jnp.maximum(conv1d(feat, cw1, cb1), 0.0)
    z = jnp.maximum(conv1d(y, cw2, cb2), 0.0)
    return z.reshape(-1, HIDDEN)


if __name__ == "__main__":
    # TODO(synk): Batch.from_data_list (torch_geometric graph batching) has no Pallas
    # equivalent; inputs are assumed pre-batched as dense equal-length graphs.
    B, L = 32, 8  # 32 graphs x 8 residues -> 256 nodes; row tile 128 -> grid of 2
    key = jax.random.PRNGKey(0)
    k_ns, k_lg, k_p = jax.random.split(key, 3)

    node_s = jax.random.normal(k_ns, (B * L, ESM_DIM), jnp.float32)
    legal_idx = jax.random.randint(k_lg, (B * L,), 0, LEGAL)
    legal_onehot = jax.nn.one_hot(legal_idx, LEGAL, dtype=jnp.float32)

    params = make_params(k_p)

    out = representation_network(node_s, legal_onehot, params, num_graphs=B, seq_len=L)
    out = jax.block_until_ready(out)
    out_np = np.asarray(out)

    # Tight structural check against a reference with matching bf16 MXU inputs.
    ref_bf16 = reference(node_s, legal_onehot, params, B, L, matmul_dtype=jnp.bfloat16)
    np.testing.assert_allclose(out_np, np.asarray(ref_bf16), rtol=1e-2, atol=1e-2)

    # Looser fidelity check against the faithful f32 (PyTorch-equivalent) forward.
    ref_f32 = reference(node_s, legal_onehot, params, B, L, matmul_dtype=jnp.float32)
    np.testing.assert_allclose(out_np, np.asarray(ref_f32), rtol=8e-2, atol=8e-2)

    assert out_np.shape == (B * L, HIDDEN)
    print("KERNEL_OK")
</pallas_src>

<mosaic_0001>
module attributes {stable_mosaic.version = 11 : i64} {
  func.func @repr_kernel(%arg0: i32, %arg1: memref<128x1280xf32, #tpu.memory_space<vmem>>, %arg2: memref<128x20xf32, #tpu.memory_space<vmem>>, %arg3: memref<1280x512xbf16, #tpu.memory_space<vmem>>, %arg4: memref<1x512xf32, #tpu.memory_space<vmem>>, %arg5: memref<512x256xbf16, #tpu.memory_space<vmem>>, %arg6: memref<1x256xf32, #tpu.memory_space<vmem>>, %arg7: memref<256x32xbf16, #tpu.memory_space<vmem>>, %arg8: memref<1x32xf32, #tpu.memory_space<vmem>>, %arg9: memref<3x52x32xf32, #tpu.memory_space<vmem>>, %arg10: memref<1x32xf32, #tpu.memory_space<vmem>>, %arg11: memref<3x32x32xf32, #tpu.memory_space<vmem>>, %arg12: memref<1x32xf32, #tpu.memory_space<vmem>>, %arg13: memref<128x32xf32, #tpu.memory_space<vmem>>) attributes {dimension_semantics = [#tpu.dimension_semantics<parallel>], iteration_bounds = array<i64: 2>, scalar_prefetch = 0 : i64, scratch_operands = 0 : i64, tpu.core_type = #tpu.core_type<tc>, window_params = [{transform_indices = @transform_0, window_bounds = array<i64: 128, 1280>}, {transform_indices = @transform_1, window_bounds = array<i64: 128, 20>}, {pipeline_mode = #tpu.pipeline_mode<synchronous>, transform_indices = @transform_2, window_bounds = array<i64: 1280, 512>}, {pipeline_mode = #tpu.pipeline_mode<synchronous>, transform_indices = @transform_3, window_bounds = array<i64: 1, 512>}, {pipeline_mode = #tpu.pipeline_mode<synchronous>, transform_indices = @transform_4, window_bounds = array<i64: 512, 256>}, {pipeline_mode = #tpu.pipeline_mode<synchronous>, transform_indices = @transform_5, window_bounds = array<i64: 1, 256>}, {pipeline_mode = #tpu.pipeline_mode<synchronous>, transform_indices = @transform_6, window_bounds = array<i64: 256, 32>}, {pipeline_mode = #tpu.pipeline_mode<synchronous>, transform_indices = @transform_7, window_bounds = array<i64: 1, 32>}, {pipeline_mode = #tpu.pipeline_mode<synchronous>, transform_indices = @transform_8, window_bounds = array<i64: 3, 52, 32>}, {pipeline_mode = #tpu.pipeline_mode<synchronous>, transform_indices = @transform_9, window_bounds = array<i64: 1, 32>}, {pipeline_mode = #tpu.pipeline_mode<synchronous>, transform_indices = @transform_10, window_bounds = array<i64: 3, 32, 32>}, {pipeline_mode = #tpu.pipeline_mode<synchronous>, transform_indices = @transform_11, window_bounds = array<i64: 1, 32>}, {transform_indices = @transform_12, window_bounds = array<i64: 128, 32>}]} {
    %c0 = arith.constant 0 : index
    %c0_0 = arith.constant 0 : index
    %0 = vector.load %arg1[%c0, %c0_0] : memref<128x1280xf32, #tpu.memory_space<vmem>>, vector<128x1280xf32>
    %cst = arith.constant dense<0.000000e+00> : vector<128xf32>
    %1 = vector.multi_reduction <add>, %0, %cst [1] : vector<128x1280xf32> to vector<128xf32>
    %2 = vector.shape_cast %1 : vector<128xf32> to vector<128x1xf32>
    %cst_1 = arith.constant 1.280000e+03 : f32
    %3 = vector.broadcast %cst_1 : f32 to vector<128x1xf32>
    %4 = arith.divf %2, %3 : vector<128x1xf32>
    %5 = arith.mulf %0, %0 : vector<128x1280xf32>
    %cst_2 = arith.constant dense<0.000000e+00> : vector<128xf32>
    %6 = vector.multi_reduction <add>, %5, %cst_2 [1] : vector<128x1280xf32> to vector<128xf32>
    %7 = vector.shape_cast %6 : vector<128xf32> to vector<128x1xf32>
    %cst_3 = arith.constant 1.280000e+03 : f32
    %8 = vector.broadcast %cst_3 : f32 to vector<128x1xf32>
    %9 = arith.divf %7, %8 : vector<128x1xf32>
    %10 = arith.mulf %4, %4 : vector<128x1xf32>
    %11 = arith.subf %9, %10 : vector<128x1xf32>
    %12 = vector.broadcast %4 : vector<128x1xf32> to vector<128x1280xf32>
    %13 = arith.subf %0, %12 : vector<128x1280xf32>
    %cst_4 = arith.constant 9.99999974E-6 : f32
    %14 = vector.broadcast %cst_4 : f32 to vector<128x1xf32>
    %15 = arith.addf %11, %14 : vector<128x1xf32>
    %16 = math.rsqrt %15 : vector<128x1xf32>
    %17 = vector.broadcast %16 : vector<128x1xf32> to vector<128x1280xf32>
    %18 = arith.mulf %13, %17 : vector<128x1280xf32>
    %19 = arith.truncf %18 : vector<128x1280xf32> to vector<128x1280xbf16>
    %c0_5 = arith.constant 0 : index
    %c0_6 = arith.constant 0 : index
    %20 = vector.load %arg3[%c0_5, %c0_6] : memref<1280x512xbf16, #tpu.memory_space<vmem>>, vector<1280x512xbf16>
    %cst_7 = arith.constant dense<0.000000e+00> : vector<128x512xf32>
    %21 = tpu.matmul %19, %20, %cst_7 {dimension_numbers = #tpu.dot_dimension_numbers<[1], [0], [0], [1], [0, 0, 1, 1], [], []>} : vector<128x1280xbf16>, vector<1280x512xbf16>, vector<128x512xf32> -> vector<128x512xf32>
    %c0_8 = arith.constant 0 : index
    %c0_9 = arith.constant 0 : index
    %22 = vector.load %arg4[%c0_8, %c0_9] : memref<1x512xf32, #tpu.memory_space<vmem>>, vector<1x512xf32>
    %23 = vector.broadcast %22 : vector<1x512xf32> to vector<128x512xf32>
    %24 = arith.addf %21, %23 : vector<128x512xf32>
    %cst_10 = arith.constant 0.000000e+00 : f32
    %25 = vector.broadcast %cst_10 : f32 to vector<128x512xf32>
    %26 = arith.cmpf ogt, %24, %25 : vector<128x512xf32>
    %cst_11 = arith.constant 0.00999999977 : f32
    %27 = vector.broadcast %cst_11 : f32 to vector<128x512xf32>
    %28 = arith.mulf %27, %24 : vector<128x512xf32>
    %29 = arith.select %26, %24, %28 : vector<128x512xi1>, vector<128x512xf32>
    %30 = arith.truncf %29 : vector<128x512xf32> to vector<128x512xbf16>
    %c0_12 = arith.constant 0 : index
    %c0_13 = arith.constant 0 : index
    %31 = vector.load %arg5[%c0_12, %c0_13] : memref<512x256xbf16, #tpu.memory_space<vmem>>, vector<512x256xbf16>
    %cst_14 = arith.constant dense<0.000000e+00> : vector<128x256xf32>
    %32 = tpu.matmul %30, %31, %cst_14 {dimension_numbers = #tpu.dot_dimension_numbers<[1], [0], [0], [1], [0, 0, 1, 1], [], []>} : vector<128x512xbf16>, vector<512x256xbf16>, vector<128x256xf32> -> vector<128x256xf32>
    %c0_15 = arith.constant 0 : index
    %c0_16 = arith.constant 0 : index
    %33 = vector.load %arg6[%c0_15, %c0_16] : memref<1x256xf32, #tpu.memory_space<vmem>>, vector<1x256xf32>
    %34 = vector.broadcast %33 : vector<1x256xf32> to vector<128x256xf32>
    %35 = arith.addf %32, %34 : vector<128x256xf32>
    %cst_17 = arith.constant 0.000000e+00 : f32
    %36 = vector.broadcast %cst_17 : f32 to vector<128x256xf32>
    %37 = arith.cmpf ogt, %35, %36 : vector<128x256xf32>
    %cst_18 = arith.constant 0.00999999977 : f32
    %38 = vector.broadcast %cst_18 : f32 to vector<128x256xf32>
    %39 = arith.mulf %38, %35 : vector<128x256xf32>
    %40 = arith.select %37, %35, %39 : vector<128x256xi1>, vector<128x256xf32>
    %41 = arith.truncf %40 : vector<128x256xf32> to vector<128x256xbf16>
    %c0_19 = arith.constant 0 : index
    %c0_20 = arith.constant 0 : index
    %42 = vector.load %arg7[%c0_19, %c0_20] : memref<256x32xbf16, #tpu.memory_space<vmem>>, vector<256x32xbf16>
    %cst_21 = arith.constant dense<0.000000e+00> : vector<128x32xf32>
    %43 = tpu.matmul %41, %42, %cst_21 {dimension_numbers = #tpu.dot_dimension_numbers<[1], [0], [0], [1], [0, 0, 1, 1], [], []>} : vector<128x256xbf16>, vector<256x32xbf16>, vector<128x32xf32> -> vector<128x32xf32>
    %c0_22 = arith.constant 0 : index
    %c0_23 = arith.constant 0 : index
    %44 = vector.load %arg8[%c0_22, %c0_23] : memref<1x32xf32, #tpu.memory_space<vmem>>, vector<1x32xf32>
    %45 = vector.broadcast %44 : vector<1x32xf32> to vector<128x32xf32>
    %46 = arith.addf %43, %45 : vector<128x32xf32>
    %c0_24 = arith.constant 0 : index
    %c0_25 = arith.constant 0 : index
    %47 = vector.load %arg2[%c0_24, %c0_25] : memref<128x20xf32, #tpu.memory_space<vmem>>, vector<128x20xf32>
    %48 = tpu.concatenate %46, %47 in 1 : vector<128x32xf32>, vector<128x20xf32> -> vector<128x52xf32>
    %49 = tpu.iota {dimensions = array<i32: 0>} : vector<128x1xi32>
    %c8_i32 = arith.constant 8 : i32
    %c0_i32 = arith.constant 0 : i32
    %50 = arith.cmpi eq, %c8_i32, %c0_i32 : i32
    %c1_i32 = arith.constant 1 : i32
    %51 = arith.select %50, %c1_i32, %c8_i32 : i32
    %52 = vector.broadcast %51 : i32 to vector<128x1xi32>
    %53 = arith.remsi %49, %52 : vector<128x1xi32>
    %c0_i32_26 = arith.constant 0 : i32
    %54 = vector.broadcast %c0_i32_26 : i32 to vector<128x1xi32>
    %55 = arith.cmpi ne, %53, %54 : vector<128x1xi32>
    %c0_i32_27 = arith.constant 0 : i32
    %56 = vector.broadcast %c0_i32_27 : i32 to vector<128x1xi32>
    %57 = arith.cmpi slt, %53, %56 : vector<128x1xi32>
    %c0_i32_28 = arith.constant 0 : i32
    %58 = arith.cmpi slt, %51, %c0_i32_28 : i32
    %59 = vector.broadcast %58 : i1 to vector<128x1xi1>
    %60 = vector.broadcast %59 : vector<128x1xi1> to vector<128x1xi1>
    %61 = arith.xori %57, %60 : vector<128x1xi1>
    %62 = arith.andi %61, %55 : vector<128x1xi1>
    %63 = vector.broadcast %51 : i32 to vector<128x1xi32>
    %64 = arith.addi %53, %63 : vector<128x1xi32>
    %65 = arith.select %62, %64, %53 : vector<128x1xi1>, vector<128x1xi32>
    %c0_i32_29 = arith.constant 0 : i32
    %66 = vector.broadcast %c0_i32_29 : i32 to vector<128x1xi32>
    %67 = arith.cmpi ne, %65, %66 : vector<128x1xi32>
    %c8_i32_30 = arith.constant 8 : i32
    %c0_i32_31 = arith.constant 0 : i32
    %68 = arith.cmpi eq, %c8_i32_30, %c0_i32_31 : i32
    %c1_i32_32 = arith.constant 1 : i32
    %69 = arith.select %68, %c1_i32_32, %c8_i32_30 : i32
    %70 = vector.broadcast %69 : i32 to vector<128x1xi32>
    %71 = arith.remsi %49, %70 : vector<128x1xi32>
    %c0_i32_33 = arith.constant 0 : i32
    %72 = vector.broadcast %c0_i32_33 : i32 to vector<128x1xi32>
    %73 = arith.cmpi ne, %71, %72 : vector<128x1xi32>
    %c0_i32_34 = arith.constant 0 : i32
    %74 = vector.broadcast %c0_i32_34 : i32 to vector<128x1xi32>
    %75 = arith.cmpi slt, %71, %74 : vector<128x1xi32>
    %c0_i32_35 = arith.constant 0 : i32
    %76 = arith.cmpi slt, %69, %c0_i32_35 : i32
    %77 = vector.broadcast %76 : i1 to vector<128x1xi1>
    %78 = vector.broadcast %77 : vector<128x1xi1> to vector<128x1xi1>
    %79 = arith.xori %75, %78 : vector<128x1xi1>
    %80 = arith.andi %79, %73 : vector<128x1xi1>
    %81 = vector.broadcast %69 : i32 to vector<128x1xi32>
    %82 = arith.addi %71, %81 : vector<128x1xi32>
    %83 = arith.select %80, %82, %71 : vector<128x1xi1>, vector<128x1xi32>
    %c7_i32 = arith.constant 7 : i32
    %84 = vector.broadcast %c7_i32 : i32 to vector<128x1xi32>
    %85 = arith.cmpi ne, %83, %84 : vector<128x1xi32>
    %c1_i32_36 = arith.constant 1 : i32
    %86 = tpu.dynamic_rotate %48 by %c1_i32_36 dim 0 : vector<128x52xf32>, i32 -> vector<128x52xf32>
    %cst_37 = arith.constant 0.000000e+00 : f32
    %87 = vector.shape_cast %67 : vector<128x1xi1> to vector<128x1xi1>
    %88 = vector.broadcast %87 : vector<128x1xi1> to vector<128x52xi1>
    %89 = vector.broadcast %cst_37 : f32 to vector<128x52xf32>
    %90 = arith.select %88, %86, %89 : vector<128x52xi1>, vector<128x52xf32>
    %c127_i32 = arith.constant 127 : i32
    %91 = tpu.dynamic_rotate %48 by %c127_i32 dim 0 : vector<128x52xf32>, i32 -> vector<128x52xf32>
    %cst_38 = arith.constant 0.000000e+00 : f32
    %92 = vector.shape_cast %85 : vector<128x1xi1> to vector<128x1xi1>
    %93 = vector.broadcast %92 : vector<128x1xi1> to vector<128x52xi1>
    %94 = vector.broadcast %cst_38 : f32 to vector<128x52xf32>
    %95 = arith.select %93, %91, %94 : vector<128x52xi1>, vector<128x52xf32>
    %c0_39 = arith.constant 0 : index
    %c0_40 = arith.constant 0 : index
    %c0_41 = arith.constant 0 : index
    %96 = vector.load %arg9[%c0_39, %c0_40, %c0_41] : memref<3x52x32xf32, #tpu.memory_space<vmem>>, vector<1x52x32xf32>
    %97 = vector.shape_cast %96 : vector<1x52x32xf32> to vector<52x32xf32>
    %cst_42 = arith.constant dense<0.000000e+00> : vector<128x32xf32>
    %98 = tpu.matmul %90, %97, %cst_42 {dimension_numbers = #tpu.dot_dimension_numbers<[1], [0], [0], [1], [0, 0, 1, 1], [], []>} : vector<128x52xf32>, vector<52x32xf32>, vector<128x32xf32> -> vector<128x32xf32>
    %c1 = arith.constant 1 : index
    %c0_43 = arith.constant 0 : index
    %c0_44 = arith.constant 0 : index
    %99 = vector.load %arg9[%c1, %c0_43, %c0_44] : memref<3x52x32xf32, #tpu.memory_space<vmem>>, vector<1x52x32xf32>
    %100 = vector.shape_cast %99 : vector<1x52x32xf32> to vector<52x32xf32>
    %cst_45 = arith.constant dense<0.000000e+00> : vector<128x32xf32>
    %101 = tpu.matmul %48, %100, %cst_45 {dimension_numbers = #tpu.dot_dimension_numbers<[1], [0], [0], [1], [0, 0, 1, 1], [], []>} : vector<128x52xf32>, vector<52x32xf32>, vector<128x32xf32> -> vector<128x32xf32>
    %102 = arith.addf %98, %101 : vector<128x32xf32>
    %c2 = arith.constant 2 : index
    %c0_46 = arith.constant 0 : index
    %c0_47 = arith.constant 0 : index
    %103 = vector.load %arg9[%c2, %c0_46, %c0_47] : memref<3x52x32xf32, #tpu.memory_space<vmem>>, vector<1x52x32xf32>
    %104 = vector.shape_cast %103 : vector<1x52x32xf32> to vector<52x32xf32>
    %cst_48 = arith.constant dense<0.000000e+00> : vector<128x32xf32>
    %105 = tpu.matmul %95, %104, %cst_48 {dimension_numbers = #tpu.dot_dimension_numbers<[1], [0], [0], [1], [0, 0, 1, 1], [], []>} : vector<128x52xf32>, vector<52x32xf32>, vector<128x32xf32> -> vector<128x32xf32>
    %106 = arith.addf %102, %105 : vector<128x32xf32>
    %c0_49 = arith.constant 0 : index
    %c0_50 = arith.constant 0 : index
    %107 = vector.load %arg10[%c0_49, %c0_50] : memref<1x32xf32, #tpu.memory_space<vmem>>, vector<1x32xf32>
    %108 = vector.broadcast %107 : vector<1x32xf32> to vector<128x32xf32>
    %109 = arith.addf %106, %108 : vector<128x32xf32>
    %cst_51 = arith.constant 0.000000e+00 : f32
    %110 = vector.broadcast %cst_51 : f32 to vector<128x32xf32>
    %111 = arith.maximumf %109, %110 : vector<128x32xf32>
    %c1_i32_52 = arith.constant 1 : i32
    %112 = tpu.dynamic_rotate %111 by %c1_i32_52 dim 0 : vector<128x32xf32>, i32 -> vector<128x32xf32>
    %cst_53 = arith.constant 0.000000e+00 : f32
    %113 = vector.shape_cast %67 : vector<128x1xi1> to vector<128x1xi1>
    %114 = vector.broadcast %113 : vector<128x1xi1> to vector<128x32xi1>
    %115 = vector.broadcast %cst_53 : f32 to vector<128x32xf32>
    %116 = arith.select %114, %112, %115 : vector<128x32xi1>, vector<128x32xf32>
    %c127_i32_54 = arith.constant 127 : i32
    %117 = tpu.dynamic_rotate %111 by %c127_i32_54 dim 0 : vector<128x32xf32>, i32 -> vector<128x32xf32>
    %cst_55 = arith.constant 0.000000e+00 : f32
    %118 = vector.shape_cast %85 : vector<128x1xi1> to vector<128x1xi1>
    %119 = vector.broadcast %118 : vector<128x1xi1> to vector<128x32xi1>
    %120 = vector.broadcast %cst_55 : f32 to vector<128x32xf32>
    %121 = arith.select %119, %117, %120 : vector<128x32xi1>, vector<128x32xf32>
    %c0_56 = arith.constant 0 : index
    %c0_57 = arith.constant 0 : index
    %c0_58 = arith.constant 0 : index
    %122 = vector.load %arg11[%c0_56, %c0_57, %c0_58] : memref<3x32x32xf32, #tpu.memory_space<vmem>>, vector<1x32x32xf32>
    %123 = vector.shape_cast %122 : vector<1x32x32xf32> to vector<32x32xf32>
    %cst_59 = arith.constant dense<0.000000e+00> : vector<128x32xf32>
    %124 = tpu.matmul %116, %123, %cst_59 {dimension_numbers = #tpu.dot_dimension_numbers<[1], [0], [0], [1], [0, 0, 1, 1], [], []>} : vector<128x32xf32>, vector<32x32xf32>, vector<128x32xf32> -> vector<128x32xf32>
    %c1_60 = arith.constant 1 : index
    %c0_61 = arith.constant 0 : index
    %c0_62 = arith.constant 0 : index
    %125 = vector.load %arg11[%c1_60, %c0_61, %c0_62] : memref<3x32x32xf32, #tpu.memory_space<vmem>>, vector<1x32x32xf32>
    %126 = vector.shape_cast %125 : vector<1x32x32xf32> to vector<32x32xf32>
    %cst_63 = arith.constant dense<0.000000e+00> : vector<128x32xf32>
    %127 = tpu.matmul %111, %126, %cst_63 {dimension_numbers = #tpu.dot_dimension_numbers<[1], [0], [0], [1], [0, 0, 1, 1], [], []>} : vector<128x32xf32>, vector<32x32xf32>, vector<128x32xf32> -> vector<128x32xf32>
    %128 = arith.addf %124, %127 : vector<128x32xf32>
    %c2_64 = arith.constant 2 : index
    %c0_65 = arith.constant 0 : index
    %c0_66 = arith.constant 0 : index
    %129 = vector.load %arg11[%c2_64, %c0_65, %c0_66] : memref<3x32x32xf32, #tpu.memory_space<vmem>>, vector<1x32x32xf32>
    %130 = vector.shape_cast %129 : vector<1x32x32xf32> to vector<32x32xf32>
    %cst_67 = arith.constant dense<0.000000e+00> : vector<128x32xf32>
    %131 = tpu.matmul %121, %130, %cst_67 {dimension_numbers = #tpu.dot_dimension_numbers<[1], [0], [0], [1], [0, 0, 1, 1], [], []>} : vector<128x32xf32>, vector<32x32xf32>, vector<128x32xf32> -> vector<128x32xf32>
    %132 = arith.addf %128, %131 : vector<128x32xf32>
    %c0_68 = arith.constant 0 : index
    %c0_69 = arith.constant 0 : index
    %133 = vector.load %arg12[%c0_68, %c0_69] : memref<1x32xf32, #tpu.memory_space<vmem>>, vector<1x32xf32>
    %134 = vector.broadcast %133 : vector<1x32xf32> to vector<128x32xf32>
    %135 = arith.addf %132, %134 : vector<128x32xf32>
    %cst_70 = arith.constant 0.000000e+00 : f32
    %136 = vector.broadcast %cst_70 : f32 to vector<128x32xf32>
    %137 = arith.maximumf %135, %136 : vector<128x32xf32>
    %c0_71 = arith.constant 0 : index
    %c0_72 = arith.constant 0 : index
    %138 = vector.load %arg13[%c0_71, %c0_72] : memref<128x32xf32, #tpu.memory_space<vmem>>, vector<128x32xf32>
    tpu.vector_store %arg13[%c0_71, %c0_72], %137 {strides = array<i32>} : memref<128x32xf32, #tpu.memory_space<vmem>>, vector<128x32xf32>,
    return
  }
  func.func @transform_0(%arg0: i32) -> (i32, i32) {
    %c0_i32 = arith.constant 0 : i32
    %c0_i32_0 = arith.constant 0 : i32
    return %arg0, %c0_i32 : i32, i32
  }
  func.func @transform_1(%arg0: i32) -> (i32, i32) {
    %c0_i32 = arith.constant 0 : i32
    %c0_i32_0 = arith.constant 0 : i32
    return %arg0, %c0_i32 : i32, i32
  }
  func.func @transform_2(%arg0: i32) -> (i32, i32) {
    %c0_i32 = arith.constant 0 : i32
    %c0_i32_0 = arith.constant 0 : i32
    %c0_i32_1 = arith.constant 0 : i32
    return %c0_i32, %c0_i32_0 : i32, i32
  }
  func.func @transform_3(%arg0: i32) -> (i32, i32) {
    %c0_i32 = arith.constant 0 : i32
    %c0_i32_0 = arith.constant 0 : i32
    %c0_i32_1 = arith.constant 0 : i32
    return %c0_i32, %c0_i32_0 : i32, i32
  }
  func.func @transform_4(%arg0: i32) -> (i32, i32) {
    %c0_i32 = arith.constant 0 : i32
    %c0_i32_0 = arith.constant 0 : i32
    %c0_i32_1 = arith.constant 0 : i32
    return %c0_i32, %c0_i32_0 : i32, i32
  }
  func.func @transform_5(%arg0: i32) -> (i32, i32) {
    %c0_i32 = arith.constant 0 : i32
    %c0_i32_0 = arith.constant 0 : i32
    %c0_i32_1 = arith.constant 0 : i32
    return %c0_i32, %c0_i32_0 : i32, i32
  }
  func.func @transform_6(%arg0: i32) -> (i32, i32) {
    %c0_i32 = arith.constant 0 : i32
    %c0_i32_0 = arith.constant 0 : i32
    %c0_i32_1 = arith.constant 0 : i32
    return %c0_i32, %c0_i32_0 : i32, i32
  }
  func.func @transform_7(%arg0: i32) -> (i32, i32) {
    %c0_i32 = arith.constant 0 : i32
    %c0_i32_0 = arith.constant 0 : i32
    %c0_i32_1 = arith.constant 0 : i32
    return %c0_i32, %c0_i32_0 : i32, i32
  }
  func.func @transform_8(%arg0: i32) -> (i32, i32, i32) {
    %c0_i32 = arith.constant 0 : i32
    %c0_i32_0 = arith.constant 0 : i32
    %c0_i32_1 = arith.constant 0 : i32
    %c0_i32_2 = arith.constant 0 : i32
    return %c0_i32, %c0_i32_0, %c0_i32_1 : i32, i32, i32
  }
  func.func @transform_9(%arg0: i32) -> (i32, i32) {
    %c0_i32 = arith.constant 0 : i32
    %c0_i32_0 = arith.constant 0 : i32
    %c0_i32_1 = arith.constant 0 : i32
    return %c0_i32, %c0_i32_0 : i32, i32
  }
  func.func @transform_10(%arg0: i32) -> (i32, i32, i32) {
    %c0_i32 = arith.constant 0 : i32
    %c0_i32_0 = arith.constant 0 : i32
    %c0_i32_1 = arith.constant 0 : i32
    %c0_i32_2 = arith.constant 0 : i32
    return %c0_i32, %c0_i32_0, %c0_i32_1 : i32, i32, i32
  }
  func.func @transform_11(%arg0: i32) -> (i32, i32) {
    %c0_i32 = arith.constant 0 : i32
    %c0_i32_0 = arith.constant 0 : i32
    %c0_i32_1 = arith.constant 0 : i32
    return %c0_i32, %c0_i32_0 : i32, i32
  }
  func.func @transform_12(%arg0: i32) -> (i32, i32) {
    %c0_i32 = arith.constant 0 : i32
    %c0_i32_0 = arith.constant 0 : i32
    return %arg0, %c0_i32 : i32, i32
  }
}

</mosaic_0001>

<bundles_post_ra>
// kernel: tpu_custom_call.1
= control target key start
LH: loop header
LB: loop body
LE: loop exit
PB: predicated region body
PF: predicated region fallthrough
CT: control target
= control target key end

     0   :  { %s14496_s0 = inlined_call_operand.hbm [shape: f32[256,1280], index: 0, kind: input, shape index: {}]   ;;  %s14497_s1 = inlined_call_operand.vmem [shape: f32[256,20], index: 1, kind: input, shape index: {}]   ;;  %s14498_s2 = inlined_call_operand.hbm [shape: bf16[1280,512], index: 2, kind: input, shape index: {}]   ;;  %s14499_s3 = inlined_call_operand.hbm [shape: f32[1,512], index: 3, kind: input, shape index: {}]   ;;  %s14500_s4 = inlined_call_operand.hbm [shape: bf16[512,256], index: 4, kind: input, shape index: {}]   ;;  %s14501_s5 = inlined_call_operand.hbm [shape: f32[1,256], index: 5, kind: input, shape index: {}]   ;;  %s14502_s6 = inlined_call_operand.vmem [shape: bf16[256,32], index: 6, kind: input, shape index: {}]   ;;  %s14503_s7 = inlined_call_operand.hbm [shape: f32[1,32], index: 7, kind: input, shape index: {}]   ;;  %s14504_s8 = inlined_call_operand.vmem [shape: f32[3,52,32], index: 8, kind: input, shape index: {}]   ;;  %s14505_s9 = inlined_call_operand.hbm [shape: f32[1,32], index: 9, kind: input, shape index: {}]   ;;  %s14506_s10 = inlined_call_operand.hbm [shape: f32[3,32,32], index: 10, kind: input, shape index: {}]   ;;  %s14507_s11 = inlined_call_operand.hbm [shape: f32[1,32], index: 11, kind: input, shape index: {}]   ;;  %s14508_s12 = inlined_call_operand.vmem [shape: f32[256,32], index: 12, kind: output, shape index: {}]  }
   0x1   :  { %14603 = sst [smem:[#allocation53_spill]] %s14497_s1 }
   0x2   :  { %14604 = sst [smem:[#allocation54_spill]] %s14502_s6 }
   0x3   :  { %14605 = sst [smem:[#allocation55_spill]] %s14504_s8 }
   0x4   :  { %14606 = sst [smem:[#allocation56_spill]] %s14508_s12 }
   0x5   :  { %17 = vsyncpa [#allocation3], 0 }
   0x6   :  { %19 = vsyncpa [#allocation3 + $0x1], 0 }
   0x7   :  { %20 = vsyncpa [#allocation5], 0 }
   0x8   :  { %21 = vsyncpa [#allocation8], 0 }
   0x9   :  { %22 = vsyncpa [#allocation11], 0 }
   0xa   :  { %23 = vsyncpa [#allocation14], 0  ;;  %s10870_s21 = smov 0   ;;  %s10872_s22 = smov 0  }
   0xb   :  { %s10874_s23 = smov 0   ;;  %s10876_s24 = smov 0  }
   0xc LB: > { %s10789_s25 = smov [#allocation4]   ;;  %s14509_s27 = sadd.s32 4294967295, %s10787_s24   ;;  %s10787_s24 = sphi %s10876_s24, %s14983_s24   ;;  %s10783_s23 = sphi %s10874_s23, %s14982_s23   ;;  %s10779_s22 = sphi %s10872_s22, %s14981_s22   ;;  %s10775_s21 = sphi %s10870_s21, %s14980_s21  }
   0xd   : > { %s334_s26 = sshll.u32 %s10789_s25, 4  ;;  %p8082_p0 = scmp.ge.s32.totalorder %s10787_s24, 1  ;;  %s10899_s26 = int_to_ptr.vmem [resolvable:$true] %s334_s26 }
   0xe   : > { %p10894_p1 = scmp.eq.s32.totalorder %s14509_s27, 0  ;;  %p322_p2 = scmp.lt.s32.totalorder %s10787_s24, 3 }
   0xf   : > { %s10790_s30 = smov [#allocation7]   ;;  %s10791_s15 = smov [#allocation10]  }
  0x10   : > { %s14607_s28 = scalar_select %p10894_p1, 1, 0 }
  0x11   : > { %p10901_p3 = pnand %p8082_p0, %p322_p2  ;;  %s358_s13 = sshll.u32 %s10790_s30, 4  ;;  %s10913_s13 = int_to_ptr.vmem [resolvable:$true] %s358_s13 }
  0x12   : > { %s10915_s16 = sshll.u32 %s10791_s15, 4  ;;  %s10483_s19 = scalar_lea.hbm %s14498_s2, 40960  ;;  %s387_s16 = int_to_ptr.vmem [resolvable:$true] %s10915_s16 }
  0x13   : > { %s14608_s29 = scalar_select %p10901_p3, 1, 0 }
  0x14   : > { %p9606_p4 = pneg %p10901_p3  ;;  %p10484_p6 = scmp.ne.s32.totalorder %s14498_s2, %s10483_s19 }
  0x15   : > { %p10490_p10 = scmp.lt.u32.totalorder %s10483_s19, %s14498_s2 }
  0x16   : > { %p10909_p5 = pnand %p9606_p4, %p10894_p1 }
  0x18   : > { %p10925_p7 = pneg %p10909_p5 }
  0x1a   : > { %p10486_p8 = pnand %p10925_p7, %p10484_p6 }
  0x1c   : > { %p10487_p9 = pneg %p10486_p8 }
  0x1e   : > { %p10492_p11 = pnand %p10490_p10, %p10487_p9 }
  0x20   : > { %10495 = shalt.err (!%p10492_p11)
}
  0x21   : > { %s10496_s17 = scalar_lea.vmem %s10899_s26, 40960  ;;  %p10504_p2 = scmp.lt.s32.totalorder %s10899_s26, %s10899_s26 }
  0x22   : > { %p10497_p12 = scmp.ne.s32.totalorder %s10899_s26, %s10496_s17  ;;  %p10505_p4 = scmp.lt.s32.totalorder %s10496_s17, %s10496_s17 }
  0x24   : > { %p10499_p13 = pnand %p10497_p12, %p10925_p7  ;;  %p10506_p6 = por %p10505_p4, %p10504_p2 }
  0x26   : > { %p10500_p0 = pneg %p10499_p13 }
  0x28   : > { %p10507_p8 = pnand %p10506_p6, %p10500_p0 }
  0x2a   : > { %10510 = shalt.err (!%p10507_p8)
}
  0x2b   : > { %s10792_s18 = smov 256   ;;  %s10793_s27 = smov 16  }
  0x2c   : > { %9609 = dma.hbm_to_vmem [thread:$0]  (!%p10909_p5), %s14498_s2, 40960, %s10899_s26, [#allocation5], %s10792_s18, %s10792_s18, %s10793_s27  }
  0x2d   : > { %s10511_s12 = scalar_lea.hbm %s14500_s4, 8192 }
  0x2e   : > { %p10512_p9 = scmp.ne.s32.totalorder %s14500_s4, %s10511_s12  ;;  %p10518_p12 = scmp.lt.u32.totalorder %s10511_s12, %s14500_s4 }
  0x30   : > { %p10514_p10 = pnand %p10512_p9, %p10925_p7 }
  0x32   : > { %p10515_p11 = pneg %p10514_p10 }
  0x34   : > { %p10520_p13 = pnand %p10518_p12, %p10515_p11 }
  0x36   : > { %10523 = shalt.err (!%p10520_p13)
}
  0x37   : > { %s10524_s26 = scalar_lea.vmem %s10913_s13, 8192  ;;  %p10532_p6 = scmp.lt.s32.totalorder %s10913_s13, %s10913_s13 }
  0x38   : > { %p10525_p0 = scmp.ne.s32.totalorder %s10913_s13, %s10524_s26  ;;  %p10533_p8 = scmp.lt.s32.totalorder %s10524_s26, %s10524_s26 }
  0x3a   : > { %p10527_p2 = pnand %p10525_p0, %p10925_p7  ;;  %p10534_p9 = por %p10533_p8, %p10532_p6 }
  0x3c   : > { %p10528_p4 = pneg %p10527_p2 }
  0x3e   : > { %p10535_p10 = pnand %p10534_p9, %p10528_p4 }
  0x40   : > { %10538 = shalt.err (!%p10535_p10)
}
  0x41   : > { %s14515_s1 = smov 128   ;;  %s10795_s6 = smov 8  }
  0x42   : > { %9615 = dma.hbm_to_vmem [thread:$0]  (!%p10909_p5), %s14500_s4, 8192, %s10913_s13, [#allocation8], %s14515_s1, %s14515_s1, %s10795_s6  }
  0x43   : > { %s10539_s19 = scalar_lea.hbm %s14503_s7, 16 }
  0x44   : > { %p10540_p11 = scmp.ne.s32.totalorder %s14503_s7, %s10539_s19  ;;  %p10546_p0 = scmp.lt.u32.totalorder %s10539_s19, %s14503_s7 }
  0x46   : > { %p10542_p12 = pnand %p10540_p11, %p10925_p7 }
  0x48   : > { %p10543_p13 = pneg %p10542_p12 }
  0x4a   : > { %p10548_p2 = pnand %p10546_p0, %p10543_p13 }
  0x4c   : > { %10551 = shalt.err (!%p10548_p2)
}
  0x4d   : > { %s10552_s26 = scalar_lea.vmem %s387_s16, 16  ;;  %s10559_s13 = scalar_lea.vmem %s387_s16, 32 }
  0x4e   : > { %p10553_p4 = scmp.ne.s32.totalorder %s387_s16, %s10552_s26  ;;  %p10560_p9 = scmp.lt.s32.totalorder %s387_s16, %s387_s16 }
  0x4f   : > { %p10561_p10 = scmp.lt.s32.totalorder %s10559_s13, %s10552_s26 }
  0x50   : > { %p10555_p6 = pnand %p10553_p4, %p10925_p7 }
  0x51   : > { %p10562_p3 = por %p10561_p10, %p10560_p9 }
  0x52   : > { %p10556_p8 = pneg %p10555_p6 }
  0x54   : > { %p10563_p1 = pnand %p10562_p3, %p10556_p8 }
  0x56   : > { %10566 = shalt.err (!%p10563_p1)
}
  0x57   : > { %9621 = dma.hbm_to_vmem [thread:$0]  (!%p10909_p5), %s14503_s7, 16, %s387_s16, [#allocation11]  }
  0x58   : > { %s10796_s18 = smov [#allocation13]   ;;  %s10797_s19 = smov [#allocation6]  }
  0x59   : > { %s410_s27 = sshll.u32 %s10796_s18, 4  ;;  %s348_s20 = sshll.u32 %s10797_s19, 4  ;;  %s411_s27 = int_to_ptr.vmem [resolvable:$true] %s410_s27  ;;  %s349_s20 = int_to_ptr.vmem [resolvable:$true] %s348_s20 }
  0x5a   : > { %s10567_s17 = scalar_lea.hbm %s14506_s10, 1536 }
  0x5b   : > { %p10568_p1 = scmp.ne.s32.totalorder %s14506_s10, %s10567_s17  ;;  %p10574_p12 = scmp.lt.u32.totalorder %s10567_s17, %s14506_s10 }
  0x5d   : > { %p10570_p3 = pnand %p10568_p1, %p10925_p7 }
  0x5f   : > { %p10571_p11 = pneg %p10570_p3 }
  0x61   : > { %p10576_p13 = pnand %p10574_p12, %p10571_p11 }
  0x63   : > { %10579 = shalt.err (!%p10576_p13)
}
  0x64   : > { %s10580_s16 = scalar_lea.vmem %s411_s27, 1536  ;;  %p10588_p6 = scmp.lt.s32.totalorder %s411_s27, %s411_s27 }
  0x65   : > { %p10581_p0 = scmp.ne.s32.totalorder %s411_s27, %s10580_s16  ;;  %p10589_p8 = scmp.lt.s32.totalorder %s10580_s16, %s10580_s16 }
  0x67   : > { %p10583_p2 = pnand %p10581_p0, %p10925_p7  ;;  %p10590_p9 = por %p10589_p8, %p10588_p6 }
  0x69   : > { %p10584_p4 = pneg %p10583_p2 }
  0x6b   : > { %p10591_p10 = pnand %p10590_p9, %p10584_p4 }
  0x6d   : > { %10594 = shalt.err (!%p10591_p10)
}
  0x6e   : > { %s14611_s12 = smov 128   ;;  %s10595_s15 = scalar_lea.hbm %s14499_s3, 64 }
  0x6f   : > { %9627 = dma.hbm_to_vmem [thread:$0]  (!%p10909_p5), %s14506_s10, 1536, %s411_s27, [#allocation14], %s14611_s12, %s14611_s12, %s10795_s6  }
  0x70   : > { %p10596_p1 = scmp.ne.s32.totalorder %s14499_s3, %s10595_s15  ;;  %p10602_p12 = scmp.lt.u32.totalorder %s10595_s15, %s14499_s3 }
  0x72   : > { %p10598_p3 = pnand %p10596_p1, %p10925_p7 }
  0x74   : > { %p10599_p11 = pneg %p10598_p3 }
  0x76   : > { %p10604_p13 = pnand %p10602_p12, %p10599_p11 }
  0x78   : > { %10607 = shalt.err (!%p10604_p13)
}
  0x79   : > { %s10608_s16 = scalar_lea.vmem %s349_s20, 64  ;;  %p10616_p6 = scmp.lt.s32.totalorder %s349_s20, %s349_s20 }
  0x7a   : > { %p10609_p0 = scmp.ne.s32.totalorder %s349_s20, %s10608_s16  ;;  %p10617_p8 = scmp.lt.s32.totalorder %s10608_s16, %s10608_s16 }
  0x7c   : > { %p10611_p2 = pnand %p10609_p0, %p10925_p7  ;;  %p10618_p9 = por %p10617_p8, %p10616_p6 }
  0x7e   : > { %p10612_p4 = pneg %p10611_p2 }
  0x80   : > { %p10619_p10 = pnand %p10618_p9, %p10612_p4 }
  0x82   : > { %10622 = shalt.err (!%p10619_p10)
}
  0x83   : > { %9612 = dma.hbm_to_vmem [thread:$0]  (!%p10909_p5), %s14499_s3, 64, %s349_s20, [#allocation5]  }
  0x84   : > { %s10798_s12 = smov [#allocation9]   ;;  %s10799_s18 = smov [#allocation12]  }
  0x85   : > { %s372_s1 = sshll.u32 %s10798_s12, 4  ;;  %s400_s19 = sshll.u32 %s10799_s18, 4  ;;  %s373_s1 = int_to_ptr.vmem [resolvable:$true] %s372_s1  ;;  %s401_s19 = int_to_ptr.vmem [resolvable:$true] %s400_s19 }
  0x86   : > { %s10623_s17 = scalar_lea.hbm %s14501_s5, 32 }
  0x87   : > { %p10624_p1 = scmp.ne.s32.totalorder %s14501_s5, %s10623_s17  ;;  %p10630_p12 = scmp.lt.u32.totalorder %s10623_s17, %s14501_s5 }
  0x89   : > { %p10626_p3 = pnand %p10624_p1, %p10925_p7 }
  0x8b   : > { %p10627_p11 = pneg %p10626_p3 }
  0x8d   : > { %p10632_p13 = pnand %p10630_p12, %p10627_p11 }
  0x8f   : > { %10635 = shalt.err (!%p10632_p13)
}
  0x90   : > { %s10636_s20 = scalar_lea.vmem %s373_s1, 32  ;;  %p10644_p6 = scmp.lt.s32.totalorder %s373_s1, %s373_s1 }
  0x91   : > { %p10637_p0 = scmp.ne.s32.totalorder %s373_s1, %s10636_s20  ;;  %p10645_p8 = scmp.lt.s32.totalorder %s10636_s20, %s10636_s20 }
  0x93   : > { %p10639_p2 = pnand %p10637_p0, %p10925_p7  ;;  %p10646_p9 = por %p10645_p8, %p10644_p6 }
  0x95   : > { %p10640_p4 = pneg %p10639_p2 }
  0x97   : > { %p10647_p10 = pnand %p10646_p9, %p10640_p4 }
  0x99   : > { %10650 = shalt.err (!%p10647_p10)
}
  0x9a   : > { %9618 = dma.hbm_to_vmem [thread:$0]  (!%p10909_p5), %s14501_s5, 32, %s373_s1, [#allocation8]  }
  0x9b   : > { %s10651_s25 = scalar_lea.hbm %s14505_s9, 16 }
  0x9c   : > { %p10652_p1 = scmp.ne.s32.totalorder %s14505_s9, %s10651_s25  ;;  %p10658_p12 = scmp.lt.u32.totalorder %s10651_s25, %s14505_s9 }
  0x9e   : > { %p10654_p3 = pnand %p10652_p1, %p10925_p7 }
  0xa0   : > { %p10655_p11 = pneg %p10654_p3 }
  0xa2   : > { %p10660_p13 = pnand %p10658_p12, %p10655_p11 }
  0xa4   : > { %10663 = shalt.err (!%p10660_p13)
}
  0xa5   : > { %s10664_s8 = scalar_lea.vmem %s401_s19, 16  ;;  %s10671_s1 = scalar_lea.vmem %s401_s19, 32 }
  0xa6   : > { %p10665_p0 = scmp.ne.s32.totalorder %s401_s19, %s10664_s8  ;;  %p10672_p6 = scmp.lt.s32.totalorder %s401_s19, %s401_s19 }
  0xa7   : > { %p10673_p8 = scmp.lt.s32.totalorder %s10671_s1, %s10664_s8 }
  0xa8   : > { %p10667_p2 = pnand %p10665_p0, %p10925_p7 }
  0xa9   : > { %p10674_p9 = por %p10673_p8, %p10672_p6 }
  0xaa   : > { %p10668_p4 = pneg %p10667_p2 }
  0xac   : > { %p10675_p10 = pnand %p10674_p9, %p10668_p4 }
  0xae   : > { %10678 = shalt.err (!%p10675_p10)
}
  0xaf   : > { %9624 = dma.hbm_to_vmem [thread:$0]  (!%p10909_p5), %s14505_s9, 16, %s401_s19, [#allocation11]  }
  0xb0   : > { %s10800_s6 = smov [#allocation15]   ;;  %s10679_s25 = scalar_lea.hbm %s14507_s11, 16 }
  0xb1   : > { %s424_s27 = sshll.u32 %s10800_s6, 4  ;;  %p10680_p1 = scmp.ne.s32.totalorder %s14507_s11, %s10679_s25  ;;  %s425_s27 = int_to_ptr.vmem [resolvable:$true] %s424_s27 }
  0xb2   : > { %p10686_p12 = scmp.lt.u32.totalorder %s10679_s25, %s14507_s11 }
  0xb3   : > { %p10682_p3 = pnand %p10680_p1, %p10925_p7 }
  0xb5   : > { %p10683_p11 = pneg %p10682_p3 }
  0xb7   : > { %p10688_p13 = pnand %p10686_p12, %p10683_p11 }
  0xb9   : > { %10691 = shalt.err (!%p10688_p13)
}
  0xba   : > { %s10692_s19 = scalar_lea.vmem %s425_s27, 16  ;;  %s10699_s8 = scalar_lea.vmem %s425_s27, 32 }
  0xbb   : > { %p10693_p0 = scmp.ne.s32.totalorder %s425_s27, %s10692_s19  ;;  %p10700_p6 = scmp.lt.s32.totalorder %s425_s27, %s425_s27 }
  0xbc   : > { %p10701_p8 = scmp.lt.s32.totalorder %s10699_s8, %s10692_s19 }
  0xbd   : > { %p10695_p2 = pnand %p10693_p0, %p10925_p7 }
  0xbe   : > { %p10702_p9 = por %p10701_p8, %p10700_p6 }
  0xbf   : > { %p10696_p4 = pneg %p10695_p2 }
  0xc1   : > { %p10703_p10 = pnand %p10702_p9, %p10696_p4 }
  0xc3   : > { %10706 = shalt.err (!%p10703_p10)
}
  0xc4   : > { %9630 = dma.hbm_to_vmem [thread:$0]  (!%p10909_p5), %s14507_s11, 16, %s425_s27, [#allocation14]  }
  0xc5   : > { %s11085_s30 = sadd.s32 1, %s10787_s24   ;;  %s36_s14 = sadd.s32 1, %s10783_s23 }
  0xc6   : > { %s33_s20 = ssub.s32 %s10787_s24, %s11085_s30  ;;  %p43_p7 = scmp.ne.s32.totalorder %s10783_s23, %s10779_s22 }
  0xc7   : > { %p34_p1 = scmp.eq.s32.totalorder %s33_s20, 0  ;;  %p44_p3 = scmp.eq.s32.totalorder %s10787_s24, 0 }
  0xc8   : > { %p49_p11 = scmp.ne.s32.totalorder %s10779_s22, %s10775_s21  ;;  %p9643_p12 = scmp.lt.s32.totalorder %s10787_s24, 2 }
  0xc9   : > { %s11097_s6 = scalar_select %p34_p1, %s10783_s23, %s36_s14  }
  0xca   : > { %p45_p13 = por %p44_p3, %p43_p7  ;;  %p14612_p0 = scmp.ne.s32.totalorder %s14607_s28, 0 }
  0xcb   : > { %s435_s18 = sand.u32 1, %s10783_s23   ;;  %s9570_s27 = smul.u32 20480, %s10787_s24 }
  0xcc   : > { %p11101_p2 = por %p14612_p0, %p49_p11  ;;  %s9569_s25 = smul.u32 1280, %s435_s18 }
  0xcd   : > { %s11110_s26 = scalar_lea.hbm %s14496_s0, %s9570_s27  ;;  %p11112_p5 = pnand %p9643_p12, %p45_p13 }
  0xce   : > { %s439_s13 = scalar_lea.vmem [#allocation2], %s9569_s25  ;;  %s11118_s8 = scalar_lea.sflag [#allocation3], %s435_s18 }
  0xcf   : > { %s447_s19 = sshll.u32 %s439_s13, 4  ;;  %s10707_s1 = scalar_lea.hbm %s11110_s26, 20480  ;;  %s11116_s19 = int_to_ptr.vmem [resolvable:$true] %s447_s19 }
  0xd0   : > { %p10708_p4 = scmp.ne.s32.totalorder %s11110_s26, %s10707_s1  ;;  %p10709_p6 = pneg %p11112_p5 }
  0xd1   : > { %s10712_s20 = scalar_lea.hbm %s14496_s0, 40960  ;;  %p10713_p10 = scmp.lt.u32.totalorder %s11110_s26, %s14496_s0 }
  0xd2   : > { %p10710_p8 = pnand %p10709_p6, %p10708_p4  ;;  %p10714_p7 = scmp.lt.u32.totalorder %s10712_s20, %s10707_s1 }
  0xd3   : > { %p10716_p3 = scmp.lt.u32.totalorder %s10707_s1, %s11110_s26 }
  0xd4   : > { %p10711_p9 = pneg %p10710_p8  ;;  %p10715_p1 = por %p10714_p7, %p10713_p10 }
  0xd6   : > { %p10717_p11 = por %p10716_p3, %p10715_p1 }
  0xd8   : > { %p10718_p12 = pnand %p10717_p11, %p10711_p9 }
  0xda   : > { %10721 = shalt.err (!%p10718_p12)
}
  0xdb   : > { %s10722_s18 = scalar_lea.vmem %s11116_s19, 20480  ;;  %s10801_s25 = smov [#allocation2]  }
  0xdc   : > { %p10723_p13 = scmp.ne.s32.totalorder %s11116_s19, %s10722_s18  ;;  %s10727_s17 = sshll.u32 %s10801_s25, 4  ;;  %s10728_s17 = int_to_ptr.vmem [resolvable:$false] %s10727_s17 }
  0xdd   : > { %s10729_s13 = scalar_lea.vmem %s10728_s17, 40960  ;;  %p10730_p8 = scmp.lt.s32.totalorder %s11116_s19, %s10728_s17 }
  0xde   : > { %p10725_p0 = pnand %p10723_p13, %p10709_p6  ;;  %p10731_p10 = scmp.lt.s32.totalorder %s10729_s13, %s10722_s18 }
  0xe0   : > { %p10726_p4 = pneg %p10725_p0  ;;  %p10732_p7 = por %p10731_p10, %p10730_p8 }
  0xe2   : > { %p10733_p1 = pnand %p10732_p7, %p10726_p4 }
  0xe4   : > { %10736 = shalt.err (!%p10733_p1)
}
  0xe5   : > { %s10802_s1 = smov 1280   ;;  %s10803_s16 = smov 80  }
  0xe6   : > { %9634 = dma.hbm_to_vmem [thread:$0]  (!%p11112_p5), %s11110_s26, 20480, %s11116_s19, %s11118_s8, %s10802_s1, %s10802_s1, %s10803_s16  }
  0xe7   : > { %p14615_p6 = scmp.ne.s32.totalorder %s14608_s29, 0 }
  0xe9   : > { %468 = sbr.rel (%p14615_p6) target bundleno = 2115 (0x843), region = 68 }
  0xf0   : > { %s470_s14 = sand.u32 1, %s10779_s22  }
  0xf1   : > { %s9571_s20 = smul.u32 1280, %s470_s14  ;;  %s471_s27 = scalar_lea.sflag [#allocation3], %s470_s14 }
  0xf3   : > { %s11149_s15 = scalar_lea.vmem [#allocation2], %s9571_s20 }
  0xf4   : > { %10754 = dma.done.wait (%p11101_p2), %s471_s27, 20480  }
  0xf5   : > { %10756 = vsyncadd (%p11101_p2), %s471_s27, 4294946816  ;;  %p14616_p9 = scmp.ne.s32.totalorder %s14607_s28, 0 }
  0xf7   : > { %10758 = dma.done.wait (%p14616_p9), [#allocation5], 41024  }
  0xf8   : > { %10760 = vsyncadd (%p14616_p9), [#allocation5], 4294926272 }
  0xf9   : > { %10762 = dma.done.wait (%p14616_p9), [#allocation8], 8224  }
  0xfa   : > { %10764 = vsyncadd (%p14616_p9), [#allocation8], 4294959072 }
  0xfb   : > { %10766 = dma.done.wait (%p14616_p9), [#allocation11], 32  }
  0xfc   : > { %10768 = vsyncadd (%p14616_p9), [#allocation11], 4294967264 }
  0xfd   : > { %10770 = dma.done.wait (%p14616_p9), [#allocation14], 1552  }
  0xfe   : > { %10772 = vsyncadd (%p14616_p9), [#allocation14], 4294965744  ;;  %v566_v0 = vld [vmem:[%s11149_s15] sm:$0xff]  ;;  %v567_v1 = vld [vmem:[%s11149_s15 + $0x8] sm:$0xff]  ;;  %s14778_s12 = sld [smem:[#allocation54_spill]]  ;;  %s14779_s28 = sadd.s32 4294967295, %s10787_s24  }
  0xff   : > { %v568_v2 = vld [vmem:[%s11149_s15 + $0x10] sm:$0xff]  ;;  %v569_v3 = vld [vmem:[%s11149_s15 + $0x18] sm:$0xff]  ;;  %v726_v4 = vadd.f32 %v567_v1, %v566_v0  ;;  %v919_v5 = vmul.f32 %v566_v0, %v566_v0  ;;  %v920_v6 = vmul.f32 %v567_v1, %v567_v1  ;;  %v570_v7 = vld [vmem:[%s11149_s15 + $0x20] sm:$0xff]  ;;  %s8104_s29 = sshll.u32 %s14779_s28, 4  ;;  %s14780_s19 = sld [smem:[#allocation55_spill]] }
 0x100   : > { %v571_v8 = vld [vmem:[%s11149_s15 + $0x28] sm:$0xff]  ;;  %v572_v9 = vld [vmem:[%s11149_s15 + $0x30] sm:$0xff]  ;;  %v921_v10 = vmul.f32 %v568_v2, %v568_v2  ;;  %v573_v11 = vld [vmem:[%s11149_s15 + $0x38] sm:$0xff]  ;;  %v922_v17 = vmul.f32 %v569_v3, %v569_v3  ;;  %v923_v23 = vmul.f32 %v570_v7, %v570_v7  ;;  %p554_p2 = scmp.lt.s32.totalorder %s8104_s29, 31  ;;  %s14781_s13 = sld [smem:[#allocation53_spill]] }
 0x101   : > { %v727_v12 = vadd.f32 %v726_v4, %v568_v2  ;;  %v576_v13 = vld [vmem:[%s11149_s15 + $0x50] sm:$0xff]  ;;  %v577_v14 = vld [vmem:[%s11149_s15 + $0x58] sm:$0xff]  ;;  %v11182_v15 = vld [vmem:[%s11149_s15 + $0x40] sm:$0xff]  ;;  %v1079_v18 = vadd.f32 %v920_v6, %v919_v5  ;;  %v924_v24 = vmul.f32 %v571_v8, %v571_v8  ;;  %v925_v27 = vmul.f32 %v572_v9, %v572_v9  ;;  %s10804_s16 = smov 32  }
 0x102   : > { %v11185_v16 = vld [vmem:[%s11149_s15 + $0x48] sm:$0xff]  ;;  %v578_v19 = vld [vmem:[%s11149_s15 + $0x60] sm:$0xff]  ;;  %v737_v20 = vadd.f32 %v577_v14, %v576_v13  ;;  %v929_v21 = vmul.f32 %v576_v13, %v576_v13  ;;  %v930_v26 = vmul.f32 %v577_v14, %v577_v14  ;;  %v580_v29 = vld [vmem:[%s11149_s15 + $0x70] sm:$0xff]  ;;  %v926_v35 = vmul.f32 %v573_v11, %v573_v11  ;;  %s14985_s29 = smov (!%p554_p2, %s8104_s29), 31 }
 0x103   : > { %v728_v22 = vadd.f32 %v727_v12, %v569_v3  ;;  %v579_v25 = vld [vmem:[%s11149_s15 + $0x68] sm:$0xff]  ;;  %v1080_v28 = vadd.f32 %v1079_v18, %v921_v10  ;;  %v581_v30 = vld [vmem:[%s11149_s15 + $0x78] sm:$0xff]  ;;  %v931_v32 = vmul.f32 %v578_v19, %v578_v19  ;;  %v586_v33 = vld [vmem:[%s11149_s15 + $0xa0] sm:$0xff]  ;;  %v927_v36 = vmul.f32 %v11182_v15, %v11182_v15  ;;  %s8105_s25 = sshll.u32 %s14985_s29, 3 }
 0x104   : > { %v738_v31 = vadd.f32 %v737_v20, %v578_v19  ;;  %v11196_v37 = vmul.f32 %v11185_v16, %v11185_v16  ;;  %v582_v38 = vld [vmem:[%s11149_s15 + $0x80] sm:$0xff]  ;;  %v587_v39 = vld [vmem:[%s11149_s15 + $0xa8] sm:$0xff]  ;;  %v932_v43 = vmul.f32 %v579_v25, %v579_v25  ;;  %v1090_v44 = vadd.f32 %v930_v26, %v929_v21  ;;  %v588_v45 = vld [vmem:[%s11149_s15 + $0xb0] sm:$0xff] }
 0x105   : > { %v729_v34 = vadd.f32 %v728_v22, %v570_v7  ;;  %v1081_v40 = vadd.f32 %v1080_v28, %v922_v17  ;;  %v583_v41 = vld [vmem:[%s11149_s15 + $0x88] sm:$0xff]  ;;  %v584_v47 = vld [vmem:[%s11149_s15 + $0x90] sm:$0xff]  ;;  %v933_v48 = vmul.f32 %v580_v29, %v580_v29  ;;  %v934_v49 = vmul.f32 %v581_v30, %v581_v30  ;;  %v589_v50 = vld [vmem:[%s11149_s15 + $0xb8] sm:$0xff] }
 0x106   : > { %v739_v42 = vadd.f32 %v738_v31, %v579_v25  ;;  %v748_v51 = vadd.f32 %v587_v39, %v586_v33  ;;  %v935_v54 = vmul.f32 %v582_v38, %v582_v38  ;;  %v1091_v55 = vadd.f32 %v1090_v44, %v931_v32  ;;  %v596_v56 = vld [vmem:[%s11149_s15 + $0xf0] sm:$0xff]  ;;  %v597_v57 = vld [vmem:[%s11149_s15 + $0xf8] sm:$0xff]  ;;  %v11207_v58 = vld [vmem:[%s11149_s15 + $0x100] sm:$0xff]  ;;  %s13396_s1 = scalar_lea.vmem %s14781_s13, %s8105_s25 }
 0x107   : > { %v730_v46 = vadd.f32 %v729_v34, %v571_v8  ;;  %v1082_v52 = vadd.f32 %v1081_v40, %v923_v23  ;;  %v936_v60 = vmul.f32 %v583_v41, %v583_v41  ;;  %v759_v62 = vadd.f32 %v597_v57, %v596_v56  ;;  %v585_v0 = vld [vmem:[%s11149_s15 + $0x98] sm:$0xff]  ;;  %v590_v4 = vld [vmem:[%s11149_s15 + $0xc0] sm:$0xff]  ;;  %v11212_v5 = vld [vmem:[%s11149_s15 + $0x108] sm:$0xff] }
 0x108   : > { %v740_v53 = vadd.f32 %v739_v42, %v580_v29  ;;  %v749_v61 = vadd.f32 %v748_v51, %v588_v45  ;;  %v937_v2 = vmul.f32 %v584_v47, %v584_v47  ;;  %v1092_v3 = vadd.f32 %v1091_v55, %v932_v43  ;;  %v591_v14 = vld [vmem:[%s11149_s15 + $0xc8] sm:$0xff]  ;;  %v11217_v17 = vld [vmem:[%s11149_s15 + $0x110] sm:$0xff]  ;;  %v11223_v26 = vld [vmem:[%s11149_s15 + $0x118] sm:$0xff] }
 0x109   : > { %v731_v59 = vadd.f32 %v730_v46, %v572_v9  ;;  %v1083_v63 = vadd.f32 %v1082_v52, %v924_v24  ;;  %v760_v8 = vadd.f32 %v759_v62, %v11207_v58  ;;  %v939_v9 = vmul.f32 %v586_v33, %v586_v33  ;;  %v592_v25 = vld [vmem:[%s11149_s15 + $0xd0] sm:$0xff]  ;;  %v593_v34 = vld [vmem:[%s11149_s15 + $0xd8] sm:$0xff] }
 0x10a   : > { %v741_v1 = vadd.f32 %v740_v53, %v581_v30  ;;  %v750_v7 = vadd.f32 %v749_v61, %v589_v50  ;;  %v1093_v13 = vadd.f32 %v1092_v3, %v933_v48  ;;  %v940_v18 = vmul.f32 %v587_v39, %v587_v39  ;;  %v604_v53 = vld [vmem:[%s11149_s15 + $0x130] sm:$0xff] }
 0x10b   : > { %v732_v6 = vadd.f32 %v731_v59, %v573_v11  ;;  %v1084_v10 = vadd.f32 %v1083_v63, %v925_v27  ;;  %v938_v20 = vmul.f32 %v585_v0, %v585_v0  ;;  %v761_v11 = vadd.f32 %v760_v8, %v11212_v5  ;;  %v606_v59 = vld [vmem:[%s11149_s15 + $0x140] sm:$0xff] }
 0x10c   : > { %v742_v12 = vadd.f32 %v741_v1, %v582_v38  ;;  %v751_v21 = vadd.f32 %v750_v7, %v590_v4  ;;  %v1094_v24 = vadd.f32 %v1093_v13, %v934_v49  ;;  %v941_v27 = vmul.f32 %v588_v45, %v588_v45  ;;  %v603_v45 = vld [vmem:[%s11149_s15 + $0x128] sm:$0xff]  ;;  %v608_v7 = vld [vmem:[%s11149_s15 + $0x150] sm:$0xff]  ;;  %v11246_v13 = vld [vmem:[%s11149_s15 + $0x1a0] sm:$0xff] }
 0x10d   : > { %v733_v19 = vadd.f32 %v732_v6, %v11182_v15  ;;  %v1085_v22 = vadd.f32 %v1084_v10, %v926_v35  ;;  %v762_v30 = vadd.f32 %v761_v11, %v11217_v17  ;;  %v942_v15 = vmul.f32 %v589_v50, %v589_v50  ;;  %v602_v35 = vld [vmem:[%s11149_s15 + $0x120] sm:$0xff] }
 0x10e   : > { %v743_v23 = vadd.f32 %v742_v12, %v583_v41  ;;  %v752_v29 = vadd.f32 %v751_v21, %v591_v14  ;;  %v1095_v33 = vadd.f32 %v1094_v24, %v935_v54  ;;  %v1101_v38 = vadd.f32 %v940_v18, %v939_v9  ;;  %v609_v18 = vld [vmem:[%s11149_s15 + $0x158] sm:$0xff] }
 0x10f   : > { %v734_v28 = vadd.f32 %v733_v19, %v11185_v16  ;;  %v1086_v31 = vadd.f32 %v1085_v22, %v927_v36  ;;  %v763_v40 = vadd.f32 %v762_v30, %v11223_v26  ;;  %v943_v41 = vmul.f32 %v590_v4, %v590_v4  ;;  %v594_v36 = vld [vmem:[%s11149_s15 + $0xe0] sm:$0xff]  ;;  %v619_v22 = vld [vmem:[%s11149_s15 + $0x1a8] sm:$0xff] }
 0x110   : > { %v744_v32 = vadd.f32 %v743_v23, %v584_v47  ;;  %v753_v39 = vadd.f32 %v752_v29, %v592_v25  ;;  %v944_v16 = vmul.f32 %v591_v14, %v591_v14  ;;  %v1096_v44 = vadd.f32 %v1095_v33, %v936_v60  ;;  %v595_v47 = vld [vmem:[%s11149_s15 + $0xe8] sm:$0xff] }
 0x111   : > { %735 = vadd.xlane.f32.xlu0 %v734_v28  ;;  %v1087_v42 = vadd.f32 %v1086_v31, %v11196_v37  ;;  %v1102_v46 = vadd.f32 %v1101_v38, %v941_v27  ;;  %v764_v49 = vadd.f32 %v763_v40, %v602_v35  ;;  %v949_v50 = vmul.f32 %v596_v56, %v596_v56  ;;  %v607_v60 = vld [vmem:[%s11149_s15 + $0x148] sm:$0xff]  ;;  %v610_v28 = vld [vmem:[%s11149_s15 + $0x160] sm:$0xff]  ;;  %v620_v31 = vld [vmem:[%s11149_s15 + $0x1b0] sm:$0xff] }
 0x112   : > { %v745_v43 = vadd.f32 %v744_v32, %v585_v0  ;;  %v754_v48 = vadd.f32 %v753_v39, %v593_v34  ;;  %v950_v51 = vmul.f32 %v597_v57, %v597_v57  ;;  %v1097_v52 = vadd.f32 %v1096_v44, %v937_v2  ;;  %v616_v0 = vld [vmem:[%s11149_s15 + $0x190] sm:$0xff]  ;;  %v617_v57 = vld [vmem:[%s11149_s15 + $0x198] sm:$0xff]  ;;  %v611_v39 = vld [vmem:[%s11149_s15 + $0x168] sm:$0xff] }
 0x113   : > { %1088 = vadd.xlane.f32.xlu1 %v1087_v42  ;;  %v945_v54 = vmul.f32 %v592_v25, %v592_v25  ;;  %v946_v37 = vmul.f32 %v593_v34, %v593_v34  ;;  %v1103_v55 = vadd.f32 %v1102_v46, %v942_v15  ;;  %v765_v62 = vadd.f32 %v764_v49, %v603_v45  ;;  %v605_v2 = vld [vmem:[%s11149_s15 + $0x138] sm:$0xff]  ;;  %v612_v44 = vld [vmem:[%s11149_s15 + $0x170] sm:$0xff]  ;;  %v614_v49 = vld [vmem:[%s11149_s15 + $0x180] sm:$0xff] }
 0x114   : > { %v755_v61 = vadd.f32 %v754_v48, %v594_v36  ;;  %v947_v63 = vmul.f32 %v594_v36, %v594_v36  ;;  %v951_v56 = vmul.f32 %v11207_v58, %v11207_v58  ;;  %v1098_v1 = vadd.f32 %v1097_v52, %v938_v20  ;;  %v613_v48 = vld [vmem:[%s11149_s15 + $0x178] sm:$0xff] }
 0x115   : > { %746 = vadd.xlane.f32.xlu0 %v745_v43  ;;  %v948_v3 = vmul.f32 %v595_v47, %v595_v47  ;;  %v1104_v4 = vadd.f32 %v1103_v55, %v943_v41  ;;  %v952_v6 = vmul.f32 %v11212_v5, %v11212_v5  ;;  %v766_v9 = vadd.f32 %v765_v62, %v604_v53  ;;  %v621_v41 = vld [vmem:[%s11149_s15 + $0x1b8] sm:$0xff]  ;;  %v623_v55 = vld [vmem:[%s11149_s15 + $0x1c8] sm:$0xff]  ;;  %v626_v62 = vld [vmem:[%s11149_s15 + $0x1e0] sm:$0xff] }
 0x116   : > { %v756_v8 = vadd.f32 %v755_v61, %v595_v47  ;;  %v1112_v10 = vadd.f32 %v950_v51, %v949_v50  ;;  %v770_v12 = vadd.f32 %v607_v60, %v606_v59  ;;  %v953_v14 = vmul.f32 %v11217_v17, %v11217_v17  ;;  %v622_v51 = vld [vmem:[%s11149_s15 + $0x1c0] sm:$0xff] }
 0x117   : > { %1099 = vadd.xlane.f32.xlu1 %v1098_v1  ;;  %v1105_v58 = vadd.f32 %v1104_v4, %v944_v16  ;;  %v781_v19 = vadd.f32 %v617_v57, %v616_v0  ;;  %v959_v20 = vmul.f32 %v606_v59, %v606_v59  ;;  %v767_v5 = vadd.f32 %v766_v9, %v605_v2  ;;  %v627_v4 = vld [vmem:[%s11149_s15 + $0x1e8] sm:$0xff] }
 0x118   : > { %v1113_v21 = vadd.f32 %v1112_v10, %v951_v56  ;;  %v771_v11 = vadd.f32 %v770_v12, %v608_v7  ;;  %v960_v23 = vmul.f32 %v607_v60, %v607_v60  ;;  %v954_v25 = vmul.f32 %v11223_v26, %v11223_v26  ;;  %v624_v12 = vld [vmem:[%s11149_s15 + $0x1d0] sm:$0xff] }
 0x119   : > { %757 = vadd.xlane.f32.xlu0 %v756_v8  ;;  %v1106_v24 = vadd.f32 %v1105_v58, %v945_v54  ;;  %v955_v27 = vmul.f32 %v602_v35, %v602_v35  ;;  %v782_v17 = vadd.f32 %v781_v19, %v11246_v13  ;;  %v956_v29 = vmul.f32 %v603_v45, %v603_v45  ;;  %v11278_v19 = vld [vmem:[%s11149_s15 + $0x240] sm:$0xff] }
 0x11a   : > { %v1114_v30 = vadd.f32 %v1113_v21, %v952_v6  ;;  %v772_v15 = vadd.f32 %v771_v11, %v609_v18  ;;  %v961_v32 = vmul.f32 %v608_v7, %v608_v7  ;;  %v957_v34 = vmul.f32 %v604_v53, %v604_v53  ;;  %v11268_v6 = vld [vmem:[%s11149_s15 + $0x230] sm:$0xff]  ;;  %v11271_v7 = vld [vmem:[%s11149_s15 + $0x238] sm:$0xff] }
 0x11b   : > { %768 = vadd.xlane.f32.xlu1 %v767_v5  ;;  %v1107_v33 = vadd.f32 %v1106_v24, %v946_v37  ;;  %v958_v38 = vmul.f32 %v605_v2, %v605_v2  ;;  %v783_v26 = vadd.f32 %v782_v17, %v619_v22  ;;  %v962_v16 = vmul.f32 %v609_v18, %v609_v18  ;;  %v615_v37 = vld [vmem:[%s11149_s15 + $0x188] sm:$0xff]  ;;  %v628_v18 = vld [vmem:[%s11149_s15 + $0x1f0] sm:$0xff]  ;;  %v625_v17 = vld [vmem:[%s11149_s15 + $0x1d8] sm:$0xff] }
 0x11c   : > { %v1115_v35 = vadd.f32 %v1114_v30, %v953_v14  ;;  %v773_v40 = vadd.f32 %v772_v15, %v610_v28  ;;  %v1123_v42 = vadd.f32 %v960_v23, %v959_v20  ;;  %v963_v45 = vmul.f32 %v610_v28, %v610_v28  ;;  %v11284_v28 = vld [vmem:[%s11149_s15 + $0x248] sm:$0xff] }
 0x11d   : > { %v1108_v43 = vadd.f32 %v1107_v33, %v947_v63  ;;  %v784_v36 = vadd.f32 %v783_v26, %v620_v31  ;;  %v964_v46 = vmul.f32 %v611_v39, %v611_v39  ;;  %v965_v52 = vmul.f32 %v612_v44, %v612_v44 }
 0x11e   : > { %v1116_v47 = vadd.f32 %v1115_v35, %v954_v25  ;;  %v774_v50 = vadd.f32 %v773_v40, %v611_v39  ;;  %v1124_v53 = vadd.f32 %v1123_v42, %v961_v32  ;;  %v969_v60 = vmul.f32 %v616_v0, %v616_v0  ;;  %v11290_v35 = vld [vmem:[%s11149_s15 + $0x250] sm:$0xff] }
 0x11f   : > { %v1109_v54 = vadd.f32 %v1108_v43, %v948_v3  ;;  %v785_v59 = vadd.f32 %v784_v36, %v621_v41  ;;  %v970_v61 = vmul.f32 %v617_v57, %v617_v57  ;;  %v966_v1 = vmul.f32 %v613_v48, %v613_v48  ;;  %v631_v36 = vld [vmem:[%s11149_s15 + $0x208] sm:$0xff] }
 0x120   : > { %v1117_v63 = vadd.f32 %v1116_v47, %v955_v27  ;;  %v775_v56 = vadd.f32 %v774_v50, %v612_v44  ;;  %v1125_v2 = vadd.f32 %v1124_v53, %v962_v16  ;;  %v967_v8 = vmul.f32 %v614_v49, %v614_v49  ;;  %v629_v27 = vld [vmem:[%s11149_s15 + $0x1f8] sm:$0xff]  ;;  %v632_v53 = vld [vmem:[%s11149_s15 + $0x210] sm:$0xff] }
 0x121   : > { %1110 = vadd.xlane.f32.xlu0 %v1109_v54  ;;  %v786_v3 = vadd.f32 %v785_v59, %v622_v51  ;;  %v968_v9 = vmul.f32 %v615_v37, %v615_v37  ;;  %v971_v0 = vmul.f32 %v11246_v13, %v11246_v13  ;;  %v972_v14 = vmul.f32 %v619_v22, %v619_v22  ;;  %v11300_v54 = vld [vmem:[%s11149_s15 + $0x260] sm:$0xff] }
 0x122   : > { %v1118_v57 = vadd.f32 %v1117_v63, %v956_v29  ;;  %v776_v10 = vadd.f32 %v775_v56, %v613_v48  ;;  %v1126_v58 = vadd.f32 %v1125_v2, %v963_v45  ;;  %v1134_v5 = vadd.f32 %v970_v61, %v969_v60  ;;  %v11295_v45 = vld [vmem:[%s11149_s15 + $0x258] sm:$0xff]  ;;  %v11305_v56 = vld [vmem:[%s11149_s15 + $0x268] sm:$0xff] }
 0x123   : > { %v787_v20 = vadd.f32 %v786_v3, %v623_v55  ;;  %v792_v21 = vadd.f32 %v627_v4, %v626_v62  ;;  %v803_v11 = vadd.f32 %v11271_v7, %v11268_v6  ;;  %v973_v25 = vmul.f32 %v620_v31, %v620_v31  ;;  %v633_v63 = vld [vmem:[%s11149_s15 + $0x218] sm:$0xff]  ;;  %v634_v3 = vld [vmem:[%s11149_s15 + $0x220] sm:$0xff] }
 0x124   : > { %v1119_v23 = vadd.f32 %v1118_v57, %v957_v34  ;;  %v777_v13 = vadd.f32 %v776_v10, %v614_v49  ;;  %v1127_v24 = vadd.f32 %v1126_v58, %v964_v46  ;;  %v1135_v29 = vadd.f32 %v1134_v5, %v971_v0  ;;  %v630_v34 = vld [vmem:[%s11149_s15 + $0x200] sm:$0xff]  ;;  %v635_v10 = vld [vmem:[%s11149_s15 + $0x228] sm:$0xff] }
 0x125   : > { %v788_v22 = vadd.f32 %v787_v20, %v624_v12  ;;  %v793_v30 = vadd.f32 %v792_v21, %v628_v18  ;;  %v804_v15 = vadd.f32 %v803_v11, %v11278_v19  ;;  %v974_v26 = vmul.f32 %v621_v41, %v621_v41  ;;  %v646_v20 = vld [vmem:[%s11149_s15 + $0x280] sm:$0xff] }
 0x126   : > { %v1120_v32 = vadd.f32 %v1119_v23, %v958_v38  ;;  %v778_v33 = vadd.f32 %v777_v13, %v615_v37  ;;  %v1128_v39 = vadd.f32 %v1127_v24, %v965_v52  ;;  %v1136_v40 = vadd.f32 %v1135_v29, %v972_v14  ;;  %v647_v13 = vld [vmem:[%s11149_s15 + $0x288] sm:$0xff]  ;;  %v11319_v24 = vld [vmem:[%s11149_s15 + $0x2d0] sm:$0xff] }
 0x127   : > { %v794_v31 = vadd.f32 %v793_v30, %v629_v27  ;;  %v805_v16 = vadd.f32 %v804_v15, %v11284_v28  ;;  %v979_v42 = vmul.f32 %v626_v62, %v626_v62  ;;  %v789_v43 = vadd.f32 %v788_v22, %v625_v17 }
 0x128   : > { %1121 = vadd.xlane.f32.xlu1 %v1120_v32  ;;  %779 = vadd.xlane.f32.xlu0 %v778_v33  ;;  %v1129_v44 = vadd.f32 %v1128_v39, %v966_v1  ;;  %v980_v38 = vmul.f32 %v627_v4, %v627_v4  ;;  %v975_v46 = vmul.f32 %v622_v51, %v622_v51  ;;  %v648_v33 = vld [vmem:[%s11149_s15 + $0x290] sm:$0xff]  ;;  %v649_v39 = vld [vmem:[%s11149_s15 + $0x298] sm:$0xff] }
 0x129   : > { %v1137_v41 = vadd.f32 %v1136_v40, %v973_v25  ;;  %v795_v47 = vadd.f32 %v794_v31, %v630_v34  ;;  %v806_v48 = vadd.f32 %v805_v16, %v11290_v35  ;;  %v976_v50 = vmul.f32 %v623_v55, %v623_v55  ;;  %v11322_v25 = vld [vmem:[%s11149_s15 + $0x2d8] sm:$0xff]  ;;  %v11339_v16 = vld [vmem:[%s11149_s15 + $0x2e8] sm:$0xff] }
 0x12a   : > { %v1130_v49 = vadd.f32 %v1129_v44, %v967_v8  ;;  %v977_v52 = vmul.f32 %v624_v12, %v624_v12  ;;  %v981_v37 = vmul.f32 %v628_v18, %v628_v18  ;;  %v978_v59 = vmul.f32 %v625_v17, %v625_v17 }
 0x12b   : > { %v1138_v60 = vadd.f32 %v1137_v41, %v974_v26  ;;  %v796_v61 = vadd.f32 %v795_v47, %v631_v36  ;;  %v807_v51 = vadd.f32 %v806_v48, %v11295_v45  ;;  %v982_v55 = vmul.f32 %v629_v27, %v629_v27  ;;  %v645_v27 = vld [vmem:[%s11149_s15 + $0x278] sm:$0xff]  ;;  %v11336_v26 = vld [vmem:[%s11149_s15 + $0x2e0] sm:$0xff] }
 0x12c   : > { %790 = vadd.xlane.f32.xlu1 %v789_v43  ;;  %v1131_v62 = vadd.f32 %v1130_v49, %v968_v9  ;;  %v983_v1 = vmul.f32 %v630_v34, %v630_v34  ;;  %v1145_v2 = vadd.f32 %v980_v38, %v979_v42  ;;  %v984_v57 = vmul.f32 %v631_v36, %v631_v36  ;;  %v644_v9 = vld [vmem:[%s11149_s15 + $0x270] sm:$0xff]  ;;  %v650_v47 = vld [vmem:[%s11149_s15 + $0x2a0] sm:$0xff] }
 0x12d   : > { %v1139_v4 = vadd.f32 %v1138_v60, %v975_v46  ;;  %v797_v8 = vadd.f32 %v796_v61, %v632_v53  ;;  %v808_v0 = vadd.f32 %v807_v51, %v11300_v54  ;;  %v985_v12 = vmul.f32 %v632_v53, %v632_v53  ;;  %v9699_v36 = vld [vmem:[#allocation4 + $0x4] ss:$16 sps:$4 sm:$0xff]   ;;  %v9701_v38 = vld [vmem:[#allocation4] ss:$16 sps:$4 sm:$0xff]   ;;  %v651_v53 = vld [vmem:[%s11149_s15 + $0x2a8] sm:$0xff] }
 0x12e   : > { %1132 = vadd.xlane.f32.xlu0 %v1131_v62  ;;  %v1146_v58 = vadd.f32 %v1145_v2, %v981_v37  ;;  %v989_v14 = vmul.f32 %v11268_v6, %v11268_v6  ;;  %v990_v18 = vmul.f32 %v11271_v7, %v11271_v7  ;;  %v986_v23 = vmul.f32 %v633_v63, %v633_v63  ;;  %v11351_v37 = vld [vmem:[%s11149_s15 + $0x2f0] sm:$0xff]  ;;  %v9704_v62 = vld [vmem:[#allocation4 + $0x8] ss:$16 sps:$4 sm:$0xff]  }
 0x12f   : > { %v1140_v5 = vadd.f32 %v1139_v4, %v976_v50  ;;  %v798_v21 = vadd.f32 %v797_v8, %v633_v63  ;;  %v809_v11 = vadd.f32 %v808_v0, %v11305_v56  ;;  %v11325_v6 = vmul.f32 %v634_v3, %v634_v3  ;;  %v9702_v50 = vld [vmem:[#allocation4 + $0xc] ss:$16 sps:$4 sm:$0xff]   ;;  %3677 = vmatprep.subr.bf16.mxu0 %v9699_v36  ;;  %v652_v2 = vld [vmem:[%s11149_s15 + $0x2b0] sm:$0xff] }
 0x130   : > { %v11327_v17 = vmul.f32 %v635_v10, %v635_v10  ;;  %v1147_v7 = vadd.f32 %v1146_v58, %v982_v55  ;;  %v991_v22 = vmul.f32 %v11278_v19, %v11278_v19  ;;  %v992_v32 = vmul.f32 %v11284_v28, %v11284_v28  ;;  %v11362_v4 = vld [vmem:[%s11149_s15 + $0x2f8] sm:$0xff]  ;;  %3678 = vmatpush1.bf16.msra.mxu0 %v9701_v38  ;;  %v9705_v8 = vld [vmem:[#allocation4 + $0x24] ss:$16 sps:$4 sm:$0xff]  }
 0x131   : > { %v1141_v29 = vadd.f32 %v1140_v5, %v977_v52  ;;  %v799_v30 = vadd.f32 %v798_v21, %v634_v3  ;;  %v810_v15 = vadd.f32 %v809_v11, %v644_v9  ;;  %v1156_v40 = vadd.f32 %v990_v18, %v989_v14  ;;  %4242 = vmatprep.subr.bf16.mxu1 %v9702_v50  ;;  %v653_v58 = vld [vmem:[%s11149_s15 + $0x2b8] sm:$0xff] }
 0x132   : > { %v1148_v34 = vadd.f32 %v1147_v7, %v983_v1  ;;  %v814_v31 = vadd.f32 %v647_v13, %v646_v20  ;;  %v825_v42 = vadd.f32 %v11322_v25, %v11319_v24  ;;  %v993_v28 = vmul.f32 %v11290_v35, %v11290_v35  ;;  %v9708_v5 = vld [vmem:[#allocation4 + $0x2c] ss:$16 sps:$4 sm:$0xff]   ;;  %4243 = vmatpush1.bf16.msra.mxu1 %v9704_v62 }
 0x133   : > { %v1142_v19 = vadd.f32 %v1141_v29, %v978_v59  ;;  %v800_v43 = vadd.f32 %v799_v30, %v635_v10  ;;  %v994_v44 = vmul.f32 %v11295_v45, %v11295_v45  ;;  %v1157_v41 = vadd.f32 %v1156_v40, %v991_v22  ;;  %v11378_v22 = vld [vmem:[%s11149_s15 + $0x310] sm:$0xff]  ;;  %3679 = vmatprep.subr.bf16.mxu0 %v9705_v8  ;;  %v9714_v50 = vld [vmem:[#allocation4 + $0x4c] ss:$16 sps:$4 sm:$0xff]  }
 0x134   : > { %v1149_v46 = vadd.f32 %v1148_v34, %v984_v57  ;;  %v815_v48 = vadd.f32 %v814_v31, %v648_v33  ;;  %v826_v49 = vadd.f32 %v825_v42, %v11336_v26  ;;  %v811_v52 = vadd.f32 %v810_v15, %v645_v27  ;;  %v655_v31 = vld [vmem:[%s11149_s15 + $0x2c8] sm:$0xff]  ;;  %4244 = vmatprep.subr.bf16.mxu1 %v9708_v5 }
 0x135   : > { %1143 = vadd.xlane.f32.xlu1 %v1142_v19  ;;  %801 = vadd.xlane.f32.xlu0 %v800_v43  ;;  %v999_v35 = vmul.f32 %v646_v20, %v646_v20  ;;  %v1000_v59 = vmul.f32 %v647_v13, %v647_v13  ;;  %v1158_v60 = vadd.f32 %v1157_v41, %v992_v32  ;;  %v11373_v13 = vld [vmem:[%s11149_s15 + $0x308] sm:$0xff]  ;;  %v666_v32 = vld [vmem:[%s11149_s15 + $0x320] sm:$0xff]  ;;  %v11392_v43 = vld [vmem:[%s11149_s15 + $0x370] sm:$0xff] }
 0x136   : > { %v1150_v45 = vadd.f32 %v1149_v46, %v985_v12  ;;  %v816_v61 = vadd.f32 %v815_v48, %v649_v39  ;;  %v827_v51 = vadd.f32 %v826_v49, %v11339_v16  ;;  %v995_v63 = vmul.f32 %v11300_v54, %v11300_v54  ;;  %v11365_v12 = vld [vmem:[%s11149_s15 + $0x300] sm:$0xff] }
 0x137   : > { %v996_v55 = vmul.f32 %v11305_v56, %v11305_v56  ;;  %v11358_v1 = vmul.f32 %v644_v9, %v644_v9  ;;  %v1001_v3 = vmul.f32 %v648_v33, %v648_v33  ;;  %v1159_v57 = vadd.f32 %v1158_v60, %v993_v28  ;;  %v9707_v56 = vld [vmem:[#allocation4 + $0x20] ss:$16 sps:$4 sm:$0xff]   ;;  %v11386_v33 = vld [vmem:[%s11149_s15 + $0x328] sm:$0xff]  ;;  %v11395_v28 = vld [vmem:[%s11149_s15 + $0x378] sm:$0xff] }
 0x138   : > { %v1151_v0 = vadd.f32 %v1150_v45, %v986_v23  ;;  %v817_v10 = vadd.f32 %v816_v61, %v650_v47  ;;  %v828_v54 = vadd.f32 %v827_v51, %v11351_v37  ;;  %v11368_v9 = vmul.f32 %v645_v27, %v645_v27  ;;  %v654_v27 = vld [vmem:[%s11149_s15 + $0x2c0] sm:$0xff]  ;;  %3680 = vmatpush1.bf16.msra.mxu0 %v9707_v56  ;;  %v669_v45 = vld [vmem:[%s11149_s15 + $0x338] sm:$0xff] }
 0x139   : > { %812 = vadd.xlane.f32.xlu1 %v811_v52  ;;  %v1002_v14 = vmul.f32 %v649_v39, %v649_v39  ;;  %v1003_v18 = vmul.f32 %v650_v47, %v650_v47  ;;  %v1167_v20 = vadd.f32 %v1000_v59, %v999_v35  ;;  %v1160_v11 = vadd.f32 %v1159_v57, %v994_v44  ;;  %v9710_v39 = vld [vmem:[#allocation4 + $0x28] ss:$16 sps:$4 sm:$0xff]   ;;  %v9713_v46 = vld [vmem:[#allocation4 + $0x40] ss:$16 sps:$4 sm:$0xff]   ;;  %v9717_v57 = vld [vmem:[#allocation4 + $0x64] ss:$16 sps:$4 sm:$0xff]  }
 0x13a   : > { %v1152_v21 = vadd.f32 %v1151_v0, %v11325_v6  ;;  %v818_v23 = vadd.f32 %v817_v10, %v651_v53  ;;  %v829_v7 = vadd.f32 %v828_v54, %v11362_v4  ;;  %v1004_v29 = vmul.f32 %v651_v53, %v651_v53  ;;  %v665_v52 = vld [vmem:[%s11149_s15 + $0x318] sm:$0xff]  ;;  %4245 = vmatpush1.bf16.msra.mxu1 %v9710_v39  ;;  %v670_v0 = vld [vmem:[%s11149_s15 + $0x340] sm:$0xff] }
 0x13b   : > { %v1168_v30 = vadd.f32 %v1167_v20, %v1001_v3  ;;  %v1009_v15 = vmul.f32 %v11319_v24, %v11319_v24  ;;  %v1010_v6 = vmul.f32 %v11322_v25, %v11322_v25  ;;  %v1161_v40 = vadd.f32 %v1160_v11, %v995_v63  ;;  %v9711_v24 = vld [vmem:[#allocation4 + $0x44] ss:$16 sps:$4 sm:$0xff]   ;;  %v9716_v60 = vld [vmem:[#allocation4 + $0x48] ss:$16 sps:$4 sm:$0xff]   ;;  %4246 = vmatprep.subr.bf16.mxu1 %v9714_v50  ;;  %v9720_v11 = vld [vmem:[#allocation4 + $0x6c] ss:$16 sps:$4 sm:$0xff]  }
 0x13c   : > { %v1153_v34 = vadd.f32 %v1152_v21, %v11327_v17  ;;  %v819_v42 = vadd.f32 %v818_v23, %v652_v2  ;;  %v830_v19 = vadd.f32 %v829_v7, %v11365_v12  ;;  %v1005_v25 = vmul.f32 %v652_v2, %v652_v2  ;;  %v668_v17 = vld [vmem:[%s11149_s15 + $0x330] sm:$0xff]  ;;  %v11414_v2 = vld [vmem:[%s11149_s15 + $0x388] sm:$0xff]  ;;  %3681 = vmatprep.subr.bf16.mxu0 %v9711_v24 }
 0x13d   : > { %v1006_v44 = vmul.f32 %v653_v58, %v653_v58  ;;  %v1169_v36 = vadd.f32 %v1168_v30, %v1002_v14  ;;  %v1011_v38 = vmul.f32 %v11336_v26, %v11336_v26  ;;  %v1162_v41 = vadd.f32 %v1161_v40, %v996_v55  ;;  %v11411_v55 = vld [vmem:[%s11149_s15 + $0x380] sm:$0xff]  ;;  %3682 = vmatpush1.bf16.msra.mxu0 %v9713_v46  ;;  %v671_v20 = vld [vmem:[%s11149_s15 + $0x348] sm:$0xff]  ;;  %v11427_v7 = vld [vmem:[%s11149_s15 + $0x390] sm:$0xff] }
 0x13e   : > { %1154 = vadd.xlane.f32.xlu0 %v1153_v34  ;;  %v820_v47 = vadd.f32 %v819_v42, %v653_v58  ;;  %v831_v48 = vadd.f32 %v830_v19, %v11373_v13  ;;  %v1007_v49 = vmul.f32 %v654_v27, %v654_v27  ;;  %v11402_v53 = vmul.f32 %v655_v31, %v655_v31  ;;  %v9719_v14 = vld [vmem:[#allocation4 + $0x60] ss:$16 sps:$4 sm:$0xff]   ;;  %v9722_v39 = vld [vmem:[#allocation4 + $0x68] ss:$16 sps:$4 sm:$0xff]   ;;  %v9723_v42 = vld [vmem:[#allocation4 + $0x84] ss:$16 sps:$4 sm:$0xff]  }
 0x13f   : > { %v1170_v35 = vadd.f32 %v1169_v36, %v1003_v18  ;;  %v1012_v26 = vmul.f32 %v11339_v16, %v11339_v16  ;;  %v1178_v59 = vadd.f32 %v1010_v6, %v1009_v15  ;;  %v1163_v61 = vadd.f32 %v1162_v41, %v11358_v1  ;;  %4247 = vmatpush1.bf16.msra.mxu1 %v9716_v60  ;;  %v672_v6 = vld [vmem:[%s11149_s15 + $0x350] sm:$0xff]  ;;  %v675_v60 = vld [vmem:[%s11149_s15 + $0x368] sm:$0xff] }
 0x140   : > { %v821_v51 = vadd.f32 %v820_v47, %v654_v27  ;;  %v832_v62 = vadd.f32 %v831_v48, %v11378_v22  ;;  %v836_v63 = vadd.f32 %v11386_v33, %v666_v32  ;;  %v1013_v16 = vmul.f32 %v11351_v37, %v11351_v37  ;;  %3683 = vmatprep.subr.bf16.mxu0 %v9717_v57  ;;  %v9725_v41 = vld [vmem:[#allocation4 + $0x80] ss:$16 sps:$4 sm:$0xff]  }
 0x141   : > { %v1171_v3 = vadd.f32 %v1170_v35, %v1004_v29  ;;  %v1179_v8 = vadd.f32 %v1178_v59, %v1011_v38  ;;  %v847_v1 = vadd.f32 %v11395_v28, %v11392_v43  ;;  %v1164_v10 = vadd.f32 %v1163_v61, %v11368_v9  ;;  %3684 = vmatpush1.bf16.msra.mxu0 %v9719_v14  ;;  %v686_v35 = vld [vmem:[%s11149_s15 + $0x3c0] sm:$0xff]  ;;  %v9726_v59 = vld [vmem:[#allocation4 + $0x8c] ss:$16 sps:$4 sm:$0xff]   ;;  %v11466_v57 = vld [vmem:[%s11149_s15 + $0x410] sm:$0xff] }
 0x142   : > { %v822_v54 = vadd.f32 %v821_v51, %v655_v31  ;;  %v1014_v56 = vmul.f32 %v11362_v4, %v11362_v4  ;;  %v837_v58 = vadd.f32 %v836_v63, %v668_v17  ;;  %v1019_v21 = vmul.f32 %v666_v32, %v666_v32  ;;  %v11430_v4 = vld [vmem:[%s11149_s15 + $0x398] sm:$0xff]  ;;  %4248 = vmatprep.subr.bf16.mxu1 %v9720_v11 }
 0x143   : > { %v1172_v18 = vadd.f32 %v1171_v3, %v1005_v25  ;;  %v1180_v37 = vadd.f32 %v1179_v8, %v1012_v26  ;;  %v848_v5 = vadd.f32 %v847_v1, %v11411_v55  ;;  %1165 = vadd.xlane.f32.xlu1 %v1164_v10  ;;  %v833_v9 = vadd.f32 %v832_v62, %v665_v52  ;;  %v673_v25 = vld [vmem:[%s11149_s15 + $0x358] sm:$0xff]  ;;  %v687_v26 = vld [vmem:[%s11149_s15 + $0x3c8] sm:$0xff]  ;;  %v688_v1 = vld [vmem:[%s11149_s15 + $0x3d0] sm:$0xff] }
 0x144   : > { %823 = vadd.xlane.f32.xlu0 %v822_v54  ;;  %v838_v23 = vadd.f32 %v837_v58, %v669_v45  ;;  %v1020_v27 = vmul.f32 %v11386_v33, %v11386_v33  ;;  %v1015_v30 = vmul.f32 %v11365_v12, %v11365_v12  ;;  %v1016_v34 = vmul.f32 %v11373_v13, %v11373_v13  ;;  %v9728_v63 = vld [vmem:[#allocation4 + $0x88] ss:$16 sps:$4 sm:$0xff]   ;;  %v9729_v10 = vld [vmem:[#allocation4 + $0xa4] ss:$16 sps:$4 sm:$0xff]  }
 0x145   : > { %v1173_v29 = vadd.f32 %v1172_v18, %v1006_v44  ;;  %v1181_v15 = vadd.f32 %v1180_v37, %v1013_v16  ;;  %v849_v32 = vadd.f32 %v848_v5, %v11414_v2  ;;  %v1017_v40 = vmul.f32 %v11378_v22, %v11378_v22  ;;  %v11444_v44 = vld [vmem:[%s11149_s15 + $0x3a0] sm:$0xff]  ;;  %v11448_v22 = vld [vmem:[%s11149_s15 + $0x3a8] sm:$0xff]  ;;  %4249 = vmatpush1.bf16.msra.mxu1 %v9722_v39  ;;  %v11474_v14 = vld [vmem:[%s11149_s15 + $0x418] sm:$0xff] }
 0x146   : > { %v839_v33 = vadd.f32 %v838_v23, %v670_v0  ;;  %v1021_v31 = vmul.f32 %v668_v17, %v668_v17  ;;  %v1018_v12 = vmul.f32 %v665_v52, %v665_v52  ;;  %v1022_v38 = vmul.f32 %v669_v45, %v669_v45  ;;  %v11457_v45 = vld [vmem:[%s11149_s15 + $0x3b0] sm:$0xff]  ;;  %3685 = vmatprep.subr.bf16.mxu0 %v9723_v42  ;;  %v689_v11 = vld [vmem:[%s11149_s15 + $0x3d8] sm:$0xff]  ;;  %v11492_v42 = vld [vmem:[%s11149_s15 + $0x428] sm:$0xff] }
 0x147   : > { %v1174_v19 = vadd.f32 %v1173_v29, %v1007_v49  ;;  %v1182_v24 = vadd.f32 %v1181_v15, %v1014_v56  ;;  %v850_v36 = vadd.f32 %v849_v32, %v11427_v7  ;;  %834 = vadd.xlane.f32.xlu1 %v833_v9  ;;  %v1023_v17 = vmul.f32 %v670_v0, %v670_v0  ;;  %v674_v49 = vld [vmem:[%s11149_s15 + $0x360] sm:$0xff]  ;;  %v685_v56 = vld [vmem:[%s11149_s15 + $0x3b8] sm:$0xff] }
 0x148   : > { %v840_v13 = vadd.f32 %v839_v33, %v671_v20  ;;  %v1189_v46 = vadd.f32 %v1020_v27, %v1019_v21  ;;  %v1024_v52 = vmul.f32 %v671_v20, %v671_v20  ;;  %v1030_v62 = vmul.f32 %v11395_v28, %v11395_v28  ;;  %3686 = vmatpush1.bf16.msra.mxu0 %v9725_v41  ;;  %v9731_v18 = vld [vmem:[#allocation4 + $0xa0] ss:$16 sps:$4 sm:$0xff]   ;;  %v9732_v39 = vld [vmem:[#allocation4 + $0xac] ss:$16 sps:$4 sm:$0xff]  }
 0x149   : > { %v1175_v47 = vadd.f32 %v1174_v19, %v11402_v53  ;;  %v1183_v48 = vadd.f32 %v1182_v24, %v1015_v30  ;;  %v851_v50 = vadd.f32 %v850_v36, %v11430_v4  ;;  %v1029_v53 = vmul.f32 %v11392_v43, %v11392_v43  ;;  %4250 = vmatprep.subr.bf16.mxu1 %v9726_v59  ;;  %v11483_v29 = vld [vmem:[%s11149_s15 + $0x420] sm:$0xff]  ;;  %v9734_v19 = vld [vmem:[#allocation4 + $0xa8] ss:$16 sps:$4 sm:$0xff]  }
 0x14a   : > { %v841_v61 = vadd.f32 %v840_v13, %v672_v6  ;;  %v1190_v51 = vadd.f32 %v1189_v46, %v1021_v31  ;;  %v1025_v8 = vmul.f32 %v672_v6, %v672_v6  ;;  %v1026_v0 = vmul.f32 %v673_v25, %v673_v25  ;;  %4251 = vmatpush1.bf16.msra.mxu1 %v9728_v63  ;;  %v690_v32 = vld [vmem:[%s11149_s15 + $0x3e0] sm:$0xff]  ;;  %v691_v24 = vld [vmem:[%s11149_s15 + $0x3e8] sm:$0xff] }
 0x14b   : > { %1176 = vadd.xlane.f32.xlu0 %v1175_v47  ;;  %v1184_v3 = vadd.f32 %v1183_v48, %v1016_v34  ;;  %v852_v16 = vadd.f32 %v851_v50, %v11444_v44  ;;  %v11469_v43 = vmul.f32 %v674_v49, %v674_v49  ;;  %v1031_v58 = vmul.f32 %v11411_v55, %v11411_v55  ;;  %v9735_v47 = vld [vmem:[#allocation4 + $0xc4] ss:$16 sps:$4 sm:$0xff]   ;;  %v9737_v59 = vld [vmem:[#allocation4 + $0xc0] ss:$16 sps:$4 sm:$0xff]  }
 0x14c   : > { %v842_v54 = vadd.f32 %v841_v61, %v673_v25  ;;  %v1191_v28 = vadd.f32 %v1190_v51, %v1022_v38  ;;  %v11477_v5 = vmul.f32 %v675_v60, %v675_v60  ;;  %v1032_v21 = vmul.f32 %v11414_v2, %v11414_v2  ;;  %3687 = vmatprep.subr.bf16.mxu0 %v9729_v10  ;;  %v692_v50 = vld [vmem:[%s11149_s15 + $0x3f0] sm:$0xff]  ;;  %v11521_v10 = vld [vmem:[%s11149_s15 + $0x448] sm:$0xff] }
 0x14d   : > { %v1185_v37 = vadd.f32 %v1184_v3, %v1017_v40  ;;  %v853_v20 = vadd.f32 %v852_v16, %v11448_v22  ;;  %v1200_v27 = vadd.f32 %v1030_v62, %v1029_v53  ;;  %v858_v55 = vadd.f32 %v687_v26, %v686_v35  ;;  %3688 = vmatpush1.bf16.msra.mxu0 %v9731_v18  ;;  %v693_v62 = vld [vmem:[%s11149_s15 + $0x3f8] sm:$0xff] }
 0x14e   : > { %v843_v9 = vadd.f32 %v842_v54, %v674_v49  ;;  %v1192_v23 = vadd.f32 %v1191_v28, %v1023_v17  ;;  %v1033_v6 = vmul.f32 %v11427_v7, %v11427_v7  ;;  %v869_v2 = vadd.f32 %v11474_v14, %v11466_v57  ;;  %v11496_v7 = vld [vmem:[%s11149_s15 + $0x430] sm:$0xff]  ;;  %4252 = vmatprep.subr.bf16.mxu1 %v9732_v39 }
 0x14f   : > { %v1186_v30 = vadd.f32 %v1185_v37, %v1018_v12  ;;  %v854_v15 = vadd.f32 %v853_v20, %v11457_v45  ;;  %v1201_v33 = vadd.f32 %v1200_v27, %v1031_v58  ;;  %v859_v31 = vadd.f32 %v858_v55, %v688_v1  ;;  %4253 = vmatpush1.bf16.msra.mxu1 %v9734_v19  ;;  %v706_v20 = vld [vmem:[%s11149_s15 + $0x460] sm:$0xff]  ;;  %v11533_v27 = vld [vmem:[%s11149_s15 + $0x450] sm:$0xff] }
 0x150   : > { %v844_v34 = vadd.f32 %v843_v9, %v675_v60  ;;  %v1193_v40 = vadd.f32 %v1192_v23, %v1024_v52  ;;  %v870_v25 = vadd.f32 %v869_v2, %v11483_v29  ;;  %v1039_v36 = vmul.f32 %v686_v35, %v686_v35  ;;  %v11507_v52 = vld [vmem:[%s11149_s15 + $0x438] sm:$0xff]  ;;  %3689 = vmatprep.subr.bf16.mxu0 %v9735_v47 }
 0x151   : > { %1187 = vadd.xlane.f32.xlu1 %v1186_v30  ;;  %v855_v12 = vadd.f32 %v854_v15, %v685_v56  ;;  %v1040_v13 = vmul.f32 %v687_v26, %v687_v26  ;;  %v1034_v17 = vmul.f32 %v11430_v4, %v11430_v4  ;;  %v1202_v46 = vadd.f32 %v1201_v33, %v1032_v21  ;;  %v9741_v21 = vld [vmem:[#allocation4 + $0xe4] ss:$16 sps:$4 sm:$0xff]   ;;  %v11541_v15 = vld [vmem:[%s11149_s15 + $0x4b8] sm:$0xff] }
 0x152   : > { %845 = vadd.xlane.f32.xlu0 %v844_v34  ;;  %v1194_v38 = vadd.f32 %v1193_v40, %v1025_v8  ;;  %v860_v41 = vadd.f32 %v859_v31, %v689_v11  ;;  %v1035_v48 = vmul.f32 %v11444_v44, %v11444_v44  ;;  %v1036_v49 = vmul.f32 %v11448_v22, %v11448_v22  ;;  %v11513_v44 = vld [vmem:[%s11149_s15 + $0x440] sm:$0xff]  ;;  %v9738_v22 = vld [vmem:[#allocation4 + $0xcc] ss:$16 sps:$4 sm:$0xff]   ;;  %v9740_v8 = vld [vmem:[#allocation4 + $0xc8] ss:$16 sps:$4 sm:$0xff]  }
 0x153   : > { %v871_v35 = vadd.f32 %v870_v25, %v11492_v42  ;;  %v1041_v26 = vmul.f32 %v688_v1, %v688_v1  ;;  %v1037_v60 = vmul.f32 %v11457_v45, %v11457_v45  ;;  %v1203_v61 = vadd.f32 %v1202_v46, %v1033_v6  ;;  %3690 = vmatpush1.bf16.msra.mxu0 %v9737_v59  ;;  %v11538_v30 = vld [vmem:[%s11149_s15 + $0x4b0] sm:$0xff]  ;;  %v695_v6 = vld [vmem:[%s11149_s15 + $0x408] sm:$0xff]  ;;  %v11547_v31 = vld [vmem:[%s11149_s15 + $0x458] sm:$0xff] }
 0x154   : > { %v1195_v4 = vadd.f32 %v1194_v38, %v1026_v0  ;;  %v861_v51 = vadd.f32 %v860_v41, %v690_v32  ;;  %v11515_v53 = vmul.f32 %v685_v56, %v685_v56  ;;  %v1042_v3 = vmul.f32 %v689_v11, %v689_v11  ;;  %v694_v56 = vld [vmem:[%s11149_s15 + $0x400] sm:$0xff]  ;;  %4254 = vmatprep.subr.bf16.mxu1 %v9738_v22  ;;  %v708_v34 = vld [vmem:[%s11149_s15 + $0x470] sm:$0xff]  ;;  %v9744_v40 = vld [vmem:[#allocation4 + $0xec] ss:$16 sps:$4 sm:$0xff]  }
 0x155   : > { %856 = vadd.xlane.f32.xlu1 %v855_v12  ;;  %v872_v63 = vadd.f32 %v871_v35, %v11496_v7  ;;  %v1211_v16 = vadd.f32 %v1040_v13, %v1039_v36  ;;  %v1204_v0 = vadd.f32 %v1203_v61, %v1034_v17  ;;  %v1043_v54 = vmul.f32 %v690_v32, %v690_v32  ;;  %v709_v17 = vld [vmem:[%s11149_s15 + $0x478] sm:$0xff]  ;;  %v9747_v46 = vld [vmem:[#allocation4 + $0x104] ss:$16 sps:$4 sm:$0xff]  }
 0x156   : > { %v1196_v45 = vadd.f32 %v1195_v4, %v11469_v43  ;;  %v862_v1 = vadd.f32 %v861_v51, %v691_v24  ;;  %v1044_v58 = vmul.f32 %v691_v24, %v691_v24  ;;  %v1049_v37 = vmul.f32 %v11466_v57, %v11466_v57  ;;  %v11529_v43 = vld [vmem:[%s11149_s15 + $0x468] sm:$0xff]  ;;  %v9743_v57 = vld [vmem:[#allocation4 + $0xe0] ss:$16 sps:$4 sm:$0xff]   ;;  %4255 = vmatpush1.bf16.msra.mxu1 %v9740_v8 }
 0x157   : > { %v873_v28 = vadd.f32 %v872_v63, %v11507_v52  ;;  %v1212_v18 = vadd.f32 %v1211_v16, %v1041_v26  ;;  %v1205_v9 = vadd.f32 %v1204_v0, %v1035_v48  ;;  %v1050_v55 = vmul.f32 %v11474_v14, %v11474_v14  ;;  %v9746_v24 = vld [vmem:[#allocation4 + $0xe8] ss:$16 sps:$4 sm:$0xff]   ;;  %3691 = vmatprep.subr.bf16.mxu0 %v9741_v21  ;;  %v710_v26 = vld [vmem:[%s11149_s15 + $0x480] sm:$0xff] }
 0x158   : > { %v1197_v11 = vadd.f32 %v1196_v45, %v11477_v5  ;;  %v863_v23 = vadd.f32 %v862_v1, %v692_v50  ;;  %v1045_v2 = vmul.f32 %v692_v50, %v692_v50  ;;  %v1046_v39 = vmul.f32 %v693_v62, %v693_v62  ;;  %v11562_v50 = vld [vmem:[%s11149_s15 + $0x4c8] sm:$0xff]  ;;  %3692 = vmatpush1.bf16.msra.mxu0 %v9743_v57  ;;  %v9749_v4 = vld [vmem:[#allocation4 + $0x100] ss:$16 sps:$4 sm:$0xff]  }
 0x159   : > { %v874_v32 = vadd.f32 %v873_v28, %v11513_v44  ;;  %v1213_v5 = vadd.f32 %v1212_v18, %v1042_v3  ;;  %v1206_v33 = vadd.f32 %v1205_v9, %v1036_v49  ;;  %v1047_v19 = vmul.f32 %v694_v56, %v694_v56  ;;  %4256 = vmatprep.subr.bf16.mxu1 %v9744_v40  ;;  %v9752_v45 = vld [vmem:[#allocation4 + $0x108] ss:$16 sps:$4 sm:$0xff]   ;;  %v11575_v1 = vld [vmem:[%s11149_s15 + $0x4d0] sm:$0xff] }
 0x15a   : > { %1198 = vadd.xlane.f32.xlu0 %v1197_v11  ;;  %v864_v14 = vadd.f32 %v863_v23, %v693_v62  ;;  %v1051_v12 = vmul.f32 %v11483_v29, %v11483_v29  ;;  %v1052_v13 = vmul.f32 %v11492_v42, %v11492_v42  ;;  %v1053_v38 = vmul.f32 %v11496_v7, %v11496_v7  ;;  %v11559_v29 = vld [vmem:[%s11149_s15 + $0x4c0] sm:$0xff]  ;;  %v9750_v62 = vld [vmem:[#allocation4 + $0x10c] ss:$16 sps:$4 sm:$0xff]   ;;  %v712_v18 = vld [vmem:[%s11149_s15 + $0x490] sm:$0xff] }
 0x15b   : > { %v875_v25 = vadd.f32 %v874_v32, %v11521_v10  ;;  %v1214_v36 = vadd.f32 %v1213_v5, %v1043_v54  ;;  %v1207_v41 = vadd.f32 %v1206_v33, %v1037_v60  ;;  %v1222_v48 = vadd.f32 %v1050_v55, %v1049_v37  ;;  %4257 = vmatpush1.bf16.msra.mxu1 %v9746_v24  ;;  %v11578_v54 = vld [vmem:[%s11149_s15 + $0x4d8] sm:$0xff]  ;;  %v9755_v55 = vld [vmem:[#allocation4 + $0x120] ss:$16 sps:$4 sm:$0xff]  }
 0x15c   : > { %v865_v47 = vadd.f32 %v864_v14, %v694_v56  ;;  %v880_v49 = vadd.f32 %v11529_v43, %v706_v20  ;;  %v1054_v7 = vmul.f32 %v11507_v52, %v11507_v52  ;;  %v891_v59 = vadd.f32 %v11541_v15, %v11538_v30  ;;  %v711_v52 = vld [vmem:[%s11149_s15 + $0x488] sm:$0xff]  ;;  %3693 = vmatprep.subr.bf16.mxu0 %v9747_v46  ;;  %v713_v32 = vld [vmem:[%s11149_s15 + $0x498] sm:$0xff] }
 0x15d   : > { %v876_v35 = vadd.f32 %v875_v25, %v11533_v27  ;;  %v1215_v42 = vadd.f32 %v1214_v36, %v1044_v58  ;;  %v1208_v60 = vadd.f32 %v1207_v41, %v11515_v53  ;;  %v1223_v51 = vadd.f32 %v1222_v48, %v1051_v12  ;;  %3694 = vmatpush1.bf16.msra.mxu0 %v9749_v4  ;;  %v9756_v14 = vld [vmem:[#allocation4 + $0x12c] ss:$16 sps:$4 sm:$0xff]   ;;  %v9758_v25 = vld [vmem:[#allocation4 + $0x128] ss:$16 sps:$4 sm:$0xff]   ;;  %v9759_v41 = vld [vmem:[#allocation4 + $0x144] ss:$16 sps:$4 sm:$0xff]  }
 0x15e   : > { %v866_v61 = vadd.f32 %v865_v47, %v695_v6  ;;  %v881_v22 = vadd.f32 %v880_v49, %v708_v34  ;;  %v892_v16 = vadd.f32 %v891_v59, %v11559_v29  ;;  %v1059_v8 = vmul.f32 %v706_v20, %v706_v20  ;;  %v9753_v20 = vld [vmem:[#allocation4 + $0x124] ss:$16 sps:$4 sm:$0xff]   ;;  %4258 = vmatprep.subr.bf16.mxu1 %v9750_v62  ;;  %v715_v48 = vld [vmem:[%s11149_s15 + $0x4a8] sm:$0xff]  ;;  %v9767_v62 = vld [vmem:[#allocation4 + $0x160] ss:$16 sps:$4 sm:$0xff]  }
 0x15f   : > { %v877_v63 = vadd.f32 %v876_v35, %v11547_v31  ;;  %v1216_v3 = vadd.f32 %v1215_v42, %v1045_v2  ;;  %1209 = vadd.xlane.f32.xlu1 %v1208_v60  ;;  %v1224_v53 = vadd.f32 %v1223_v51, %v1052_v13  ;;  %v1060_v56 = vmul.f32 %v11529_v43, %v11529_v43  ;;  %v11592_v2 = vld [vmem:[%s11149_s15 + $0x4e0] sm:$0xff]  ;;  %v9762_v42 = vld [vmem:[#allocation4 + $0x14c] ss:$16 sps:$4 sm:$0xff]  }
 0x160   : > { %867 = vadd.xlane.f32.xlu0 %v866_v61  ;;  %v882_v0 = vadd.f32 %v881_v22, %v709_v17  ;;  %v1048_v28 = vmul.f32 %v695_v6, %v695_v6  ;;  %v893_v37 = vadd.f32 %v892_v16, %v11562_v50  ;;  %v1055_v21 = vmul.f32 %v11513_v44, %v11513_v44  ;;  %v9761_v35 = vld [vmem:[#allocation4 + $0x140] ss:$16 sps:$4 sm:$0xff]   ;;  %v9765_v60 = vld [vmem:[#allocation4 + $0x164] ss:$16 sps:$4 sm:$0xff]   ;;  %v725_v61 = vld [vmem:[%s11149_s15 + $0x4f8] sm:$0xff] }
 0x161   : > { %v1217_v58 = vadd.f32 %v1216_v3, %v1046_v39  ;;  %v1225_v11 = vadd.f32 %v1224_v53, %v1053_v38  ;;  %v1061_v23 = vmul.f32 %v708_v34, %v708_v34  ;;  %v1056_v57 = vmul.f32 %v11521_v10, %v11521_v10  ;;  %4259 = vmatpush1.bf16.msra.mxu1 %v9752_v45  ;;  %v11596_v34 = vld [vmem:[%s11149_s15 + $0x4e8] sm:$0xff]  ;;  %v714_v10 = vld [vmem:[%s11149_s15 + $0x4a0] sm:$0xff]  ;;  %v11603_v38 = vld [vmem:[%s11149_s15 + $0x4f0] sm:$0xff] }
 0x162   : > { %v883_v9 = vadd.f32 %v882_v0, %v710_v26  ;;  %v1057_v6 = vmul.f32 %v11533_v27, %v11533_v27  ;;  %v894_v39 = vadd.f32 %v893_v37, %v11575_v1  ;;  %v1062_v40 = vmul.f32 %v709_v17, %v709_v17  ;;  %3695 = vmatprep.subr.bf16.mxu0 %v9753_v20  ;;  %v9771_v45 = vld [vmem:[#allocation4 + $0x184] ss:$16 sps:$4 sm:$0xff]  }
 0x163   : > { %v1218_v43 = vadd.f32 %v1217_v58, %v1047_v19  ;;  %878 = vadd.xlane.f32.xlu1 %v877_v63  ;;  %v1226_v44 = vadd.f32 %v1225_v11, %v1054_v7  ;;  %v1233_v33 = vadd.f32 %v1060_v56, %v1059_v8  ;;  %v1063_v12 = vmul.f32 %v710_v26, %v710_v26  ;;  %v9768_v63 = vld [vmem:[#allocation4 + $0x16c] ss:$16 sps:$4 sm:$0xff]   ;;  %v9770_v56 = vld [vmem:[#allocation4 + $0x168] ss:$16 sps:$4 sm:$0xff]  }
 0x164   : > { %v884_v5 = vadd.f32 %v883_v9, %v711_v52  ;;  %v895_v27 = vadd.f32 %v894_v39, %v11578_v54  ;;  %v1069_v24 = vmul.f32 %v11538_v30, %v11538_v30  ;;  %v1070_v17 = vmul.f32 %v11541_v15, %v11541_v15  ;;  %3696 = vmatpush1.bf16.msra.mxu0 %v9755_v55  ;;  %v9764_v15 = vld [vmem:[#allocation4 + $0x148] ss:$16 sps:$4 sm:$0xff]   ;;  %v9777_v55 = vld [vmem:[#allocation4 + $0x1a4] ss:$16 sps:$4 sm:$0xff]  }
 0x165   : > { %v1219_v19 = vadd.f32 %v1218_v43, %v1048_v28  ;;  %v1227_v36 = vadd.f32 %v1226_v44, %v1055_v21  ;;  %v1234_v46 = vadd.f32 %v1233_v33, %v1061_v23  ;;  %v1058_v47 = vmul.f32 %v11547_v31, %v11547_v31  ;;  %4260 = vmatprep.subr.bf16.mxu1 %v9756_v14  ;;  %v9773_v21 = vld [vmem:[#allocation4 + $0x180] ss:$16 sps:$4 sm:$0xff]   ;;  %v9776_v43 = vld [vmem:[#allocation4 + $0x188] ss:$16 sps:$4 sm:$0xff]  }
 0x166   : > { %v885_v13 = vadd.f32 %v884_v5, %v712_v18  ;;  %v896_v30 = vadd.f32 %v895_v27, %v11592_v2  ;;  %v1064_v49 = vmul.f32 %v711_v52, %v711_v52  ;;  %v1071_v4 = vmul.f32 %v11559_v29, %v11559_v29  ;;  %4261 = vmatpush1.bf16.msra.mxu1 %v9758_v25  ;;  %v9779_v44 = vld [vmem:[#allocation4 + $0x1a0] ss:$16 sps:$4 sm:$0xff]   ;;  %v9782_v27 = vld [vmem:[#allocation4 + $0x1a8] ss:$16 sps:$4 sm:$0xff]  }
 0x167   : > { %1220 = vadd.xlane.f32.xlu0 %v1219_v19  ;;  %v1228_v7 = vadd.f32 %v1227_v36, %v1056_v57  ;;  %v1235_v59 = vadd.f32 %v1234_v46, %v1062_v40  ;;  %v1065_v22 = vmul.f32 %v712_v18, %v712_v18  ;;  %v1072_v31 = vmul.f32 %v11562_v50, %v11562_v50 }
 0x168   : > { %v886_v26 = vadd.f32 %v885_v13, %v713_v32  ;;  %v897_v51 = vadd.f32 %v896_v30, %v11596_v34  ;;  %v1244_v8 = vadd.f32 %v1070_v17, %v1069_v24  ;;  %3697 = vmatprep.subr.bf16.mxu0 %v9759_v41  ;;  %v1066_v53 = vmul.f32 %v713_v32, %v713_v32  ;;  %v9786_v24 = vld [vmem:[#allocation4 + $0x1cc] ss:$16 sps:$4 sm:$0xff]   ;;  %v9789_v13 = vld [vmem:[#allocation4 + $0x1e4] ss:$16 sps:$4 sm:$0xff]   ;;  %v9791_v41 = vld [vmem:[#allocation4 + $0x1e0] ss:$16 sps:$4 sm:$0xff]  }
 0x169   : > { %v1229_v3 = vadd.f32 %v1228_v7, %v1057_v6  ;;  %v1236_v16 = vadd.f32 %v1235_v59, %v1063_v12  ;;  %v1073_v0 = vmul.f32 %v11575_v1, %v11575_v1  ;;  %3698 = vmatpush1.bf16.msra.mxu0 %v9761_v35  ;;  %4262 = vmatprep.subr.bf16.mxu1 %v9762_v42  ;;  %v9774_v1 = vld [vmem:[#allocation4 + $0x18c] ss:$16 sps:$4 sm:$0xff]   ;;  %v9785_v12 = vld [vmem:[#allocation4 + $0x1c0] ss:$16 sps:$4 sm:$0xff]  }
 0x16a   : > { %v887_v52 = vadd.f32 %v886_v26, %v714_v10  ;;  %v898_v29 = vadd.f32 %v897_v51, %v11603_v38  ;;  %v1245_v18 = vadd.f32 %v1244_v8, %v1071_v4  ;;  %3699 = vmatprep.subr.bf16.mxu0 %v9765_v60  ;;  %v1067_v37 = vmul.f32 %v714_v10, %v714_v10  ;;  %v9792_v17 = vld [vmem:[#allocation4 + $0x1ec] ss:$16 sps:$4 sm:$0xff]  }
 0x16b   : > { %v1230_v28 = vadd.f32 %v1229_v3, %v1058_v47  ;;  %v1237_v58 = vadd.f32 %v1236_v16, %v1064_v49  ;;  %v1074_v20 = vmul.f32 %v11578_v54, %v11578_v54  ;;  %4263 = vmatpush1.bf16.msra.mxu1 %v9764_v15  ;;  %v1068_v57 = vmul.f32 %v715_v48, %v715_v48  ;;  %v9780_v54 = vld [vmem:[#allocation4 + $0x1ac] ss:$16 sps:$4 sm:$0xff]   ;;  %v9794_v47 = vld [vmem:[#allocation4 + $0x1e8] ss:$16 sps:$4 sm:$0xff]  }
 0x16c   : > { %v888_v50 = vadd.f32 %v887_v52, %v715_v48  ;;  %v899_v11 = vadd.f32 %v898_v29, %v725_v61  ;;  %v1246_v23 = vadd.f32 %v1245_v18, %v1072_v31  ;;  %4264 = vmatprep.subr.bf16.mxu1 %v9768_v63  ;;  %v1075_v32 = vmul.f32 %v11592_v2, %v11592_v2  ;;  %v9783_v2 = vld [vmem:[#allocation4 + $0x1c4] ss:$16 sps:$4 sm:$0xff]   ;;  %v9800_v30 = vld [vmem:[#allocation4 + $0x20c] ss:$16 sps:$4 sm:$0xff]  }
 0x16d   : > { %1231 = vadd.xlane.f32.xlu1 %v1230_v28  ;;  %v1238_v9 = vadd.f32 %v1237_v58, %v1065_v22  ;;  %3700 = vmatpush1.bf16.msra.mxu0 %v9767_v62  ;;  %v1076_v40 = vmul.f32 %v11596_v34, %v11596_v34  ;;  %v1077_v19 = vmul.f32 %v11603_v38, %v11603_v38  ;;  %v9788_v34 = vld [vmem:[#allocation4 + $0x1c8] ss:$16 sps:$4 sm:$0xff]   ;;  %v9797_v48 = vld [vmem:[#allocation4 + $0x204] ss:$16 sps:$4 sm:$0xff]  }
 0x16e   : > { %889 = vadd.xlane.f32.xlu0 %v888_v50  ;;  %v1247_v39 = vadd.f32 %v1246_v23, %v1073_v0  ;;  %3701 = vmatprep.subr.bf16.mxu0 %v9771_v45  ;;  %v1078_v25 = vmul.f32 %v725_v61, %v725_v61  ;;  %v10323_v45 = vld [vmem:[%s11149_s15 + $0x8] sm:$0xff]  ;;  %v10326_v58 = vld [vmem:[%s11149_s15 + $0x10] sm:$0xff] }
 0x16f   : > { %v1239_v6 = vadd.f32 %v1238_v9, %v1066_v53  ;;  %4265 = vmatpush1.bf16.msra.mxu1 %v9770_v56  ;;  %v10324_v53 = vld [vmem:[%s11149_s15] sm:$0xff]  ;;  %v10325_v56 = vld [vmem:[%s11149_s15 + $0x18] sm:$0xff] }
 0x170   : > { %v1248_v33 = vadd.f32 %v1247_v39, %v1074_v20  ;;  %4266 = vmatprep.subr.bf16.mxu1 %v9774_v1  ;;  %v10329_v9 = vld [vmem:[%s11149_s15 + $0x38] sm:$0xff]  ;;  %v10330_v1 = vld [vmem:[%s11149_s15 + $0x30] sm:$0xff] }
 0x171   : > { %900 = vadd.xlane.f32.xlu1 %v899_v11  ;;  %v1240_v5 = vadd.f32 %v1239_v6, %v1067_v37  ;;  %3702 = vmatpush1.bf16.msra.mxu0 %v9773_v21  ;;  %v10327_v37 = vld [vmem:[%s11149_s15 + $0x28] sm:$0xff]  ;;  %v10328_v21 = vld [vmem:[%s11149_s15 + $0x20] sm:$0xff] }
 0x172   : > { %v1249_v10 = vadd.f32 %v1248_v33, %v1075_v32  ;;  %3703 = vmatprep.subr.bf16.mxu0 %v9777_v55  ;;  %v10332_v6 = vld [vmem:[%s11149_s15 + $0x40] sm:$0xff]  ;;  %v10334_v33 = vld [vmem:[%s11149_s15 + $0x50] sm:$0xff] }
 0x173   : > { %v1241_v14 = vadd.f32 %v1240_v5, %v1068_v57  ;;  %4267 = vmatpush1.bf16.msra.mxu1 %v9776_v43  ;;  %v10331_v43 = vld [vmem:[%s11149_s15 + $0x48] sm:$0xff]  ;;  %v10333_v5 = vld [vmem:[%s11149_s15 + $0x58] sm:$0xff] }
 0x174   : > { %v1250_v36 = vadd.f32 %v1249_v10, %v1076_v40  ;;  %4268 = vmatprep.subr.bf16.mxu1 %v9780_v54 }
 0x175   : > { %1242 = vadd.xlane.f32.xlu0 %v1241_v14  ;;  %3704 = vmatpush1.bf16.msra.mxu0 %v9779_v44 }
 0x176   : > { %v1251_v46 = vadd.f32 %v1250_v36, %v1077_v19  ;;  %3705 = vmatprep.subr.bf16.mxu0 %v9783_v2  ;;  %v10335_v19 = vld [vmem:[%s11149_s15 + $0x68] sm:$0xff] }
 0x177   : > { %4269 = vmatpush1.bf16.msra.mxu1 %v9782_v27  ;;  %v10336_v27 = vld [vmem:[%s11149_s15 + $0x60] sm:$0xff] }
 0x178   : > { %v1252_v38 = vadd.f32 %v1251_v46, %v1078_v25  ;;  %4270 = vmatprep.subr.bf16.mxu1 %v9786_v24  ;;  %v10337_v25 = vld [vmem:[%s11149_s15 + $0x78] sm:$0xff] }
 0x179   : > { %3706 = vmatpush1.bf16.msra.mxu0 %v9785_v12 }
 0x17a   : > { %1253 = vadd.xlane.f32.xlu1 %v1252_v38  ;;  %3707 = vmatprep.subr.bf16.mxu0 %v9789_v13 }
 0x17b   : > { %4271 = vmatpush1.bf16.msra.mxu1 %v9788_v34 }
 0x17c   : > { %4272 = vmatprep.subr.bf16.mxu1 %v9792_v17 }
 0x17d   : > { %3708 = vmatpush1.bf16.msra.mxu0 %v9791_v41 }
 0x17e   : > { %3790 = vmatprep.subr.bf16.mxu0 %v9797_v48 }
 0x17f   : > { %4273 = vmatpush1.bf16.msra.mxu1 %v9794_v47 }
 0x180   : > { %4355 = vmatprep.subr.bf16.mxu1 %v9800_v30 }
 0x19e   : > { %v736_v49 = vpop.xlane.xlu0 %735 }
 0x19f   : > { %v11628_v35 = vmul.f32 0.00078125, %v736_v49 }
 0x1a0   : > { %v1089_v42 = vpop.xlane.xlu1 %1088 }
 0x1a1   : > { %v1271_v7 = vmul.f32 %v11628_v35, %v11628_v35  ;;  %v1255_v26 = vmul.f32 0.00078125, %v1089_v42  ;;  %v1304_v29 = vsub.f32 %v10323_v45, %v11628_v35  ;;  %v1303_v0 = vsub.f32 %v10324_v53, %v11628_v35 }
 0x1a2   : > { %v747_v59 = vpop.xlane.xlu0 %746  ;;  %v1306_v28 = vsub.f32 %v10325_v56, %v11628_v35  ;;  %v1305_v18 = vsub.f32 %v10326_v58, %v11628_v35  ;;  %v1308_v20 = vsub.f32 %v10327_v37, %v11628_v35  ;;  %v1307_v11 = vsub.f32 %v10328_v21, %v11628_v35  ;;  %v9809_v21 = vld [vmem:[#allocation4 + $0x244] ss:$16 sps:$4 sm:$0xff]  }
 0x1a3   : > { %v11632_v4 = vmul.f32 0.00078125, %v747_v59  ;;  %v1287_v15 = vsub.f32 %v1255_v26, %v1271_v7  ;;  %v1310_v23 = vsub.f32 %v10329_v9, %v11628_v35  ;;  %v1309_v55 = vsub.f32 %v10330_v1, %v11628_v35  ;;  %v10338_v26 = vld [vmem:[%s11149_s15 + $0x70] sm:$0xff] }
 0x1a4   : > { %v1100_v60 = vpop.xlane.xlu1 %1099  ;;  %v1312_v57 = vsub.f32 %v10331_v43, %v11628_v35  ;;  %v1311_v32 = vsub.f32 %v10332_v6, %v11628_v35  ;;  %v10339_v43 = vld [vmem:[%s11149_s15 + $0x88] sm:$0xff]  ;;  %v10340_v6 = vld [vmem:[%s11149_s15 + $0x80] sm:$0xff] }
 0x1a5   : > { %v1272_v61 = vmul.f32 %v11632_v4, %v11632_v4  ;;  %v1463_v51 = vadd.f32 1e-05, %v1287_v15  ;;  %v1256_v22 = vmul.f32 0.00078125, %v1100_v60  ;;  %v1314_v40 = vsub.f32 %v10333_v5, %v11632_v4  ;;  %v9810_v5 = vld [vmem:[#allocation4 + $0x248] ss:$16 sps:$4 sm:$0xff]  }
 0x1a6   : > { %v758_v62 = vpop.xlane.xlu0 %757  ;;  %v1313_v14 = vsub.f32 %v10334_v33, %v11632_v4  ;;  %v1316_v10 = vsub.f32 %v10335_v19, %v11632_v4  ;;  %v1315_v12 = vsub.f32 %v10336_v27, %v11632_v4  ;;  %v1318_v36 = vsub.f32 %v10337_v25, %v11632_v4  ;;  %v9815_v19 = vld [vmem:[#allocation4 + $0x264] ss:$16 sps:$4 sm:$0xff]  }
 0x1a7   : > { %10291 = vrsqrt.f32 %v1463_v51  ;;  %v1288_v31 = vsub.f32 %v1256_v22, %v1272_v61  ;;  %v11636_v3 = vmul.f32 0.00078125, %v758_v62  ;;  %v1317_v59 = vsub.f32 %v10338_v26, %v11632_v4  ;;  %v9795_v51 = vld [vmem:[#allocation4 + $0x200] ss:$16 sps:$4 sm:$0xff]   ;;  %v9803_v62 = vld [vmem:[#allocation4 + $0x224] ss:$16 sps:$4 sm:$0xff]  }
 0x1a8   : > { %v769_v16 = vpop.xlane.xlu1 %768  ;;  %v10342_v27 = vld [vmem:[%s11149_s15 + $0x90] sm:$0xff] }
 0x1a9   : > { %v1464_v63 = vadd.f32 1e-05, %v1288_v31  ;;  %v1273_v52 = vmul.f32 %v11636_v3, %v11636_v3  ;;  %v11660_v54 = vmul.f32 0.00078125, %v769_v16  ;;  %v9798_v31 = vld [vmem:[#allocation4 + $0x208] ss:$16 sps:$4 sm:$0xff]  }
 0x1ab   : > { %10293 = vrsqrt.f32 %v1464_v63  ;;  %v1274_v30 = vmul.f32 %v11660_v54, %v11660_v54 }
 0x1ae   : > { %v1111_v8 = vpop.xlane.xlu0 %1110 }
 0x1af   : > { %v1257_v50 = vmul.f32 0.00078125, %v1111_v8 }
 0x1b1   : > { %v10292_v39 = vpop.eup %10291  ;;  %v1289_v44 = vsub.f32 %v1257_v50, %v1273_v52 }
 0x1b2   : > { %v1498_v2 = vmul.f32 %v10292_v39, %v1306_v28  ;;  %v1497_v24 = vmul.f32 %v10292_v39, %v1305_v18  ;;  %v1500_v13 = vmul.f32 %v10292_v39, %v1308_v20  ;;  %v1499_v34 = vmul.f32 %v10292_v39, %v1307_v11  ;;  %v9801_v18 = vld [vmem:[#allocation4 + $0x220] ss:$16 sps:$4 sm:$0xff]   ;;  %v9804_v20 = vld [vmem:[#allocation4 + $0x228] ss:$16 sps:$4 sm:$0xff]  }
 0x1b3   : > { %v11672_v46 = vmul.f32 %v10292_v39, %v1310_v23  ;;  %v1465_v17 = vadd.f32 1e-05, %v1289_v44  ;;  %v11674_v41 = vmul.f32 %v10292_v39, %v1309_v55  ;;  %v11676_v38 = vmul.f32 %v10292_v39, %v1312_v57  ;;  %v9812_v55 = vld [vmem:[#allocation4 + $0x24c] ss:$16 sps:$4 sm:$0xff]   ;;  %v9807_v44 = vld [vmem:[#allocation4 + $0x240] ss:$16 sps:$4 sm:$0xff]  }
 0x1b4   : > { %v11678_v47 = vmul.f32 %v10292_v39, %v1311_v32  ;;  %v1496_v42 = vmul.f32 %v10292_v39, %v1304_v29  ;;  %v1495_v7 = vmul.f32 %v10292_v39, %v1303_v0  ;;  %v9806_v0 = vld [vmem:[#allocation4 + $0x22c] ss:$16 sps:$4 sm:$0xff]   ;;  %v1320_v57 = vsub.f32 %v10339_v43, %v11632_v4 }
 0x1b5   : > { %v11680_v48 = vpop.eup %10293  ;;  %v1122_v49 = vpop.xlane.xlu1 %1121  ;;  %10295 = vrsqrt.f32 %v1465_v17  ;;  %v1319_v32 = vsub.f32 %v10340_v6, %v11632_v4  ;;  %v10345_v17 = vld [vmem:[%s11149_s15 + $0xb8] sm:$0xff] }
 0x1b6   : > { %v780_v35 = vpop.xlane.xlu0 %779  ;;  %v1258_v15 = vmul.f32 0.00078125, %v1122_v49  ;;  %v1506_v61 = vmul.f32 %v11680_v48, %v1314_v40  ;;  %v1505_v22 = vmul.f32 %v11680_v48, %v1313_v14  ;;  %v1508_v63 = vmul.f32 %v11680_v48, %v1316_v10  ;;  %v10341_v40 = vld [vmem:[%s11149_s15 + $0x98] sm:$0xff]  ;;  %v10346_v49 = vld [vmem:[%s11149_s15 + $0xb0] sm:$0xff] }
 0x1b7   : > { %v11686_v60 = vmul.f32 0.00078125, %v780_v35  ;;  %v1507_v52 = vmul.f32 %v11680_v48, %v1315_v12  ;;  %v1510_v16 = vmul.f32 %v11680_v48, %v1318_v36  ;;  %v1509_v8 = vmul.f32 %v11680_v48, %v1317_v59  ;;  %v10344_v36 = vld [vmem:[%s11149_s15 + $0xa0] sm:$0xff]  ;;  %v10347_v35 = vld [vmem:[%s11149_s15 + $0xc8] sm:$0xff] }
 0x1b8   : > { %v1290_v45 = vsub.f32 %v1258_v15, %v1274_v30  ;;  %v1656_v29 = vpack.c.bf16 %v1506_v61, %v1496_v42  ;;  %v1655_v53 = vpack.c.bf16 %v1505_v22, %v1495_v7  ;;  %v11694_v56 = vpack.c.bf16 %v1508_v63, %v1498_v2  ;;  %v11727_v7 = vld [vmem:[%s11149_s15 + $0xc0] sm:$0xff] }
 0x1b9   : > { %14617 = vst [vmem:[#allocation21_spill] sm:$0xff] %v11686_v60  ;;  %v11696_v28 = vpack.c.bf16 %v1507_v52, %v1497_v24  ;;  %v1275_v58 = vmul.f32 %v11686_v60, %v11686_v60  ;;  %v11700_v11 = vpack.c.bf16 %v1510_v16, %v1500_v13  ;;  %v11702_v9 = vpack.c.bf16 %v1509_v8, %v1499_v34  ;;  %v791_v23 = vpop.xlane.xlu1 %790  ;;  %v10343_v24 = vld [vmem:[%s11149_s15 + $0xa8] sm:$0xff]  ;;  %v10350_v8 = vld [vmem:[%s11149_s15 + $0xf0] sm:$0xff] }
 0x1ba   : > { %14618 = vst [vmem:[#allocation22_spill] sm:$0xff] %v11694_v56  ;;  %v1466_v50 = vadd.f32 1e-05, %v1290_v45  ;;  %3709 = vmatprep.mubr.bf16.mxu0 %v1656_v29  ;;  %4274 = vmatprep.mubr.bf16.mxu1 %v1656_v29  ;;  %v1322_v33 = vsub.f32 %v10341_v40, %v11632_v4  ;;  %v11710_v14 = vmul.f32 0.00078125, %v791_v23  ;;  %v1512_v10 = vmul.f32 %v11680_v48, %v1320_v57  ;;  %v12159_v56 = vld [vmem:[%s11149_s15 + $0x340] sm:$0xff] }
 0x1bb   : > { %14619 = vst [vmem:[#allocation23_spill] sm:$0xff] %v11696_v28  ;;  %v1133_v37 = vpop.xlane.xlu0 %1132  ;;  %3710 = vmatmul.mubr.bf16.vlgmr.msra.gmra.mrb[0].mxu0 %v1655_v53  ;;  %4275 = vmatmul.mubr.bf16.vlgmr.msra.gmra.mrb[0].mxu1 %v1655_v53  ;;  %14620 = vst [vmem:[#allocation24_spill] sm:$0xff] %v11700_v11  ;;  %v1511_v2 = vmul.f32 %v11680_v48, %v1319_v32  ;;  %v1321_v12 = vsub.f32 %v10342_v27, %v11632_v4  ;;  %v9818_v34 = vld [vmem:[#allocation4 + $0x26c] ss:$16 sps:$4 sm:$0xff]   ;;  %v9816_v29 = vld [vmem:[#allocation4 + $0x268] ss:$16 sps:$4 sm:$0xff]  }
 0x1bc   : > { %14621 = vst [vmem:[#allocation25_spill] sm:$0xff] %v11702_v9  ;;  %10297 = vrsqrt.f32 %v1466_v50  ;;  %v1259_v1 = vmul.f32 0.00078125, %v1133_v37  ;;  %3791 = vmatpush1.bf16.msra.mxu0 %v9795_v51  ;;  %4356 = vmatpush1.bf16.msra.mxu1 %v9798_v31  ;;  %14622 = vst [vmem:[#allocation26_spill] sm:$0xff] %v11710_v14  ;;  %v1324_v25 = vsub.f32 %v10343_v24, %v11636_v3  ;;  %v10349_v51 = vld [vmem:[%s11149_s15 + $0xf8] sm:$0xff]  ;;  %v12001_v9 = vld [vmem:[%s11149_s15 + $0x2f0] sm:$0xff] }
 0x1bd   : > { %3792 = vmatprep.subr.bf16.mxu0 %v9803_v62  ;;  %4357 = vmatprep.subr.bf16.mxu1 %v9806_v0  ;;  %v1323_v13 = vsub.f32 %v10344_v36, %v11636_v3  ;;  %v1326_v30 = vsub.f32 %v10345_v17, %v11636_v3  ;;  %v1325_v4 = vsub.f32 %v10346_v49, %v11636_v3  ;;  %v9813_v31 = vld [vmem:[#allocation4 + $0x260] ss:$16 sps:$4 sm:$0xff]   ;;  %v9821_v53 = vld [vmem:[#allocation4 + $0x284] ss:$16 sps:$4 sm:$0xff]   ;;  %v10351_v0 = vld [vmem:[%s11149_s15 + $0x108] sm:$0xff] }
 0x1be   : > { %v1291_v39 = vsub.f32 %v1259_v1, %v1275_v58  ;;  %v1328_v42 = vsub.f32 %v10347_v35, %v11636_v3  ;;  %v1327_v26 = vsub.f32 %v11727_v7, %v11636_v3  ;;  %v1334_v22 = vsub.f32 %v10349_v51, %v11660_v54  ;;  %v10352_v58 = vld [vmem:[%s11149_s15 + $0x100] sm:$0xff]  ;;  %v10353_v1 = vld [vmem:[%s11149_s15 + $0x118] sm:$0xff] }
 0x1bf   : > { %v11731_v59 = vpop.eup %10295  ;;  %v11736_v62 = vpack.c.bf16 %v1512_v10, %v11672_v46  ;;  %v11739_v63 = vpack.c.bf16 %v1511_v2, %v11674_v41  ;;  %v1276_v52 = vmul.f32 %v11710_v14, %v11710_v14  ;;  %v1333_v45 = vsub.f32 %v10350_v8, %v11660_v54  ;;  %v9824_v46 = vld [vmem:[#allocation4 + $0x28c] ss:$16 sps:$4 sm:$0xff]   ;;  %v9827_v36 = vld [vmem:[#allocation4 + $0x2a4] ss:$16 sps:$4 sm:$0xff]  }
 0x1c0   : > { %3793 = vmatpush1.bf16.msra.mxu0 %v9801_v18  ;;  %4358 = vmatpush1.bf16.msra.mxu1 %v9804_v20  ;;  %v1467_v15 = vadd.f32 1e-05, %v1291_v39  ;;  %v1336_v50 = vsub.f32 %v10351_v0, %v11660_v54  ;;  %v1335_v41 = vsub.f32 %v10352_v58, %v11660_v54  ;;  %v11750_v18 = vmul.f32 %v11680_v48, %v1322_v33  ;;  %v9822_v33 = vld [vmem:[#allocation4 + $0x288] ss:$16 sps:$4 sm:$0xff]   ;;  %v10358_v58 = vld [vmem:[%s11149_s15 + $0x120] sm:$0xff] }
 0x1c1   : > { %3794 = vmatprep.subr.bf16.mxu0 %v9809_v21  ;;  %4359 = vmatprep.subr.bf16.mxu1 %v9812_v55  ;;  %14623 = vst [vmem:[#allocation27_spill] sm:$0xff] %v11736_v62  ;;  %14624 = vst [vmem:[#allocation28_spill] sm:$0xff] %v11739_v63  ;;  %v11753_v37 = vmul.f32 %v11680_v48, %v1321_v12  ;;  %v1516_v23 = vmul.f32 %v11731_v59, %v1324_v25  ;;  %v12154_v28 = vld [vmem:[%s11149_s15 + $0x398] sm:$0xff] }
 0x1c2   : > { %v1144_v61 = vpop.xlane.xlu1 %1143  ;;  %v802_v21 = vpop.xlane.xlu0 %801  ;;  %v1338_v55 = vsub.f32 %v10353_v1, %v11660_v54  ;;  %10299 = vrsqrt.f32 %v1467_v15  ;;  %v1515_v6 = vmul.f32 %v11731_v59, %v1323_v13  ;;  %v1518_v32 = vmul.f32 %v11731_v59, %v1326_v30  ;;  %v9830_v13 = vld [vmem:[#allocation4 + $0x2ac] ss:$16 sps:$4 sm:$0xff]   ;;  %v10354_v30 = vld [vmem:[%s11149_s15 + $0x110] sm:$0xff]  ;;  %v9828_v15 = vld [vmem:[#allocation4 + $0x2a8] ss:$16 sps:$4 sm:$0xff]  }
 0x1c3   : > { %v1260_v16 = vmul.f32 0.00078125, %v1144_v61  ;;  %v11760_v57 = vmul.f32 0.00078125, %v802_v21  ;;  %v1517_v40 = vmul.f32 %v11731_v59, %v1325_v4  ;;  %v1520_v24 = vmul.f32 %v11731_v59, %v1328_v42  ;;  %v9825_v42 = vld [vmem:[#allocation4 + $0x2a0] ss:$16 sps:$4 sm:$0xff]  }
 0x1c4   : > { %3795 = vmatpush1.bf16.msra.mxu0 %v9807_v44  ;;  %4360 = vmatpush1.bf16.msra.mxu1 %v9810_v5  ;;  %v9819_v5 = vld [vmem:[#allocation4 + $0x280] ss:$16 sps:$4 sm:$0xff]   ;;  %v1337_v49 = vsub.f32 %v10354_v30, %v11660_v54  ;;  %v9842_v30 = vld [vmem:[#allocation4 + $0x2ec] ss:$16 sps:$4 sm:$0xff]  }
 0x1c5   : > { %v1292_v20 = vsub.f32 %v1260_v16, %v1276_v52  ;;  %3796 = vmatprep.subr.bf16.mxu0 %v9815_v19  ;;  %4361 = vmatprep.subr.bf16.mxu1 %v9818_v34  ;;  %v1277_v25 = vmul.f32 %v11760_v57, %v11760_v57  ;;  %v10355_v16 = vld [vmem:[%s11149_s15 + $0xd8] sm:$0xff] }
 0x1c6   : > { %v11758_v43 = vpop.eup %10297  ;;  %v813_v4 = vpop.xlane.xlu1 %812  ;;  %v1330_v8 = vsub.f32 %v10355_v16, %v11636_v3 }
 0x1c7   : > { %v1468_v48 = vadd.f32 1e-05, %v1292_v20  ;;  %v1526_v39 = vmul.f32 %v11758_v43, %v1334_v22  ;;  %v1525_v44 = vmul.f32 %v11758_v43, %v1333_v45  ;;  %v1528_v19 = vmul.f32 %v11758_v43, %v1336_v50  ;;  %v9833_v22 = vld [vmem:[#allocation4 + $0x2c4] ss:$16 sps:$4 sm:$0xff]   ;;  %v10356_v45 = vld [vmem:[%s11149_s15 + $0x128] sm:$0xff] }
 0x1c8   : > { %3797 = vmatpush1.bf16.msra.mxu0 %v9813_v31  ;;  %4362 = vmatpush1.bf16.msra.mxu1 %v9816_v29  ;;  %v1527_v10 = vmul.f32 %v11758_v43, %v1335_v41  ;;  %v1530_v2 = vmul.f32 %v11758_v43, %v1338_v55  ;;  %v1519_v31 = vmul.f32 %v11731_v59, %v1327_v26  ;;  %v11792_v50 = vmul.f32 0.00078125, %v813_v4  ;;  %v9836_v26 = vld [vmem:[#allocation4 + $0x2cc] ss:$16 sps:$4 sm:$0xff]   ;;  %v9831_v20 = vld [vmem:[#allocation4 + $0x2c0] ss:$16 sps:$4 sm:$0xff]  }
 0x1c9   : > { %10301 = vrsqrt.f32 %v1468_v48  ;;  %v1666_v27 = vpack.c.bf16 %v1526_v39, %v1516_v23  ;;  %v1665_v12 = vpack.c.bf16 %v1525_v44, %v1515_v6  ;;  %3798 = vmatprep.subr.bf16.mxu0 %v9821_v53  ;;  %4363 = vmatprep.subr.bf16.mxu1 %v9824_v46  ;;  %v11773_v34 = vpack.c.bf16 %v1528_v19, %v1518_v32  ;;  %v10357_v53 = vld [vmem:[%s11149_s15 + $0xd0] sm:$0xff]  ;;  %v10359_v55 = vld [vmem:[%s11149_s15 + $0x148] sm:$0xff]  ;;  %v10361_v19 = vld [vmem:[%s11149_s15 + $0x140] sm:$0xff] }
 0x1ca   : > { %v11775_v17 = vpack.c.bf16 %v1527_v10, %v1517_v40  ;;  %v11779_v61 = vpack.c.bf16 %v1530_v2, %v1520_v24  ;;  %v1529_v52 = vmul.f32 %v11758_v43, %v1337_v49  ;;  %v1340_v29 = vsub.f32 %v10356_v45, %v11660_v54  ;;  %v9834_v32 = vld [vmem:[#allocation4 + $0x2c8] ss:$16 sps:$4 sm:$0xff]  }
 0x1cb   : > { %14625 = vst [vmem:[#allocation29_spill] sm:$0xff] %v11773_v34  ;;  %v1155_v35 = vpop.xlane.xlu0 %1154  ;;  %3719 = vmatprep.mubr.bf16.mxu0 %v1666_v27  ;;  %4284 = vmatprep.mubr.bf16.mxu1 %v1666_v27  ;;  %v1329_v0 = vsub.f32 %v10357_v53, %v11636_v3  ;;  %v1339_v41 = vsub.f32 %v10358_v58, %v11660_v54  ;;  %v10360_v40 = vld [vmem:[%s11149_s15 + $0x198] sm:$0xff] }
 0x1cc   : > { %14626 = vst [vmem:[#allocation30_spill] sm:$0xff] %v11775_v17  ;;  %14627 = vst [vmem:[#allocation31_spill] sm:$0xff] %v11779_v61  ;;  %v1261_v51 = vmul.f32 0.00078125, %v1155_v35  ;;  %3720 = vmatmul.mubr.bf16.gmra.mrb[4].mxu0 %v1665_v12  ;;  %4285 = vmatmul.mubr.bf16.gmra.mrb[4].mxu1 %v1665_v12  ;;  %v11794_v46 = vpack.c.bf16 %v1529_v52, %v1519_v31  ;;  %v1522_v21 = vmul.f32 %v11731_v59, %v1330_v8  ;;  %v11800_v1 = vpop.eup %10299  ;;  %v9848_v53 = vld [vmem:[#allocation4 + $0x30c] ss:$16 sps:$4 sm:$0xff]  }
 0x1cd   : > { %3799 = vmatpush1.bf16.msra.mxu0 %v9819_v5  ;;  %4364 = vmatpush1.bf16.msra.mxu1 %v9822_v33  ;;  %v1532_v23 = vmul.f32 %v11758_v43, %v1340_v29  ;;  %14629 = vst [vmem:[#allocation33_spill] sm:$0xff] %v11800_v1  ;;  %v1344_v6 = vsub.f32 %v10359_v55, %v11686_v60  ;;  %v11922_v55 = vld [vmem:[%s11149_s15 + $0x218] sm:$0xff]  ;;  %v11996_v61 = vld [vmem:[%s11149_s15 + $0x2a0] sm:$0xff] }
 0x1ce   : > { %v1293_v7 = vsub.f32 %v1261_v51, %v1277_v25  ;;  %3800 = vmatprep.subr.bf16.mxu0 %v9827_v36  ;;  %4365 = vmatprep.subr.bf16.mxu1 %v9830_v13  ;;  %14628 = vst [vmem:[#allocation32_spill] sm:$0xff] %v11794_v46  ;;  %v1521_v48 = vmul.f32 %v11731_v59, %v1329_v0  ;;  %v10362_v25 = vld [vmem:[%s11149_s15 + $0x190] sm:$0xff]  ;;  %v11839_v0 = vld [vmem:[%s11149_s15 + $0xe8] sm:$0xff]  ;;  %v11991_v46 = vld [vmem:[%s11149_s15 + $0x2f8] sm:$0xff] }
 0x1cf   : > { %v1531_v39 = vmul.f32 %v11758_v43, %v1339_v41  ;;  %v1354_v33 = vsub.f32 %v10360_v40, %v11710_v14  ;;  %v1343_v10 = vsub.f32 %v10361_v19, %v11686_v60  ;;  %v11810_v2 = vpack.c.bf16 %v1532_v23, %v1522_v21  ;;  %v9839_v13 = vld [vmem:[#allocation4 + $0x2e4] ss:$16 sps:$4 sm:$0xff]   ;;  %v9843_v41 = vld [vmem:[#allocation4 + $0x300] ss:$16 sps:$4 sm:$0xff]   ;;  %v11942_v21 = vld [vmem:[%s11149_s15 + $0x288] sm:$0xff] }
 0x1d0   : > { %v1469_v44 = vadd.f32 1e-05, %v1293_v7  ;;  %v1166_v5 = vpop.xlane.xlu1 %1165  ;;  %v1278_v27 = vmul.f32 %v11792_v50, %v11792_v50  ;;  %v1353_v36 = vsub.f32 %v10362_v25, %v11710_v14  ;;  %v11829_v51 = vpack.c.bf16 %v11753_v37, %v11678_v47  ;;  %v9840_v47 = vld [vmem:[#allocation4 + $0x2e8] ss:$16 sps:$4 sm:$0xff]   ;;  %v9845_v37 = vld [vmem:[#allocation4 + $0x304] ss:$16 sps:$4 sm:$0xff]  }
 0x1d1   : > { %3801 = vmatpush1.bf16.msra.mxu0 %v9825_v42  ;;  %4366 = vmatpush1.bf16.msra.mxu1 %v9828_v15  ;;  %14630 = vst [vmem:[#allocation34_spill] sm:$0xff] %v11810_v2  ;;  %v1262_v12 = vmul.f32 0.00078125, %v1166_v5  ;;  %v824_v24 = vpop.xlane.xlu0 %823  ;;  %v11816_v49 = vpack.c.bf16 %v1531_v39, %v1521_v48  ;;  %v1536_v42 = vmul.f32 %v11800_v1, %v1344_v6  ;;  %v11849_v23 = vld [vmem:[%s11149_s15 + $0xe0] sm:$0xff]  ;;  %v11854_v6 = vld [vmem:[%s11149_s15 + $0x130] sm:$0xff]  ;;  %v11859_v39 = vld [vmem:[%s11149_s15 + $0x1e8] sm:$0xff] }
 0x1d2   : > { %3802 = vmatprep.subr.bf16.mxu0 %v9833_v22  ;;  %4367 = vmatprep.subr.bf16.mxu1 %v9836_v26  ;;  %v11820_v35 = vmul.f32 0.00078125, %v824_v24  ;;  %v11825_v15 = vpack.c.bf16 %v11750_v18, %v11676_v38  ;;  %14634 = vst [vmem:[#allocation38_spill] sm:$0xff] %v11829_v51  ;;  %v1535_v52 = vmul.f32 %v11800_v1, %v1343_v10  ;;  %10303 = vrsqrt.f32 %v1469_v44  ;;  %v9837_v38 = vld [vmem:[#allocation4 + $0x2e0] ss:$16 sps:$4 sm:$0xff]   ;;  %v11874_v10 = vld [vmem:[%s11149_s15 + $0x238] sm:$0xff] }
 0x1d3   : > { %14631 = vst [vmem:[#allocation35_spill] sm:$0xff] %v11816_v49  ;;  %v11818_v4 = vpop.eup %10301  ;;  %v1294_v22 = vsub.f32 %v1262_v12, %v1278_v27  ;;  %v11864_v5 = vld [vmem:[%s11149_s15 + $0x1e0] sm:$0xff]  ;;  %v9846_v12 = vld [vmem:[#allocation4 + $0x308] ss:$16 sps:$4 sm:$0xff]   ;;  %v11879_v25 = vld [vmem:[%s11149_s15 + $0x1f0] sm:$0xff] }
 0x1d4   : > { %14632 = vst [vmem:[#allocation36_spill] sm:$0xff] %v11818_v4  ;;  %14633 = vst [vmem:[#allocation37_spill] sm:$0xff] %v11825_v15  ;;  %v1546_v31 = vmul.f32 %v11818_v4, %v1354_v33  ;;  %v1545_v16 = vmul.f32 %v11818_v4, %v1353_v36  ;;  %v11836_v18 = vmul.f32 %v11820_v35, %v11820_v35  ;;  %v835_v26 = vpop.xlane.xlu1 %834  ;;  %v11869_v33 = vld [vmem:[%s11149_s15 + $0x1f8] sm:$0xff]  ;;  %v9851_v24 = vld [vmem:[#allocation4 + $0x324] ss:$16 sps:$4 sm:$0xff]  }
 0x1d5   : > { %3803 = vmatpush1.bf16.msra.mxu0 %v9831_v20  ;;  %4368 = vmatpush1.bf16.msra.mxu1 %v9834_v32  ;;  %v1470_v8 = vadd.f32 1e-05, %v1294_v22  ;;  %v11844_v20 = vld [vmem:[%s11149_s15 + $0x138] sm:$0xff]  ;;  %v11927_v7 = vld [vmem:[%s11149_s15 + $0x268] sm:$0xff]  ;;  %v11971_v51 = vld [vmem:[%s11149_s15 + $0x2d0] sm:$0xff] }
 0x1d6   : > { %v1676_v45 = vpack.c.bf16 %v1546_v31, %v1536_v42  ;;  %v1675_v29 = vpack.c.bf16 %v1545_v16, %v1535_v52  ;;  %3804 = vmatprep.subr.bf16.mxu0 %v9839_v13  ;;  %4369 = vmatprep.subr.bf16.mxu1 %v9842_v30  ;;  %v11884_v13 = vld [vmem:[%s11149_s15 + $0x208] sm:$0xff]  ;;  %v11888_v42 = vmul.f32 0.00078125, %v835_v26  ;;  %v11892_v31 = vld [vmem:[%s11149_s15 + $0x230] sm:$0xff]  ;;  %v11907_v26 = vld [vmem:[%s11149_s15 + $0x258] sm:$0xff]  ;;  %v14653_v14 = vsub.f32 %v11927_v7, %v11792_v50 }
 0x1d7   : > { %10305 = vrsqrt.f32 %v1470_v8  ;;  %v9854_v16 = vld [vmem:[#allocation4 + $0x32c] ss:$16 sps:$4 sm:$0xff]   ;;  %v11932_v30 = vld [vmem:[%s11149_s15 + $0x210] sm:$0xff]  ;;  %v9858_v17 = vld [vmem:[#allocation4 + $0x348] ss:$16 sps:$4 sm:$0xff]  }
 0x1d8   : > { %v1177_v58 = vpop.xlane.xlu0 %1176  ;;  %3729 = vmatprep.mubr.bf16.mxu0 %v1676_v45  ;;  %4294 = vmatprep.mubr.bf16.mxu1 %v1676_v45  ;;  %v11897_v8 = vld [vmem:[%s11149_s15 + $0x248] sm:$0xff]  ;;  %v11952_v27 = vld [vmem:[%s11149_s15 + $0x298] sm:$0xff]  ;;  %v1280_v19 = vmul.f32 %v11888_v42, %v11888_v42  ;;  %v11966_v52 = vld [vmem:[%s11149_s15 + $0x290] sm:$0xff] }
 0x1d9   : > { %v1263_v48 = vmul.f32 0.00078125, %v1177_v58  ;;  %3730 = vmatmul.mubr.bf16.gmra.mrb[8].mxu0 %v1675_v29  ;;  %4295 = vmatmul.mubr.bf16.gmra.mrb[8].mxu1 %v1675_v29  ;;  %v9849_v29 = vld [vmem:[#allocation4 + $0x320] ss:$16 sps:$4 sm:$0xff]   ;;  %v9857_v58 = vld [vmem:[#allocation4 + $0x344] ss:$16 sps:$4 sm:$0xff]  }
 0x1da   : > { %3805 = vmatpush1.bf16.msra.mxu0 %v9837_v38  ;;  %4370 = vmatpush1.bf16.msra.mxu1 %v9840_v47  ;;  %v9852_v38 = vld [vmem:[#allocation4 + $0x328] ss:$16 sps:$4 sm:$0xff]   ;;  %v11902_v47 = vld [vmem:[%s11149_s15 + $0x240] sm:$0xff] }
 0x1db   : > { %v1295_v22 = vsub.f32 %v1263_v48, %v11836_v18  ;;  %3806 = vmatprep.subr.bf16.mxu0 %v9845_v37  ;;  %4371 = vmatprep.subr.bf16.mxu1 %v9848_v53  ;;  %v11912_v53 = vld [vmem:[%s11149_s15 + $0x200] sm:$0xff]  ;;  %v11917_v48 = vld [vmem:[%s11149_s15 + $0x250] sm:$0xff]  ;;  %v11961_v44 = vld [vmem:[%s11149_s15 + $0x2d8] sm:$0xff] }
 0x1dc   : > { %v11937_v18 = vld [vmem:[%s11149_s15 + $0x260] sm:$0xff]  ;;  %v11956_v32 = vpop.eup %10303  ;;  %v11976_v49 = vld [vmem:[%s11149_s15 + $0x2e8] sm:$0xff] }
 0x1dd   : > { %v1471_v36 = vadd.f32 1e-05, %v1295_v22  ;;  %v11947_v37 = vld [vmem:[%s11149_s15 + $0x280] sm:$0xff]  ;;  %v11986_v2 = vld [vmem:[%s11149_s15 + $0x2a8] sm:$0xff]  ;;  %v14636_v22 = vsub.f32 %v11864_v5, %v11760_v57  ;;  %v14639_v5 = vsub.f32 %v11869_v33, %v11760_v57 }
 0x1de   : > { %v1188_v45 = vpop.xlane.xlu1 %1187  ;;  %3807 = vmatpush1.bf16.msra.mxu0 %v9843_v41  ;;  %4372 = vmatpush1.bf16.msra.mxu1 %v9846_v12  ;;  %v9860_v12 = vld [vmem:[#allocation4 + $0x34c] ss:$16 sps:$4 sm:$0xff]   ;;  %v9855_v15 = vld [vmem:[#allocation4 + $0x340] ss:$16 sps:$4 sm:$0xff]   ;;  %v14637_v41 = vsub.f32 %v11874_v10, %v11792_v50  ;;  %v14640_v10 = vsub.f32 %v11897_v8, %v11792_v50 }
 0x1df   : > { %v1264_v40 = vmul.f32 0.00078125, %v1188_v45  ;;  %3808 = vmatprep.subr.bf16.mxu0 %v9851_v24  ;;  %4373 = vmatprep.subr.bf16.mxu1 %v9854_v16  ;;  %v11981_v16 = vld [vmem:[%s11149_s15 + $0x2e0] sm:$0xff]  ;;  %v846_v62 = vpop.xlane.xlu0 %845  ;;  %10307 = vrsqrt.f32 %v1471_v36  ;;  %v1555_v24 = vmul.f32 %v11956_v32, %v14636_v22  ;;  %v14638_v36 = vsub.f32 %v11892_v31, %v11792_v50  ;;  %v9866_v22 = vld [vmem:[#allocation4 + $0x36c] ss:$16 sps:$4 sm:$0xff]  }
 0x1e0   : > { %v14641_v31 = vsub.f32 %v11879_v25, %v11760_v57 }
 0x1e1   : > { %v1296_v63 = vsub.f32 %v1264_v40, %v1280_v19  ;;  %v12005_v11 = vpop.eup %10305  ;;  %v12007_v40 = vmul.f32 0.00078125, %v846_v62  ;;  %v14635_v19 = vsub.f32 %v11859_v39, %v11760_v57 }
 0x1e2   : > { %3809 = vmatpush1.bf16.msra.mxu0 %v9849_v29  ;;  %4374 = vmatpush1.bf16.msra.mxu1 %v9852_v38  ;;  %v1566_v62 = vmul.f32 %v12005_v11, %v14637_v41  ;;  %v1565_v39 = vmul.f32 %v12005_v11, %v14638_v36  ;;  %v1558_v29 = vmul.f32 %v11956_v32, %v14639_v5  ;;  %v857_v38 = vpop.xlane.xlu1 %856 }
 0x1e3   : > { %v1556_v45 = vmul.f32 %v11956_v32, %v14635_v19  ;;  %v1472_v1 = vadd.f32 1e-05, %v1296_v63  ;;  %3810 = vmatprep.subr.bf16.mxu0 %v9857_v58  ;;  %4375 = vmatprep.subr.bf16.mxu1 %v9860_v12  ;;  %v9863_v19 = vld [vmem:[#allocation4 + $0x364] ss:$16 sps:$4 sm:$0xff]   ;;  %v9861_v63 = vld [vmem:[#allocation4 + $0x360] ss:$16 sps:$4 sm:$0xff]   ;;  %v1568_v41 = vmul.f32 %v12005_v11, %v14640_v10  ;;  %v1557_v58 = vmul.f32 %v11956_v32, %v14641_v31 }
 0x1e4   : > { %v14642_v12 = vsub.f32 %v11902_v47, %v11792_v50  ;;  %v14643_v36 = vsub.f32 %v11884_v13, %v11760_v57  ;;  %v1685_v8 = vpack.c.bf16 %v1565_v39, %v1555_v24  ;;  %v14644_v10 = vsub.f32 %v11912_v53, %v11760_v57  ;;  %v9864_v47 = vld [vmem:[#allocation4 + $0x368] ss:$16 sps:$4 sm:$0xff]   ;;  %v9872_v24 = vld [vmem:[#allocation4 + $0x38c] ss:$16 sps:$4 sm:$0xff]  }
 0x1e5   : > { %10309 = vrsqrt.f32 %v1472_v1  ;;  %v1686_v4 = vpack.c.bf16 %v1566_v62, %v1556_v45  ;;  %v1281_v31 = vmul.f32 %v12007_v40, %v12007_v40  ;;  %v12051_v60 = vpack.c.bf16 %v1568_v41, %v1558_v29 }
 0x1e6   : > { %v1567_v33 = vmul.f32 %v12005_v11, %v14642_v12  ;;  %v1560_v5 = vmul.f32 %v11956_v32, %v14643_v36  ;;  %v1559_v25 = vmul.f32 %v11956_v32, %v14644_v10  ;;  %3811 = vmatpush1.bf16.msra.mxu0 %v9855_v15  ;;  %4376 = vmatpush1.bf16.msra.mxu1 %v9858_v17  ;;  %v9869_v12 = vld [vmem:[#allocation4 + $0x384] ss:$16 sps:$4 sm:$0xff]   ;;  %v12059_v45 = vmul.f32 0.00078125, %v857_v38  ;;  %v9870_v38 = vld [vmem:[#allocation4 + $0x388] ss:$16 sps:$4 sm:$0xff]  }
 0x1e7   : > { %14645 = vst [vmem:[#allocation39_spill] sm:$0xff] %v12051_v60  ;;  %v14646_v1 = vsub.f32 %v11922_v55, %v11760_v57  ;;  %v1199_v53 = vpop.xlane.xlu0 %1198  ;;  %3739 = vmatprep.mubr.bf16.mxu0 %v1686_v4  ;;  %4304 = vmatprep.mubr.bf16.mxu1 %v1686_v4  ;;  %v14648_v15 = vsub.f32 %v11932_v30, %v11760_v57  ;;  %v12070_v55 = vld [vmem:[%s11149_s15 + $0x2b8] sm:$0xff]  ;;  %v9867_v4 = vld [vmem:[#allocation4 + $0x380] ss:$16 sps:$4 sm:$0xff]   ;;  %v12083_v36 = vld [vmem:[%s11149_s15 + $0x308] sm:$0xff] }
 0x1e8   : > { %v12061_v17 = vpack.c.bf16 %v1567_v33, %v1557_v58  ;;  %v1265_v29 = vmul.f32 0.00078125, %v1199_v53  ;;  %3740 = vmatmul.mubr.bf16.gmra.mrb[12].mxu0 %v1685_v8  ;;  %4305 = vmatmul.mubr.bf16.gmra.mrb[12].mxu1 %v1685_v8  ;;  %v14649_v41 = vsub.f32 %v11907_v26, %v11792_v50  ;;  %v14650_v58 = vsub.f32 %v11917_v48, %v11792_v50  ;;  %v12088_v8 = vld [vmem:[%s11149_s15 + $0x328] sm:$0xff]  ;;  %v12098_v48 = vld [vmem:[%s11149_s15 + $0x2b0] sm:$0xff]  ;;  %v12115_v53 = vld [vmem:[%s11149_s15 + $0x378] sm:$0xff] }
 0x1e9   : > { %v12057_v13 = vmul.f32 %v11956_v32, %v14646_v1  ;;  %v12067_v62 = vmul.f32 %v11956_v32, %v14648_v15  ;;  %v12093_v1 = vld [vmem:[%s11149_s15 + $0x320] sm:$0xff]  ;;  %3812 = vmatprep.subr.bf16.mxu0 %v9863_v19  ;;  %4377 = vmatprep.subr.bf16.mxu1 %v9866_v22  ;;  %v12108_v10 = vld [vmem:[%s11149_s15 + $0x330] sm:$0xff]  ;;  %v1282_v22 = vmul.f32 %v12059_v45, %v12059_v45  ;;  %v12121_v26 = vpop.eup %10307  ;;  %v12129_v60 = vld [vmem:[%s11149_s15 + $0x388] sm:$0xff] }
 0x1ea   : > { %14647 = vst [vmem:[#allocation40_spill] sm:$0xff] %v12061_v17  ;;  %v1570_v30 = vmul.f32 %v12005_v11, %v14649_v41  ;;  %v1569_v33 = vmul.f32 %v12005_v11, %v14650_v58  ;;  %v1297_v41 = vsub.f32 %v1265_v29, %v1281_v31  ;;  %3813 = vmatpush1.bf16.msra.mxu0 %v9861_v63  ;;  %v12103_v58 = vld [vmem:[%s11149_s15 + $0x338] sm:$0xff]  ;;  %v9875_v31 = vld [vmem:[#allocation4 + $0x3a4] ss:$16 sps:$4 sm:$0xff]   ;;  %v9873_v17 = vld [vmem:[#allocation4 + $0x3a0] ss:$16 sps:$4 sm:$0xff]  }
 0x1eb   : > { %4378 = vmatpush1.bf16.msra.mxu1 %v9864_v47  ;;  %3814 = vmatprep.subr.bf16.mxu0 %v9869_v12  ;;  %v9878_v47 = vld [vmem:[#allocation4 + $0x3ac] ss:$16 sps:$4 sm:$0xff]   ;;  %v12124_v19 = vld [vmem:[%s11149_s15 + $0x370] sm:$0xff]  ;;  %v1572_v12 = vmul.f32 %v12005_v11, %v14653_v14  ;;  %v14658_v14 = vsub.f32 %v11961_v44, %v11888_v42  ;;  %v14662_v44 = vsub.f32 %v11976_v49, %v11888_v42 }
 0x1ec   : > { %4379 = vmatprep.subr.bf16.mxu1 %v9872_v24  ;;  %v12119_v29 = vpack.c.bf16 %v1570_v30, %v1560_v5  ;;  %v1473_v15 = vadd.f32 1e-05, %v1297_v41  ;;  %v12133_v24 = vpack.c.bf16 %v1569_v33, %v1559_v25  ;;  %v1210_v63 = vpop.xlane.xlu1 %1209  ;;  %v9876_v5 = vld [vmem:[#allocation4 + $0x3a8] ss:$16 sps:$4 sm:$0xff]   ;;  %v12136_v30 = vld [vmem:[%s11149_s15 + $0x380] sm:$0xff]  ;;  %v14654_v25 = vsub.f32 %v11937_v18, %v11792_v50  ;;  %v12206_v49 = vld [vmem:[%s11149_s15 + $0x390] sm:$0xff] }
 0x1ed   : > { %v868_v34 = vpop.xlane.xlu0 %867  ;;  %v9881_v41 = vld [vmem:[#allocation4 + $0x3c4] ss:$16 sps:$4 sm:$0xff]  }
 0x1ee   : > { %14651 = vst [vmem:[#allocation41_spill] sm:$0xff] %v12119_v29  ;;  %14652 = vst [vmem:[#allocation42_spill] sm:$0xff] %v12133_v24  ;;  %v12141_v29 = vld [vmem:[%s11149_s15 + $0x348] sm:$0xff]  ;;  %v1571_v33 = vmul.f32 %v12005_v11, %v14654_v25  ;;  %10311 = vrsqrt.f32 %v1473_v15  ;;  %v1266_v24 = vmul.f32 0.00078125, %v1210_v63  ;;  %3815 = vmatpush1.bf16.msra.mxu0 %v9867_v4  ;;  %v14655_v15 = vsub.f32 %v11942_v21, %v11820_v35 }
 0x1ef   : > { %4380 = vmatpush1.bf16.msra.mxu1 %v9870_v38  ;;  %v12163_v7 = vpop.eup %10309  ;;  %v12165_v18 = vmul.f32 0.00078125, %v868_v34  ;;  %3816 = vmatprep.subr.bf16.mxu0 %v9875_v31  ;;  %v9884_v38 = vld [vmem:[#allocation4 + $0x3cc] ss:$16 sps:$4 sm:$0xff]   ;;  %v12172_v63 = vpack.c.bf16 %v1572_v12, %v12057_v13  ;;  %v14659_v21 = vsub.f32 %v11947_v37, %v11820_v35  ;;  %v9879_v12 = vld [vmem:[#allocation4 + $0x3c0] ss:$16 sps:$4 sm:$0xff]   ;;  %v14663_v37 = vsub.f32 %v11966_v52, %v11820_v35 }
 0x1f0   : > { %v1576_v4 = vmul.f32 %v12121_v26, %v14655_v15  ;;  %4381 = vmatprep.subr.bf16.mxu1 %v9878_v47  ;;  %v12175_v25 = vpack.c.bf16 %v1571_v33, %v12067_v62  ;;  %v1298_v39 = vsub.f32 %v1266_v24, %v1282_v22  ;;  %v1586_v34 = vmul.f32 %v12163_v7, %v14658_v14 }
 0x1f1   : > { %14656 = vst [vmem:[#allocation43_spill] sm:$0xff] %v12172_v63  ;;  %v1575_v31 = vmul.f32 %v12121_v26, %v14659_v21  ;;  %v14660_v47 = vsub.f32 %v11971_v51, %v11888_v42  ;;  %v14661_v62 = vsub.f32 %v11952_v27, %v11820_v35  ;;  %v1588_v24 = vmul.f32 %v12163_v7, %v14662_v44  ;;  %v879_v21 = vpop.xlane.xlu1 %878 }
 0x1f2   : > { %14657 = vst [vmem:[#allocation44_spill] sm:$0xff] %v12175_v25  ;;  %v1577_v33 = vmul.f32 %v12121_v26, %v14663_v37  ;;  %v14664_v51 = vsub.f32 %v11981_v16, %v11888_v42  ;;  %v1474_v15 = vadd.f32 1e-05, %v1298_v39  ;;  %v1696_v27 = vpack.c.bf16 %v1586_v34, %v1576_v4  ;;  %3817 = vmatpush1.bf16.msra.mxu0 %v9873_v17  ;;  %v9887_v16 = vld [vmem:[#allocation4 + $0x3e4] ss:$16 sps:$4 sm:$0xff]  }
 0x1f3   : > { %v1585_v13 = vmul.f32 %v12163_v7, %v14660_v47  ;;  %v1578_v22 = vmul.f32 %v12121_v26, %v14661_v62  ;;  %4382 = vmatpush1.bf16.msra.mxu1 %v9876_v5  ;;  %v9882_v62 = vld [vmem:[#allocation4 + $0x3c8] ss:$16 sps:$4 sm:$0xff]   ;;  %v1283_v52 = vmul.f32 %v12165_v18, %v12165_v18  ;;  %3818 = vmatprep.subr.bf16.mxu0 %v9881_v41  ;;  %v9890_v37 = vld [vmem:[#allocation4 + $0x3ec] ss:$16 sps:$4 sm:$0xff]   ;;  %v9885_v5 = vld [vmem:[#allocation4 + $0x3e0] ss:$16 sps:$4 sm:$0xff]  }
 0x1f4   : > { %v1587_v14 = vmul.f32 %v12163_v7, %v14664_v51  ;;  %4383 = vmatprep.subr.bf16.mxu1 %v9884_v38  ;;  %10313 = vrsqrt.f32 %v1474_v15  ;;  %v1221_v17 = vpop.xlane.xlu0 %1220  ;;  %3749 = vmatprep.mubr.bf16.mxu0 %v1696_v27  ;;  %v9888_v34 = vld [vmem:[#allocation4 + $0x3e8] ss:$16 sps:$4 sm:$0xff]   ;;  %v14666_v38 = vsub.f32 %v11996_v61, %v11820_v35  ;;  %v14668_v61 = vsub.f32 %v12098_v48, %v11820_v35 }
 0x1f5   : > { %v1695_v47 = vpack.c.bf16 %v1585_v13, %v1575_v31  ;;  %v12212_v39 = vpack.c.bf16 %v1588_v24, %v1578_v22  ;;  %4314 = vmatprep.mubr.bf16.mxu1 %v1696_v27  ;;  %v14665_v31 = vsub.f32 %v11986_v2, %v11820_v35  ;;  %v14667_v22 = vsub.f32 %v12070_v55, %v11820_v35  ;;  %v10410_v2 = vld [vmem:[%s11149_s15 + $0x300] sm:$0xff]  ;;  %v12247_v48 = vld [vmem:[%s11149_s15 + $0x3c8] sm:$0xff] }
 0x1f6   : > { %v12214_v4 = vpack.c.bf16 %v1587_v14, %v1577_v33  ;;  %v1579_v13 = vmul.f32 %v12121_v26, %v14666_v38  ;;  %v12228_v33 = vmul.f32 0.00078125, %v879_v21  ;;  %v1267_v51 = vmul.f32 0.00078125, %v1221_v17  ;;  %3819 = vmatpush1.bf16.msra.mxu0 %v9879_v12  ;;  %v10411_v17 = vld [vmem:[%s11149_s15 + $0x358] sm:$0xff] }
 0x1f7   : > { %v1580_v41 = vmul.f32 %v12121_v26, %v14665_v31  ;;  %v1582_v24 = vmul.f32 %v12121_v26, %v14667_v22  ;;  %3750 = vmatmul.mubr.bf16.gmra.mrb[16].mxu0 %v1695_v47  ;;  %4315 = vmatmul.mubr.bf16.gmra.mrb[16].mxu1 %v1695_v47  ;;  %v1399_v14 = vsub.f32 %v10410_v2, %v11888_v42  ;;  %v9896_v22 = vld [vmem:[#allocation4 + $0x40c] ss:$16 sps:$4 sm:$0xff]  }
 0x1f8   : > { %v1581_v15 = vmul.f32 %v12121_v26, %v14668_v61  ;;  %4384 = vmatpush1.bf16.msra.mxu1 %v9882_v62  ;;  %v14669_v55 = vsub.f32 %v11991_v46, %v11888_v42  ;;  %v14670_v27 = vsub.f32 %v12001_v9, %v11888_v42  ;;  %v1410_v31 = vsub.f32 %v10411_v17, %v12007_v40  ;;  %v12252_v62 = vld [vmem:[%s11149_s15 + $0x3c0] sm:$0xff]  ;;  %v12256_v2 = vpop.eup %10311  ;;  %v12259_v61 = vld [vmem:[%s11149_s15 + $0x3d8] sm:$0xff] }
 0x1f9   : > { %v1299_v38 = vsub.f32 %v1267_v51, %v1283_v52  ;;  %3820 = vmatprep.subr.bf16.mxu0 %v9887_v16  ;;  %4385 = vmatprep.subr.bf16.mxu1 %v9890_v37  ;;  %v9893_v9 = vld [vmem:[#allocation4 + $0x404] ss:$16 sps:$4 sm:$0xff]   ;;  %v1284_v17 = vmul.f32 %v12228_v33, %v12228_v33  ;;  %v12274_v46 = vld [vmem:[%s11149_s15 + $0x418] sm:$0xff] }
 0x1fa   : > { %v1590_v21 = vmul.f32 %v12163_v7, %v14669_v55  ;;  %v1589_v47 = vmul.f32 %v12163_v7, %v14670_v27  ;;  %v14673_v27 = vsub.f32 %v12083_v36, %v11888_v42  ;;  %3821 = vmatpush1.bf16.msra.mxu0 %v9885_v5  ;;  %v14675_v36 = vsub.f32 %v12108_v10, %v12007_v40  ;;  %v1232_v5 = vpop.xlane.xlu1 %1231 }
 0x1fb   : > { %v1475_v37 = vadd.f32 1e-05, %v1299_v38  ;;  %3903 = vmatprep.subr.bf16.mxu0 %v9893_v9  ;;  %v12317_v10 = vmul.f32 %v12256_v2, %v1410_v31  ;;  %v890_v9 = vpop.xlane.xlu0 %889 }
 0x1fc   : > { %v12263_v51 = vpack.c.bf16 %v1590_v21, %v1580_v41  ;;  %v12265_v55 = vpack.c.bf16 %v1589_v47, %v1579_v13  ;;  %v1592_v16 = vmul.f32 %v12163_v7, %v14673_v27  ;;  %v14674_v41 = vsub.f32 %v12103_v58, %v12007_v40  ;;  %4386 = vmatpush1.bf16.msra.mxu1 %v9888_v34  ;;  %v12299_v34 = vld [vmem:[%s11149_s15 + $0x410] sm:$0xff] }
 0x1fd   : > { %v1597_v21 = vmul.f32 %v12256_v2, %v14675_v36  ;;  %v14676_v47 = vsub.f32 %v12141_v29, %v12007_v40  ;;  %v14677_v58 = vsub.f32 %v12159_v56, %v12007_v40  ;;  %10315 = vrsqrt.f32 %v1475_v37  ;;  %4468 = vmatprep.subr.bf16.mxu1 %v9896_v22  ;;  %v12307_v36 = vld [vmem:[%s11149_s15 + $0x428] sm:$0xff]  ;;  %v12320_v22 = vld [vmem:[%s11149_s15 + $0x420] sm:$0xff]  ;;  %v12364_v37 = vld [vmem:[%s11149_s15 + $0x430] sm:$0xff] }
 0x1fe   : > { %14671 = vst [vmem:[#allocation45_spill] sm:$0xff] %v12263_v51  ;;  %14672 = vst [vmem:[#allocation46_spill] sm:$0xff] %v12265_v55  ;;  %v1598_v13 = vmul.f32 %v12256_v2, %v14674_v41  ;;  %v12303_v29 = vpack.c.bf16 %v1592_v16, %v1582_v24  ;;  %v1591_v41 = vmul.f32 %v12163_v7, %v1399_v14  ;;  %v1268_v56 = vmul.f32 0.00078125, %v1232_v5  ;;  %v10420_v14 = vld [vmem:[%s11149_s15 + $0x3e8] sm:$0xff]  ;;  %v12327_v5 = vld [vmem:[%s11149_s15 + $0x438] sm:$0xff]  ;;  %v12333_v31 = vpop.eup %10313  ;;  %v901_v25 = vpop.xlane.xlu1 %900 }
 0x1ff   : > { %v12290_v38 = vmul.f32 %v12256_v2, %v14676_v47  ;;  %v12296_v27 = vmul.f32 %v12256_v2, %v14677_v58  ;;  %v12312_v47 = vld [vmem:[%s11149_s15 + $0x3d0] sm:$0xff]  ;;  %v1428_v16 = vsub.f32 %v10420_v14, %v12165_v18  ;;  %v12335_v52 = vmul.f32 0.00078125, %v890_v9 }
 0x200   : > { %14678 = vst [vmem:[#allocation47_spill] sm:$0xff] %v12303_v29  ;;  %v12331_v12 = vpack.c.bf16 %v1591_v41, %v1581_v15  ;;  %v1300_v58 = vsub.f32 %v1268_v56, %v1284_v17  ;;  %v14680_v24 = vsub.f32 %v12088_v8, %v12007_v40  ;;  %v14681_v14 = vsub.f32 %v12093_v1, %v12007_v40  ;;  %v12422_v51 = vld [vmem:[%s11149_s15 + $0x470] sm:$0xff] }
 0x201   : > { %v14682_v15 = vsub.f32 %v12115_v53, %v12059_v45  ;;  %v14683_v17 = vsub.f32 %v12124_v19, %v12059_v45  ;;  %v14684_v8 = vsub.f32 %v12129_v60, %v12059_v45  ;;  %v14685_v1 = vsub.f32 %v12136_v30, %v12059_v45  ;;  %v10422_v53 = vld [vmem:[%s11149_s15 + $0x3e0] sm:$0xff] }
 0x202   : > { %14679 = vst [vmem:[#allocation48_spill] sm:$0xff] %v12331_v12  ;;  %v1596_v44 = vmul.f32 %v12256_v2, %v14680_v24  ;;  %v1595_v29 = vmul.f32 %v12256_v2, %v14681_v14  ;;  %v1476_v14 = vadd.f32 1e-05, %v1300_v58  ;;  %v12374_v58 = vmul.f32 0.00078125, %v901_v25  ;;  %v1243_v55 = vpop.xlane.xlu0 %1242 }
 0x203   : > { %v1606_v41 = vmul.f32 %v12333_v31, %v14682_v15  ;;  %v1605_v56 = vmul.f32 %v12333_v31, %v14683_v17  ;;  %v1608_v9 = vmul.f32 %v12333_v31, %v14684_v8  ;;  %v1607_v24 = vmul.f32 %v12333_v31, %v14685_v1  ;;  %v10424_v17 = vld [vmem:[%s11149_s15 + $0x3a8] sm:$0xff] }
 0x204   : > { %v1427_v15 = vsub.f32 %v10422_v53, %v12165_v18  ;;  %v1420_v60 = vsub.f32 %v10424_v17, %v12059_v45  ;;  %10317 = vrsqrt.f32 %v1476_v14  ;;  %v1285_v1 = vmul.f32 %v12335_v52, %v12335_v52  ;;  %v10425_v53 = vld [vmem:[%s11149_s15 + $0x350] sm:$0xff]  ;;  %v10429_v17 = vld [vmem:[%s11149_s15 + $0x448] sm:$0xff] }
 0x205   : > { %v1706_v8 = vpack.c.bf16 %v1606_v41, %v1596_v44  ;;  %v1705_v12 = vpack.c.bf16 %v1605_v56, %v1595_v29  ;;  %v12370_v30 = vpack.c.bf16 %v1608_v9, %v1598_v13  ;;  %v12372_v63 = vpack.c.bf16 %v1607_v24, %v1597_v21  ;;  %v10426_v21 = vld [vmem:[%s11149_s15 + $0x3a0] sm:$0xff]  ;;  %v10427_v29 = vld [vmem:[%s11149_s15 + $0x3f8] sm:$0xff]  ;;  %v12389_v9 = vld [vmem:[%s11149_s15 + $0x468] sm:$0xff] }
 0x206   : > { %v1409_v19 = vsub.f32 %v10425_v53, %v12007_v40  ;;  %v14687_v44 = vsub.f32 %v12154_v28, %v12059_v45  ;;  %v1419_v25 = vsub.f32 %v10426_v21, %v12059_v45  ;;  %v1430_v41 = vsub.f32 %v10427_v29, %v12165_v18 }
 0x207   : > { %14686 = vst [vmem:[#allocation49_spill] sm:$0xff] %v12372_v63  ;;  %3759 = vmatprep.mubr.bf16.mxu0 %v1706_v8  ;;  %4324 = vmatprep.mubr.bf16.mxu1 %v1706_v8  ;;  %v1269_v56 = vmul.f32 0.00078125, %v1243_v55  ;;  %v14688_v28 = vsub.f32 %v12206_v49, %v12059_v45  ;;  %v1440_v8 = vsub.f32 %v10429_v17, %v12228_v33  ;;  %v12399_v53 = vpop.eup %10315  ;;  %v12407_v55 = vld [vmem:[%s11149_s15 + $0x478] sm:$0xff]  ;;  %v1254_v63 = vpop.xlane.xlu1 %1253 }
 0x208   : > { %v1610_v13 = vmul.f32 %v12333_v31, %v14687_v44  ;;  %3760 = vmatmul.mubr.bf16.gmra.mrb[20].mxu0 %v1705_v12  ;;  %4325 = vmatmul.mubr.bf16.gmra.mrb[20].mxu1 %v1705_v12  ;;  %v12402_v44 = vld [vmem:[%s11149_s15 + $0x460] sm:$0xff]  ;;  %v1612_v49 = vmul.f32 %v12333_v31, %v1420_v60  ;;  %v1286_v17 = vmul.f32 %v12374_v58, %v12374_v58 }
 0x209   : > { %v1609_v14 = vmul.f32 %v12333_v31, %v14688_v28  ;;  %v1301_v28 = vsub.f32 %v1269_v56, %v1285_v1  ;;  %v14690_v24 = vsub.f32 %v12259_v61, %v12165_v18  ;;  %v1620_v56 = vmul.f32 %v12399_v53, %v1428_v16  ;;  %v10436_v16 = vld [vmem:[%s11149_s15 + $0x440] sm:$0xff] }
 0x20a   : > { %v12412_v29 = vpack.c.bf16 %v1610_v13, %v12290_v38  ;;  %v14691_v13 = vsub.f32 %v12312_v47, %v12165_v18  ;;  %v1619_v61 = vmul.f32 %v12399_v53, %v1427_v15  ;;  %v1611_v38 = vmul.f32 %v12333_v31, %v1419_v25  ;;  %v12441_v47 = vld [vmem:[%s11149_s15 + $0x4b8] sm:$0xff] }
 0x20b   : > { %v1618_v12 = vmul.f32 %v12399_v53, %v14690_v24  ;;  %v12431_v1 = vpack.c.bf16 %v1609_v14, %v12296_v27  ;;  %v1477_v21 = vadd.f32 1e-05, %v1301_v28  ;;  %v12436_v24 = vpack.c.bf16 %v1612_v49, %v12317_v10  ;;  %v12446_v14 = vld [vmem:[%s11149_s15 + $0x4b0] sm:$0xff] }
 0x20c   : > { %14689 = vst [vmem:[#allocation50_spill] sm:$0xff] %v12412_v29  ;;  %v1617_v60 = vmul.f32 %v12399_v53, %v14691_v13  ;;  %v1601_v29 = vmul.f32 %v12256_v2, %v1409_v19  ;;  %v1622_v15 = vmul.f32 %v12399_v53, %v1430_v41  ;;  %v10435_v10 = vld [vmem:[%s11149_s15 + $0x3f0] sm:$0xff]  ;;  %v1270_v19 = vmul.f32 0.00078125, %v1254_v63 }
 0x20d   : > { %14692 = vst [vmem:[#allocation51_spill] sm:$0xff] %v12431_v1  ;;  %14693 = vst [vmem:[#allocation52_spill] sm:$0xff] %v12436_v24  ;;  %v1429_v49 = vsub.f32 %v10435_v10, %v12165_v18  ;;  %10319 = vrsqrt.f32 %v1477_v21  ;;  %v14694_v25 = vsub.f32 %v12247_v48, %v12165_v18  ;;  %v14695_v27 = vsub.f32 %v12252_v62, %v12165_v18 }
 0x20e   : > { %v12457_v13 = vpack.c.bf16 %v1611_v38, %v1601_v29  ;;  %v1439_v41 = vsub.f32 %v10436_v16, %v12228_v33  ;;  %v14696_v63 = vsub.f32 %v11839_v0, %v11636_v3  ;;  %v12470_v48 = vpop.eup %10317  ;;  %v1302_v10 = vsub.f32 %v1270_v19, %v1286_v17 }
 0x20f   : > { %v1616_v28 = vmul.f32 %v12399_v53, %v14694_v25  ;;  %v1615_v24 = vmul.f32 %v12399_v53, %v14695_v27  ;;  %v1621_v1 = vmul.f32 %v12399_v53, %v1429_v49  ;;  %v14697_v29 = vsub.f32 %v11844_v20, %v11660_v54 }
 0x210   : > { %v1524_v21 = vmul.f32 %v11731_v59, %v14696_v63  ;;  %v14698_v38 = vsub.f32 %v11849_v23, %v11636_v3  ;;  %v14699_v16 = vsub.f32 %v11854_v6, %v11660_v54  ;;  %v14700_v49 = vsub.f32 %v12274_v46, %v12228_v33 }
 0x211   : > { %v1534_v62 = vmul.f32 %v11758_v43, %v14697_v29  ;;  %v14701_v20 = vsub.f32 %v12299_v34, %v12228_v33  ;;  %v14702_v3 = vsub.f32 %v12307_v36, %v12228_v33  ;;  %v14703_v54 = vsub.f32 %v12320_v22, %v12228_v33 }
 0x212   : > { %v1523_v27 = vmul.f32 %v11731_v59, %v14698_v38  ;;  %v1533_v0 = vmul.f32 %v11758_v43, %v14699_v16  ;;  %v1626_v17 = vmul.f32 %v12470_v48, %v14700_v49  ;;  %v1478_v23 = vadd.f32 1e-05, %v1302_v10 }
 0x213   : > { %v1625_v19 = vmul.f32 %v12470_v48, %v14701_v20  ;;  %v1628_v59 = vmul.f32 %v12470_v48, %v14702_v3  ;;  %v1627_v43 = vmul.f32 %v12470_v48, %v14703_v54  ;;  %v14704_v6 = vsub.f32 %v12327_v5, %v12228_v33 }
 0x214   : > { %v14705_v34 = vsub.f32 %v12364_v37, %v12228_v33  ;;  %v1632_v36 = vmul.f32 %v12470_v48, %v1440_v8  ;;  %v1716_v63 = vpack.c.bf16 %v1626_v17, %v1616_v28  ;;  %10321 = vrsqrt.f32 %v1478_v23  ;;  %v10439_v28 = vld [vmem:[%s11149_s15 + $0x488] sm:$0xff] }
 0x215   : > { %v1630_v46 = vmul.f32 %v12470_v48, %v14704_v6  ;;  %v1715_v29 = vpack.c.bf16 %v1625_v19, %v1615_v24  ;;  %v12509_v22 = vpack.c.bf16 %v1628_v59, %v1618_v12  ;;  %v12511_v38 = vpack.c.bf16 %v1627_v43, %v1617_v60  ;;  %v10437_v60 = vld [vmem:[%s11149_s15 + $0x4c8] sm:$0xff]  ;;  %v10443_v19 = vld [vmem:[%s11149_s15 + $0x498] sm:$0xff]  ;;  %v10445_v43 = vld [vmem:[%s11149_s15 + $0x490] sm:$0xff] }
 0x216   : > { %v1629_v25 = vmul.f32 %v12470_v48, %v14705_v34  ;;  %v12517_v37 = vpack.c.bf16 %v1632_v36, %v1622_v15  ;;  %3769 = vmatprep.mubr.bf16.mxu0 %v1716_v63  ;;  %4334 = vmatprep.mubr.bf16.mxu1 %v1716_v63  ;;  %v1631_v8 = vmul.f32 %v12470_v48, %v1439_v41  ;;  %v10440_v41 = vld [vmem:[%s11149_s15 + $0x4d8] sm:$0xff]  ;;  %v10444_v59 = vld [vmem:[%s11149_s15 + $0x4e8] sm:$0xff]  ;;  %v10446_v6 = vld [vmem:[%s11149_s15 + $0x4e0] sm:$0xff] }
 0x217   : > { %v12513_v5 = vpack.c.bf16 %v1630_v46, %v1620_v56  ;;  %v12520_v24 = vpack.c.bf16 %v1534_v62, %v1524_v21  ;;  %v12522_v12 = vpack.c.bf16 %v1533_v0, %v1523_v27  ;;  %3770 = vmatmul.mubr.bf16.gmra.mrb[24].mxu0 %v1715_v29  ;;  %4335 = vmatmul.mubr.bf16.gmra.mrb[24].mxu1 %v1715_v29  ;;  %v10441_v62 = vld [vmem:[%s11149_s15 + $0x480] sm:$0xff]  ;;  %v10442_v0 = vld [vmem:[%s11149_s15 + $0x4d0] sm:$0xff]  ;;  %v12538_v20 = vpop.eup %10319  ;;  %v10447_v63 = vld [vmem:[%s11149_s15 + $0x228] sm:$0xff] }
 0x218   : > { %v12515_v10 = vpack.c.bf16 %v1629_v25, %v1619_v61  ;;  %v1456_v56 = vsub.f32 %v10437_v60, %v12374_v58  ;;  %v10438_v61 = vld [vmem:[%s11149_s15 + $0x4c0] sm:$0xff]  ;;  %v1448_v16 = vsub.f32 %v10439_v28, %v12335_v52  ;;  %v1458_v21 = vsub.f32 %v10440_v41, %v12374_v58 }
 0x219   : > { %v1455_v15 = vsub.f32 %v10438_v61, %v12374_v58  ;;  %v1447_v27 = vsub.f32 %v10441_v62, %v12335_v52  ;;  %v1457_v49 = vsub.f32 %v10442_v0, %v12374_v58  ;;  %v12536_v17 = vpack.c.bf16 %v1631_v8, %v1621_v1  ;;  %v10448_v8 = vld [vmem:[%s11149_s15 + $0x278] sm:$0xff] }
 0x21a   : > { %v1450_v3 = vsub.f32 %v10443_v19, %v12335_v52  ;;  %v1460_v54 = vsub.f32 %v10444_v59, %v12374_v58  ;;  %v1449_v23 = vsub.f32 %v10445_v43, %v12335_v52  ;;  %v1459_v46 = vsub.f32 %v10446_v6, %v12374_v58  ;;  %v10449_v59 = vld [vmem:[%s11149_s15 + $0x220] sm:$0xff]  ;;  %v10450_v43 = vld [vmem:[%s11149_s15 + $0x270] sm:$0xff] }
 0x21b   : > { %v14706_v34 = vsub.f32 %v12407_v55, %v12335_v52  ;;  %v14707_v25 = vsub.f32 %v12422_v51, %v12335_v52  ;;  %v1372_v29 = vsub.f32 %v10447_v63, %v11760_v57  ;;  %v1382_v60 = vsub.f32 %v10448_v8, %v11792_v50 }
 0x21c   : > { %v1640_v61 = vmul.f32 %v12538_v20, %v1448_v16  ;;  %v1639_v55 = vmul.f32 %v12538_v20, %v1447_v27  ;;  %v1642_v28 = vmul.f32 %v12538_v20, %v1450_v3  ;;  %v1641_v51 = vmul.f32 %v12538_v20, %v1449_v23 }
 0x21d   : > { %v1638_v1 = vmul.f32 %v12538_v20, %v14706_v34  ;;  %v1637_v36 = vmul.f32 %v12538_v20, %v14707_v25  ;;  %v14708_v41 = vsub.f32 %v12389_v9, %v12335_v52  ;;  %v1564_v0 = vmul.f32 %v11956_v32, %v1372_v29  ;;  %v10451_v9 = vld [vmem:[%s11149_s15 + $0x2c8] sm:$0xff]  ;;  %v10452_v34 = vld [vmem:[%s11149_s15 + $0x318] sm:$0xff] }
 0x21e   : > { %v1574_v19 = vmul.f32 %v12005_v11, %v1382_v60  ;;  %v1371_v16 = vsub.f32 %v10449_v59, %v11760_v57  ;;  %v14709_v27 = vsub.f32 %v12402_v44, %v12335_v52  ;;  %v1381_v23 = vsub.f32 %v10450_v43, %v11792_v50  ;;  %v10453_v57 = vld [vmem:[%s11149_s15 + $0x2c0] sm:$0xff]  ;;  %v10454_v44 = vld [vmem:[%s11149_s15 + $0x310] sm:$0xff]  ;;  %v10455_v43 = vld [vmem:[%s11149_s15 + $0x368] sm:$0xff] }
 0x21f   : > { %v1636_v62 = vmul.f32 %v12538_v20, %v14708_v41  ;;  %v1392_v6 = vsub.f32 %v10451_v9, %v11820_v35  ;;  %v1402_v25 = vsub.f32 %v10452_v34, %v11888_v42  ;;  %v1391_v8 = vsub.f32 %v10453_v57, %v11820_v35  ;;  %v12589_v41 = vpop.eup %10321 }
 0x220   : > { %v1635_v3 = vmul.f32 %v12538_v20, %v14709_v27  ;;  %v12582_v63 = vpack.c.bf16 %v1574_v19, %v1564_v0  ;;  %v1563_v29 = vmul.f32 %v11956_v32, %v1371_v16  ;;  %v1401_v60 = vsub.f32 %v10454_v44, %v11888_v42 }
 0x221   : > { %v1573_v50 = vmul.f32 %v12005_v11, %v1381_v23  ;;  %v1584_v59 = vmul.f32 %v12121_v26, %v1392_v6  ;;  %v1594_v27 = vmul.f32 %v12163_v7, %v1402_v25  ;;  %v1412_v0 = vsub.f32 %v10455_v43, %v12007_v40 }
 0x222   : > { %v14710_v32 = vsub.f32 %v12441_v47, %v12374_v58  ;;  %v14711_v35 = vsub.f32 %v12446_v14, %v12374_v58  ;;  %v1648_v16 = vmul.f32 %v12589_v41, %v1456_v56  ;;  %v1647_v11 = vmul.f32 %v12589_v41, %v1455_v15 }
 0x223   : > { %v1650_v23 = vmul.f32 %v12589_v41, %v1458_v21  ;;  %v1649_v9 = vmul.f32 %v12589_v41, %v1457_v49  ;;  %v1652_v6 = vmul.f32 %v12589_v41, %v1460_v54  ;;  %v1651_v34 = vmul.f32 %v12589_v41, %v1459_v46 }
 0x224   : > { %v1646_v19 = vmul.f32 %v12589_v41, %v14710_v32  ;;  %v1645_v42 = vmul.f32 %v12589_v41, %v14711_v35  ;;  %v12610_v57 = vpack.c.bf16 %v1648_v16, %v1638_v1  ;;  %v12612_v14 = vpack.c.bf16 %v1647_v11, %v1637_v36  ;;  %v10456_v36 = vld [vmem:[%s11149_s15 + $0x3b8] sm:$0xff]  ;;  %v10462_v32 = vld [vmem:[%s11149_s15 + $0x450] sm:$0xff]  ;;  %v10463_v11 = vld [vmem:[%s11149_s15 + $0x4a8] sm:$0xff] }
 0x225   : > { %v12614_v44 = vpack.c.bf16 %v1650_v23, %v1640_v61  ;;  %v12616_v56 = vpack.c.bf16 %v1649_v9, %v1639_v55  ;;  %v12618_v15 = vpack.c.bf16 %v1652_v6, %v1642_v28  ;;  %v12620_v21 = vpack.c.bf16 %v1651_v34, %v1641_v51  ;;  %v14712_v28 = vld [vmem:[#allocation22_spill] sm:$0xff]  ;;  %v10457_v51 = vld [vmem:[%s11149_s15 + $0x360] sm:$0xff] }
 0x226   : > { %v1726_v47 = vpack.c.bf16 %v1646_v19, %v1636_v62  ;;  %v1725_v25 = vpack.c.bf16 %v1645_v42, %v1635_v3  ;;  %v12622_v49 = vpack.c.bf16 %v1573_v50, %v1563_v29  ;;  %v12624_v54 = vpack.c.bf16 %v1594_v27, %v1584_v59  ;;  %v10459_v29 = vld [vmem:[%s11149_s15 + $0x408] sm:$0xff]  ;;  %v10460_v50 = vld [vmem:[%s11149_s15 + $0x458] sm:$0xff]  ;;  %v10461_v27 = vld [vmem:[%s11149_s15 + $0x400] sm:$0xff] }
 0x227   : > { %v1583_v46 = vmul.f32 %v12121_v26, %v1391_v8  ;;  %v1593_v1 = vmul.f32 %v12163_v7, %v1401_v60  ;;  %v1422_v61 = vsub.f32 %v10456_v36, %v12059_v45  ;;  %v1604_v55 = vmul.f32 %v12256_v2, %v1412_v0  ;;  %v10458_v26 = vld [vmem:[%s11149_s15 + $0x3b0] sm:$0xff]  ;;  %v10465_v34 = vld [vmem:[%s11149_s15 + $0x4a0] sm:$0xff] }
 0x228   : > { %3779 = vmatprep.mubr.bf16.mxu0 %v1726_v47  ;;  %4344 = vmatprep.mubr.bf16.mxu1 %v1726_v47  ;;  %v1411_v62 = vsub.f32 %v10457_v51, %v12007_v40  ;;  %v1421_v3 = vsub.f32 %v10458_v26, %v12059_v45  ;;  %v1432_v7 = vsub.f32 %v10459_v29, %v12165_v18  ;;  %v9891_v23 = vld [vmem:[#allocation4 + $0x400] ss:$16 sps:$4 sm:$0xff]   ;;  %v9894_v47 = vld [vmem:[#allocation4 + $0x408] ss:$16 sps:$4 sm:$0xff]   ;;  %v9899_v36 = vld [vmem:[#allocation4 + $0x424] ss:$16 sps:$4 sm:$0xff]  }
 0x229   : > { %3780 = vmatmul.mubr.bf16.gmra.mrb[28].mxu0 %v1725_v25  ;;  %4345 = vmatmul.mubr.bf16.gmra.mrb[28].mxu1 %v1725_v25  ;;  %v12639_v8 = vpack.c.bf16 %v1593_v1, %v1583_v46  ;;  %v1614_v60 = vmul.f32 %v12333_v31, %v1422_v61  ;;  %v1442_v59 = vsub.f32 %v10460_v50, %v12228_v33  ;;  %v10466_v46 = vld [vmem:[%s11149_s15 + $0x4f0] sm:$0xff]  ;;  %v9902_v61 = vld [vmem:[#allocation4 + $0x42c] ss:$16 sps:$4 sm:$0xff]  }
 0x22a   : > { %3822 = vmatprep.mubr.bf16.mxu0 %v14712_v28  ;;  %4387 = vmatprep.mubr.bf16.mxu1 %v14712_v28  ;;  %v1431_v43 = vsub.f32 %v10461_v27, %v12165_v18  ;;  %v1603_v40 = vmul.f32 %v12256_v2, %v1411_v62  ;;  %v1613_v45 = vmul.f32 %v12333_v31, %v1421_v3  ;;  %v10464_v31 = vld [vmem:[%s11149_s15 + $0x4f8] sm:$0xff]  ;;  %v14714_v62 = vld [vmem:[#allocation29_spill] sm:$0xff] }
 0x22b   : > { %v1624_v0 = vmul.f32 %v12399_v53, %v1432_v7  ;;  %v1441_v19 = vsub.f32 %v10462_v32, %v12228_v33  ;;  %v12651_v35 = vpack.c.bf16 %v1614_v60, %v1604_v55  ;;  %v1634_v42 = vmul.f32 %v12470_v48, %v1442_v59  ;;  %v14713_v51 = vld [vmem:[#allocation23_spill] sm:$0xff]  ;;  %v14715_v3 = vld [vmem:[#allocation26_spill] sm:$0xff]  ;;  %v14716_v27 = vld [vmem:[#allocation21_spill] sm:$0xff] }
 0x22c   : > { %v1623_v16 = vmul.f32 %v12399_v53, %v1431_v43  ;;  %v1452_v18 = vsub.f32 %v10463_v11, %v12335_v52  ;;  %v12657_v9 = vpack.c.bf16 %v1613_v45, %v1603_v40  ;;  %v1462_v6 = vsub.f32 %v10464_v31, %v12374_v58  ;;  %v9897_v26 = vld [vmem:[#allocation4 + $0x420] ss:$16 sps:$4 sm:$0xff]   ;;  %v9905_v60 = vld [vmem:[#allocation4 + $0x444] ss:$16 sps:$4 sm:$0xff]   ;;  %v9908_v59 = vld [vmem:[#allocation4 + $0x44c] ss:$16 sps:$4 sm:$0xff]  }
 0x22d   : > { %v1633_v2 = vmul.f32 %v12470_v48, %v1441_v19  ;;  %v1451_v33 = vsub.f32 %v10465_v34, %v12335_v52  ;;  %v12664_v25 = vpack.c.bf16 %v1634_v42, %v1624_v0  ;;  %v1461_v1 = vsub.f32 %v10466_v46, %v12374_v58  ;;  %v10467_v58 = vld [vmem:[%s11149_s15 + $0x1a8] sm:$0xff]  ;;  %v9903_v0 = vld [vmem:[#allocation4 + $0x440] ss:$16 sps:$4 sm:$0xff]   ;;  %v9911_v11 = vld [vmem:[#allocation4 + $0x464] ss:$16 sps:$4 sm:$0xff]  }
 0x22e   : > { %v1644_v53 = vmul.f32 %v12538_v20, %v1452_v18  ;;  %v1654_v48 = vmul.f32 %v12589_v41, %v1462_v6  ;;  %v1356_v29 = vsub.f32 %v10467_v58, %v14715_v3  ;;  %v14717_v40 = vld [vmem:[#allocation36_spill] sm:$0xff]  ;;  %v14718_v32 = vld [vmem:[#allocation33_spill] sm:$0xff] }
 0x22f   : > { %v12669_v55 = vpack.c.bf16 %v1633_v2, %v1623_v16  ;;  %v1643_v28 = vmul.f32 %v12538_v20, %v1451_v33  ;;  %v1653_v52 = vmul.f32 %v12589_v41, %v1461_v1  ;;  %v9900_v20 = vld [vmem:[#allocation4 + $0x428] ss:$16 sps:$4 sm:$0xff]   ;;  %v9914_v18 = vld [vmem:[#allocation4 + $0x46c] ss:$16 sps:$4 sm:$0xff]   ;;  %v10469_v2 = vld [vmem:[%s11149_s15 + $0x1a0] sm:$0xff] }
 0x230   : > { %v12679_v7 = vpack.c.bf16 %v1654_v48, %v1644_v53  ;;  %v10468_v41 = vld [vmem:[%s11149_s15 + $0x158] sm:$0xff]  ;;  %v1548_v45 = vmul.f32 %v14717_v40, %v1356_v29  ;;  %v1355_v31 = vsub.f32 %v10469_v2, %v14715_v3  ;;  %v9909_v6 = vld [vmem:[#allocation4 + $0x460] ss:$16 sps:$4 sm:$0xff]   ;;  %v9917_v33 = vld [vmem:[#allocation4 + $0x484] ss:$16 sps:$4 sm:$0xff]  }
 0x231   : > { %3823 = vmatmul.mubr.bf16.vlgmr.msra.gmra.mrb[0].mxu0 %v14713_v51  ;;  %4388 = vmatmul.mubr.bf16.vlgmr.msra.gmra.mrb[0].mxu1 %v14713_v51  ;;  %v12682_v50 = vpack.c.bf16 %v1653_v52, %v1643_v28  ;;  %v1346_v43 = vsub.f32 %v10468_v41, %v14716_v27  ;;  %v9906_v42 = vld [vmem:[#allocation4 + $0x448] ss:$16 sps:$4 sm:$0xff]   ;;  %v9920_v1 = vld [vmem:[#allocation4 + $0x48c] ss:$16 sps:$4 sm:$0xff]   ;;  %v9923_v51 = vld [vmem:[#allocation4 + $0x4a4] ss:$16 sps:$4 sm:$0xff]  }
 0x232   : > { %3904 = vmatpush1.bf16.msra.mxu0 %v9891_v23  ;;  %3832 = vmatprep.mubr.bf16.mxu0 %v14714_v62  ;;  %v14719_v23 = vld [vmem:[#allocation30_spill] sm:$0xff]  ;;  %v1547_v46 = vmul.f32 %v14717_v40, %v1355_v31  ;;  %v9926_v52 = vld [vmem:[#allocation4 + $0x4ac] ss:$16 sps:$4 sm:$0xff]  }
 0x233   : > { %4397 = vmatprep.mubr.bf16.mxu1 %v14714_v62  ;;  %4469 = vmatpush1.bf16.msra.mxu1 %v9894_v47  ;;  %v1538_v19 = vmul.f32 %v14718_v32, %v1346_v43  ;;  %v9912_v34 = vld [vmem:[#allocation4 + $0x468] ss:$16 sps:$4 sm:$0xff]   ;;  %v10470_v47 = vld [vmem:[%s11149_s15 + $0x150] sm:$0xff]  ;;  %v14720_v62 = vld [vmem:[#allocation39_spill] sm:$0xff] }
 0x234   : > { %3905 = vmatprep.subr.bf16.mxu0 %v9899_v36  ;;  %4470 = vmatprep.subr.bf16.mxu1 %v9902_v61  ;;  %v1345_v53 = vsub.f32 %v10470_v47, %v14716_v27  ;;  %v9915_v61 = vld [vmem:[#allocation4 + $0x480] ss:$16 sps:$4 sm:$0xff]   ;;  %v9918_v28 = vld [vmem:[#allocation4 + $0x488] ss:$16 sps:$4 sm:$0xff]   ;;  %v9929_v29 = vld [vmem:[#allocation4 + $0x4c4] ss:$16 sps:$4 sm:$0xff]  }
 0x235   : > { %v1678_v16 = vpack.c.bf16 %v1548_v45, %v1538_v19  ;;  %v9924_v58 = vld [vmem:[#allocation4 + $0x4a8] ss:$16 sps:$4 sm:$0xff]   ;;  %v9935_v41 = vld [vmem:[#allocation4 + $0x4e4] ss:$16 sps:$4 sm:$0xff]   ;;  %v9938_v43 = vld [vmem:[#allocation4 + $0x4ec] ss:$16 sps:$4 sm:$0xff]  }
 0x236   : > { %3906 = vmatpush1.bf16.msra.mxu0 %v9897_v26  ;;  %v1537_v36 = vmul.f32 %v14718_v32, %v1345_v53  ;;  %v9921_v26 = vld [vmem:[#allocation4 + $0x4a0] ss:$16 sps:$4 sm:$0xff]   ;;  %v14721_v45 = vld [vmem:[#allocation40_spill] sm:$0xff]  ;;  %v9950_v2 = vld [vmem:[#allocation4 + $0x52c] ss:$16 sps:$4 sm:$0xff]  }
 0x237   : > { %4471 = vmatpush1.bf16.msra.mxu1 %v9900_v20  ;;  %3907 = vmatprep.subr.bf16.mxu0 %v9905_v60  ;;  %v9932_v20 = vld [vmem:[#allocation4 + $0x4cc] ss:$16 sps:$4 sm:$0xff]   ;;  %v9927_v60 = vld [vmem:[#allocation4 + $0x4c0] ss:$16 sps:$4 sm:$0xff]   ;;  %v9936_v19 = vld [vmem:[#allocation4 + $0x4e8] ss:$16 sps:$4 sm:$0xff]  }
 0x238   : > { %4472 = vmatprep.subr.bf16.mxu1 %v9908_v59  ;;  %v1677_v48 = vpack.c.bf16 %v1547_v46, %v1537_v36  ;;  %v9930_v59 = vld [vmem:[#allocation4 + $0x4c8] ss:$16 sps:$4 sm:$0xff]   ;;  %v9959_v53 = vld [vmem:[#allocation4 + $0x564] ss:$16 sps:$4 sm:$0xff]   ;;  %v14722_v46 = vld [vmem:[#allocation49_spill] sm:$0xff] }
 0x239   : > { %3833 = vmatmul.mubr.bf16.gmra.mrb[4].mxu0 %v14719_v23  ;;  %4398 = vmatmul.mubr.bf16.gmra.mrb[4].mxu1 %v14719_v23  ;;  %v9947_v23 = vld [vmem:[#allocation4 + $0x524] ss:$16 sps:$4 sm:$0xff]   ;;  %v9948_v31 = vld [vmem:[#allocation4 + $0x528] ss:$16 sps:$4 sm:$0xff]  }
 0x23a   : > { %3908 = vmatpush1.bf16.msra.mxu0 %v9903_v0  ;;  %3842 = vmatprep.mubr.bf16.mxu0 %v1678_v16  ;;  %v9933_v0 = vld [vmem:[#allocation4 + $0x4e0] ss:$16 sps:$4 sm:$0xff]   ;;  %v9954_v47 = vld [vmem:[#allocation4 + $0x548] ss:$16 sps:$4 sm:$0xff]   ;;  %v9965_v36 = vld [vmem:[#allocation4 + $0x584] ss:$16 sps:$4 sm:$0xff]  }
 0x23b   : > { %4407 = vmatprep.mubr.bf16.mxu1 %v1678_v16  ;;  %4473 = vmatpush1.bf16.msra.mxu1 %v9906_v42  ;;  %v9941_v42 = vld [vmem:[#allocation4 + $0x504] ss:$16 sps:$4 sm:$0xff]   ;;  %v9944_v16 = vld [vmem:[#allocation4 + $0x50c] ss:$16 sps:$4 sm:$0xff]  }
 0x23c   : > { %3909 = vmatprep.subr.bf16.mxu0 %v9911_v11  ;;  %4474 = vmatprep.subr.bf16.mxu1 %v9914_v18  ;;  %v9939_v11 = vld [vmem:[#allocation4 + $0x500] ss:$16 sps:$4 sm:$0xff]   ;;  %v9942_v18 = vld [vmem:[#allocation4 + $0x508] ss:$16 sps:$4 sm:$0xff]  }
 0x23e   : > { %3910 = vmatpush1.bf16.msra.mxu0 %v9909_v6  ;;  %v9953_v6 = vld [vmem:[#allocation4 + $0x544] ss:$16 sps:$4 sm:$0xff]  }
 0x23f   : > { %4475 = vmatpush1.bf16.msra.mxu1 %v9912_v34  ;;  %3911 = vmatprep.subr.bf16.mxu0 %v9917_v33  ;;  %v9956_v34 = vld [vmem:[#allocation4 + $0x54c] ss:$16 sps:$4 sm:$0xff]   ;;  %v9951_v33 = vld [vmem:[#allocation4 + $0x540] ss:$16 sps:$4 sm:$0xff]  }
 0x240   : > { %4476 = vmatprep.subr.bf16.mxu1 %v9920_v1  ;;  %v9960_v1 = vld [vmem:[#allocation4 + $0x568] ss:$16 sps:$4 sm:$0xff]  }
 0x241   : > { %3843 = vmatmul.mubr.bf16.gmra.mrb[8].mxu0 %v1677_v48  ;;  %4408 = vmatmul.mubr.bf16.gmra.mrb[8].mxu1 %v1677_v48  ;;  %v9963_v48 = vld [vmem:[#allocation4 + $0x580] ss:$16 sps:$4 sm:$0xff]  }
 0x242   : > { %3912 = vmatpush1.bf16.msra.mxu0 %v9915_v61  ;;  %3852 = vmatprep.mubr.bf16.mxu0 %v14720_v62  ;;  %v9968_v61 = vld [vmem:[#allocation4 + $0x58c] ss:$16 sps:$4 sm:$0xff]  }
 0x243   : > { %4417 = vmatprep.mubr.bf16.mxu1 %v14720_v62  ;;  %4477 = vmatpush1.bf16.msra.mxu1 %v9918_v28  ;;  %v9966_v28 = vld [vmem:[#allocation4 + $0x588] ss:$16 sps:$4 sm:$0xff]  }
 0x244   : > { %3913 = vmatprep.subr.bf16.mxu0 %v9923_v51  ;;  %4478 = vmatprep.subr.bf16.mxu1 %v9926_v52  ;;  %v9971_v51 = vld [vmem:[#allocation4 + $0x5a4] ss:$16 sps:$4 sm:$0xff]   ;;  %v9974_v52 = vld [vmem:[#allocation4 + $0x5ac] ss:$16 sps:$4 sm:$0xff]   ;;  %v9972_v62 = vld [vmem:[#allocation4 + $0x5a8] ss:$16 sps:$4 sm:$0xff]  }
 0x246   : > { %3914 = vmatpush1.bf16.msra.mxu0 %v9921_v26  ;;  %v9977_v26 = vld [vmem:[#allocation4 + $0x5c4] ss:$16 sps:$4 sm:$0xff]  }
 0x247   : > { %4479 = vmatpush1.bf16.msra.mxu1 %v9924_v58  ;;  %3915 = vmatprep.subr.bf16.mxu0 %v9929_v29  ;;  %v9980_v58 = vld [vmem:[#allocation4 + $0x5cc] ss:$16 sps:$4 sm:$0xff]   ;;  %v9975_v29 = vld [vmem:[#allocation4 + $0x5c0] ss:$16 sps:$4 sm:$0xff]  }
 0x248   : > { %4480 = vmatprep.subr.bf16.mxu1 %v9932_v20  ;;  %v9978_v20 = vld [vmem:[#allocation4 + $0x5c8] ss:$16 sps:$4 sm:$0xff]  }
 0x249   : > { %3853 = vmatmul.mubr.bf16.gmra.mrb[12].mxu0 %v14721_v45  ;;  %4418 = vmatmul.mubr.bf16.gmra.mrb[12].mxu1 %v14721_v45  ;;  %v9992_v45 = vld [vmem:[#allocation4 + $0x60c] ss:$16 sps:$4 sm:$0xff]  }
 0x24a   : > { %3916 = vmatpush1.bf16.msra.mxu0 %v9927_v60  ;;  %3862 = vmatprep.mubr.bf16.mxu0 %v12212_v39  ;;  %v9983_v60 = vld [vmem:[#allocation4 + $0x5e4] ss:$16 sps:$4 sm:$0xff]  }
 0x24b   : > { %4427 = vmatprep.mubr.bf16.mxu1 %v12212_v39  ;;  %4481 = vmatpush1.bf16.msra.mxu1 %v9930_v59  ;;  %v9945_v39 = vld [vmem:[#allocation4 + $0x520] ss:$16 sps:$4 sm:$0xff]  }
 0x24c   : > { %3917 = vmatprep.subr.bf16.mxu0 %v9935_v41  ;;  %4482 = vmatprep.subr.bf16.mxu1 %v9938_v43  ;;  %v9981_v59 = vld [vmem:[#allocation4 + $0x5e0] ss:$16 sps:$4 sm:$0xff]   ;;  %v9984_v41 = vld [vmem:[#allocation4 + $0x5e8] ss:$16 sps:$4 sm:$0xff]   ;;  %v9989_v43 = vld [vmem:[#allocation4 + $0x604] ss:$16 sps:$4 sm:$0xff]  }
 0x24e   : > { %3918 = vmatpush1.bf16.msra.mxu0 %v9933_v0  ;;  %v9987_v0 = vld [vmem:[#allocation4 + $0x600] ss:$16 sps:$4 sm:$0xff]  }
 0x24f   : > { %4483 = vmatpush1.bf16.msra.mxu1 %v9936_v19  ;;  %3919 = vmatprep.subr.bf16.mxu0 %v9941_v42  ;;  %v9990_v19 = vld [vmem:[#allocation4 + $0x608] ss:$16 sps:$4 sm:$0xff]   ;;  %v14724_v42 = vld [vmem:[#allocation25_spill] sm:$0xff] }
 0x250   : > { %4484 = vmatprep.subr.bf16.mxu1 %v9944_v16  ;;  %v9998_v16 = vld [vmem:[#allocation4 + $0x62c] ss:$16 sps:$4 sm:$0xff]  }
 0x251   : > { %3863 = vmatmul.mubr.bf16.gmra.mrb[16].mxu0 %v12214_v4  ;;  %4428 = vmatmul.mubr.bf16.gmra.mrb[16].mxu1 %v12214_v4  ;;  %v9962_v4 = vld [vmem:[#allocation4 + $0x56c] ss:$16 sps:$4 sm:$0xff]  }
 0x252   : > { %3920 = vmatpush1.bf16.msra.mxu0 %v9939_v11  ;;  %3872 = vmatprep.mubr.bf16.mxu0 %v12370_v30  ;;  %v9993_v11 = vld [vmem:[#allocation4 + $0x620] ss:$16 sps:$4 sm:$0xff]  }
 0x253   : > { %4437 = vmatprep.mubr.bf16.mxu1 %v12370_v30  ;;  %4485 = vmatpush1.bf16.msra.mxu1 %v9942_v18  ;;  %v9957_v30 = vld [vmem:[#allocation4 + $0x560] ss:$16 sps:$4 sm:$0xff]  }
 0x254   : > { %3921 = vmatprep.subr.bf16.mxu0 %v9947_v23  ;;  %4486 = vmatprep.subr.bf16.mxu1 %v9950_v2  ;;  %v14725_v18 = vld [vmem:[#allocation31_spill] sm:$0xff]  ;;  %v10001_v23 = vld [vmem:[#allocation4 + $0x644] ss:$16 sps:$4 sm:$0xff]  }
 0x255   : > { %v10471_v2 = vld [vmem:[%s11149_s15 + $0x1b8] sm:$0xff] }
 0x256   : > { %3922 = vmatpush1.bf16.msra.mxu0 %v9945_v39  ;;  %v1358_v39 = vsub.f32 %v10471_v2, %v14715_v3  ;;  %v10029_v2 = vld [vmem:[#allocation4 + $0x6e0] ss:$16 sps:$4 sm:$0xff]  }
 0x257   : > { %4487 = vmatpush1.bf16.msra.mxu1 %v9948_v31  ;;  %3923 = vmatprep.subr.bf16.mxu0 %v9953_v6  ;;  %v9996_v31 = vld [vmem:[#allocation4 + $0x628] ss:$16 sps:$4 sm:$0xff]   ;;  %v10004_v6 = vld [vmem:[#allocation4 + $0x64c] ss:$16 sps:$4 sm:$0xff]  }
 0x258   : > { %4488 = vmatprep.subr.bf16.mxu1 %v9956_v34  ;;  %v10472_v34 = vld [vmem:[%s11149_s15 + $0x168] sm:$0xff] }
 0x259   : > { %3873 = vmatmul.mubr.bf16.gmra.mrb[20].mxu0 %v14722_v46  ;;  %4438 = vmatmul.mubr.bf16.gmra.mrb[20].mxu1 %v14722_v46  ;;  %v10002_v46 = vld [vmem:[#allocation4 + $0x648] ss:$16 sps:$4 sm:$0xff]  }
 0x25a   : > { %3924 = vmatpush1.bf16.msra.mxu0 %v9951_v33  ;;  %3882 = vmatprep.mubr.bf16.mxu0 %v12509_v22  ;;  %v1348_v33 = vsub.f32 %v10472_v34, %v14716_v27  ;;  %v10040_v34 = vld [vmem:[#allocation4 + $0x70c] ss:$16 sps:$4 sm:$0xff]  }
 0x25b   : > { %4447 = vmatprep.mubr.bf16.mxu1 %v12509_v22  ;;  %4489 = vmatpush1.bf16.msra.mxu1 %v9954_v47  ;;  %v9969_v22 = vld [vmem:[#allocation4 + $0x5a0] ss:$16 sps:$4 sm:$0xff]   ;;  %v1550_v47 = vmul.f32 %v14717_v40, %v1358_v39 }
 0x25c   : > { %3925 = vmatprep.subr.bf16.mxu0 %v9959_v53  ;;  %4490 = vmatprep.subr.bf16.mxu1 %v9962_v4  ;;  %v9999_v53 = vld [vmem:[#allocation4 + $0x640] ss:$16 sps:$4 sm:$0xff]   ;;  %v1540_v4 = vmul.f32 %v14718_v32, %v1348_v33 }
 0x25d   : > { %v14729_v39 = vld [vmem:[#allocation45_spill] sm:$0xff] }
 0x25e   : > { %3926 = vmatpush1.bf16.msra.mxu0 %v9957_v30  ;;  %v10007_v30 = vld [vmem:[#allocation4 + $0x664] ss:$16 sps:$4 sm:$0xff]   ;;  %v10035_v33 = vld [vmem:[#allocation4 + $0x700] ss:$16 sps:$4 sm:$0xff]  }
 0x25f   : > { %4491 = vmatpush1.bf16.msra.mxu1 %v9960_v1  ;;  %3927 = vmatprep.subr.bf16.mxu0 %v9965_v36  ;;  %v14726_v1 = vld [vmem:[#allocation32_spill] sm:$0xff]  ;;  %v1680_v36 = vpack.c.bf16 %v1550_v47, %v1540_v4  ;;  %v14730_v4 = vld [vmem:[#allocation46_spill] sm:$0xff] }
 0x260   : > { %4492 = vmatprep.subr.bf16.mxu1 %v9968_v61  ;;  %v10010_v61 = vld [vmem:[#allocation4 + $0x66c] ss:$16 sps:$4 sm:$0xff]   ;;  %v10038_v47 = vld [vmem:[#allocation4 + $0x708] ss:$16 sps:$4 sm:$0xff]  }
 0x261   : > { %3883 = vmatmul.mubr.bf16.gmra.mrb[24].mxu0 %v12511_v38  ;;  %4448 = vmatmul.mubr.bf16.gmra.mrb[24].mxu1 %v12511_v38  ;;  %v9986_v38 = vld [vmem:[#allocation4 + $0x5ec] ss:$16 sps:$4 sm:$0xff]  }
 0x262   : > { %3928 = vmatpush1.bf16.msra.mxu0 %v9963_v48  ;;  %3892 = vmatprep.mubr.bf16.mxu0 %v12610_v57  ;;  %v10473_v48 = vld [vmem:[%s11149_s15 + $0x1b0] sm:$0xff] }
 0x263   : > { %4457 = vmatprep.mubr.bf16.mxu1 %v12610_v57  ;;  %4493 = vmatpush1.bf16.msra.mxu1 %v9966_v28  ;;  %v14723_v57 = vld [vmem:[#allocation24_spill] sm:$0xff]  ;;  %v1357_v28 = vsub.f32 %v10473_v48, %v14715_v3  ;;  %v10052_v48 = vld [vmem:[#allocation4 + $0x74c] ss:$16 sps:$4 sm:$0xff]  }
 0x264   : > { %3929 = vmatprep.subr.bf16.mxu0 %v9971_v51  ;;  %4494 = vmatprep.subr.bf16.mxu1 %v9974_v52  ;;  %v10005_v51 = vld [vmem:[#allocation4 + $0x660] ss:$16 sps:$4 sm:$0xff]   ;;  %v10013_v52 = vld [vmem:[#allocation4 + $0x684] ss:$16 sps:$4 sm:$0xff]  }
 0x266   : > { %3930 = vmatpush1.bf16.msra.mxu0 %v9969_v22  ;;  %v10474_v22 = vld [vmem:[%s11149_s15 + $0x160] sm:$0xff] }
 0x267   : > { %4495 = vmatpush1.bf16.msra.mxu1 %v9972_v62  ;;  %3931 = vmatprep.subr.bf16.mxu0 %v9977_v26  ;;  %v1347_v62 = vsub.f32 %v10474_v22, %v14716_v27  ;;  %v1549_v26 = vmul.f32 %v14717_v40, %v1357_v28  ;;  %v10047_v28 = vld [vmem:[#allocation4 + $0x740] ss:$16 sps:$4 sm:$0xff]  }
 0x268   : > { %4496 = vmatprep.subr.bf16.mxu1 %v9980_v58  ;;  %v10008_v58 = vld [vmem:[#allocation4 + $0x668] ss:$16 sps:$4 sm:$0xff]   ;;  %v14732_v22 = vld [vmem:[#allocation51_spill] sm:$0xff] }
 0x269   : > { %3893 = vmatmul.mubr.bf16.gmra.mrb[28].mxu0 %v12612_v14  ;;  %4458 = vmatmul.mubr.bf16.gmra.mrb[28].mxu1 %v12612_v14  ;;  %v9995_v14 = vld [vmem:[#allocation4 + $0x624] ss:$16 sps:$4 sm:$0xff]  }
 0x26a   : > { %3932 = vmatpush1.bf16.msra.mxu0 %v9975_v29  ;;  %3935 = vmatprep.mubr.bf16.mxu0 %v14723_v57  ;;  %v1539_v29 = vmul.f32 %v14718_v32, %v1347_v62  ;;  %v10058_v62 = vld [vmem:[#allocation4 + $0x76c] ss:$16 sps:$4 sm:$0xff]  }
 0x26b   : > { %4497 = vmatpush1.bf16.msra.mxu1 %v9978_v20  ;;  %4500 = vmatprep.mubr.bf16.mxu1 %v14723_v57  ;;  %v10016_v20 = vld [vmem:[#allocation4 + $0x68c] ss:$16 sps:$4 sm:$0xff]   ;;  %v10014_v57 = vld [vmem:[#allocation4 + $0x688] ss:$16 sps:$4 sm:$0xff]  }
 0x26c   : > { %3933 = vmatprep.subr.bf16.mxu0 %v9983_v60  ;;  %4498 = vmatprep.subr.bf16.mxu1 %v9986_v38  ;;  %v10011_v60 = vld [vmem:[#allocation4 + $0x680] ss:$16 sps:$4 sm:$0xff]   ;;  %v1679_v38 = vpack.c.bf16 %v1549_v26, %v1539_v29  ;;  %v10056_v29 = vld [vmem:[#allocation4 + $0x768] ss:$16 sps:$4 sm:$0xff]  }
 0x26d   : > { %v10053_v26 = vld [vmem:[#allocation4 + $0x760] ss:$16 sps:$4 sm:$0xff]  }
 0x26e   : > { %3934 = vmatpush1.bf16.msra.mxu0 %v9981_v59  ;;  %v10019_v59 = vld [vmem:[#allocation4 + $0x6a4] ss:$16 sps:$4 sm:$0xff]  }
 0x26f   : > { %4499 = vmatpush1.bf16.msra.mxu1 %v9984_v41  ;;  %4016 = vmatprep.subr.bf16.mxu0 %v9989_v43  ;;  %v10022_v41 = vld [vmem:[#allocation4 + $0x6ac] ss:$16 sps:$4 sm:$0xff]   ;;  %v10017_v43 = vld [vmem:[#allocation4 + $0x6a0] ss:$16 sps:$4 sm:$0xff]  }
 0x270   : > { %4581 = vmatprep.subr.bf16.mxu1 %v9992_v45  ;;  %v14727_v45 = vld [vmem:[#allocation41_spill] sm:$0xff] }
 0x271   : > { %3936 = vmatmul.mubr.bf16.vlgmr.msra.gmra.mrb[0].mxu0 %v14724_v42 }
 0x272   : > { %4017 = vmatpush1.bf16.msra.mxu0 %v9987_v0  ;;  %4501 = vmatmul.mubr.bf16.vlgmr.msra.gmra.mrb[0].mxu1 %v14724_v42  ;;  %v10025_v0 = vld [vmem:[#allocation4 + $0x6c4] ss:$16 sps:$4 sm:$0xff]   ;;  %v10023_v42 = vld [vmem:[#allocation4 + $0x6c0] ss:$16 sps:$4 sm:$0xff]  }
 0x273   : > { %3945 = vmatprep.mubr.bf16.mxu0 %v14725_v18  ;;  %4510 = vmatprep.mubr.bf16.mxu1 %v14725_v18  ;;  %v14728_v18 = vld [vmem:[#allocation42_spill] sm:$0xff] }
 0x274   : > { %4582 = vmatpush1.bf16.msra.mxu1 %v9990_v19  ;;  %4018 = vmatprep.subr.bf16.mxu0 %v9995_v14  ;;  %v10020_v19 = vld [vmem:[#allocation4 + $0x6a8] ss:$16 sps:$4 sm:$0xff]   ;;  %v10028_v14 = vld [vmem:[#allocation4 + $0x6cc] ss:$16 sps:$4 sm:$0xff]  }
 0x275   : > { %4583 = vmatprep.subr.bf16.mxu1 %v9998_v16  ;;  %v10026_v16 = vld [vmem:[#allocation4 + $0x6c8] ss:$16 sps:$4 sm:$0xff]  }
 0x276   : > { %4019 = vmatpush1.bf16.msra.mxu0 %v9993_v11  ;;  %v10031_v11 = vld [vmem:[#allocation4 + $0x6e4] ss:$16 sps:$4 sm:$0xff]  }
 0x277   : > { %4020 = vmatprep.subr.bf16.mxu0 %v10001_v23  ;;  %v10034_v23 = vld [vmem:[#allocation4 + $0x6ec] ss:$16 sps:$4 sm:$0xff]  }
 0x278   : > { %4584 = vmatpush1.bf16.msra.mxu1 %v9996_v31  ;;  %v10037_v31 = vld [vmem:[#allocation4 + $0x704] ss:$16 sps:$4 sm:$0xff]  }
 0x279   : > { %3946 = vmatmul.mubr.bf16.gmra.mrb[4].mxu0 %v14726_v1  ;;  %4585 = vmatprep.subr.bf16.mxu1 %v10004_v6  ;;  %v10032_v6 = vld [vmem:[#allocation4 + $0x6e8] ss:$16 sps:$4 sm:$0xff]  }
 0x27a   : > { %4021 = vmatpush1.bf16.msra.mxu0 %v9999_v53  ;;  %4511 = vmatmul.mubr.bf16.gmra.mrb[4].mxu1 %v14726_v1  ;;  %v10043_v53 = vld [vmem:[#allocation4 + $0x724] ss:$16 sps:$4 sm:$0xff]  }
 0x27b   : > { %3955 = vmatprep.mubr.bf16.mxu0 %v1680_v36  ;;  %4520 = vmatprep.mubr.bf16.mxu1 %v1680_v36  ;;  %v14731_v1 = vld [vmem:[#allocation50_spill] sm:$0xff] }
 0x27c   : > { %4586 = vmatpush1.bf16.msra.mxu1 %v10002_v46  ;;  %4022 = vmatprep.subr.bf16.mxu0 %v10007_v30  ;;  %v10046_v46 = vld [vmem:[#allocation4 + $0x72c] ss:$16 sps:$4 sm:$0xff]   ;;  %v10041_v30 = vld [vmem:[#allocation4 + $0x720] ss:$16 sps:$4 sm:$0xff]   ;;  %v10049_v36 = vld [vmem:[#allocation4 + $0x744] ss:$16 sps:$4 sm:$0xff]  }
 0x27d   : > { %4587 = vmatprep.subr.bf16.mxu1 %v10010_v61  ;;  %v10044_v61 = vld [vmem:[#allocation4 + $0x728] ss:$16 sps:$4 sm:$0xff]  }
 0x27e   : > { %4023 = vmatpush1.bf16.msra.mxu0 %v10005_v51  ;;  %v10050_v51 = vld [vmem:[#allocation4 + $0x748] ss:$16 sps:$4 sm:$0xff]  }
 0x27f   : > { %4024 = vmatprep.subr.bf16.mxu0 %v10013_v52  ;;  %v10055_v52 = vld [vmem:[#allocation4 + $0x764] ss:$16 sps:$4 sm:$0xff]  }
 0x280   : > { %4588 = vmatpush1.bf16.msra.mxu1 %v10008_v58  ;;  %v10061_v58 = vld [vmem:[#allocation4 + $0x784] ss:$16 sps:$4 sm:$0xff]  }
 0x281   : > { %3956 = vmatmul.mubr.bf16.gmra.mrb[8].mxu0 %v1679_v38  ;;  %4589 = vmatprep.subr.bf16.mxu1 %v10016_v20  ;;  %v10064_v20 = vld [vmem:[#allocation4 + $0x78c] ss:$16 sps:$4 sm:$0xff]  }
 0x282   : > { %4025 = vmatpush1.bf16.msra.mxu0 %v10011_v60  ;;  %4521 = vmatmul.mubr.bf16.gmra.mrb[8].mxu1 %v1679_v38  ;;  %v10059_v60 = vld [vmem:[#allocation4 + $0x780] ss:$16 sps:$4 sm:$0xff]   ;;  %v10062_v38 = vld [vmem:[#allocation4 + $0x788] ss:$16 sps:$4 sm:$0xff]  }
 0x283   : > { %3965 = vmatprep.mubr.bf16.mxu0 %v14727_v45  ;;  %4530 = vmatprep.mubr.bf16.mxu1 %v14727_v45  ;;  %v10076_v45 = vld [vmem:[#allocation4 + $0x7cc] ss:$16 sps:$4 sm:$0xff]  }
 0x284   : > { %4590 = vmatpush1.bf16.msra.mxu1 %v10014_v57  ;;  %4026 = vmatprep.subr.bf16.mxu0 %v10019_v59  ;;  %v10067_v57 = vld [vmem:[#allocation4 + $0x7a4] ss:$16 sps:$4 sm:$0xff]   ;;  %v10070_v59 = vld [vmem:[#allocation4 + $0x7ac] ss:$16 sps:$4 sm:$0xff]  }
 0x285   : > { %4591 = vmatprep.subr.bf16.mxu1 %v10022_v41  ;;  %v10073_v41 = vld [vmem:[#allocation4 + $0x7c4] ss:$16 sps:$4 sm:$0xff]  }
 0x286   : > { %4027 = vmatpush1.bf16.msra.mxu0 %v10017_v43  ;;  %v10068_v43 = vld [vmem:[#allocation4 + $0x7a8] ss:$16 sps:$4 sm:$0xff]  }
 0x287   : > { %4028 = vmatprep.subr.bf16.mxu0 %v10025_v0  ;;  %v10071_v0 = vld [vmem:[#allocation4 + $0x7c0] ss:$16 sps:$4 sm:$0xff]  }
 0x288   : > { %4592 = vmatpush1.bf16.msra.mxu1 %v10020_v19  ;;  %v10074_v19 = vld [vmem:[#allocation4 + $0x7c8] ss:$16 sps:$4 sm:$0xff]  }
 0x289   : > { %3966 = vmatmul.mubr.bf16.gmra.mrb[12].mxu0 %v14728_v18  ;;  %4593 = vmatprep.subr.bf16.mxu1 %v10028_v14  ;;  %v10079_v14 = vld [vmem:[#allocation4 + $0x7e4] ss:$16 sps:$4 sm:$0xff]  }
 0x28a   : > { %4029 = vmatpush1.bf16.msra.mxu0 %v10023_v42  ;;  %4531 = vmatmul.mubr.bf16.gmra.mrb[12].mxu1 %v14728_v18  ;;  %v14733_v42 = vld [vmem:[#allocation27_spill] sm:$0xff] }
 0x28b   : > { %3975 = vmatprep.mubr.bf16.mxu0 %v14729_v39  ;;  %4540 = vmatprep.mubr.bf16.mxu1 %v14729_v39  ;;  %v10088_v18 = vld [vmem:[#allocation4 + $0x80c] ss:$16 sps:$4 sm:$0xff]   ;;  %v10086_v39 = vld [vmem:[#allocation4 + $0x808] ss:$16 sps:$4 sm:$0xff]  }
 0x28c   : > { %4594 = vmatpush1.bf16.msra.mxu1 %v10026_v16  ;;  %4030 = vmatprep.subr.bf16.mxu0 %v10031_v11  ;;  %v10085_v16 = vld [vmem:[#allocation4 + $0x804] ss:$16 sps:$4 sm:$0xff]   ;;  %v10080_v11 = vld [vmem:[#allocation4 + $0x7e8] ss:$16 sps:$4 sm:$0xff]  }
 0x28d   : > { %4595 = vmatprep.subr.bf16.mxu1 %v10034_v23  ;;  %v10083_v23 = vld [vmem:[#allocation4 + $0x800] ss:$16 sps:$4 sm:$0xff]  }
 0x28e   : > { %4031 = vmatpush1.bf16.msra.mxu0 %v10029_v2  ;;  %v10091_v2 = vld [vmem:[#allocation4 + $0x824] ss:$16 sps:$4 sm:$0xff]  }
 0x28f   : > { %4032 = vmatprep.subr.bf16.mxu0 %v10037_v31  ;;  %v10094_v31 = vld [vmem:[#allocation4 + $0x82c] ss:$16 sps:$4 sm:$0xff]  }
 0x290   : > { %4596 = vmatpush1.bf16.msra.mxu1 %v10032_v6  ;;  %v14735_v6 = vld [vmem:[#allocation34_spill] sm:$0xff] }
 0x291   : > { %3976 = vmatmul.mubr.bf16.gmra.mrb[16].mxu0 %v14730_v4  ;;  %4597 = vmatprep.subr.bf16.mxu1 %v10040_v34  ;;  %v10089_v34 = vld [vmem:[#allocation4 + $0x820] ss:$16 sps:$4 sm:$0xff]  }
 0x292   : > { %4033 = vmatpush1.bf16.msra.mxu0 %v10035_v33  ;;  %4541 = vmatmul.mubr.bf16.gmra.mrb[16].mxu1 %v14730_v4  ;;  %v10475_v33 = vld [vmem:[%s11149_s15 + $0x1c8] sm:$0xff] }
 0x293   : > { %3985 = vmatprep.mubr.bf16.mxu0 %v14731_v1  ;;  %4550 = vmatprep.mubr.bf16.mxu1 %v14731_v1  ;;  %v10092_v4 = vld [vmem:[#allocation4 + $0x828] ss:$16 sps:$4 sm:$0xff]  }
 0x294   : > { %4598 = vmatpush1.bf16.msra.mxu1 %v10038_v47  ;;  %4034 = vmatprep.subr.bf16.mxu0 %v10043_v53  ;;  %v1360_v47 = vsub.f32 %v10475_v33, %v14715_v3  ;;  %v10097_v53 = vld [vmem:[#allocation4 + $0x844] ss:$16 sps:$4 sm:$0xff]   ;;  %v10128_v33 = vld [vmem:[#allocation4 + $0x8e8] ss:$16 sps:$4 sm:$0xff]  }
 0x295   : > { %4599 = vmatprep.subr.bf16.mxu1 %v10046_v46  ;;  %v10476_v46 = vld [vmem:[%s11149_s15 + $0x178] sm:$0xff] }
 0x296   : > { %4035 = vmatpush1.bf16.msra.mxu0 %v10041_v30  ;;  %v1350_v30 = vsub.f32 %v10476_v46, %v14716_v27  ;;  %v1552_v1 = vmul.f32 %v14717_v40, %v1360_v47  ;;  %v10136_v47 = vld [vmem:[#allocation4 + $0x90c] ss:$16 sps:$4 sm:$0xff]   ;;  %v10134_v46 = vld [vmem:[#allocation4 + $0x908] ss:$16 sps:$4 sm:$0xff]  }
 0x297   : > { %4036 = vmatprep.subr.bf16.mxu0 %v10049_v36  ;;  %v10100_v36 = vld [vmem:[#allocation4 + $0x84c] ss:$16 sps:$4 sm:$0xff]  }
 0x298   : > { %4600 = vmatpush1.bf16.msra.mxu1 %v10044_v61  ;;  %v10095_v61 = vld [vmem:[#allocation4 + $0x840] ss:$16 sps:$4 sm:$0xff]  }
 0x299   : > { %3986 = vmatmul.mubr.bf16.gmra.mrb[20].mxu0 %v14732_v22  ;;  %4601 = vmatprep.subr.bf16.mxu1 %v10052_v48  ;;  %v1542_v48 = vmul.f32 %v14718_v32, %v1350_v30  ;;  %v14740_v30 = vld [vmem:[#allocation48_spill] sm:$0xff] }
 0x29a   : > { %4037 = vmatpush1.bf16.msra.mxu0 %v10047_v28  ;;  %4551 = vmatmul.mubr.bf16.gmra.mrb[20].mxu1 %v14732_v22  ;;  %v10103_v28 = vld [vmem:[#allocation4 + $0x864] ss:$16 sps:$4 sm:$0xff]   ;;  %v14736_v22 = vld [vmem:[#allocation35_spill] sm:$0xff] }
 0x29b   : > { %3995 = vmatprep.mubr.bf16.mxu0 %v12513_v5  ;;  %4560 = vmatprep.mubr.bf16.mxu1 %v12513_v5  ;;  %v10065_v5 = vld [vmem:[#allocation4 + $0x7a0] ss:$16 sps:$4 sm:$0xff]  }
 0x29c   : > { %4602 = vmatpush1.bf16.msra.mxu1 %v10050_v51  ;;  %4038 = vmatprep.subr.bf16.mxu0 %v10055_v52  ;;  %v10098_v51 = vld [vmem:[#allocation4 + $0x848] ss:$16 sps:$4 sm:$0xff]   ;;  %v1682_v52 = vpack.c.bf16 %v1552_v1, %v1542_v48  ;;  %v10142_v1 = vld [vmem:[#allocation4 + $0x92c] ss:$16 sps:$4 sm:$0xff]   ;;  %v10145_v48 = vld [vmem:[#allocation4 + $0x944] ss:$16 sps:$4 sm:$0xff]  }
 0x29d   : > { %4603 = vmatprep.subr.bf16.mxu1 %v10058_v62  ;;  %v10106_v62 = vld [vmem:[#allocation4 + $0x86c] ss:$16 sps:$4 sm:$0xff]  }
 0x29e   : > { %4039 = vmatpush1.bf16.msra.mxu0 %v10053_v26  ;;  %v10477_v26 = vld [vmem:[%s11149_s15 + $0x1c0] sm:$0xff] }
 0x29f   : > { %4040 = vmatprep.subr.bf16.mxu0 %v10061_v58  ;;  %v1359_v58 = vsub.f32 %v10477_v26, %v14715_v3  ;;  %v10154_v26 = vld [vmem:[#allocation4 + $0x96c] ss:$16 sps:$4 sm:$0xff]  }
 0x2a0   : > { %4604 = vmatpush1.bf16.msra.mxu1 %v10056_v29  ;;  %v10101_v29 = vld [vmem:[#allocation4 + $0x860] ss:$16 sps:$4 sm:$0xff]  }
 0x2a1   : > { %3996 = vmatmul.mubr.bf16.gmra.mrb[24].mxu0 %v12515_v10  ;;  %4605 = vmatprep.subr.bf16.mxu1 %v10064_v20  ;;  %v10109_v20 = vld [vmem:[#allocation4 + $0x884] ss:$16 sps:$4 sm:$0xff]  }
 0x2a2   : > { %4041 = vmatpush1.bf16.msra.mxu0 %v10059_v60  ;;  %4561 = vmatmul.mubr.bf16.gmra.mrb[24].mxu1 %v12515_v10  ;;  %v10082_v10 = vld [vmem:[#allocation4 + $0x7ec] ss:$16 sps:$4 sm:$0xff]   ;;  %v10478_v60 = vld [vmem:[%s11149_s15 + $0x170] sm:$0xff] }
 0x2a3   : > { %4005 = vmatprep.mubr.bf16.mxu0 %v12614_v44  ;;  %4570 = vmatprep.mubr.bf16.mxu1 %v12614_v44  ;;  %v10077_v44 = vld [vmem:[#allocation4 + $0x7e0] ss:$16 sps:$4 sm:$0xff]  }
 0x2a4   : > { %4606 = vmatpush1.bf16.msra.mxu1 %v10062_v38  ;;  %4042 = vmatprep.subr.bf16.mxu0 %v10067_v57  ;;  %v1349_v38 = vsub.f32 %v10478_v60, %v14716_v27  ;;  %v1551_v57 = vmul.f32 %v14717_v40, %v1359_v58  ;;  %v10149_v58 = vld [vmem:[#allocation4 + $0x960] ss:$16 sps:$4 sm:$0xff]   ;;  %v10160_v60 = vld [vmem:[#allocation4 + $0x98c] ss:$16 sps:$4 sm:$0xff]  }
 0x2a5   : > { %4607 = vmatprep.subr.bf16.mxu1 %v10070_v59  ;;  %v10104_v59 = vld [vmem:[#allocation4 + $0x868] ss:$16 sps:$4 sm:$0xff]  }
 0x2a6   : > { %4043 = vmatpush1.bf16.msra.mxu0 %v10065_v5  ;;  %v1541_v5 = vmul.f32 %v14718_v32, %v1349_v38  ;;  %v10155_v38 = vld [vmem:[#allocation4 + $0x980] ss:$16 sps:$4 sm:$0xff]  }
 0x2a7   : > { %4044 = vmatprep.subr.bf16.mxu0 %v10073_v41  ;;  %v10112_v41 = vld [vmem:[#allocation4 + $0x88c] ss:$16 sps:$4 sm:$0xff]  }
 0x2a8   : > { %4608 = vmatpush1.bf16.msra.mxu1 %v10068_v43  ;;  %v10107_v43 = vld [vmem:[#allocation4 + $0x880] ss:$16 sps:$4 sm:$0xff]  }
 0x2a9   : > { %4006 = vmatmul.mubr.bf16.gmra.mrb[28].mxu0 %v12616_v56  ;;  %4609 = vmatprep.subr.bf16.mxu1 %v10076_v45  ;;  %v1681_v45 = vpack.c.bf16 %v1551_v57, %v1541_v5  ;;  %v10163_v57 = vld [vmem:[#allocation4 + $0x9a4] ss:$16 sps:$4 sm:$0xff]   ;;  %v10166_v5 = vld [vmem:[#allocation4 + $0x9ac] ss:$16 sps:$4 sm:$0xff]  }
 0x2aa   : > { %4045 = vmatpush1.bf16.msra.mxu0 %v10071_v0  ;;  %4571 = vmatmul.mubr.bf16.gmra.mrb[28].mxu1 %v12616_v56  ;;  %v14734_v56 = vld [vmem:[#allocation28_spill] sm:$0xff] }
 0x2ab   : > { %4048 = vmatprep.mubr.bf16.mxu0 %v14733_v42  ;;  %4613 = vmatprep.mubr.bf16.mxu1 %v14733_v42  ;;  %v10115_v0 = vld [vmem:[#allocation4 + $0x8a4] ss:$16 sps:$4 sm:$0xff]  }
 0x2ac   : > { %4610 = vmatpush1.bf16.msra.mxu1 %v10074_v19  ;;  %4046 = vmatprep.subr.bf16.mxu0 %v10079_v14  ;;  %v10110_v19 = vld [vmem:[#allocation4 + $0x888] ss:$16 sps:$4 sm:$0xff]   ;;  %v10118_v14 = vld [vmem:[#allocation4 + $0x8ac] ss:$16 sps:$4 sm:$0xff]   ;;  %v10121_v42 = vld [vmem:[#allocation4 + $0x8c4] ss:$16 sps:$4 sm:$0xff]  }
 0x2ad   : > { %4611 = vmatprep.subr.bf16.mxu1 %v10082_v10  ;;  %v14737_v10 = vld [vmem:[#allocation43_spill] sm:$0xff] }
 0x2ae   : > { %4047 = vmatpush1.bf16.msra.mxu0 %v10077_v44  ;;  %v10113_v44 = vld [vmem:[#allocation4 + $0x8a0] ss:$16 sps:$4 sm:$0xff]  }
 0x2af   : > { %4129 = vmatprep.subr.bf16.mxu0 %v10085_v16  ;;  %v10116_v16 = vld [vmem:[#allocation4 + $0x8a8] ss:$16 sps:$4 sm:$0xff]  }
 0x2b0   : > { %4612 = vmatpush1.bf16.msra.mxu1 %v10080_v11  ;;  %v10124_v11 = vld [vmem:[#allocation4 + $0x8cc] ss:$16 sps:$4 sm:$0xff]  }
 0x2b1   : > { %4049 = vmatmul.mubr.bf16.vlgmr.msra.gmra.mrb[0].mxu0 %v14734_v56  ;;  %4694 = vmatprep.subr.bf16.mxu1 %v10088_v18  ;;  %v10119_v18 = vld [vmem:[#allocation4 + $0x8c0] ss:$16 sps:$4 sm:$0xff]  }
 0x2b2   : > { %4130 = vmatpush1.bf16.msra.mxu0 %v10083_v23  ;;  %4058 = vmatprep.mubr.bf16.mxu0 %v14735_v6  ;;  %v10127_v23 = vld [vmem:[#allocation4 + $0x8e4] ss:$16 sps:$4 sm:$0xff]  }
 0x2b3   : > { %4614 = vmatmul.mubr.bf16.vlgmr.msra.gmra.mrb[0].mxu1 %v14734_v56  ;;  %4131 = vmatprep.subr.bf16.mxu0 %v10091_v2  ;;  %v10122_v2 = vld [vmem:[#allocation4 + $0x8c8] ss:$16 sps:$4 sm:$0xff]   ;;  %v10130_v56 = vld [vmem:[#allocation4 + $0x8ec] ss:$16 sps:$4 sm:$0xff]  }
 0x2b4   : > { %4623 = vmatprep.mubr.bf16.mxu1 %v14735_v6  ;;  %4695 = vmatpush1.bf16.msra.mxu1 %v10086_v39  ;;  %v14738_v39 = vld [vmem:[#allocation44_spill] sm:$0xff]  ;;  %v10125_v6 = vld [vmem:[#allocation4 + $0x8e0] ss:$16 sps:$4 sm:$0xff]  }
 0x2b5   : > { %4696 = vmatprep.subr.bf16.mxu1 %v10094_v31  ;;  %v14739_v31 = vld [vmem:[#allocation47_spill] sm:$0xff] }
 0x2b6   : > { %4132 = vmatpush1.bf16.msra.mxu0 %v10089_v34  ;;  %v10133_v34 = vld [vmem:[#allocation4 + $0x904] ss:$16 sps:$4 sm:$0xff]  }
 0x2b7   : > { %4133 = vmatprep.subr.bf16.mxu0 %v10097_v53  ;;  %v10131_v53 = vld [vmem:[#allocation4 + $0x900] ss:$16 sps:$4 sm:$0xff]  }
 0x2b8   : > { %4697 = vmatpush1.bf16.msra.mxu1 %v10092_v4  ;;  %v10139_v4 = vld [vmem:[#allocation4 + $0x924] ss:$16 sps:$4 sm:$0xff]  }
 0x2b9   : > { %4059 = vmatmul.mubr.bf16.gmra.mrb[4].mxu0 %v14736_v22  ;;  %4698 = vmatprep.subr.bf16.mxu1 %v10100_v36  ;;  %v14741_v36 = vld [vmem:[#allocation52_spill] sm:$0xff] }
 0x2ba   : > { %4134 = vmatpush1.bf16.msra.mxu0 %v10095_v61  ;;  %4068 = vmatprep.mubr.bf16.mxu0 %v1682_v52  ;;  %v10137_v61 = vld [vmem:[#allocation4 + $0x920] ss:$16 sps:$4 sm:$0xff]  }
 0x2bb   : > { %4624 = vmatmul.mubr.bf16.gmra.mrb[4].mxu1 %v14736_v22  ;;  %4135 = vmatprep.subr.bf16.mxu0 %v10103_v28  ;;  %v10140_v28 = vld [vmem:[#allocation4 + $0x928] ss:$16 sps:$4 sm:$0xff]   ;;  %v10151_v22 = vld [vmem:[#allocation4 + $0x964] ss:$16 sps:$4 sm:$0xff]  }
 0x2bc   : > { %4633 = vmatprep.mubr.bf16.mxu1 %v1682_v52  ;;  %4699 = vmatpush1.bf16.msra.mxu1 %v10098_v51  ;;  %v10148_v51 = vld [vmem:[#allocation4 + $0x94c] ss:$16 sps:$4 sm:$0xff]   ;;  %v10143_v52 = vld [vmem:[#allocation4 + $0x940] ss:$16 sps:$4 sm:$0xff]  }
 0x2bd   : > { %4700 = vmatprep.subr.bf16.mxu1 %v10106_v62  ;;  %v10146_v62 = vld [vmem:[#allocation4 + $0x948] ss:$16 sps:$4 sm:$0xff]  }
 0x2be   : > { %4136 = vmatpush1.bf16.msra.mxu0 %v10101_v29  ;;  %v10157_v29 = vld [vmem:[#allocation4 + $0x984] ss:$16 sps:$4 sm:$0xff]  }
 0x2bf   : > { %4137 = vmatprep.subr.bf16.mxu0 %v10109_v20  ;;  %v10152_v20 = vld [vmem:[#allocation4 + $0x968] ss:$16 sps:$4 sm:$0xff]  }
 0x2c0   : > { %4701 = vmatpush1.bf16.msra.mxu1 %v10104_v59  ;;  %v10158_v59 = vld [vmem:[#allocation4 + $0x988] ss:$16 sps:$4 sm:$0xff]  }
 0x2c1   : > { %4069 = vmatmul.mubr.bf16.gmra.mrb[8].mxu0 %v1681_v45  ;;  %4702 = vmatprep.subr.bf16.mxu1 %v10112_v41  ;;  %v10164_v41 = vld [vmem:[#allocation4 + $0x9a8] ss:$16 sps:$4 sm:$0xff]  }
 0x2c2   : > { %4138 = vmatpush1.bf16.msra.mxu0 %v10107_v43  ;;  %4078 = vmatprep.mubr.bf16.mxu0 %v14737_v10  ;;  %v10172_v43 = vld [vmem:[#allocation4 + $0x9cc] ss:$16 sps:$4 sm:$0xff]  }
 0x2c3   : > { %4634 = vmatmul.mubr.bf16.gmra.mrb[8].mxu1 %v1681_v45  ;;  %4139 = vmatprep.subr.bf16.mxu0 %v10115_v0  ;;  %v10167_v45 = vld [vmem:[#allocation4 + $0x9c0] ss:$16 sps:$4 sm:$0xff]   ;;  %v10175_v0 = vld [vmem:[#allocation4 + $0x9e4] ss:$16 sps:$4 sm:$0xff]  }
 0x2c4   : > { %4643 = vmatprep.mubr.bf16.mxu1 %v14737_v10  ;;  %4703 = vmatpush1.bf16.msra.mxu1 %v10110_v19  ;;  %v10170_v19 = vld [vmem:[#allocation4 + $0x9c8] ss:$16 sps:$4 sm:$0xff]   ;;  %v10173_v10 = vld [vmem:[#allocation4 + $0x9e0] ss:$16 sps:$4 sm:$0xff]  }
 0x2c5   : > { %4704 = vmatprep.subr.bf16.mxu1 %v10118_v14  ;;  %v10178_v14 = vld [vmem:[#allocation4 + $0x9ec] ss:$16 sps:$4 sm:$0xff]  }
 0x2c6   : > { %4140 = vmatpush1.bf16.msra.mxu0 %v10113_v44  ;;  %v10176_v44 = vld [vmem:[#allocation4 + $0x9e8] ss:$16 sps:$4 sm:$0xff]  }
 0x2c7   : > { %4141 = vmatprep.subr.bf16.mxu0 %v10121_v42  ;;  %v12798_v42 = vld [vmem:[#allocation7 + $0x104] ss:$8 sps:$4 sm:$0xff]  }
 0x2c8   : > { %4705 = vmatpush1.bf16.msra.mxu1 %v10116_v16  ;;  %v10179_v16 = vld [vmem:[#allocation7] ss:$8 sps:$4 sm:$0xff]  }
 0x2c9   : > { %4079 = vmatmul.mubr.bf16.gmra.mrb[12].mxu0 %v14738_v39  ;;  %4706 = vmatprep.subr.bf16.mxu1 %v10124_v11  ;;  %v10184_v11 = vld [vmem:[#allocation7 + $0x14] ss:$8 sps:$4 sm:$0xff]  }
 0x2ca   : > { %4142 = vmatpush1.bf16.msra.mxu0 %v10119_v18  ;;  %4088 = vmatprep.mubr.bf16.mxu0 %v14739_v31  ;;  %v12800_v18 = vld [vmem:[#allocation7 + $0x100] ss:$8 sps:$4 sm:$0xff]  }
 0x2cb   : > { %4644 = vmatmul.mubr.bf16.gmra.mrb[12].mxu1 %v14738_v39  ;;  %4143 = vmatprep.subr.bf16.mxu0 %v10127_v23  ;;  %v14743_v23 = vld [vmem:[#allocation38_spill] sm:$0xff] }
 0x2cc   : > { %4653 = vmatprep.mubr.bf16.mxu1 %v14739_v31  ;;  %4707 = vmatpush1.bf16.msra.mxu1 %v10122_v2  ;;  %v10479_v2 = vld [vmem:[%s11149_s15 + $0x1d8] sm:$0xff]  ;;  %v10187_v31 = vld [vmem:[#allocation7 + $0x24] ss:$8 sps:$4 sm:$0xff]  }
 0x2cd   : > { %4708 = vmatprep.subr.bf16.mxu1 %v10130_v56  ;;  %v1362_v39 = vsub.f32 %v10479_v2, %v14715_v3  ;;  %v10182_v56 = vld [vmem:[#allocation7 + $0x10] ss:$8 sps:$4 sm:$0xff]   ;;  %v12899_v2 = vld [vmem:[#allocation7 + $0x1a4] ss:$8 sps:$4 sm:$0xff]  }
 0x2ce   : > { %4144 = vmatpush1.bf16.msra.mxu0 %v10125_v6  ;;  %v10480_v6 = vld [vmem:[%s11149_s15 + $0x188] sm:$0xff] }
 0x2cf   : > { %4145 = vmatprep.subr.bf16.mxu0 %v10133_v34  ;;  %v1352_v34 = vsub.f32 %v10480_v6, %v14716_v27  ;;  %v12915_v6 = vld [vmem:[#allocation7 + $0x1d0] ss:$8 sps:$4 sm:$0xff]  }
 0x2d0   : > { %4709 = vmatpush1.bf16.msra.mxu1 %v10128_v33  ;;  %v1554_v33 = vmul.f32 %v14717_v40, %v1362_v39  ;;  %v12905_v39 = vld [vmem:[#allocation7 + $0x1b4] ss:$8 sps:$4 sm:$0xff]  }
 0x2d1   : > { %4089 = vmatmul.mubr.bf16.gmra.mrb[16].mxu0 %v14740_v30  ;;  %4710 = vmatprep.subr.bf16.mxu1 %v10136_v47  ;;  %v12815_v47 = vld [vmem:[#allocation7 + $0x110] ss:$8 sps:$4 sm:$0xff]  }
 0x2d2   : > { %4146 = vmatpush1.bf16.msra.mxu0 %v10131_v53  ;;  %4098 = vmatprep.mubr.bf16.mxu0 %v14741_v36  ;;  %v12818_v53 = vld [vmem:[#allocation7 + $0x124] ss:$8 sps:$4 sm:$0xff]  }
 0x2d3   : > { %4654 = vmatmul.mubr.bf16.gmra.mrb[16].mxu1 %v14740_v30  ;;  %4147 = vmatprep.subr.bf16.mxu0 %v10139_v4  ;;  %v1544_v4 = vmul.f32 %v14718_v32, %v1352_v34  ;;  %v12917_v34 = vld [vmem:[#allocation7 + $0x1d4] ss:$8 sps:$4 sm:$0xff]  }
 0x2d4   : > { %4663 = vmatprep.mubr.bf16.mxu1 %v14741_v36  ;;  %4711 = vmatpush1.bf16.msra.mxu1 %v10134_v46  ;;  %v10185_v46 = vld [vmem:[#allocation7 + $0x20] ss:$8 sps:$4 sm:$0xff]   ;;  %v10481_v36 = vld [vmem:[%s11149_s15 + $0x1d0] sm:$0xff] }
 0x2d5   : > { %4712 = vmatprep.subr.bf16.mxu1 %v10142_v1  ;;  %v1684_v30 = vpack.c.bf16 %v1554_v33, %v1544_v4  ;;  %v12822_v1 = vld [vmem:[#allocation7 + $0x120] ss:$8 sps:$4 sm:$0xff]   ;;  %v12923_v4 = vld [vmem:[#allocation7 + $0x1e4] ss:$8 sps:$4 sm:$0xff]  }
 0x2d6   : > { %4148 = vmatpush1.bf16.msra.mxu0 %v10137_v61  ;;  %v1361_v61 = vsub.f32 %v10481_v36, %v14715_v3  ;;  %v12835_v3 = vld [vmem:[#allocation7 + $0x130] ss:$8 sps:$4 sm:$0xff]   ;;  %v12921_v33 = vld [vmem:[#allocation7 + $0x1e0] ss:$8 sps:$4 sm:$0xff]   ;;  %14745 = vst [vmem:[#allocation23_spill] sm:$0xff] %v12923_v4 }
 0x2d7   : > { %4149 = vmatprep.subr.bf16.mxu0 %v10145_v48  ;;  %v12828_v48 = vld [vmem:[#allocation7 + $0x134] ss:$8 sps:$4 sm:$0xff]   ;;  %14744 = vst [vmem:[#allocation22_spill] sm:$0xff] %v12921_v33 }
 0x2d8   : > { %4713 = vmatpush1.bf16.msra.mxu1 %v10140_v28  ;;  %v10188_v28 = vld [vmem:[#allocation7 + $0x30] ss:$8 sps:$4 sm:$0xff]  }
 0x2d9   : > { %4099 = vmatmul.mubr.bf16.gmra.mrb[20].mxu0 %v12457_v13  ;;  %4714 = vmatprep.subr.bf16.mxu1 %v10148_v51  ;;  %v10482_v51 = vld [vmem:[%s11149_s15 + $0x180] sm:$0xff] }
 0x2da   : > { %4150 = vmatpush1.bf16.msra.mxu0 %v10143_v52  ;;  %4108 = vmatprep.mubr.bf16.mxu0 %v12517_v37  ;;  %v1351_v52 = vsub.f32 %v10482_v51, %v14716_v27  ;;  %v10196_v27 = vld [vmem:[#allocation7 + $0x54] ss:$8 sps:$4 sm:$0xff]  }
 0x2db   : > { %4664 = vmatmul.mubr.bf16.gmra.mrb[20].mxu1 %v12457_v13  ;;  %4151 = vmatprep.subr.bf16.mxu0 %v10151_v22  ;;  %v10161_v13 = vld [vmem:[#allocation4 + $0x9a0] ss:$16 sps:$4 sm:$0xff]   ;;  %v1553_v22 = vmul.f32 %v14717_v40, %v1361_v61  ;;  %v12842_v40 = vld [vmem:[#allocation7 + $0x140] ss:$8 sps:$4 sm:$0xff]  }
 0x2dc   : > { %4673 = vmatprep.mubr.bf16.mxu1 %v12517_v37  ;;  %4715 = vmatpush1.bf16.msra.mxu1 %v10146_v62  ;;  %v10169_v37 = vld [vmem:[#allocation4 + $0x9c4] ss:$16 sps:$4 sm:$0xff]   ;;  %v10193_v62 = vld [vmem:[#allocation7 + $0x44] ss:$8 sps:$4 sm:$0xff]  }
 0x2dd   : > { %4716 = vmatprep.subr.bf16.mxu1 %v10154_v26  ;;  %v1543_v26 = vmul.f32 %v14718_v32, %v1351_v52  ;;  %v10194_v32 = vld [vmem:[#allocation7 + $0x50] ss:$8 sps:$4 sm:$0xff]  }
 0x2de   : > { %4152 = vmatpush1.bf16.msra.mxu0 %v10149_v58  ;;  %v12839_v58 = vld [vmem:[#allocation7 + $0x144] ss:$8 sps:$4 sm:$0xff]  }
 0x2df   : > { %4153 = vmatprep.subr.bf16.mxu0 %v10157_v29  ;;  %v1683_v29 = vpack.c.bf16 %v1553_v22, %v1543_v26 }
 0x2e0   : > { %4717 = vmatpush1.bf16.msra.mxu1 %v10152_v20  ;;  %v10199_v20 = vld [vmem:[#allocation7 + $0x64] ss:$8 sps:$4 sm:$0xff]  }
 0x2e1   : > { %4109 = vmatmul.mubr.bf16.gmra.mrb[24].mxu0 %v12536_v17  ;;  %4718 = vmatprep.subr.bf16.mxu1 %v10160_v60  ;;  %v10197_v60 = vld [vmem:[#allocation7 + $0x60] ss:$8 sps:$4 sm:$0xff]  }
 0x2e2   : > { %4154 = vmatpush1.bf16.msra.mxu0 %v10155_v38  ;;  %4118 = vmatprep.mubr.bf16.mxu0 %v12618_v15  ;;  %v10202_v38 = vld [vmem:[#allocation7 + $0x74] ss:$8 sps:$4 sm:$0xff]  }
 0x2e3   : > { %4674 = vmatmul.mubr.bf16.gmra.mrb[24].mxu1 %v12536_v17  ;;  %4155 = vmatprep.subr.bf16.mxu0 %v10163_v57  ;;  %v14742_v17 = vld [vmem:[#allocation37_spill] sm:$0xff]  ;;  %v10200_v57 = vld [vmem:[#allocation7 + $0x70] ss:$8 sps:$4 sm:$0xff]  }
 0x2e4   : > { %4683 = vmatprep.mubr.bf16.mxu1 %v12618_v15  ;;  %4719 = vmatpush1.bf16.msra.mxu1 %v10158_v59  ;;  %v10181_v15 = vld [vmem:[#allocation7 + $0x4] ss:$8 sps:$4 sm:$0xff]  }
 0x2e5   : > { %4720 = vmatprep.subr.bf16.mxu1 %v10166_v5  ;;  %v10205_v59 = vld [vmem:[#allocation7 + $0x84] ss:$8 sps:$4 sm:$0xff]   ;;  %v10211_v5 = vld [vmem:[#allocation7 + $0x94] ss:$8 sps:$4 sm:$0xff]  }
 0x2e6   : > { %4156 = vmatpush1.bf16.msra.mxu0 %v10161_v13  ;;  %v10209_v13 = vld [vmem:[#allocation7 + $0x90] ss:$8 sps:$4 sm:$0xff]  }
 0x2e7   : > { %4157 = vmatprep.subr.bf16.mxu0 %v10169_v37  ;;  %v10217_v37 = vld [vmem:[#allocation7 + $0xa4] ss:$8 sps:$4 sm:$0xff]  }
 0x2e8   : > { %4721 = vmatpush1.bf16.msra.mxu1 %v10164_v41  ;;  %v10221_v41 = vld [vmem:[#allocation7 + $0xb0] ss:$8 sps:$4 sm:$0xff]  }
 0x2e9   : > { %4119 = vmatmul.mubr.bf16.gmra.mrb[28].mxu0 %v12620_v21  ;;  %4722 = vmatprep.subr.bf16.mxu1 %v10172_v43  ;;  %v10229_v43 = vld [vmem:[#allocation7 + $0xc4] ss:$8 sps:$4 sm:$0xff]  }
 0x2ea   : > { %4158 = vmatpush1.bf16.msra.mxu0 %v10167_v45  ;;  %4161 = vmatprep.mubr.bf16.mxu0 %v14742_v17  ;;  %v10233_v45 = vld [vmem:[#allocation7 + $0xd0] ss:$8 sps:$4 sm:$0xff]  }
 0x2eb   : > { %4684 = vmatmul.mubr.bf16.gmra.mrb[28].mxu1 %v12620_v21  ;;  %4159 = vmatprep.subr.bf16.mxu0 %v10175_v0  ;;  %v12804_v21 = vld [vmem:[#allocation7 + $0x114] ss:$8 sps:$4 sm:$0xff]   ;;  %v10239_v0 = vld [vmem:[#allocation7 + $0xe0] ss:$8 sps:$4 sm:$0xff]  }
 0x2ec   : > { %4723 = vmatpush1.bf16.msra.mxu1 %v10170_v19  ;;  %4726 = vmatprep.mubr.bf16.mxu1 %v14742_v17  ;;  %v10241_v19 = vld [vmem:[#allocation7 + $0xe4] ss:$8 sps:$4 sm:$0xff]   ;;  %v12876_v17 = vld [vmem:[#allocation7 + $0x174] ss:$8 sps:$4 sm:$0xff]  }
 0x2ed   : > { %4724 = vmatprep.subr.bf16.mxu1 %v10178_v14  ;;  %v12872_v14 = vld [vmem:[#allocation7 + $0x160] ss:$8 sps:$4 sm:$0xff]  }
 0x2ee   : > { %4160 = vmatpush1.bf16.msra.mxu0 %v10173_v10  ;;  %v12880_v10 = vld [vmem:[#allocation7 + $0x170] ss:$8 sps:$4 sm:$0xff]  }
 0x2ef   : > { %5427 = vmatprep.subr.bf16.mxu0 %v10181_v15  ;;  %v12885_v15 = vld [vmem:[#allocation7 + $0x180] ss:$8 sps:$4 sm:$0xff]  }
 0x2f0   : > { %4725 = vmatpush1.bf16.msra.mxu1 %v10176_v44  ;;  %v12887_v44 = vld [vmem:[#allocation7 + $0x184] ss:$8 sps:$4 sm:$0xff]  }
 0x2f1   : > { %4162 = vmatmul.mubr.bf16.vlgmr.msra.gmra.mrb[0].mxu0 %v14743_v23  ;;  %9089 = vmatprep.subr.bf16.mxu1 %v12798_v42 }
 0x2f2   : > { %4171 = vmatprep.mubr.bf16.mxu0 %v12520_v24  ;;  %5428 = vmatpush1.bf16.msra.mxu0 %v10179_v16  ;;  %v12891_v16 = vld [vmem:[#allocation7 + $0x190] ss:$8 sps:$4 sm:$0xff]  }
 0x2f3   : > { %4727 = vmatmul.mubr.bf16.vlgmr.msra.gmra.mrb[0].mxu1 %v14743_v23  ;;  %5429 = vmatprep.subr.bf16.mxu0 %v10184_v11  ;;  %v12893_v11 = vld [vmem:[#allocation7 + $0x194] ss:$8 sps:$4 sm:$0xff]   ;;  %v12897_v23 = vld [vmem:[#allocation7 + $0x1a0] ss:$8 sps:$4 sm:$0xff]  }
 0x2f4   : > { %4736 = vmatprep.mubr.bf16.mxu1 %v12520_v24  ;;  %9105 = vmatpush1.bf16.msra.mxu1 %v12800_v18  ;;  %v10190_v24 = vld [vmem:[#allocation7 + $0x34] ss:$8 sps:$4 sm:$0xff]  }
 0x2f5   : > { %9090 = vmatprep.subr.bf16.mxu1 %v12804_v21 }
 0x2f6   : > { %5430 = vmatpush1.bf16.msra.mxu0 %v10182_v56  ;;  %v12909_v56 = vld [vmem:[#allocation7 + $0x1c0] ss:$8 sps:$4 sm:$0xff]  }
 0x2f7   : > { %5431 = vmatprep.subr.bf16.mxu0 %v10187_v31  ;;  %v12911_v31 = vld [vmem:[#allocation7 + $0x1c4] ss:$8 sps:$4 sm:$0xff]  }
 0x2f8   : > { %9106 = vmatpush1.bf16.msra.mxu1 %v12815_v47 }
 0x2f9   : > { %4172 = vmatmul.mubr.bf16.gmra.mrb[4].mxu0 %v12522_v12  ;;  %9091 = vmatprep.subr.bf16.mxu1 %v12818_v53 }
 0x2fa   : > { %4181 = vmatprep.mubr.bf16.mxu0 %v1684_v30  ;;  %5432 = vmatpush1.bf16.msra.mxu0 %v10185_v46  ;;  %v12927_v46 = vld [vmem:[#allocation7 + $0x1f0] ss:$8 sps:$4 sm:$0xff]  }
 0x2fb   : > { %4737 = vmatmul.mubr.bf16.gmra.mrb[4].mxu1 %v12522_v12  ;;  %5433 = vmatprep.subr.bf16.mxu0 %v10190_v24  ;;  %v10191_v12 = vld [vmem:[#allocation7 + $0x40] ss:$8 sps:$4 sm:$0xff]   ;;  %14746 = vst [vmem:[#allocation29_spill] sm:$0xff] %v12927_v46  ;;  %v12929_v24 = vld [vmem:[#allocation7 + $0x1f4] ss:$8 sps:$4 sm:$0xff]  }
 0x2fc   : > { %4746 = vmatprep.mubr.bf16.mxu1 %v1684_v30  ;;  %9107 = vmatpush1.bf16.msra.mxu1 %v12822_v1  ;;  %14747 = vst [vmem:[#allocation26_spill] sm:$0xff] %v12929_v24  ;;  %v2057_v30 = vlaneseq }
 0x2fd   : > { %9092 = vmatprep.subr.bf16.mxu1 %v12828_v48 }
 0x2fe   : > { %5434 = vmatpush1.bf16.msra.mxu0 %v10188_v28  ;;  %v12933_v36 = vshrl.u32 %v2057_v30, 7  ;;  %v2055_v28 = vld [vmem:[#allocation6] sm:$0xf] }
 0x2ff   : > { %5435 = vmatprep.subr.bf16.mxu0 %v10193_v62 }
 0x300   : > { %9108 = vmatpush1.bf16.msra.mxu1 %v12835_v3  ;;  %14748 = vst [vmem:[#allocation21_spill] sm:$0xff] %v12933_v36  ;;  %v14553_v61 = vsub.s32 0, %v12933_v36  ;;  %v2067_v51 = vsub.s32 2, %v12933_v36  ;;  %v14552_v22 = vsub.s32 1, %v12933_v36 }
 0x301   : > { %4182 = vmatmul.mubr.bf16.gmra.mrb[8].mxu0 %v1683_v29  ;;  %9093 = vmatprep.subr.bf16.mxu1 %v12839_v58 }
 0x302   : > { %4191 = vmatprep.mubr.bf16.mxu0 %v12582_v63  ;;  %5436 = vmatpush1.bf16.msra.mxu0 %v10191_v12  ;;  %v12939_v52 = vrot.slane %v2055_v28, %v14553_v61  ;;  %v12942_v62 = vrot.slane %v2055_v28, %v2067_v51  ;;  %v2071_v12 = vsub.s32 3, %v12933_v36 }
 0x303   : > { %4747 = vmatmul.mubr.bf16.gmra.mrb[8].mxu1 %v1683_v29  ;;  %5437 = vmatprep.subr.bf16.mxu0 %v10196_v27  ;;  %v12948_v27 = vrot.slane %v2055_v28, %v14552_v22 }
 0x304   : > { %4756 = vmatprep.mubr.bf16.mxu1 %v12582_v63  ;;  %9109 = vmatpush1.bf16.msra.mxu1 %v12842_v40  ;;  %v10203_v63 = vld [vmem:[#allocation7 + $0x80] ss:$8 sps:$4 sm:$0xff]  }
 0x306   : > { %5438 = vmatpush1.bf16.msra.mxu0 %v10194_v32 }
 0x307   : > { %5439 = vmatprep.subr.bf16.mxu0 %v10199_v20 }
 0x309   : > { %4192 = vmatmul.mubr.bf16.gmra.mrb[12].mxu0 %v12622_v49 }
 0x30a   : > { %4201 = vmatprep.mubr.bf16.mxu0 %v12624_v54  ;;  %5440 = vmatpush1.bf16.msra.mxu0 %v10197_v60 }
 0x30b   : > { %4757 = vmatmul.mubr.bf16.gmra.mrb[12].mxu1 %v12622_v49  ;;  %5441 = vmatprep.subr.bf16.mxu0 %v10202_v38  ;;  %v10215_v49 = vld [vmem:[#allocation7 + $0xa0] ss:$8 sps:$4 sm:$0xff]  }
 0x30c   : > { %4766 = vmatprep.mubr.bf16.mxu1 %v12624_v54  ;;  %v10223_v54 = vld [vmem:[#allocation7 + $0xb4] ss:$8 sps:$4 sm:$0xff]  }
 0x30e   : > { %5442 = vmatpush1.bf16.msra.mxu0 %v10200_v57 }
 0x30f   : > { %5443 = vmatprep.subr.bf16.mxu0 %v10205_v59 }
 0x311   : > { %4202 = vmatmul.mubr.bf16.gmra.mrb[16].mxu0 %v12639_v8 }
 0x312   : > { %4211 = vmatprep.mubr.bf16.mxu0 %v12651_v35  ;;  %5444 = vmatpush1.bf16.msra.mxu0 %v10203_v63 }
 0x313   : > { %4767 = vmatmul.mubr.bf16.gmra.mrb[16].mxu1 %v12639_v8  ;;  %5445 = vmatprep.subr.bf16.mxu0 %v10211_v5  ;;  %v10227_v8 = vld [vmem:[#allocation7 + $0xc0] ss:$8 sps:$4 sm:$0xff]  }
 0x314   : > { %4776 = vmatprep.mubr.bf16.mxu1 %v12651_v35  ;;  %v10235_v35 = vld [vmem:[#allocation7 + $0xd4] ss:$8 sps:$4 sm:$0xff]  }
 0x316   : > { %5446 = vmatpush1.bf16.msra.mxu0 %v10209_v13  ;;  %v12952_v13 = vrot.slane %v2055_v28, %v2071_v12 }
 0x317   : > { %5447 = vmatprep.subr.bf16.mxu0 %v10217_v37 }
 0x319   : > { %4212 = vmatmul.mubr.bf16.gmra.mrb[20].mxu0 %v12657_v9 }
 0x31a   : > { %4221 = vmatprep.mubr.bf16.mxu0 %v12664_v25  ;;  %5448 = vmatpush1.bf16.msra.mxu0 %v10215_v49 }
 0x31b   : > { %4777 = vmatmul.mubr.bf16.gmra.mrb[20].mxu1 %v12657_v9  ;;  %5449 = vmatprep.subr.bf16.mxu0 %v10223_v54  ;;  %v12866_v9 = vld [vmem:[#allocation7 + $0x150] ss:$8 sps:$4 sm:$0xff]  }
 0x31c   : > { %4786 = vmatprep.mubr.bf16.mxu1 %v12664_v25  ;;  %v12868_v25 = vld [vmem:[#allocation7 + $0x154] ss:$8 sps:$4 sm:$0xff]  }
 0x31d   : > { %9094 = vmatprep.subr.bf16.mxu1 %v12868_v25 }
 0x31e   : > { %5450 = vmatpush1.bf16.msra.mxu0 %v10221_v41  ;;  %9110 = vmatpush1.bf16.msra.mxu1 %v12866_v9 }
 0x31f   : > { %5451 = vmatprep.subr.bf16.mxu0 %v10229_v43 }
 0x321   : > { %4222 = vmatmul.mubr.bf16.gmra.mrb[24].mxu0 %v12669_v55 }
 0x322   : > { %4231 = vmatprep.mubr.bf16.mxu0 %v12679_v7  ;;  %5452 = vmatpush1.bf16.msra.mxu0 %v10227_v8 }
 0x323   : > { %4787 = vmatmul.mubr.bf16.gmra.mrb[24].mxu1 %v12669_v55  ;;  %5453 = vmatprep.subr.bf16.mxu0 %v10235_v35  ;;  %v12874_v55 = vld [vmem:[#allocation7 + $0x164] ss:$8 sps:$4 sm:$0xff]  }
 0x324   : > { %4796 = vmatprep.mubr.bf16.mxu1 %v12679_v7  ;;  %v10247_v7 = vld [vmem:[#allocation7 + $0xf4] ss:$8 sps:$4 sm:$0xff]   ;;  %9095 = vmatprep.subr.bf16.mxu1 %v12874_v55 }
 0x325   : > { %9111 = vmatpush1.bf16.msra.mxu1 %v12872_v14 }
 0x326   : > { %5454 = vmatpush1.bf16.msra.mxu0 %v10233_v45  ;;  %9096 = vmatprep.subr.bf16.mxu1 %v12876_v17 }
 0x327   : > { %5455 = vmatprep.subr.bf16.mxu0 %v10241_v19 }
 0x329   : > { %4232 = vmatmul.mubr.bf16.gmra.mrb[28].mxu0 %v12682_v50  ;;  %9112 = vmatpush1.bf16.msra.mxu1 %v12880_v10 }
 0x32a   : > { %5456 = vmatpush1.bf16.msra.mxu0 %v10239_v0  ;;  %9097 = vmatprep.subr.bf16.mxu1 %v12887_v44 }
 0x32b   : > { %4797 = vmatmul.mubr.bf16.gmra.mrb[28].mxu1 %v12682_v50  ;;  %v10245_v50 = vld [vmem:[#allocation7 + $0xf0] ss:$8 sps:$4 sm:$0xff]   ;;  %5457 = vmatprep.subr.bf16.mxu0 %v10247_v7 }
 0x32d   : > { %9113 = vmatpush1.bf16.msra.mxu1 %v12885_v15 }
 0x32e   : > { %5458 = vmatpush1.bf16.msra.mxu0 %v10245_v50  ;;  %9098 = vmatprep.subr.bf16.mxu1 %v12893_v11 }
 0x32f   : > { %5540 = vmatprep.subr.bf16.mxu0 %v12798_v42  ;;  %v12903_v42 = vld [vmem:[#allocation7 + $0x1b0] ss:$8 sps:$4 sm:$0xff]  }
 0x331   : > { %9114 = vmatpush1.bf16.msra.mxu1 %v12891_v16 }
 0x332   : > { %9099 = vmatprep.subr.bf16.mxu1 %v12899_v2 }
 0x335   : > { %9115 = vmatpush1.bf16.msra.mxu1 %v12897_v23 }
 0x336   : > { %9100 = vmatprep.subr.bf16.mxu1 %v12905_v39 }
 0x339   : > { %9116 = vmatpush1.bf16.msra.mxu1 %v12903_v42 }
 0x33a   : > { %9101 = vmatprep.subr.bf16.mxu1 %v12911_v31 }
 0x33d   : > { %9117 = vmatpush1.bf16.msra.mxu1 %v12909_v56 }
 0x33e   : > { %9102 = vmatprep.subr.bf16.mxu1 %v12917_v34 }
 0x341   : > { %9118 = vmatpush1.bf16.msra.mxu1 %v12915_v6 }
 0x342   : > { %9103 = vmatprep.subr.bf16.mxu1 %v12923_v4 }
 0x345   : > { %9119 = vmatpush1.bf16.msra.mxu1 %v12921_v33 }
 0x346   : > { %9104 = vmatprep.subr.bf16.mxu1 %v12929_v24 }
 0x349   : > { %9120 = vmatpush1.bf16.msra.mxu1 %v12927_v46 }
 0x3c4   : > { %v4163_v26 = vpop.f32.mrb[0].mxu0 }
 0x3c5   : > { %v9121_v29 = vadd.f32 %v4163_v26, %v12939_v52  ;;  %v4165_v32 = vpop.f32.mrb[1].mxu0 }
 0x3c6   : > { %v4728_v20 = vpop.f32.mrb[0].mxu1  ;;  %v4167_v60 = vpop.f32.mrb[2].mxu0  ;;  %v9122_v49 = vadd.f32 %v4165_v32, %v12948_v27 }
 0x3c7   : > { %v9153_v38 = vadd.f32 %v4728_v20, %v12942_v62  ;;  %v4730_v57 = vpop.f32.mrb[1].mxu1  ;;  %v9123_v59 = vadd.f32 %v4167_v60, %v12939_v52  ;;  %v4169_v63 = vpop.f32.mrb[3].mxu0  ;;  %v4871_v5 = vmul.f32 0.01, %v9121_v29  ;;  %vm4807_vm0 = vcmp.gt.f32.partialorder %v9121_v29, 0.0 }
 0x3c8   : > { %v4732_v37 = vpop.f32.mrb[2].mxu1  ;;  %v9124_v54 = vadd.f32 %v4169_v63, %v12948_v27  ;;  %v4872_v50 = vmul.f32 0.01, %v9122_v49  ;;  %v12958_v30 = vadd.f32 %v4730_v57, %v12952_v13  ;;  %vm4808_vm5 = vcmp.gt.f32.partialorder %v9122_v49, 0.0 }
 0x3c9   : > { %vm4811_vm1 = vcmp.gt.f32.partialorder %v9123_v59, 0.0  ;;  %v4734_v41 = vpop.f32.mrb[3].mxu1  ;;  %v4873_v43 = vmul.f32 0.01, %v9153_v38  ;;  %v4875_v8 = vmul.f32 0.01, %v9123_v59  ;;  %v9155_v35 = vadd.f32 %v4732_v37, %v12942_v62 }
 0x3ca   : > { %vm4809_vm2 = vcmp.gt.f32.partialorder %v9153_v38, 0.0  ;;  %v4935_v45 = vsel %vm4807_vm0, %v9121_v29, %v4871_v5  ;;  %v4876_v51 = vmul.f32 0.01, %v9124_v54  ;;  %vm4812_vm4 = vcmp.gt.f32.partialorder %v9124_v54, 0.0 }
 0x3cb   : > { %v4939_v0 = vsel %vm4811_vm1, %v9123_v59, %v4875_v8  ;;  %vm4813_vm3 = vcmp.gt.f32.partialorder %v9155_v35, 0.0  ;;  %v4877_v19 = vmul.f32 0.01, %v9155_v35  ;;  %v12960_v12 = vsel %vm4809_vm2, %v9153_v38, %v4873_v43 }
 0x3cc   : > { %v4173_v7 = vpop.f32.mrb[4].mxu0  ;;  %v4999_v28 = vpack.c.bf16 %v4939_v0, %v4935_v45  ;;  %14749 = vst [vmem:[#allocation36_spill] sm:$0xff] %v12960_v12  ;;  %v9156_v57 = vadd.f32 %v4734_v41, %v12952_v13  ;;  %vm4810_vm6 = vcmp.gt.f32.partialorder %v12958_v30, 0.0  ;;  %v4940_v45 = vsel %vm4812_vm4, %v9124_v54, %v4876_v51 }
 0x3cd   : > { %v4175_v26 = vpop.f32.mrb[5].mxu0  ;;  %v12962_v32 = vsel %vm4813_vm3, %v9155_v35, %v4877_v19  ;;  %v4874_v0 = vmul.f32 0.01, %v12958_v30  ;;  %v9125_v19 = vadd.f32 %v4173_v7, %v12939_v52 }
 0x3ce   : > { %14750 = vst [vmem:[#allocation33_spill] sm:$0xff] %v12962_v32  ;;  %v4738_v20 = vpop.f32.mrb[4].mxu1  ;;  %v9126_v60 = vadd.f32 %v4175_v26, %v12948_v27  ;;  %v4177_v29 = vpop.f32.mrb[6].mxu0  ;;  %v4936_v26 = vsel %vm4808_vm5, %v9122_v49, %v4872_v50  ;;  %vm4814_vm9 = vcmp.gt.f32.partialorder %v9156_v57, 0.0  ;;  %v4878_v61 = vmul.f32 0.01, %v9156_v57 }
 0x3cf   : > { %v4740_v63 = vpop.f32.mrb[5].mxu1  ;;  %v4179_v5 = vpop.f32.mrb[7].mxu0  ;;  %v9127_v37 = vadd.f32 %v4177_v29, %v12939_v52  ;;  %v12974_v22 = vadd.f32 %v4738_v20, %v12942_v62  ;;  %vm4815_vm11 = vcmp.gt.f32.partialorder %v9125_v19, 0.0  ;;  %v4879_v49 = vmul.f32 0.01, %v9125_v19 }
 0x3d0   : > { %v4742_v8 = vpop.f32.mrb[6].mxu1  ;;  %v4880_v38 = vmul.f32 0.01, %v9126_v60  ;;  %v9128_v43 = vadd.f32 %v4179_v5, %v12948_v27  ;;  %vm4816_vm7 = vcmp.gt.f32.partialorder %v9126_v60, 0.0  ;;  %v12977_v41 = vadd.f32 %v4740_v63, %v12952_v13 }
 0x3d1   : > { %v4744_v35 = vpop.f32.mrb[7].mxu1  ;;  %v4883_v59 = vmul.f32 0.01, %v9127_v37  ;;  %v5000_v5 = vpack.c.bf16 %v4940_v45, %v4936_v26  ;;  %vm4819_vm10 = vcmp.gt.f32.partialorder %v9127_v37, 0.0  ;;  %v12982_v46 = vmul.f32 0.01, %v12974_v22 }
 0x3d2   : > { %vm4820_vm8 = vcmp.gt.f32.partialorder %v9128_v43, 0.0  ;;  %v4884_v29 = vmul.f32 0.01, %v9128_v43  ;;  %v4944_v7 = vsel %vm4816_vm7, %v9126_v60, %v4880_v38  ;;  %v12985_v45 = vmul.f32 0.01, %v12977_v41 }
 0x3d3   : > { %5459 = vmatprep.mubr.bf16.mxu0 %v5000_v5  ;;  %v12988_v26 = vadd.f32 %v4742_v8, %v12942_v62  ;;  %vm4818_vm0 = vcmp.gt.f32.partialorder %v12977_v41, 0.0 }
 0x3d4   : > { %v4183_v36 = vpop.f32.mrb[8].mxu0  ;;  %v4948_v12 = vsel %vm4820_vm8, %v9128_v43, %v4884_v29  ;;  %5460 = vmatmul.mubr.bf16.vlgmr.msra.gmra.mrb[32].mxu0 %v4999_v28  ;;  %v12992_v43 = vadd.f32 %v4744_v35, %v12952_v13  ;;  %v4943_v35 = vsel %vm4815_vm11, %v9125_v19, %v4879_v49 }
 0x3d5   : > { %v9129_v54 = vadd.f32 %v4183_v36, %v12939_v52  ;;  %v4185_v51 = vpop.f32.mrb[9].mxu0  ;;  %v5004_v32 = vpack.c.bf16 %v4948_v12, %v4944_v7  ;;  %5541 = vmatpush1.bf16.msra.mxu0 %v12800_v18  ;;  %v13001_v7 = vsel %vm4810_vm6, %v12958_v30, %v4874_v0 }
 0x3d6   : > { %v4748_v50 = vpop.f32.mrb[8].mxu1  ;;  %v9130_v20 = vadd.f32 %v4185_v51, %v12948_v27  ;;  %v4187_v63 = vpop.f32.mrb[10].mxu0  ;;  %v4947_v51 = vsel %vm4819_vm10, %v9127_v37, %v4883_v59  ;;  %5542 = vmatprep.subr.bf16.mxu0 %v12804_v21  ;;  %14751 = vst [vmem:[#allocation30_spill] sm:$0xff] %v13001_v7  ;;  %v13008_v21 = vsel %vm4814_vm9, %v9156_v57, %v4878_v61  ;;  %v13014_v30 = vmul.f32 0.01, %v12992_v43 }
 0x3d7   : > { %v4750_v36 = vpop.f32.mrb[9].mxu1  ;;  %v9131_v60 = vadd.f32 %v4187_v63, %v12939_v52  ;;  %v4189_v38 = vpop.f32.mrb[11].mxu0  ;;  %v4887_v12 = vmul.f32 0.01, %v9129_v54  ;;  %5469 = vmatprep.mubr.bf16.mxu0 %v5004_v32  ;;  %vm4823_vm13 = vcmp.gt.f32.partialorder %v9129_v54, 0.0  ;;  %v13005_v32 = vadd.f32 %v4748_v50, %v12942_v62  ;;  %14752 = vst [vmem:[#allocation39_spill] sm:$0xff] %v13008_v21 }
 0x3d8   : > { %v4752_v29 = vpop.f32.mrb[10].mxu1  ;;  %v9132_v5 = vadd.f32 %v4189_v38, %v12948_v27  ;;  %v4888_v8 = vmul.f32 0.01, %v9130_v20  ;;  %vm4824_vm14 = vcmp.gt.f32.partialorder %v9130_v20, 0.0  ;;  %v5003_v37 = vpack.c.bf16 %v4947_v51, %v4943_v35 }
 0x3d9   : > { %vm4827_vm12 = vcmp.gt.f32.partialorder %v9131_v60, 0.0  ;;  %v4891_v28 = vmul.f32 0.01, %v9131_v60  ;;  %v4754_v18 = vpop.f32.mrb[11].mxu1  ;;  %v13011_v63 = vmul.f32 0.01, %v12988_v26  ;;  %5543 = vmatpush1.bf16.msra.mxu0 %v12815_v47  ;;  %v13018_v0 = vadd.f32 %v4750_v36, %v12952_v13 }
 0x3da   : > { %vm4828_vm15 = vcmp.gt.f32.partialorder %v9132_v5, 0.0  ;;  %v4892_v59 = vmul.f32 0.01, %v9132_v5  ;;  %5544 = vmatprep.subr.bf16.mxu0 %v12818_v53  ;;  %v4952_v57 = vsel %vm4824_vm14, %v9130_v20, %v4888_v8  ;;  %v4951_v51 = vsel %vm4823_vm13, %v9129_v54, %v4887_v12 }
 0x3db   : > { %v4955_v49 = vsel %vm4827_vm12, %v9131_v60, %v4891_v28  ;;  %v13030_v53 = vmul.f32 0.01, %v13005_v32  ;;  %v13033_v28 = vadd.f32 %v4752_v29, %v12942_v62  ;;  %v13036_v20 = vadd.f32 %v4754_v18, %v12952_v13 }
 0x3dc   : > { %v4193_v19 = vpop.f32.mrb[12].mxu0  ;;  %v4956_v38 = vsel %vm4828_vm15, %v9132_v5, %v4892_v59  ;;  %v5007_v33 = vpack.c.bf16 %v4955_v49, %v4951_v51  ;;  %5470 = vmatmul.mubr.bf16.gmra.mrb[36].mxu0 %v5003_v37  ;;  %vm4822_vm5 = vcmp.gt.f32.partialorder %v12992_v43, 0.0 }
 0x3dd   : > { %v9133_v50 = vadd.f32 %v4193_v19, %v12939_v52  ;;  %v4195_v61 = vpop.f32.mrb[13].mxu0  ;;  %v5008_v36 = vpack.c.bf16 %v4956_v38, %v4952_v57  ;;  %14753 = vst [vmem:[#allocation40_spill] sm:$0xff] %v13030_v53  ;;  %5545 = vmatpush1.bf16.msra.mxu0 %v12822_v1  ;;  %v13050_v1 = vmul.f32 0.01, %v13018_v0  ;;  %v13056_v57 = vmul.f32 0.01, %v13036_v20 }
 0x3de   : > { %v4758_v35 = vpop.f32.mrb[12].mxu1  ;;  %v9134_v47 = vadd.f32 %v4195_v61, %v12948_v27  ;;  %v4197_v24 = vpop.f32.mrb[14].mxu0  ;;  %5546 = vmatprep.subr.bf16.mxu0 %v12828_v48  ;;  %v13053_v61 = vmul.f32 0.01, %v13033_v28 }
 0x3df   : > { %v4760_v54 = vpop.f32.mrb[13].mxu1  ;;  %v9135_v12 = vadd.f32 %v4197_v24, %v12939_v52  ;;  %v4199_v5 = vpop.f32.mrb[15].mxu0  ;;  %v4895_v8 = vmul.f32 0.01, %v9133_v50  ;;  %v13041_v59 = vadd.f32 %v4758_v35, %v12942_v62  ;;  %5479 = vmatprep.mubr.bf16.mxu0 %v5008_v36  ;;  %vm4831_vm2 = vcmp.gt.f32.partialorder %v9133_v50, 0.0 }
 0x3e0   : > { %v13044_v19 = vadd.f32 %v4760_v54, %v12952_v13  ;;  %v4762_v49 = vpop.f32.mrb[14].mxu1  ;;  %v9136_v29 = vadd.f32 %v4199_v5, %v12948_v27  ;;  %v4896_v18 = vmul.f32 0.01, %v9134_v47  ;;  %vm4832_vm3 = vcmp.gt.f32.partialorder %v9134_v47, 0.0  ;;  %14754 = vst [vmem:[#allocation49_spill] sm:$0xff] %v13053_v61 }
 0x3e1   : > { %vm4835_vm1 = vcmp.gt.f32.partialorder %v9135_v12, 0.0  ;;  %v4899_v24 = vmul.f32 0.01, %v9135_v12  ;;  %v4764_v37 = vpop.f32.mrb[15].mxu1  ;;  %v13060_v48 = vmul.f32 0.01, %v13041_v59  ;;  %5547 = vmatpush1.bf16.msra.mxu0 %v12835_v3  ;;  %v4959_v21 = vsel %vm4831_vm2, %v9133_v50, %v4895_v8 }
 0x3e2   : > { %vm4836_vm4 = vcmp.gt.f32.partialorder %v9136_v29, 0.0  ;;  %v4900_v38 = vmul.f32 0.01, %v9136_v29  ;;  %v13064_v51 = vmul.f32 0.01, %v13044_v19  ;;  %5548 = vmatprep.subr.bf16.mxu0 %v12839_v58  ;;  %v4960_v60 = vsel %vm4832_vm3, %v9134_v47, %v4896_v18 }
 0x3e3   : > { %14755 = vst [vmem:[#allocation24_spill] sm:$0xff] %v13060_v48  ;;  %v4963_v36 = vsel %vm4835_vm1, %v9135_v12, %v4899_v24  ;;  %v13070_v61 = vadd.f32 %v4762_v49, %v12942_v62  ;;  %v13074_v12 = vadd.f32 %v4764_v37, %v12952_v13  ;;  %v13082_v50 = vsel %vm4818_vm0, %v12977_v41, %v12985_v45 }
 0x3e4   : > { %14756 = vst [vmem:[#allocation25_spill] sm:$0xff] %v13064_v51  ;;  %v4203_v35 = vpop.f32.mrb[16].mxu0  ;;  %v4964_v7 = vsel %vm4836_vm4, %v9136_v29, %v4900_v38  ;;  %v5011_v51 = vpack.c.bf16 %v4963_v36, %v4959_v21  ;;  %5480 = vmatmul.mubr.bf16.gmra.mrb[40].mxu0 %v5007_v33 }
 0x3e5   : > { %v9137_v54 = vadd.f32 %v4203_v35, %v12939_v52  ;;  %v4205_v5 = vpop.f32.mrb[17].mxu0  ;;  %v5012_v53 = vpack.c.bf16 %v4964_v7, %v4960_v60  ;;  %5549 = vmatpush1.bf16.msra.mxu0 %v12842_v40 }
 0x3e6   : > { %v4768_v48 = vpop.f32.mrb[16].mxu1  ;;  %v9138_v3 = vadd.f32 %v4205_v5, %v12948_v27  ;;  %v4207_v4 = vpop.f32.mrb[18].mxu0  ;;  %5550 = vmatprep.subr.bf16.mxu0 %v12868_v25 }
 0x3e7   : > { %v9169_v58 = vadd.f32 %v4768_v48, %v12942_v62  ;;  %v4770_v24 = vpop.f32.mrb[17].mxu1  ;;  %v9139_v47 = vadd.f32 %v4207_v4, %v12939_v52  ;;  %v4209_v29 = vpop.f32.mrb[19].mxu0  ;;  %v4903_v7 = vmul.f32 0.01, %v9137_v54  ;;  %5489 = vmatprep.mubr.bf16.mxu0 %v5012_v53  ;;  %v13091_v4 = vsel %vm4822_vm5, %v12992_v43, %v13014_v30 }
 0x3e8   : > { %v9170_v21 = vadd.f32 %v4770_v24, %v12952_v13  ;;  %v4772_v60 = vpop.f32.mrb[18].mxu1  ;;  %v9140_v33 = vadd.f32 %v4209_v29, %v12948_v27  ;;  %vm4840_vm7 = vcmp.gt.f32.partialorder %v9138_v3, 0.0  ;;  %v4904_v45 = vmul.f32 0.01, %v9138_v3 }
 0x3e9   : > { %vm4841_vm6 = vcmp.gt.f32.partialorder %v9169_v58, 0.0  ;;  %v4905_v41 = vmul.f32 0.01, %v9169_v58  ;;  %v9171_v8 = vadd.f32 %v4772_v60, %v12942_v62  ;;  %v4774_v49 = vpop.f32.mrb[19].mxu1  ;;  %vm4839_vm10 = vcmp.gt.f32.partialorder %v9137_v54, 0.0  ;;  %5551 = vmatpush1.bf16.msra.mxu0 %v12866_v9 }
 0x3ea   : > { %vm4842_vm8 = vcmp.gt.f32.partialorder %v9170_v21, 0.0  ;;  %v4906_v40 = vmul.f32 0.01, %v9170_v21  ;;  %vm4844_vm9 = vcmp.gt.f32.partialorder %v9140_v33, 0.0  ;;  %vm4843_vm11 = vcmp.gt.f32.partialorder %v9139_v47, 0.0  ;;  %5552 = vmatprep.subr.bf16.mxu0 %v12874_v55 }
 0x3eb   : > { %v4908_v53 = vmul.f32 0.01, %v9140_v33  ;;  %v9172_v18 = vadd.f32 %v4774_v49, %v12952_v13  ;;  %v13096_v37 = vsel %vm4841_vm6, %v9169_v58, %v4905_v41  ;;  %v4907_v25 = vmul.f32 0.01, %v9139_v47 }
 0x3ec   : > { %vm4845_vm12 = vcmp.gt.f32.partialorder %v9171_v8, 0.0  ;;  %v4909_v43 = vmul.f32 0.01, %v9171_v8  ;;  %v4213_v30 = vpop.f32.mrb[20].mxu0  ;;  %v4968_v35 = vsel %vm4840_vm7, %v9138_v3, %v4904_v45  ;;  %v4970_v5 = vsel %vm4842_vm8, %v9170_v21, %v4906_v40  ;;  %5490 = vmatmul.mubr.bf16.gmra.mrb[44].mxu0 %v5011_v51 }
 0x3ed   : > { %v13101_v38 = vadd.f32 %v4213_v30, %v12939_v52  ;;  %v4215_v48 = vpop.f32.mrb[21].mxu0  ;;  %v4972_v36 = vsel %vm4844_vm9, %v9140_v33, %v4908_v53  ;;  %v4967_v41 = vsel %vm4839_vm10, %v9137_v54, %v4903_v7  ;;  %vm4846_vm13 = vcmp.gt.f32.partialorder %v9172_v18, 0.0  ;;  %5553 = vmatpush1.bf16.msra.mxu0 %v12872_v14 }
 0x3ee   : > { %v4973_v58 = vsel %vm4845_vm12, %v9171_v8, %v4909_v43  ;;  %v4778_v24 = vpop.f32.mrb[20].mxu1  ;;  %v9142_v9 = vadd.f32 %v4215_v48, %v12948_v27  ;;  %v4217_v29 = vpop.f32.mrb[22].mxu0  ;;  %v5016_v60 = vpack.c.bf16 %v4972_v36, %v4968_v35  ;;  %v4910_v49 = vmul.f32 0.01, %v9172_v18  ;;  %5554 = vmatprep.subr.bf16.mxu0 %v12876_v17 }
 0x3ef   : > { %v5017_v55 = vpack.c.bf16 %v4973_v58, %v13096_v37  ;;  %v13110_v30 = vadd.f32 %v4778_v24, %v12942_v62  ;;  %v4780_v3 = vpop.f32.mrb[21].mxu1  ;;  %v4219_v33 = vpop.f32.mrb[23].mxu0  ;;  %vm4847_vm14 = vcmp.gt.f32.partialorder %v13101_v38, 0.0  ;;  %v13116_v45 = vadd.f32 %v4217_v29, %v12939_v52 }
 0x3f0   : > { %v9174_v21 = vadd.f32 %v4780_v3, %v12952_v13  ;;  %v4782_v54 = vpop.f32.mrb[22].mxu1  ;;  %5499 = vmatprep.mubr.bf16.mxu0 %v5016_v60  ;;  %v4971_v7 = vsel %vm4843_vm11, %v9139_v47, %v4907_v25  ;;  %v13121_v51 = vmul.f32 0.01, %v13101_v38  ;;  %vm4848_vm15 = vcmp.gt.f32.partialorder %v9142_v9, 0.0 }
 0x3f1   : > { %v4912_v40 = vmul.f32 0.01, %v9142_v9  ;;  %v9144_v14 = vadd.f32 %v4219_v33, %v12948_v27  ;;  %v4784_v8 = vpop.f32.mrb[23].mxu1  ;;  %vm4849_vm0 = vcmp.gt.f32.partialorder %v13110_v30, 0.0  ;;  %v13126_v53 = vmul.f32 0.01, %v13110_v30  ;;  %5555 = vmatpush1.bf16.msra.mxu0 %v12880_v10 }
 0x3f2   : > { %vm4850_vm1 = vcmp.gt.f32.partialorder %v9174_v21, 0.0  ;;  %v13129_v37 = vadd.f32 %v4782_v54, %v12942_v62  ;;  %v4914_v47 = vmul.f32 0.01, %v9174_v21  ;;  %vm4851_vm2 = vcmp.gt.f32.partialorder %v13116_v45, 0.0  ;;  %5556 = vmatprep.subr.bf16.mxu0 %v12887_v44 }
 0x3f3   : > { %vm4852_vm3 = vcmp.gt.f32.partialorder %v9144_v14, 0.0  ;;  %v4916_v17 = vmul.f32 0.01, %v9144_v14  ;;  %v4915_v25 = vmul.f32 0.01, %v13116_v45  ;;  %v9176_v43 = vadd.f32 %v4784_v8, %v12952_v13 }
 0x3f4   : > { %v4974_v48 = vsel %vm4846_vm13, %v9172_v18, %v4910_v49  ;;  %v5015_v35 = vpack.c.bf16 %v4971_v7, %v4967_v41  ;;  %v4223_v36 = vpop.f32.mrb[24].mxu0  ;;  %v4976_v60 = vsel %vm4848_vm15, %v9142_v9, %v4912_v40  ;;  %vm4853_vm4 = vcmp.gt.f32.partialorder %v13129_v37, 0.0 }
 0x3f5   : > { %v5018_v58 = vpack.c.bf16 %v4974_v48, %v4970_v5  ;;  %v13138_v24 = vadd.f32 %v4223_v36, %v12939_v52  ;;  %v4225_v29 = vpop.f32.mrb[25].mxu0  ;;  %v4980_v3 = vsel %vm4852_vm3, %v9144_v14, %v4916_v17  ;;  %v4917_v10 = vmul.f32 0.01, %v13129_v37  ;;  %5557 = vmatpush1.bf16.msra.mxu0 %v12885_v15 }
 0x3f6   : > { %v4788_v33 = vpop.f32.mrb[24].mxu1  ;;  %v9146_v54 = vadd.f32 %v4225_v29, %v12948_v27  ;;  %v4227_v18 = vpop.f32.mrb[26].mxu0  ;;  %v5020_v41 = vpack.c.bf16 %v4980_v3, %v4976_v60  ;;  %vm4854_vm5 = vcmp.gt.f32.partialorder %v9176_v43, 0.0  ;;  %v4918_v49 = vmul.f32 0.01, %v9176_v43  ;;  %5500 = vmatmul.mubr.bf16.gmra.mrb[48].mxu0 %v5015_v35  ;;  %5558 = vmatprep.subr.bf16.mxu0 %v12893_v11 }
 0x3f7   : > { %5612 = vmatprep.mubr.bf16.mxu1 %v5018_v58  ;;  %v13145_v44 = vadd.f32 %v4788_v33, %v12942_v62  ;;  %v4790_v5 = vpop.f32.mrb[25].mxu1  ;;  %v13148_v9 = vadd.f32 %v4227_v18, %v12939_v52  ;;  %v4229_v7 = vpop.f32.mrb[27].mxu0  ;;  %v13152_v40 = vmul.f32 0.01, %v13138_v24  ;;  %v4978_v15 = vsel %vm4850_vm1, %v9174_v21, %v4914_v47 }
 0x3f8   : > { %5613 = vmatmul.mubr.bf16.vlgmr.msra.gmra.mrb[32].mxu1 %v5017_v55  ;;  %vm4856_vm6 = vcmp.gt.f32.partialorder %v9146_v54, 0.0  ;;  %v13155_v14 = vadd.f32 %v4790_v5, %v12952_v13  ;;  %v4792_v8 = vpop.f32.mrb[26].mxu1  ;;  %v9148_v17 = vadd.f32 %v4229_v7, %v12948_v27  ;;  %v4920_v35 = vmul.f32 0.01, %v9146_v54  ;;  %5509 = vmatprep.mubr.bf16.mxu0 %v5020_v41 }
 0x3f9   : > { %v13160_v48 = vmul.f32 0.01, %v13145_v44  ;;  %v13163_v36 = vmul.f32 0.01, %v13148_v9  ;;  %vm4855_vm7 = vcmp.gt.f32.partialorder %v13138_v24, 0.0  ;;  %v13172_v58 = vadd.f32 %v4792_v8, %v12942_v62  ;;  %v4794_v11 = vpop.f32.mrb[27].mxu1  ;;  %5559 = vmatpush1.bf16.msra.mxu0 %v12891_v16 }
 0x3fa   : > { %vm4858_vm8 = vcmp.gt.f32.partialorder %v13155_v14, 0.0  ;;  %v13169_v55 = vmul.f32 0.01, %v13155_v14  ;;  %vm4860_vm9 = vcmp.gt.f32.partialorder %v9148_v17, 0.0  ;;  %vm4857_vm10 = vcmp.gt.f32.partialorder %v13145_v44, 0.0  ;;  %5560 = vmatprep.subr.bf16.mxu0 %v12899_v2 }
 0x3fb   : > { %vm4859_vm11 = vcmp.gt.f32.partialorder %v13148_v9, 0.0  ;;  %v4924_v29 = vmul.f32 0.01, %v9148_v17  ;;  %v13177_v60 = vadd.f32 %v4794_v11, %v12952_v13  ;;  %v4982_v21 = vsel %vm4854_vm5, %v9176_v43, %v4918_v49 }
 0x3fc   : > { %v4975_v47 = vsel %vm4847_vm14, %v13101_v38, %v13121_v51  ;;  %vm4861_vm12 = vcmp.gt.f32.partialorder %v13172_v58, 0.0  ;;  %v13187_v3 = vmul.f32 0.01, %v13172_v58  ;;  %v5022_v33 = vpack.c.bf16 %v4982_v21, %v4978_v15  ;;  %v4233_v41 = vpop.f32.mrb[28].mxu0 }
 0x3fd   : > { %v4979_v18 = vsel %vm4851_vm2, %v13116_v45, %v4915_v25  ;;  %vm4862_vm13 = vcmp.gt.f32.partialorder %v13177_v60, 0.0  ;;  %v4926_v43 = vmul.f32 0.01, %v13177_v60  ;;  %v4977_v16 = vsel %vm4849_vm0, %v13110_v30, %v13126_v53  ;;  %v4235_v51 = vpop.f32.mrb[29].mxu0  ;;  %5561 = vmatpush1.bf16.msra.mxu0 %v12897_v23 }
 0x3fe   : > { %v5019_v38 = vpack.c.bf16 %v4979_v18, %v4975_v47  ;;  %5622 = vmatprep.mubr.bf16.mxu1 %v5022_v33  ;;  %v4981_v49 = vsel %vm4853_vm4, %v13129_v37, %v4917_v10  ;;  %v13203_v45 = vadd.f32 %v4233_v41, %v12939_v52  ;;  %v4798_v25 = vpop.f32.mrb[28].mxu1  ;;  %v9150_v5 = vadd.f32 %v4235_v51, %v12948_v27  ;;  %v4237_v7 = vpop.f32.mrb[30].mxu0 }
 0x3ff   : > { %v4984_v2 = vsel %vm4856_vm6, %v9146_v54, %v4920_v35  ;;  %v5021_v8 = vpack.c.bf16 %v4981_v49, %v4977_v16  ;;  %v13208_v15 = vadd.f32 %v4798_v25, %v12942_v62  ;;  %v4800_v30 = vpop.f32.mrb[29].mxu1  ;;  %v13211_v53 = vadd.f32 %v4237_v7, %v12939_v52  ;;  %v4239_v11 = vpop.f32.mrb[31].mxu0  ;;  %5562 = vmatprep.subr.bf16.mxu0 %v12905_v39 }
 0x400   : > { %5510 = vmatmul.mubr.bf16.gmra.mrb[52].mxu0 %v5019_v38  ;;  %v4988_v37 = vsel %vm4860_vm9, %v9148_v17, %v4924_v29  ;;  %vm4863_vm0 = vcmp.gt.f32.partialorder %v13203_v45, 0.0  ;;  %v4927_v10 = vmul.f32 0.01, %v13203_v45  ;;  %vm4864_vm1 = vcmp.gt.f32.partialorder %v9150_v5, 0.0  ;;  %v4802_v17 = vpop.f32.mrb[30].mxu1 }
 0x401   : > { %v4928_v54 = vmul.f32 0.01, %v9150_v5  ;;  %5623 = vmatmul.mubr.bf16.gmra.mrb[36].mxu1 %v5021_v8  ;;  %vm4865_vm5 = vcmp.gt.f32.partialorder %v13208_v15, 0.0  ;;  %v4929_v52 = vmul.f32 0.01, %v13208_v15  ;;  %v9182_v23 = vadd.f32 %v4800_v30, %v12952_v13  ;;  %v4804_v39 = vpop.f32.mrb[31].mxu1  ;;  %5563 = vmatpush1.bf16.msra.mxu0 %v12903_v42 }
 0x402   : > { %vm4867_vm6 = vcmp.gt.f32.partialorder %v13211_v53, 0.0  ;;  %v4931_v35 = vmul.f32 0.01, %v13211_v53  ;;  %v9183_v29 = vadd.f32 %v4802_v17, %v12942_v62  ;;  %v9152_v21 = vadd.f32 %v4239_v11, %v12948_v27  ;;  %5564 = vmatprep.subr.bf16.mxu0 %v12911_v31  ;;  %v14766_v30 = vld [vmem:[#allocation25_spill] sm:$0xff]  ;;  %v14776_v17 = vld [vmem:[#allocation36_spill] sm:$0xff] }
 0x403   : > { %v5024_v47 = vpack.c.bf16 %v4988_v37, %v4984_v2  ;;  %vm4833_vm4 = vcmp.gt.f32.partialorder %v13041_v59, 0.0  ;;  %vm4837_vm3 = vcmp.gt.f32.partialorder %v13070_v61, 0.0  ;;  %vm4866_vm15 = vcmp.gt.f32.partialorder %v9182_v23, 0.0  ;;  %v14769_v37 = vld [vmem:[#allocation22_spill] sm:$0xff] }
 0x404   : > { %v4930_v33 = vmul.f32 0.01, %v9182_v23  ;;  %v9184_v18 = vadd.f32 %v4804_v39, %v12952_v13  ;;  %v4986_v41 = vsel %vm4858_vm8, %v13155_v14, %v13169_v55  ;;  %vm4869_vm2 = vcmp.gt.f32.partialorder %v9183_v29, 0.0  ;;  %v10279_v39 = vld [vmem:[%s14778_s12 + $0x50] sm:$0xff]  }
 0x405   : > { %v4933_v62 = vmul.f32 0.01, %v9183_v29  ;;  %vm4868_vm9 = vcmp.gt.f32.partialorder %v9152_v21, 0.0  ;;  %v4932_v27 = vmul.f32 0.01, %v9152_v21  ;;  %5519 = vmatprep.mubr.bf16.mxu0 %v5024_v47  ;;  %v4990_v13 = vsel %vm4862_vm13, %v13177_v60, %v4926_v43  ;;  %5565 = vmatpush1.bf16.msra.mxu0 %v12909_v56  ;;  %v10280_v47 = vld [vmem:[%s14778_s12 + $0x10] sm:$0xff]  }
 0x406   : > { %vm4870_vm14 = vcmp.gt.f32.partialorder %v9184_v18, 0.0  ;;  %v4934_v38 = vmul.f32 0.01, %v9184_v18  ;;  %v4983_v14 = vsel %vm4855_vm7, %v13138_v24, %v13152_v40  ;;  %v5026_v55 = vpack.c.bf16 %v4990_v13, %v4986_v41  ;;  %5566 = vmatprep.subr.bf16.mxu0 %v12917_v34  ;;  %v10283_v41 = vld [vmem:[%s14778_s12 + $0x60] sm:$0xff]   ;;  %v10287_v13 = vld [vmem:[%s14778_s12 + $0x70] sm:$0xff]  }
 0x407   : > { %v4987_v42 = vsel %vm4859_vm11, %v13148_v9, %v13163_v36  ;;  %v4985_v31 = vsel %vm4857_vm10, %v13145_v44, %v13160_v48  ;;  %v4989_v60 = vsel %vm4861_vm12, %v13172_v58, %v13187_v3  ;;  %v4992_v24 = vsel %vm4864_vm1, %v9150_v5, %v4928_v54 }
 0x408   : > { %v5023_v43 = vpack.c.bf16 %v4987_v42, %v4983_v14  ;;  %v5025_v16 = vpack.c.bf16 %v4989_v60, %v4985_v31  ;;  %v4996_v40 = vsel %vm4868_vm9, %v9152_v21, %v4932_v27  ;;  %v4901_v51 = vmul.f32 0.01, %v13070_v61  ;;  %5632 = vmatprep.mubr.bf16.mxu1 %v5026_v55  ;;  %v10278_v21 = vld [vmem:[%s14778_s12 + $0x8] sm:$0xff]   ;;  %v10288_v14 = vld [vmem:[%s14778_s12 + $0x30] sm:$0xff]   ;;  %v10289_v55 = vld [vmem:[%s14778_s12 + $0x78] sm:$0xff]  }
 0x409   : > { %v5028_v9 = vpack.c.bf16 %v4996_v40, %v4992_v24  ;;  %v4994_v36 = vsel %vm4866_vm15, %v9182_v23, %v4930_v33  ;;  %v4998_v44 = vsel %vm4870_vm14, %v9184_v18, %v4934_v38  ;;  %v4902_v48 = vmul.f32 0.01, %v13074_v12  ;;  %5567 = vmatpush1.bf16.msra.mxu0 %v12915_v6  ;;  %v14764_v6 = vld [vmem:[#allocation49_spill] sm:$0xff]  ;;  %v10281_v33 = vld [vmem:[%s14778_s12 + $0x58] sm:$0xff]   ;;  %v8510_v60 = vld [vmem:[%s14780_s19 + $0x40] sm:$0xff] }
 0x40a   : > { %5520 = vmatmul.mubr.bf16.gmra.mrb[56].mxu0 %v5023_v43  ;;  %5633 = vmatmul.mubr.bf16.gmra.mrb[40].mxu1 %v5025_v16  ;;  %v5030_v58 = vpack.c.bf16 %v4998_v44, %v4994_v36  ;;  %v4991_v3 = vsel %vm4863_vm0, %v13203_v45, %v4927_v10  ;;  %v4995_v49 = vsel %vm4867_vm6, %v13211_v53, %v4931_v35  ;;  %vm4838_vm7 = vcmp.gt.f32.partialorder %v13074_v12, 0.0  ;;  %v14771_v10 = vld [vmem:[#allocation30_spill] sm:$0xff]  ;;  %v14775_v23 = vld [vmem:[#allocation33_spill] sm:$0xff]  ;;  %v10276_v35 = vld [vmem:[%s14778_s12] sm:$0xff]  }
 0x40b   : > { %5529 = vmatprep.mubr.bf16.mxu0 %v5028_v9  ;;  %v5027_v56 = vpack.c.bf16 %v4995_v49, %v4991_v3  ;;  %v4993_v25 = vsel %vm4865_vm5, %v13208_v15, %v4929_v52  ;;  %v4997_v5 = vsel %vm4869_vm2, %v9183_v29, %v4933_v62  ;;  %v5006_v45 = vpack.c.bf16 %v13091_v4, %v13082_v50  ;;  %v14761_v4 = vld [vmem:[#allocation40_spill] sm:$0xff]  ;;  %v14774_v52 = vld [vmem:[#allocation29_spill] sm:$0xff]  ;;  %v10282_v18 = vld [vmem:[%s14778_s12 + $0x18] sm:$0xff]  }
 0x40c   : > { %5642 = vmatprep.mubr.bf16.mxu1 %v5030_v58  ;;  %v5029_v7 = vpack.c.bf16 %v4997_v5, %v4993_v25  ;;  %vm14757_vm8 = vcmp.gt.f32.partialorder %v12974_v22, 0.0  ;;  %vm14758_vm10 = vcmp.gt.f32.partialorder %v12988_v26, 0.0  ;;  %vm14759_vm11 = vcmp.gt.f32.partialorder %v13018_v0, 0.0  ;;  %v10277_v29 = vld [vmem:[%s14778_s12 + $0x48] sm:$0xff]   ;;  %v10284_v62 = vld [vmem:[%s14778_s12 + $0x20] sm:$0xff]   ;;  %v10290_v42 = vld [vmem:[%s14778_s12 + $0x38] sm:$0xff]  }
 0x40d   : > { %v4945_v2 = vsel %vm14757_vm8, %v12974_v22, %v12982_v46  ;;  %v4949_v34 = vsel %vm14758_vm10, %v12988_v26, %v13011_v63  ;;  %v4954_v15 = vsel %vm14759_vm11, %v13018_v0, %v13050_v1  ;;  %vm14760_vm12 = vcmp.gt.f32.partialorder %v13036_v20, 0.0  ;;  %v14763_v22 = vld [vmem:[#allocation23_spill] sm:$0xff]  ;;  %v10285_v27 = vld [vmem:[%s14778_s12 + $0x68] sm:$0xff]   ;;  %v5999_v40 = vld [vmem:[%s13396_s1 + $0x10] sm:$0xff] }
 0x40e   : > { %v5005_v8 = vpack.c.bf16 %v4949_v34, %v4945_v2  ;;  %v4958_v50 = vsel %vm14760_vm12, %v13036_v20, %v13056_v57  ;;  %vm14762_vm13 = vcmp.gt.f32.partialorder %v13005_v32, 0.0  ;;  %5568 = vmatprep.subr.bf16.mxu0 %v14763_v22  ;;  %vm14765_vm14 = vcmp.gt.f32.partialorder %v13033_v28, 0.0  ;;  %v10286_v38 = vld [vmem:[%s14778_s12 + $0x28] sm:$0xff]   ;;  %v8509_v31 = vld [vmem:[%s14780_s19 + $0x38] sm:$0xff]  ;;  %v5997_v16 = vld [vmem:[%s13396_s1] sm:$0xff] }
 0x40f   : > { %v4953_v46 = vsel %vm14762_vm13, %v13005_v32, %v14761_v4  ;;  %v5010_v26 = vpack.c.bf16 %v4958_v50, %v4954_v15  ;;  %v4957_v63 = vsel %vm14765_vm14, %v13033_v28, %v14764_v6  ;;  %vm14767_vm15 = vcmp.gt.f32.partialorder %v13044_v19, 0.0  ;;  %v14768_v32 = vld [vmem:[#allocation24_spill] sm:$0xff]  ;;  %5569 = vmatpush1.bf16.msra.mxu0 %v14769_v37  ;;  %6029 = vrot.lane.b32.xlu0 %v5997_v16, %s10804_s16  ;;  %v6000_v9 = vld [vmem:[%s13396_s1 + $0x18] sm:$0xff]  ;;  %v6003_v36 = vld [vmem:[%s13396_s1 + $0x30] sm:$0xff] }
 0x410   : > { %v4962_v0 = vsel %vm14767_vm15, %v13044_v19, %v14766_v30  ;;  %v4966_v20 = vsel %vm4838_vm7, %v13074_v12, %v4902_v48  ;;  %v5009_v1 = vpack.c.bf16 %v4957_v63, %v4953_v46  ;;  %v4961_v53 = vsel %vm4833_vm4, %v13041_v59, %v14768_v32  ;;  %v14770_v19 = vld [vmem:[#allocation39_spill] sm:$0xff]  ;;  %v14773_v12 = vld [vmem:[#allocation26_spill] sm:$0xff]  ;;  %v5998_v24 = vld [vmem:[%s13396_s1 + $0x8] sm:$0xff] }
 0x411   : > { %v5014_v57 = vpack.c.bf16 %v4966_v20, %v4962_v0  ;;  %v4965_v28 = vsel %vm4837_vm3, %v13070_v61, %v4901_v51  ;;  %v14772_v54 = vpack.c.bf16 %v14770_v19, %v14771_v10  ;;  %5570 = vmatprep.subr.bf16.mxu0 %v14773_v12  ;;  %v14777_v59 = vpack.c.bf16 %v14775_v23, %v14776_v17  ;;  %v10275_v61 = vld [vmem:[%s14778_s12 + $0x40] sm:$0xff]   ;;  %v6002_v44 = vld [vmem:[%s13396_s1 + $0x28] sm:$0xff]  ;;  %v6004_v3 = vld [vmem:[%s13396_s1 + $0x38] sm:$0xff] }
 0x412   : > { %v5013_v11 = vpack.c.bf16 %v4965_v28, %v4961_v53  ;;  %5530 = vmatmul.mubr.bf16.gmra.mrb[60].mxu0 %v5027_v56  ;;  %5643 = vmatmul.mubr.bf16.gmra.mrb[44].mxu1 %v5029_v7  ;;  %v13385_v43 = vpack.c.bf16 %v8510_v60, %v8509_v31  ;;  %v6001_v51 = vld [vmem:[%s13396_s1 + $0x20] sm:$0xff]  ;;  %v6007_v49 = vld [vmem:[%s13396_s1 + $0x50] sm:$0xff]  ;;  %v6006_v2 = vld [vmem:[%s13396_s1 + $0x48] sm:$0xff] }
 0x413   : > { %5572 = vmatprep.mubr.bf16.mxu0 %v14772_v54  ;;  %5571 = vmatpush1.bf16.msra.mxu0 %v14774_v52  ;;  %v6005_v48 = vld [vmem:[%s13396_s1 + $0x40] sm:$0xff]  ;;  %v14782_v56 = vld [vmem:[#allocation21_spill] sm:$0xff]  ;;  %v6008_v20 = vld [vmem:[%s13396_s1 + $0x58] sm:$0xff] }
 0x414   : > { %8626 = vmatprep.subr.bf16.mxu1 %v10275_v61  ;;  %6031 = vrot.lane.b32.xlu1 %v5998_v24, %s10804_s16  ;;  %v5095_v58 = vld [vmem:[#allocation9] sm:$0x3]  ;;  %v14783_v25 = vsub.s32 0, %v14782_v56  ;;  %v14784_v7 = vsub.s32 1, %v14782_v56  ;;  %v6010_v54 = vld [vmem:[%s13396_s1 + $0x68] sm:$0xff] }
 0x415   : > { %8627 = vmatpush3.bf16.msra.mxu1 %v10276_v35  ;;  %6037 = vrot.lane.b32.xlu0 %v6001_v51, %s10804_s16  ;;  %v6009_v34 = vld [vmem:[%s13396_s1 + $0x60] sm:$0xff] }
 0x416   : > { %8628 = vmatprep.subr.bf16.mxu1 %v10277_v29  ;;  %v13418_v5 = vrot.slane %v5095_v58, %v14783_v25 }
 0x418   : > { %6033 = vrot.lane.b32.xlu1 %v5999_v40, %s10804_s16 }
 0x419   : > { %8629 = vmatpush3.bf16.msra.mxu1 %v10278_v21  ;;  %6041 = vrot.lane.b32.xlu0 %v6003_v36, %s10804_s16 }
 0x41a   : > { %5573 = vmatmul.mubr.bf16.vlgmr.msra.gmra.mrb[32].mxu0 %v14777_v59  ;;  %8630 = vmatprep.subr.bf16.mxu1 %v10279_v39 }
 0x41b   : > { %5582 = vmatprep.mubr.bf16.mxu0 %v5006_v45  ;;  %v13422_v45 = vrot.slane %v5095_v58, %v14784_v7 }
 0x41c   : > { %6035 = vrot.lane.b32.xlu1 %v6000_v9, %s10804_s16 }
 0x41d   : > { %8631 = vmatpush3.bf16.msra.mxu1 %v10280_v47  ;;  %6045 = vrot.lane.b32.xlu0 %v6005_v48, %s10804_s16 }
 0x41e   : > { %8632 = vmatprep.subr.bf16.mxu1 %v10281_v33 }
 0x420   : > { %6039 = vrot.lane.b32.xlu1 %v6002_v44, %s10804_s16 }
 0x421   : > { %8633 = vmatpush3.bf16.msra.mxu1 %v10282_v18  ;;  %6049 = vrot.lane.b32.xlu0 %v6007_v49, %s10804_s16 }
 0x422   : > { %5583 = vmatmul.mubr.bf16.gmra.mrb[36].mxu0 %v5005_v8  ;;  %8634 = vmatprep.subr.bf16.mxu1 %v10283_v41 }
 0x423   : > { %5592 = vmatprep.mubr.bf16.mxu0 %v5010_v26 }
 0x424   : > { %6043 = vrot.lane.b32.xlu1 %v6004_v3, %s10804_s16 }
 0x425   : > { %8635 = vmatpush3.bf16.msra.mxu1 %v10284_v62  ;;  %6053 = vrot.lane.b32.xlu0 %v6009_v34, %s10804_s16 }
 0x426   : > { %8636 = vmatprep.subr.bf16.mxu1 %v10285_v27 }
 0x428   : > { %6047 = vrot.lane.b32.xlu1 %v6006_v2, %s10804_s16 }
 0x429   : > { %8637 = vmatpush3.bf16.msra.mxu1 %v10286_v38 }
 0x42a   : > { %5593 = vmatmul.mubr.bf16.gmra.mrb[40].mxu0 %v5009_v1  ;;  %8638 = vmatprep.subr.bf16.mxu1 %v10287_v13  ;;  %v6011_v1 = vld [vmem:[%s13396_s1 + $0x70] sm:$0xff]  ;;  %v6012_v13 = vld [vmem:[%s13396_s1 + $0x78] sm:$0xff]  ;;  %s14964_s1 = sld [smem:[#allocation56_spill]] }
 0x42b   : > { %5602 = vmatprep.mubr.bf16.mxu0 %v5014_v57  ;;  %6057 = vrot.lane.b32.xlu0 %v6011_v1, %s10804_s16 }
 0x42c   : > { %6051 = vrot.lane.b32.xlu1 %v6008_v20, %s10804_s16 }
 0x42d   : > { %8639 = vmatpush3.bf16.msra.mxu1 %v10288_v14 }
 0x42e   : > { %8640 = vmatprep.subr.bf16.mxu1 %v10289_v55 }
 0x430   : > { %6055 = vrot.lane.b32.xlu1 %v6010_v54, %s10804_s16 }
 0x431   : > { %8641 = vmatpush3.bf16.msra.mxu1 %v10290_v42 }
 0x432   : > { %5603 = vmatmul.mubr.bf16.gmra.mrb[44].mxu0 %v5013_v11  ;;  %9030 = vmatprep.subr.bf16.mxu1 %v13385_v43 }
 0x434   : > { %6059 = vrot.lane.b32.xlu1 %v6012_v13, %s10804_s16  ;;  %s14449_s16 = scalar_lea.vmem %s14964_s1, %s8105_s25 }
 0x4c9   : > { %v5501_v8 = vpop.f32.mrb[48].mxu0 }
 0x4ca   : > { %v5502_v15 = vadd.f32 %v5501_v8, %v13418_v5  ;;  %v5503_v4 = vpop.f32.mrb[49].mxu0 }
 0x4cb   : > { %v5614_v50 = vpop.f32.mrb[32].mxu1  ;;  %v5504_v46 = vadd.f32 %v5503_v4, %v13422_v45  ;;  %v5505_v26 = vpop.f32.mrb[50].mxu0 }
 0x4cc   : > { %v5616_v22 = vpop.f32.mrb[33].mxu1  ;;  %v5615_v6 = vadd.f32 %v5614_v50, %v5502_v15  ;;  %v5506_v63 = vadd.f32 %v5505_v26, %v13418_v5  ;;  %v5507_v0 = vpop.f32.mrb[51].mxu0 }
 0x4cd   : > { %v5618_v30 = vpop.f32.mrb[34].mxu1  ;;  %v5617_v57 = vadd.f32 %v5616_v22, %v5504_v46  ;;  %v5508_v32 = vadd.f32 %v5507_v0, %v13422_v45 }
 0x4ce   : > { %v5620_v53 = vpop.f32.mrb[35].mxu1  ;;  %v5701_v28 = vmul.f32 0.01, %v5615_v6  ;;  %v5619_v11 = vadd.f32 %v5618_v30, %v5506_v63  ;;  %vm5669_vm0 = vcmp.gt.f32.partialorder %v5615_v6, 0.0 }
 0x4cf   : > { %v5702_v37 = vmul.f32 0.01, %v5617_v57  ;;  %v5621_v19 = vadd.f32 %v5620_v53, %v5508_v32  ;;  %vm5670_vm1 = vcmp.gt.f32.partialorder %v5617_v57, 0.0 }
 0x4d0   : > { %vm5671_vm2 = vcmp.gt.f32.partialorder %v5619_v11, 0.0  ;;  %v5703_v10 = vmul.f32 0.01, %v5619_v11  ;;  %v13440_v59 = vsel %vm5669_vm0, %v5615_v6, %v5701_v28 }
 0x4d1   : > { %vm5672_vm3 = vcmp.gt.f32.partialorder %v5621_v19, 0.0  ;;  %v5704_v12 = vmul.f32 0.01, %v5621_v19  ;;  %v13445_v39 = vsel %vm5670_vm1, %v5617_v57, %v5702_v37 }
 0x4d2   : > { %v13442_v61 = vsel %vm5671_vm2, %v5619_v11, %v5703_v10 }
 0x4d3   : > { %v5511_v52 = vpop.f32.mrb[52].mxu0  ;;  %v13447_v47 = vsel %vm5672_vm3, %v5621_v19, %v5704_v12  ;;  %v5757_v33 = vpack.c.bf16 %v13442_v61, %v13440_v59  ;;  %v8515_v61 = vld [vmem:[%s14780_s19 + $0x68] sm:$0xf] }
 0x4d4   : > { %v5512_v23 = vadd.f32 %v5511_v52, %v13418_v5  ;;  %v5513_v17 = vpop.f32.mrb[53].mxu0  ;;  %v5624_v35 = vpop.f32.mrb[36].mxu1  ;;  %v5758_v38 = vpack.c.bf16 %v13447_v47, %v13445_v39  ;;  %v6497_v39 = vld [vmem:[%s14780_s19] sm:$0xff]  ;;  %v6498_v47 = vld [vmem:[%s14780_s19 + $0x8] sm:$0xff] }
 0x4d5   : > { %v5514_v29 = vadd.f32 %v5513_v17, %v13422_v45  ;;  %v5515_v21 = vpop.f32.mrb[54].mxu0  ;;  %v5626_v41 = vpop.f32.mrb[37].mxu1 }
 0x4d6   : > { %v5625_v18 = vadd.f32 %v5624_v35, %v5512_v23  ;;  %v5516_v62 = vadd.f32 %v5515_v21, %v13418_v5  ;;  %v5517_v27 = vpop.f32.mrb[55].mxu0  ;;  %v5628_v55 = vpop.f32.mrb[38].mxu1 }
 0x4d7   : > { %v5627_v14 = vadd.f32 %v5626_v41, %v5514_v29  ;;  %v5518_v42 = vadd.f32 %v5517_v27, %v13422_v45  ;;  %v5630_v16 = vpop.f32.mrb[39].mxu1 }
 0x4d8   : > { %v5705_v31 = vmul.f32 0.01, %v5625_v18  ;;  %v5629_v60 = vadd.f32 %v5628_v55, %v5516_v62  ;;  %vm5673_vm4 = vcmp.gt.f32.partialorder %v5625_v18, 0.0 }
 0x4d9   : > { %v5706_v24 = vmul.f32 0.01, %v5627_v14  ;;  %v5631_v40 = vadd.f32 %v5630_v16, %v5518_v42  ;;  %vm5674_vm5 = vcmp.gt.f32.partialorder %v5627_v14, 0.0 }
 0x4da   : > { %vm5675_vm6 = vcmp.gt.f32.partialorder %v5629_v60, 0.0  ;;  %v5707_v51 = vmul.f32 0.01, %v5629_v60  ;;  %v13458_v36 = vsel %vm5673_vm4, %v5625_v18, %v5705_v31 }
 0x4db   : > { %vm5676_vm9 = vcmp.gt.f32.partialorder %v5631_v40, 0.0  ;;  %v5708_v9 = vmul.f32 0.01, %v5631_v40  ;;  %v13462_v3 = vsel %vm5674_vm5, %v5627_v14, %v5706_v24 }
 0x4dc   : > { %v13460_v44 = vsel %vm5675_vm6, %v5629_v60, %v5707_v51 }
 0x4dd   : > { %v5521_v48 = vpop.f32.mrb[56].mxu0  ;;  %v5634_v58 = vpop.f32.mrb[40].mxu1  ;;  %v13464_v49 = vsel %vm5676_vm9, %v5631_v40, %v5708_v9  ;;  %v5759_v25 = vpack.c.bf16 %v13460_v44, %v13458_v36  ;;  %v13566_v36 = vld [vmem:[#allocation10] ss:$0 sm:$0xff] }
 0x4de   : > { %v5522_v7 = vadd.f32 %v5521_v48, %v13418_v5  ;;  %v5523_v2 = vpop.f32.mrb[57].mxu0  ;;  %v5636_v34 = vpop.f32.mrb[41].mxu1  ;;  %v5760_v8 = vpack.c.bf16 %v13464_v49, %v13462_v3 }
 0x4df   : > { %v5524_v15 = vadd.f32 %v5523_v2, %v13422_v45  ;;  %v5525_v50 = vpop.f32.mrb[58].mxu0  ;;  %v5638_v4 = vpop.f32.mrb[42].mxu1 }
 0x4e0   : > { %v5635_v46 = vadd.f32 %v5634_v58, %v5522_v7  ;;  %v5526_v22 = vadd.f32 %v5525_v50, %v13418_v5  ;;  %v5527_v26 = vpop.f32.mrb[59].mxu0  ;;  %v5640_v6 = vpop.f32.mrb[43].mxu1 }
 0x4e1   : > { %v5637_v63 = vadd.f32 %v5636_v34, %v5524_v15  ;;  %v5528_v30 = vadd.f32 %v5527_v26, %v13422_v45  ;;  %v6032_v3 = vpop.permute.xlu1 %6031 }
 0x4e2   : > { %v5709_v0 = vmul.f32 0.01, %v5635_v46  ;;  %v5639_v20 = vadd.f32 %v5638_v4, %v5526_v22  ;;  %vm5677_vm7 = vcmp.gt.f32.partialorder %v5635_v46, 0.0 }
 0x4e3   : > { %v5710_v1 = vmul.f32 0.01, %v5637_v63  ;;  %v5641_v57 = vadd.f32 %v5640_v6, %v5528_v30  ;;  %vm5678_vm8 = vcmp.gt.f32.partialorder %v5637_v63, 0.0 }
 0x4e4   : > { %vm5679_vm10 = vcmp.gt.f32.partialorder %v5639_v20, 0.0  ;;  %v5711_v32 = vmul.f32 0.01, %v5639_v20  ;;  %v13475_v54 = vsel %vm5677_vm7, %v5635_v46, %v5709_v0 }
 0x4e5   : > { %vm5680_vm11 = vcmp.gt.f32.partialorder %v5641_v57, 0.0  ;;  %v5712_v53 = vmul.f32 0.01, %v5641_v57  ;;  %v5531_v28 = vpop.f32.mrb[60].mxu0  ;;  %v5644_v11 = vpop.f32.mrb[44].mxu1  ;;  %v13480_v35 = vsel %vm5678_vm8, %v5637_v63, %v5710_v1 }
 0x4e6   : > { %v5532_v37 = vadd.f32 %v5531_v28, %v13418_v5  ;;  %v5533_v19 = vpop.f32.mrb[61].mxu0  ;;  %v5646_v10 = vpop.f32.mrb[45].mxu1  ;;  %v13477_v12 = vsel %vm5679_vm10, %v5639_v20, %v5711_v32  ;;  %v8511_v32 = vld [vmem:[%s14780_s19 + $0x48] sm:$0xff] }
 0x4e7   : > { %v5534_v52 = vadd.f32 %v5533_v19, %v13422_v45  ;;  %v5535_v23 = vpop.f32.mrb[62].mxu0  ;;  %v5648_v17 = vpop.f32.mrb[46].mxu1  ;;  %v13482_v29 = vsel %vm5680_vm11, %v5641_v57, %v5712_v53  ;;  %v5761_v21 = vpack.c.bf16 %v13477_v12, %v13475_v54  ;;  %v8512_v53 = vld [vmem:[%s14780_s19 + $0x50] sm:$0xff]  ;;  %v7268_v12 = vld [vmem:[#allocation13 + $0x30] sm:$0xff] }
 0x4e8   : > { %v5645_v18 = vadd.f32 %v5644_v11, %v5532_v37  ;;  %v5536_v41 = vadd.f32 %v5535_v23, %v13418_v5  ;;  %v5537_v62 = vpop.f32.mrb[63].mxu0  ;;  %v5650_v27 = vpop.f32.mrb[47].mxu1  ;;  %v5762_v13 = vpack.c.bf16 %v13482_v29, %v13480_v35  ;;  %v7267_v54 = vld [vmem:[#allocation13 + $0x28] sm:$0xff] }
 0x4e9   : > { %v5647_v14 = vadd.f32 %v5646_v10, %v5534_v52  ;;  %v5538_v55 = vadd.f32 %v5537_v62, %v13422_v45  ;;  %v6030_v29 = vpop.permute.xlu0 %6029 }
 0x4ea   : > { %v5713_v42 = vmul.f32 0.01, %v5645_v18  ;;  %v5649_v31 = vadd.f32 %v5648_v17, %v5536_v41  ;;  %vm5681_vm12 = vcmp.gt.f32.partialorder %v5645_v18, 0.0  ;;  %v9033_v41 = vpack.c.bf16 %v8512_v53, %v8511_v32 }
 0x4eb   : > { %v5714_v60 = vmul.f32 0.01, %v5647_v14  ;;  %v5651_v16 = vadd.f32 %v5650_v27, %v5538_v55  ;;  %vm5682_vm13 = vcmp.gt.f32.partialorder %v5647_v14, 0.0 }
 0x4ec   : > { %vm5683_vm14 = vcmp.gt.f32.partialorder %v5649_v31, 0.0  ;;  %v5715_v24 = vmul.f32 0.01, %v5649_v31  ;;  %v13491_v58 = vsel %vm5681_vm12, %v5645_v18, %v5713_v42 }
 0x4ed   : > { %vm5684_vm15 = vcmp.gt.f32.partialorder %v5651_v16, 0.0  ;;  %v5716_v40 = vmul.f32 0.01, %v5651_v16  ;;  %v5574_v51 = vpop.f32.mrb[32].mxu0  ;;  %v13496_v15 = vsel %vm5682_vm13, %v5647_v14, %v5714_v60 }
 0x4ee   : > { %v9185_v9 = vadd.f32 %v5574_v51, %v13418_v5  ;;  %v5576_v48 = vpop.f32.mrb[33].mxu0  ;;  %v13493_v7 = vsel %vm5683_vm14, %v5649_v31, %v5715_v24 }
 0x4ef   : > { %v9186_v2 = vadd.f32 %v5576_v48, %v13422_v45  ;;  %v5578_v34 = vpop.f32.mrb[34].mxu0  ;;  %v13498_v50 = vsel %vm5684_vm15, %v5651_v16, %v5716_v40  ;;  %v5763_v4 = vpack.c.bf16 %v13493_v7, %v13491_v58 }
 0x4f0   : > { %v5685_v46 = vmul.f32 0.01, %v9185_v9  ;;  %v9187_v22 = vadd.f32 %v5578_v34, %v13418_v5  ;;  %v5580_v26 = vpop.f32.mrb[35].mxu0  ;;  %v5764_v6 = vpack.c.bf16 %v13498_v50, %v13496_v15  ;;  %vm5653_vm0 = vcmp.gt.f32.partialorder %v9185_v9, 0.0  ;;  %v6499_v15 = vld [vmem:[%s14780_s19 + $0x10] sm:$0xff]  ;;  %v6500_v50 = vld [vmem:[%s14780_s19 + $0x18] sm:$0xff] }
 0x4f1   : > { %v5686_v63 = vmul.f32 0.01, %v9186_v2  ;;  %v9188_v30 = vadd.f32 %v5580_v26, %v13422_v45  ;;  %vm5654_vm1 = vcmp.gt.f32.partialorder %v9186_v2, 0.0 }
 0x4f2   : > { %vm5655_vm2 = vcmp.gt.f32.partialorder %v9187_v22, 0.0  ;;  %v5687_v0 = vmul.f32 0.01, %v9187_v22  ;;  %v5717_v1 = vsel %vm5653_vm0, %v9185_v9, %v5685_v46  ;;  %vm6561_vm0 = vcmask 1043456  }
 0x4f3   : > { %vm5656_vm3 = vcmp.gt.f32.partialorder %v9188_v30, 0.0  ;;  %v5688_v20 = vmul.f32 0.01, %v9188_v30  ;;  %v5718_v37 = vsel %vm5654_vm1, %v9186_v2, %v5686_v63  ;;  %vm14568_vm1 = vcmask 261120  }
 0x4f4   : > { %v5719_v57 = vsel %vm5655_vm2, %v9187_v22, %v5687_v0  ;;  %vm6512_vm2 = vcmask 424960  }
 0x4f5   : > { %v5749_v28 = vpack.c.bf16 %v5719_v57, %v5717_v1  ;;  %v5584_v11 = vpop.f32.mrb[36].mxu0  ;;  %v5720_v19 = vsel %vm5656_vm3, %v9188_v30, %v5688_v20  ;;  %vm14567_vm3 = vcmp.lt.s32.totalorder %v14782_v56, 1 }
 0x4f6   : > { %v9189_v10 = vadd.f32 %v5584_v11, %v13418_v5  ;;  %v5586_v52 = vpop.f32.mrb[37].mxu0  ;;  %v5750_v23 = vpack.c.bf16 %v5720_v19, %v5718_v37 }
 0x4f7   : > { %v9190_v17 = vadd.f32 %v5586_v52, %v13422_v45  ;;  %v5588_v18 = vpop.f32.mrb[38].mxu0 }
 0x4f8   : > { %v5689_v62 = vmul.f32 0.01, %v9189_v10  ;;  %v9191_v27 = vadd.f32 %v5588_v18, %v13418_v5  ;;  %v5590_v14 = vpop.f32.mrb[39].mxu0  ;;  %5932 = vmatprep.mubr.bf16.mxu1 %v5750_v23  ;;  %vm5657_vm4 = vcmp.gt.f32.partialorder %v9189_v10, 0.0 }
 0x4f9   : > { %v5690_v55 = vmul.f32 0.01, %v9190_v17  ;;  %v9192_v42 = vadd.f32 %v5590_v14, %v13422_v45  ;;  %5933 = vmatmul.mubr.bf16.vlgmr.msra.gmra.mrb[48].mxu1 %v5749_v28  ;;  %vm5658_vm5 = vcmp.gt.f32.partialorder %v9190_v17, 0.0 }
 0x4fa   : > { %vm5659_vm6 = vcmp.gt.f32.partialorder %v9191_v27, 0.0  ;;  %v5691_v31 = vmul.f32 0.01, %v9191_v27  ;;  %9032 = vmatpush3.bf16.msra.mxu1 %v13385_v43  ;;  %v5721_v16 = vsel %vm5657_vm4, %v9189_v10, %v5689_v62  ;;  %vm14564_vm4 = vcmp.lt.s32.totalorder %v14782_v56, 7 }
 0x4fb   : > { %vm5660_vm9 = vcmp.gt.f32.partialorder %v9192_v42, 0.0  ;;  %v5692_v60 = vmul.f32 0.01, %v9192_v42  ;;  %9034 = vmatprep.subr.bf16.mxu1 %v9033_v41  ;;  %v5722_v51 = vsel %vm5658_vm5, %v9190_v17, %v5690_v55 }
 0x4fc   : > { %v5723_v24 = vsel %vm5659_vm6, %v9191_v27, %v5691_v31 }
 0x4fd   : > { %v5594_v40 = vpop.f32.mrb[40].mxu0  ;;  %v5724_v9 = vsel %vm5660_vm9, %v9192_v42, %v5692_v60  ;;  %v5751_v48 = vpack.c.bf16 %v5723_v24, %v5721_v16 }
 0x4fe   : > { %v9193_v2 = vadd.f32 %v5594_v40, %v13418_v5  ;;  %v5596_v34 = vpop.f32.mrb[41].mxu0  ;;  %v5752_v46 = vpack.c.bf16 %v5724_v9, %v5722_v51  ;;  %9036 = vmatpush3.bf16.msra.mxu1 %v9033_v41 }
 0x4ff   : > { %v9194_v22 = vadd.f32 %v5596_v34, %v13422_v45  ;;  %v5598_v26 = vpop.f32.mrb[42].mxu0  ;;  %v9045_v34 = vpack.c.bf16 %v6500_v50, %v6499_v15 }
 0x500   : > { %v5693_v63 = vmul.f32 0.01, %v9193_v2  ;;  %v9195_v43 = vadd.f32 %v5598_v26, %v13418_v5  ;;  %v5600_v30 = vpop.f32.mrb[43].mxu0  ;;  %5940 = vmatprep.mubr.bf16.mxu1 %v5752_v46  ;;  %vm5661_vm7 = vcmp.gt.f32.partialorder %v9193_v2, 0.0  ;;  %v6501_v26 = vld [vmem:[%s14780_s19 + $0x20] sm:$0xff] }
 0x501   : > { %v5694_v0 = vmul.f32 0.01, %v9194_v22  ;;  %v9196_v20 = vadd.f32 %v5600_v30, %v13422_v45  ;;  %5941 = vmatmul.mubr.bf16.gmra.mrb[52].mxu1 %v5751_v48  ;;  %vm5662_vm8 = vcmp.gt.f32.partialorder %v9194_v22, 0.0 }
 0x502   : > { %vm5663_vm10 = vcmp.gt.f32.partialorder %v9195_v43, 0.0  ;;  %v5695_v1 = vmul.f32 0.01, %v9195_v43  ;;  %v5725_v32 = vsel %vm5661_vm7, %v9193_v2, %v5693_v63  ;;  %v6034_v2 = vpop.permute.xlu1 %6033  ;;  %v6502_v63 = vld [vmem:[%s14780_s19 + $0x28] sm:$0xff] }
 0x503   : > { %vm5664_vm11 = vcmp.gt.f32.partialorder %v9196_v20, 0.0  ;;  %v5696_v57 = vmul.f32 0.01, %v9196_v20  ;;  %v5726_v11 = vsel %vm5662_vm8, %v9194_v22, %v5694_v0 }
 0x504   : > { %v5727_v53 = vsel %vm5663_vm10, %v9195_v43, %v5695_v1 }
 0x505   : > { %v5604_v28 = vpop.f32.mrb[44].mxu0  ;;  %v5728_v37 = vsel %vm5664_vm11, %v9196_v20, %v5696_v57  ;;  %v5753_v19 = vpack.c.bf16 %v5727_v53, %v5725_v32 }
 0x506   : > { %v9197_v10 = vadd.f32 %v5604_v28, %v13418_v5  ;;  %v5606_v52 = vpop.f32.mrb[45].mxu0  ;;  %v5754_v23 = vpack.c.bf16 %v5728_v37, %v5726_v11  ;;  %v9049_v11 = vpack.c.bf16 %v6502_v63, %v6501_v26 }
 0x507   : > { %v9198_v17 = vadd.f32 %v5606_v52, %v13422_v45  ;;  %v5608_v18 = vpop.f32.mrb[46].mxu0  ;;  %v6036_v52 = vpop.permute.xlu1 %6035 }
 0x508   : > { %v5697_v41 = vmul.f32 0.01, %v9197_v10  ;;  %v9199_v62 = vadd.f32 %v5608_v18, %v13418_v5  ;;  %v5610_v27 = vpop.f32.mrb[47].mxu0  ;;  %5948 = vmatprep.mubr.bf16.mxu1 %v5754_v23  ;;  %vm5665_vm12 = vcmp.gt.f32.partialorder %v9197_v10, 0.0  ;;  %v8513_v5 = vld [vmem:[%s14780_s19 + $0x58] sm:$0xff] }
 0x509   : > { %v5698_v14 = vmul.f32 0.01, %v9198_v17  ;;  %v9200_v55 = vadd.f32 %v5610_v27, %v13422_v45  ;;  %5949 = vmatmul.mubr.bf16.gmra.mrb[56].mxu1 %v5753_v19  ;;  %vm5666_vm13 = vcmp.gt.f32.partialorder %v9198_v17, 0.0  ;;  %v8514_v45 = vld [vmem:[%s14780_s19 + $0x60] sm:$0xff] }
 0x50a   : > { %vm5667_vm14 = vcmp.gt.f32.partialorder %v9199_v62, 0.0  ;;  %v5699_v42 = vmul.f32 0.01, %v9199_v62  ;;  %v5729_v60 = vsel %vm5665_vm12, %v9197_v10, %v5697_v41  ;;  %v9037_v59 = vpack.c.bf16 %v8514_v45, %v8513_v5  ;;  %v6038_v45 = vpop.permute.xlu0 %6037 }
 0x50b   : > { %vm5668_vm15 = vcmp.gt.f32.partialorder %v9200_v55, 0.0  ;;  %v5700_v31 = vmul.f32 0.01, %v9200_v55  ;;  %v5730_v24 = vsel %vm5666_vm13, %v9198_v17, %v5698_v14  ;;  %v6503_v14 = vld [vmem:[%s14780_s19 + $0x30] sm:$0xf] }
 0x50c   : > { %v5731_v16 = vsel %vm5667_vm14, %v9199_v62, %v5699_v42  ;;  %9038 = vmatprep.subr.bf16.mxu1 %v9037_v59  ;;  %v8551_v42 = vld [vmem:[%s14780_s19 + $0x78] sm:$0xff] }
 0x50d   : > { %v5732_v40 = vsel %vm5668_vm15, %v9200_v55, %v5700_v31  ;;  %v5755_v51 = vpack.c.bf16 %v5731_v16, %v5729_v60  ;;  %9040 = vmatpush3.bf16.msra.mxu1 %v9037_v59  ;;  %v8550_v55 = vld [vmem:[%s14780_s19 + $0x70] sm:$0xff] }
 0x50e   : > { %v5756_v9 = vpack.c.bf16 %v5732_v40, %v5730_v24  ;;  %8831 = vmatprep.subr.msk.mxu1 %vm6561_vm0, %v8515_v61  ;;  %v13629_v59 = vpack.c.bf16 %v8551_v42, %v8550_v55  ;;  %v6042_v50 = vpop.permute.xlu0 %6041 }
 0x510   : > { %5956 = vmatprep.mubr.bf16.mxu1 %v5756_v9 }
 0x511   : > { %5957 = vmatmul.mubr.bf16.gmra.mrb[60].mxu1 %v5755_v51 }
 0x512   : > { %5964 = vmatprep.mubr.bf16.mxu1 %v5758_v38  ;;  %8832 = vmatpush3.msk.msra.mxu1 %vm6561_vm0, %v8515_v61 }
 0x519   : > { %5965 = vmatmul.mubr.bf16.gmra.mrb[64].mxu1 %v5757_v33  ;;  %v9041_v33 = vpack.c.bf16 %v6498_v47, %v6497_v39 }
 0x51a   : > { %5972 = vmatprep.mubr.bf16.mxu1 %v5760_v8  ;;  %v7266_v8 = vld [vmem:[#allocation13 + $0x20] sm:$0xff] }
 0x51b   : > { %9042 = vmatprep.subr.bf16.mxu1 %v9041_v33 }
 0x521   : > { %5973 = vmatmul.mubr.bf16.gmra.mrb[68].mxu1 %v5759_v25 }
 0x522   : > { %5980 = vmatprep.mubr.bf16.mxu1 %v5762_v13  ;;  %v7269_v13 = vld [vmem:[#allocation13 + $0x38] sm:$0xff] }
 0x529   : > { %5981 = vmatmul.mubr.bf16.gmra.mrb[72].mxu1 %v5761_v21  ;;  %v9065_v21 = vpack.c.bf16 %v7267_v54, %v7266_v8 }
 0x52a   : > { %5988 = vmatprep.mubr.bf16.mxu1 %v5764_v6 }
 0x52b   : > { %9066 = vmatprep.subr.bf16.mxu0 %v9065_v21 }
 0x52c   : > { %9068 = vmatpush3.bf16.msra.mxu0 %v9065_v21 }
 0x531   : > { %5989 = vmatmul.mubr.bf16.gmra.mrb[76].mxu1 %v5763_v4  ;;  %v9069_v4 = vpack.c.bf16 %v7269_v13, %v7268_v12 }
 0x533   : > { %9070 = vmatprep.subr.bf16.mxu0 %v9069_v4 }
 0x534   : > { %9072 = vmatpush3.bf16.msra.mxu0 %v9069_v4 }
 0x5cc   : > { %v8642_v38 = vpop.f32.mrb[48].mxu1 }
 0x5cd   : > { %v8643_v44 = vpop.f32.mrb[49].mxu1 }
 0x5ce   : > { %v8644_v49 = vadd.f32 %v8643_v44, %v8642_v38  ;;  %v8645_v25 = vpop.f32.mrb[50].mxu1  ;;  %v6040_v38 = vpop.permute.xlu1 %6039 }
 0x5cf   : > { %v8646_v35 = vpop.f32.mrb[51].mxu1 }
 0x5d0   : > { %v5935_v58 = vadd.f32 %v8644_v49, %v13566_v36  ;;  %v8647_v7 = vadd.f32 %v8646_v35, %v8645_v25 }
 0x5d2   : > { %v5938_v6 = vadd.f32 %v8647_v7, %v13566_v36  ;;  %v13577_v48 = vsel %vm14568_vm1, %v5935_v58, %v6030_v29 }
 0x5d3   : > { %8833 = vmatprep.mubr.msk.f32.mxu1 %vm6512_vm2, %v13577_v48  ;;  %v6335_v43 = vrot.slane %v13577_v48, 7  ;;  %v6416_v30 = vrot.slane %v13577_v48, 1  ;;  %v8555_v48 = vld [vmem:[%s14780_s19 + $0x98] sm:$0xff] }
 0x5d4   : > { %v6079_v46 = vsel %vm14568_vm1, %v5938_v6, %v6032_v3  ;;  %v8648_v22 = vpop.f32.mrb[52].mxu1 }
 0x5d5   : > { %v6336_v0 = vrot.slane %v6079_v46, 7  ;;  %v6417_v20 = vrot.slane %v6079_v46, 1  ;;  %v8649_v1 = vpop.f32.mrb[53].mxu1  ;;  %8834 = vmatmul.mubr.msk.f32.vlgmr.msra.gmra.mrb[80].mxu1 %vm6512_vm2, %v6079_v46  ;;  %v6044_v46 = vpop.permute.xlu1 %6043 }
 0x5d6   : > { %v8650_v57 = vadd.f32 %v8649_v1, %v8648_v22  ;;  %v8651_v32 = vpop.f32.mrb[54].mxu1  ;;  %9044 = vmatpush3.bf16.msra.mxu1 %v9041_v33 }
 0x5d7   : > { %v13597_v53 = vsel %vm14567_vm3, %v6335_v43, %v6336_v0  ;;  %v8652_v28 = vpop.f32.mrb[55].mxu1  ;;  %9046 = vmatprep.subr.bf16.mxu1 %v9045_v34  ;;  %v13603_v37 = vsel %vm14564_vm4, %v6416_v30, %v6417_v20 }
 0x5d8   : > { %v5943_v19 = vadd.f32 %v8650_v57, %v13566_v36  ;;  %v8653_v10 = vadd.f32 %v8652_v28, %v8651_v32 }
 0x5da   : > { %v6080_v23 = vsel %vm14568_vm1, %v5943_v19, %v6034_v2  ;;  %v5946_v17 = vadd.f32 %v8653_v10, %v13566_v36  ;;  %9048 = vmatpush3.bf16.msra.mxu1 %v9045_v34 }
 0x5db   : > { %v6337_v18 = vrot.slane %v6080_v23, 7  ;;  %v6418_v41 = vrot.slane %v6080_v23, 1  ;;  %8836 = vmatprep.mubr.msk.f32.mxu1 %vm6512_vm2, %v6080_v23  ;;  %9050 = vmatprep.subr.bf16.mxu1 %v9049_v11 }
 0x5dc   : > { %v6081_v62 = vsel %vm14568_vm1, %v5946_v17, %v6036_v52  ;;  %v8654_v27 = vpop.f32.mrb[56].mxu1  ;;  %v6046_v17 = vpop.permute.xlu0 %6045 }
 0x5dd   : > { %v13621_v31 = vsel %vm14564_vm4, %v6417_v20, %v6418_v41  ;;  %v6338_v60 = vrot.slane %v6081_v62, 7  ;;  %v6419_v16 = vrot.slane %v6081_v62, 1  ;;  %v8655_v24 = vpop.f32.mrb[57].mxu1  ;;  %8837 = vmatmul.mubr.msk.f32.gmra.mrb[82].mxu1 %vm6512_vm2, %v6081_v62  ;;  %v13626_v40 = vsel %vm14567_vm3, %v6336_v0, %v6337_v18 }
 0x5de   : > { %v8656_v51 = vadd.f32 %v8655_v24, %v8654_v27  ;;  %v8657_v9 = vpop.f32.mrb[58].mxu1  ;;  %9052 = vmatpush3.bf16.msra.mxu1 %v9049_v11 }
 0x5df   : > { %v8658_v5 = vpop.f32.mrb[59].mxu1  ;;  %8869 = vmatprep.subr.msk.mxu1 %vm6561_vm0, %v6503_v14  ;;  %v13633_v61 = vsel %vm14567_vm3, %v6337_v18, %v6338_v60  ;;  %v13637_v39 = vsel %vm14564_vm4, %v6418_v41, %v6419_v16 }
 0x5e0   : > { %v5951_v47 = vadd.f32 %v8656_v51, %v13566_v36  ;;  %v8659_v33 = vadd.f32 %v8658_v5, %v8657_v9 }
 0x5e2   : > { %v5954_v44 = vadd.f32 %v8659_v33, %v13566_v36  ;;  %v6082_v3 = vsel %vm14568_vm1, %v5951_v47, %v6038_v45  ;;  %8870 = vmatpush3.msk.msra.mxu1 %vm6561_vm0, %v6503_v14  ;;  %v6048_v14 = vpop.permute.xlu1 %6047 }
 0x5e3   : > { %v6339_v49 = vrot.slane %v6082_v3, 7  ;;  %v6420_v25 = vrot.slane %v6082_v3, 1  ;;  %8839 = vmatprep.mubr.msk.f32.mxu1 %vm6512_vm2, %v6082_v3  ;;  %9054 = vmatprep.subr.bf16.mxu1 %v13629_v59 }
 0x5e4   : > { %v6083_v8 = vsel %vm14568_vm1, %v5954_v44, %v6040_v38  ;;  %v8660_v54 = vpop.f32.mrb[60].mxu1 }
 0x5e5   : > { %v6340_v12 = vrot.slane %v6083_v8, 7  ;;  %v6421_v35 = vrot.slane %v6083_v8, 1  ;;  %v8661_v29 = vpop.f32.mrb[61].mxu1  ;;  %8840 = vmatmul.mubr.msk.f32.gmra.mrb[84].mxu1 %vm6512_vm2, %v6083_v8  ;;  %v13649_v21 = vsel %vm14567_vm3, %v6338_v60, %v6339_v49  ;;  %v13653_v13 = vsel %vm14564_vm4, %v6419_v16, %v6420_v25 }
 0x5e6   : > { %v8662_v58 = vadd.f32 %v8661_v29, %v8660_v54  ;;  %v8663_v7 = vpop.f32.mrb[62].mxu1 }
 0x5e7   : > { %v8664_v15 = vpop.f32.mrb[63].mxu1  ;;  %v13657_v4 = vsel %vm14567_vm3, %v6339_v49, %v6340_v12  ;;  %v13661_v6 = vsel %vm14564_vm4, %v6420_v25, %v6421_v35  ;;  %v6050_v49 = vpop.permute.xlu0 %6049 }
 0x5e8   : > { %v5959_v2 = vadd.f32 %v8662_v58, %v13566_v36  ;;  %v8665_v34 = vadd.f32 %v8664_v15, %v8663_v7 }
 0x5ea   : > { %v5962_v22 = vadd.f32 %v8665_v34, %v13566_v36  ;;  %v6084_v26 = vsel %vm14568_vm1, %v5959_v2, %v6042_v50 }
 0x5eb   : > { %v6341_v63 = vrot.slane %v6084_v26, 7  ;;  %v6422_v0 = vrot.slane %v6084_v26, 1  ;;  %8842 = vmatprep.mubr.msk.f32.mxu1 %vm6512_vm2, %v6084_v26 }
 0x5ec   : > { %v6085_v20 = vsel %vm14568_vm1, %v5962_v22, %v6044_v46  ;;  %v8666_v1 = vpop.f32.mrb[64].mxu1 }
 0x5ed   : > { %v6342_v57 = vrot.slane %v6085_v20, 7  ;;  %v6423_v32 = vrot.slane %v6085_v20, 1  ;;  %v8667_v28 = vpop.f32.mrb[65].mxu1  ;;  %8843 = vmatmul.mubr.msk.f32.gmra.mrb[86].mxu1 %vm6512_vm2, %v6085_v20  ;;  %v13671_v11 = vsel %vm14567_vm3, %v6340_v12, %v6341_v63  ;;  %v13675_v19 = vsel %vm14564_vm4, %v6421_v35, %v6422_v0  ;;  %v6052_v35 = vpop.permute.xlu1 %6051 }
 0x5ee   : > { %v8668_v10 = vadd.f32 %v8667_v28, %v8666_v1  ;;  %v8669_v52 = vpop.f32.mrb[66].mxu1 }
 0x5ef   : > { %v8670_v23 = vpop.f32.mrb[67].mxu1  ;;  %v13679_v18 = vsel %vm14567_vm3, %v6341_v63, %v6342_v57  ;;  %v13683_v41 = vsel %vm14564_vm4, %v6422_v0, %v6423_v32 }
 0x5f0   : > { %v5967_v62 = vadd.f32 %v8668_v10, %v13566_v36  ;;  %v8671_v27 = vadd.f32 %v8670_v23, %v8669_v52 }
 0x5f1   : > { %v6056_v23 = vpop.permute.xlu1 %6055 }
 0x5f2   : > { %v5970_v55 = vadd.f32 %v8671_v27, %v13566_v36  ;;  %v6086_v42 = vsel %vm14568_vm1, %v5967_v62, %v6046_v17 }
 0x5f3   : > { %v6343_v60 = vrot.slane %v6086_v42, 7  ;;  %v6424_v16 = vrot.slane %v6086_v42, 1  ;;  %8845 = vmatprep.mubr.msk.f32.mxu1 %vm6512_vm2, %v6086_v42 }
 0x5f4   : > { %v6087_v24 = vsel %vm14568_vm1, %v5970_v55, %v6048_v14  ;;  %v8672_v51 = vpop.f32.mrb[68].mxu1 }
 0x5f5   : > { %v6344_v9 = vrot.slane %v6087_v24, 7  ;;  %v6425_v5 = vrot.slane %v6087_v24, 1  ;;  %v8673_v45 = vpop.f32.mrb[69].mxu1  ;;  %8846 = vmatmul.mubr.msk.f32.gmra.mrb[88].mxu1 %vm6512_vm2, %v6087_v24  ;;  %v13693_v47 = vsel %vm14567_vm3, %v6342_v57, %v6343_v60  ;;  %v13697_v33 = vsel %vm14564_vm4, %v6423_v32, %v6424_v16  ;;  %v6054_v57 = vpop.permute.xlu0 %6053 }
 0x5f6   : > { %v8674_v38 = vadd.f32 %v8673_v45, %v8672_v51  ;;  %v8675_v44 = vpop.f32.mrb[70].mxu1 }
 0x5f7   : > { %v8676_v3 = vpop.f32.mrb[71].mxu1  ;;  %v13701_v25 = vsel %vm14567_vm3, %v6343_v60, %v6344_v9  ;;  %v13705_v8 = vsel %vm14564_vm4, %v6424_v16, %v6425_v5  ;;  %v13735_v60 = vadd.s32 8, %v14782_v56  ;;  %v13738_v16 = vadd.s32 16, %v14782_v56 }
 0x5f8   : > { %v5975_v54 = vadd.f32 %v8674_v38, %v13566_v36  ;;  %v8677_v12 = vadd.f32 %v8676_v3, %v8675_v44 }
 0x5fa   : > { %v5978_v29 = vadd.f32 %v8677_v12, %v13566_v36  ;;  %v6088_v58 = vsel %vm14568_vm1, %v5975_v54, %v6050_v49  ;;  %v6058_v49 = vpop.permute.xlu0 %6057 }
 0x5fb   : > { %v6345_v7 = vrot.slane %v6088_v58, 7  ;;  %v6426_v15 = vrot.slane %v6088_v58, 1  ;;  %8848 = vmatprep.mubr.msk.f32.mxu1 %vm6512_vm2, %v6088_v58  ;;  %v6122_v58 = vand.u32 7, %v13735_v60  ;;  %v14823_v60 = vmov 0 }
 0x5fc   : > { %v6089_v50 = vsel %vm14568_vm1, %v5978_v29, %v6052_v35  ;;  %v8678_v2 = vpop.f32.mrb[72].mxu1 }
 0x5fd   : > { %v6346_v34 = vrot.slane %v6089_v50, 7  ;;  %v6427_v46 = vrot.slane %v6089_v50, 1  ;;  %v8679_v22 = vpop.f32.mrb[73].mxu1  ;;  %8849 = vmatmul.mubr.msk.f32.gmra.mrb[90].mxu1 %vm6512_vm2, %v6089_v50  ;;  %v13715_v26 = vsel %vm14567_vm3, %v6344_v9, %v6345_v7  ;;  %v13719_v63 = vsel %vm14564_vm4, %v6425_v5, %v6426_v15 }
 0x5fe   : > { %v8680_v0 = vadd.f32 %v8679_v22, %v8678_v2  ;;  %v8681_v20 = vpop.f32.mrb[74].mxu1  ;;  %v6115_v50 = vand.u32 7, %v14782_v56  ;;  %v13767_v22 = vadd.s32 32, %v14782_v56  ;;  %vm13779_vm6 = vcmp.ne.s32.totalorder %v6122_v58, 0 }
 0x5ff   : > { %v8682_v1 = vpop.f32.mrb[75].mxu1  ;;  %v13723_v32 = vsel %vm14567_vm3, %v6345_v7, %v6346_v34  ;;  %v13727_v28 = vsel %vm14564_vm4, %v6426_v15, %v6427_v46  ;;  %v6129_v7 = vand.u32 7, %v13738_v16  ;;  %v6060_v15 = vpop.permute.xlu1 %6059  ;;  %v14825_v16 = vmov 0 }
 0x600   : > { %v5983_v10 = vadd.f32 %v8680_v0, %v13566_v36  ;;  %v8683_v52 = vadd.f32 %v8682_v1, %v8681_v20  ;;  %vm13773_vm5 = vcmp.ne.s32.totalorder %v6115_v50, 0 }
 0x601   : > { %vm13785_vm9 = vcmp.ne.s32.totalorder %v6129_v7, 0 }
 0x602   : > { %v5986_v17 = vadd.f32 %v8683_v52, %v13566_v36  ;;  %v6090_v62 = vsel %vm14568_vm1, %v5983_v10, %v6054_v57 }
 0x603   : > { %v6347_v27 = vrot.slane %v6090_v62, 7  ;;  %v6428_v14 = vrot.slane %v6090_v62, 1  ;;  %8851 = vmatprep.mubr.msk.f32.mxu1 %vm6512_vm2, %v6090_v62  ;;  %v8553_v62 = vld [vmem:[%s14780_s19 + $0x88] sm:$0xff] }
 0x604   : > { %v6091_v55 = vsel %vm14568_vm1, %v5986_v17, %v6056_v23  ;;  %v8684_v42 = vpop.f32.mrb[76].mxu1  ;;  %v8552_v17 = vld [vmem:[%s14780_s19 + $0x80] sm:$0xff] }
 0x605   : > { %v6348_v24 = vrot.slane %v6091_v55, 7  ;;  %v6429_v51 = vrot.slane %v6091_v55, 1  ;;  %v8685_v9 = vpop.f32.mrb[77].mxu1  ;;  %8852 = vmatmul.mubr.msk.f32.gmra.mrb[92].mxu1 %vm6512_vm2, %v6091_v55  ;;  %v13743_v5 = vsel %vm14567_vm3, %v6346_v34, %v6347_v27  ;;  %v13747_v45 = vsel %vm14564_vm4, %v6427_v46, %v6428_v14 }
 0x606   : > { %v8686_v38 = vadd.f32 %v8685_v9, %v8684_v42  ;;  %v8687_v44 = vpop.f32.mrb[78].mxu1  ;;  %v13764_v46 = vadd.s32 24, %v14782_v56  ;;  %v6143_v42 = vand.u32 7, %v13767_v22  ;;  %v13807_v9 = vadd.s32 40, %v14782_v56 }
 0x607   : > { %v8688_v3 = vpop.f32.mrb[79].mxu1  ;;  %v13751_v54 = vsel %vm14567_vm3, %v6347_v27, %v6348_v24  ;;  %v13755_v12 = vsel %vm14564_vm4, %v6428_v14, %v6429_v51 }
 0x608   : > { %v5991_v35 = vadd.f32 %v8686_v38, %v13566_v36  ;;  %v8689_v29 = vadd.f32 %v8688_v3, %v8687_v44  ;;  %v6136_v55 = vand.u32 7, %v13764_v46  ;;  %v13810_v38 = vadd.s32 48, %v14782_v56 }
 0x609   : > { %vm13860_vm8 = vcmp.ne.s32.totalorder %v6143_v42, 0  ;;  %v14831_v46 = vmov 0 }
 0x60a   : > { %v5994_v2 = vadd.f32 %v8689_v29, %v13566_v36  ;;  %v6092_v34 = vsel %vm14568_vm1, %v5991_v35, %v6058_v49  ;;  %v9057_v35 = vpack.c.bf16 %v8553_v62, %v8552_v17  ;;  %v8554_v29 = vld [vmem:[%s14780_s19 + $0x90] sm:$0xff]  ;;  %vm13848_vm7 = vcmp.ne.s32.totalorder %v6136_v55, 0 }
 0x60b   : > { %v6349_v0 = vrot.slane %v6092_v34, 7  ;;  %v6430_v20 = vrot.slane %v6092_v34, 1  ;;  %8854 = vmatprep.mubr.msk.f32.mxu1 %vm6512_vm2, %v6092_v34  ;;  %v13883_v17 = vadd.s32 72, %v14782_v56  ;;  %v13894_v62 = vadd.s32 80, %v14782_v56 }
 0x60c   : > { %v6093_v1 = vsel %vm14568_vm1, %v5994_v2, %v6060_v15  ;;  %v13854_v2 = vadd.s32 56, %v14782_v56 }
 0x60d   : > { %v6350_v52 = vrot.slane %v6093_v1, 7  ;;  %v6431_v23 = vrot.slane %v6093_v1, 1  ;;  %8855 = vmatmul.mubr.msk.f32.gmra.mrb[94].mxu1 %vm6512_vm2, %v6093_v1  ;;  %v13798_v27 = vsel %vm14567_vm3, %v6348_v24, %v6349_v0  ;;  %v13802_v14 = vsel %vm14564_vm4, %v6429_v51, %v6430_v20 }
 0x60e   : > { %v6403_v1 = vsel %vm13848_vm7, %v13633_v61, 0.0 }
 0x60f   : > { %v6367_v24 = vsel %vm14567_vm3, %v6350_v52, %v6335_v43  ;;  %v13818_v44 = vsel %vm14567_vm3, %v6349_v0, %v6350_v52  ;;  %v13822_v51 = vsel %vm14564_vm4, %v6430_v20, %v6431_v23  ;;  %v13828_v3 = vsel %vm14564_vm4, %v6431_v23, %v6416_v30 }
 0x610   : > { %v6400_v49 = vsel %vm13773_vm5, %v6367_v24, 0.0  ;;  %v6401_v43 = vsel %vm13779_vm6, %v13597_v53, 0.0  ;;  %v6402_v30 = vsel %vm13785_vm9, %v13626_v40, 0.0  ;;  %v6150_v53 = vand.u32 7, %v13807_v9 }
 0x611   : > { %8871 = vmatprep.mubr.msk.f32.mxu1 %vm6512_vm2, %v6400_v49  ;;  %v6157_v40 = vand.u32 7, %v13810_v38  ;;  %v13866_v0 = vadd.s32 64, %v14782_v56  ;;  %v9061_v20 = vpack.c.bf16 %v8555_v48, %v8554_v29  ;;  %v6164_v23 = vand.u32 7, %v13854_v2  ;;  %v8556_v49 = vld [vmem:[%s14780_s19 + $0xa0] sm:$0xf] }
 0x612   : > { %8872 = vmatmul.mubr.msk.f32.vlgmr.msra.gmra.mrb[80].mxu1 %vm6512_vm2, %v6401_v43  ;;  %vm13877_vm10 = vcmp.ne.s32.totalorder %v6150_v53, 0  ;;  %v14566_v29 = vand.u32 7, %v13883_v17  ;;  %v14839_v9 = vmov 0  ;;  %v14842_v38 = vand.u32 7, %v13894_v62 }
 0x613   : > { %9056 = vmatpush3.bf16.msra.mxu1 %v13629_v59  ;;  %8874 = vmatprep.mubr.msk.f32.mxu1 %vm6512_vm2, %v6402_v30  ;;  %v6404_v59 = vsel %vm13860_vm8, %v13649_v21, 0.0  ;;  %vm13888_vm11 = vcmp.ne.s32.totalorder %v6157_v40, 0  ;;  %v14569_v21 = vand.u32 7, %v13866_v0  ;;  %v6405_v24 = vsel %vm13877_vm10, %v13657_v4, 0.0 }
 0x614   : > { %9058 = vmatprep.subr.bf16.mxu1 %v9057_v35  ;;  %vm13908_vm12 = vcmp.ne.s32.totalorder %v6164_v23, 0  ;;  %v13914_v4 = vadd.s32 88, %v14782_v56  ;;  %v13925_v30 = vadd.s32 96, %v14782_v56  ;;  %vm13937_vm14 = vcmp.ne.s32.totalorder %v14566_v29, 0 }
 0x615   : > { %vm13919_vm13 = vcmp.ne.s32.totalorder %v14569_v21, 0  ;;  %v14809_v29 = vmov 0  ;;  %v14813_v21 = vmov 0  ;;  %v14834_v22 = vand.u32 7, %v13866_v0 }
 0x616   : > { %8875 = vmatmul.mubr.msk.f32.gmra.mrb[82].mxu1 %vm6512_vm2, %v6403_v1  ;;  %v6407_v1 = vsel %vm13908_vm12, %v13679_v18, 0.0  ;;  %v14805_v18 = vmov 0  ;;  %v14846_v2 = vmov 0  ;;  %v14852_v0 = vmov 0 }
 0x617   : > { %8877 = vmatprep.mubr.msk.f32.mxu1 %vm6512_vm2, %v6404_v59  ;;  %9060 = vmatpush3.bf16.msra.mxu1 %v9057_v35  ;;  %v6406_v35 = vsel %vm13888_vm11, %v13671_v11, 0.0  ;;  %v14565_v11 = vand.u32 7, %v13894_v62  ;;  %v6408_v59 = vsel %vm13919_vm13, %v13693_v47, 0.0  ;;  %v6199_v47 = vand.u32 7, %v13925_v30 }
 0x618   : > { %9062 = vmatprep.subr.bf16.mxu1 %v9061_v20 }
 0x619   : > { %vm13948_vm15 = vcmp.ne.s32.totalorder %v14565_v11, 0  ;;  %v14807_v11 = vmov 0 }
 0x61a   : > { %8878 = vmatmul.mubr.msk.f32.gmra.mrb[84].mxu1 %vm6512_vm2, %v6405_v24  ;;  %v6192_v24 = vand.u32 7, %v13914_v4  ;;  %v14806_v18 = vsel %vm13948_vm15, 4294967295, %v14805_v18  ;;  %v6409_v4 = vsel %vm13937_vm14, %v13701_v25, 0.0 }
 0x61b   : > { %8880 = vmatprep.mubr.msk.f32.mxu1 %vm6512_vm2, %v6406_v35  ;;  %9064 = vmatpush3.bf16.msra.mxu1 %v9061_v20  ;;  %v13943_v35 = vadd.s32 104, %v14782_v56 }
 0x61c   : > { %8907 = vmatprep.subr.msk.mxu1 %vm6561_vm0, %v8556_v49  ;;  %vm13964_vm4 = vcmp.ne.s32.totalorder %v6192_v24, 0 }
 0x61d   : > { %v14808_v11 = vsel %vm13964_vm4, 4294967295, %v14807_v11  ;;  %v6206_v30 = vand.u32 7, %v13943_v35 }
 0x61e   : > { %8881 = vmatmul.mubr.msk.f32.gmra.mrb[86].mxu1 %vm6512_vm2, %v6407_v1  ;;  %v13955_v1 = vadd.s32 112, %v14782_v56 }
 0x61f   : > { %8883 = vmatprep.mubr.msk.f32.mxu1 %vm6512_vm2, %v6408_v59  ;;  %8908 = vmatpush3.msk.msra.mxu1 %vm6561_vm0, %v8556_v49  ;;  %v6410_v59 = vsel %vm13948_vm15, %v13715_v26, 0.0  ;;  %v6110_v49 = vadd.s32 120, %v14782_v56  ;;  %vm13971_vm0 = vcmp.ne.s32.totalorder %v6199_v47, 0  ;;  %v6411_v26 = vsel %vm13964_vm4, %v13723_v32, 0.0 }
 0x620   : > { %v14810_v29 = vsel %vm13971_vm0, 4294967295, %v14809_v29  ;;  %v6213_v25 = vand.u32 7, %v13955_v1  ;;  %v6412_v35 = vsel %vm13971_vm0, %v13743_v5, 0.0  ;;  %vm13983_vm3 = vcmp.ne.s32.totalorder %v6206_v30, 0 }
 0x621   : > { %v6413_v32 = vsel %vm13983_vm3, %v13751_v54, 0.0  ;;  %v14815_v1 = vmov 0  ;;  %vm14006_vm4 = vcmp.ne.s32.totalorder %v6115_v50, 7  ;;  %v14821_v50 = vmov 0 }
 0x622   : > { %8884 = vmatmul.mubr.msk.f32.gmra.mrb[88].mxu1 %vm6512_vm2, %v6409_v4  ;;  %v14811_v4 = vmov 0  ;;  %vm13988_vm1 = vcmp.ne.s32.totalorder %v6213_v25, 0 }
 0x623   : > { %8886 = vmatprep.mubr.msk.f32.mxu1 %vm6512_vm2, %v6410_v59  ;;  %v14812_v4 = vsel %vm13983_vm3, 4294967295, %v14811_v4  ;;  %v6220_v59 = vand.u32 7, %v6110_v49  ;;  %v14814_v21 = vsel %vm13988_vm1, 4294967295, %v14813_v21  ;;  %v6414_v5 = vsel %vm13988_vm1, %v13798_v27, 0.0 }
 0x624   : > { %v14817_v49 = vmov 0  ;;  %v6481_v27 = vsel %vm14006_vm4, %v13603_v37, 0.0  ;;  %vm14019_vm1 = vcmp.ne.s32.totalorder %v6122_v58, 7  ;;  %vm14026_vm3 = vcmp.ne.s32.totalorder %v6129_v7, 7 }
 0x625   : > { %vm13999_vm0 = vcmp.ne.s32.totalorder %v6220_v59, 0  ;;  %v14818_v49 = vsel %vm14006_vm4, 4294967295, %v14817_v49  ;;  %v14822_v50 = vsel %vm14026_vm3, 4294967295, %v14821_v50  ;;  %v6483_v37 = vsel %vm14026_vm3, %v13637_v39, 0.0 }
 0x626   : > { %8887 = vmatmul.mubr.msk.f32.gmra.mrb[90].mxu1 %vm6512_vm2, %v6411_v26  ;;  %v14816_v1 = vsel %vm13999_vm0, 4294967295, %v14815_v1  ;;  %v6415_v54 = vsel %vm13999_vm0, %v13818_v44, 0.0  ;;  %v14819_v26 = vmov 0  ;;  %v6482_v44 = vsel %vm14019_vm1, %v13621_v31, 0.0 }
 0x627   : > { %8889 = vmatprep.mubr.msk.f32.mxu1 %vm6512_vm2, %v6412_v35  ;;  %v14820_v26 = vsel %vm14019_vm1, 4294967295, %v14819_v26  ;;  %vm14039_vm4 = vcmp.ne.s32.totalorder %v6136_v55, 7  ;;  %vm14046_vm0 = vcmp.ne.s32.totalorder %v6143_v42, 7  ;;  %vm14059_vm3 = vcmp.ne.s32.totalorder %v6150_v53, 7 }
 0x628   : > { %v14824_v60 = vsel %vm14039_vm4, 4294967295, %v14823_v60  ;;  %v14826_v16 = vsel %vm14046_vm0, 4294967295, %v14825_v16  ;;  %v6484_v31 = vsel %vm14039_vm4, %v13653_v13, 0.0  ;;  %v6485_v39 = vsel %vm14046_vm0, %v13661_v6, 0.0 }
 0x629   : > { %v14827_v58 = vmov 0  ;;  %vm14066_vm1 = vcmp.ne.s32.totalorder %v6157_v40, 7  ;;  %v14829_v7 = vmov 0  ;;  %v6486_v13 = vsel %vm14059_vm3, %v13675_v19, 0.0 }
 0x62a   : > { %8890 = vmatmul.mubr.msk.f32.gmra.mrb[92].mxu1 %vm6512_vm2, %v6413_v32  ;;  %v14828_v58 = vsel %vm14059_vm3, 4294967295, %v14827_v58  ;;  %v14830_v7 = vsel %vm14066_vm1, 4294967295, %v14829_v7  ;;  %v6487_v6 = vsel %vm14066_vm1, %v13683_v41, 0.0  ;;  %vm14079_vm0 = vcmp.ne.s32.totalorder %v6164_v23, 7  ;;  %v7263_v32 = vld [vmem:[#allocation13 + $0x10] sm:$0xff] }
 0x62b   : > { %8892 = vmatprep.mubr.msk.f32.mxu1 %vm6512_vm2, %v6414_v5  ;;  %v14832_v46 = vsel %vm14079_vm0, 4294967295, %v14831_v46  ;;  %vm14086_vm4 = vcmp.ne.s32.totalorder %v14834_v22, 7  ;;  %v14835_v55 = vmov 0  ;;  %v6488_v19 = vsel %vm14079_vm0, %v13697_v33, 0.0  ;;  %v7264_v5 = vld [vmem:[#allocation13 + $0x18] sm:$0xff] }
 0x62c   : > { %14833 = vst [vmem:[#allocation31_spill] sm:$0xff] %v14832_v46  ;;  %v14836_v55 = vsel %vm14086_vm4, 4294967295, %v14835_v55  ;;  %v6489_v41 = vsel %vm14086_vm4, %v13705_v8, 0.0  ;;  %v14838_v42 = vand.u32 7, %v13883_v17  ;;  %vm14106_vm3 = vcmp.ne.s32.totalorder %v14842_v38, 7 }
 0x62d   : > { %14837 = vst [vmem:[#allocation32_spill] sm:$0xff] %v14836_v55  ;;  %v14843_v53 = vmov 0  ;;  %v6491_v8 = vsel %vm14106_vm3, %v13727_v28, 0.0  ;;  %vm14117_vm4 = vcmp.ne.s32.totalorder %v6192_v24, 7  ;;  %vm14122_vm0 = vcmp.ne.s32.totalorder %v6199_v47, 7  ;;  %v7261_v24 = vld [vmem:[#allocation13] sm:$0xff] }
 0x62e   : > { %8893 = vmatmul.mubr.msk.f32.gmra.mrb[94].mxu1 %vm6512_vm2, %v6415_v54  ;;  %vm14099_vm1 = vcmp.ne.s32.totalorder %v14838_v42, 7  ;;  %v14844_v53 = vsel %vm14106_vm3, 4294967295, %v14843_v53  ;;  %v14847_v2 = vsel %vm14117_vm4, 4294967295, %v14846_v2  ;;  %v14849_v40 = vmov 0  ;;  %v7658_v42 = vld [vmem:[#allocation13 + $0x48] sm:$0xff] }
 0x62f   : > { %8909 = vmatprep.mubr.msk.f32.mxu1 %vm6512_vm2, %v6481_v27  ;;  %v14840_v9 = vsel %vm14099_vm1, 4294967295, %v14839_v9  ;;  %14845 = vst [vmem:[#allocation42_spill] sm:$0xff] %v14844_v53  ;;  %v6490_v33 = vsel %vm14099_vm1, %v13719_v63, 0.0  ;;  %14848 = vst [vmem:[#allocation45_spill] sm:$0xff] %v14847_v2  ;;  %v14850_v40 = vsel %vm14122_vm0, 4294967295, %v14849_v40  ;;  %v6492_v63 = vsel %vm14117_vm4, %v13747_v45, 0.0 }
 0x630   : > { %14841 = vst [vmem:[#allocation41_spill] sm:$0xff] %v14840_v9  ;;  %14851 = vst [vmem:[#allocation46_spill] sm:$0xff] %v14850_v40  ;;  %v6493_v28 = vsel %vm14122_vm0, %v13755_v12, 0.0  ;;  %vm14133_vm3 = vcmp.ne.s32.totalorder %v6206_v30, 7  ;;  %vm14138_vm1 = vcmp.ne.s32.totalorder %v6213_v25, 7  ;;  %v14855_v23 = vmov 0 }
 0x631   : > { %v14853_v0 = vsel %vm14133_vm3, 4294967295, %v14852_v0  ;;  %v14856_v23 = vsel %vm14138_vm1, 4294967295, %v14855_v23  ;;  %v6494_v45 = vsel %vm14133_vm3, %v13802_v14, 0.0  ;;  %v6495_v12 = vsel %vm14138_vm1, %v13822_v51, 0.0  ;;  %v7262_v14 = vld [vmem:[#allocation13 + $0x8] sm:$0xff] }
 0x632   : > { %8910 = vmatmul.mubr.msk.f32.vlgmr.msra.gmra.mrb[80].mxu1 %vm6512_vm2, %v6482_v44  ;;  %14854 = vst [vmem:[#allocation50_spill] sm:$0xff] %v14853_v0  ;;  %14857 = vst [vmem:[#allocation51_spill] sm:$0xff] %v14856_v23  ;;  %vm14149_vm0 = vcmp.ne.s32.totalorder %v6220_v59, 7  ;;  %v14858_v17 = vmov 0  ;;  %v9073_v47 = vpack.c.bf16 %v7262_v14, %v7261_v24  ;;  %v14158_v30 = vld [vmem:[#allocation12] ss:$0 sm:$0xff] }
 0x633   : > { %8912 = vmatprep.mubr.msk.f32.mxu1 %vm6512_vm2, %v6483_v37  ;;  %v14859_v17 = vsel %vm14149_vm0, 4294967295, %v14858_v17  ;;  %v6496_v62 = vsel %vm14149_vm0, %v13828_v3, 0.0  ;;  %vm14863_vm1 = vcmp.lt.s32.totalorder %v14782_v56, 1  ;;  %vm14864_vm3 = vcmp.lt.s32.totalorder %v14782_v56, 7 }
 0x634   : > { %14860 = vst [vmem:[#allocation27_spill] sm:$0xff] %v14859_v17  ;;  %9074 = vmatprep.subr.bf16.mxu0 %v9073_v47  ;;  %vm14868_vm4 = vcmp.lt.s32.totalorder %v14782_v56, 7 }
 0x636   : > { %8913 = vmatmul.mubr.msk.f32.gmra.mrb[82].mxu1 %vm6512_vm2, %v6484_v31 }
 0x637   : > { %8915 = vmatprep.mubr.msk.f32.mxu1 %vm6512_vm2, %v6485_v39 }
 0x63a   : > { %8916 = vmatmul.mubr.msk.f32.gmra.mrb[84].mxu1 %vm6512_vm2, %v6486_v13  ;;  %v9077_v13 = vpack.c.bf16 %v7264_v5, %v7263_v32 }
 0x63b   : > { %8918 = vmatprep.mubr.msk.f32.mxu1 %vm6512_vm2, %v6487_v6 }
 0x63e   : > { %8919 = vmatmul.mubr.msk.f32.gmra.mrb[86].mxu1 %vm6512_vm2, %v6488_v19 }
 0x63f   : > { %8921 = vmatprep.mubr.msk.f32.mxu1 %vm6512_vm2, %v6489_v41  ;;  %v7657_v41 = vld [vmem:[#allocation13 + $0x40] sm:$0xff] }
 0x640   : > { %v14184_v24 = vpack.c.bf16 %v7658_v42, %v7657_v41 }
 0x642   : > { %8922 = vmatmul.mubr.msk.f32.gmra.mrb[88].mxu1 %vm6512_vm2, %v6490_v33 }
 0x643   : > { %8924 = vmatprep.mubr.msk.f32.mxu1 %vm6512_vm2, %v6491_v8 }
 0x646   : > { %8925 = vmatmul.mubr.msk.f32.gmra.mrb[90].mxu1 %vm6512_vm2, %v6492_v63 }
 0x647   : > { %8927 = vmatprep.mubr.msk.f32.mxu1 %vm6512_vm2, %v6493_v28 }
 0x64a   : > { %8928 = vmatmul.mubr.msk.f32.gmra.mrb[92].mxu1 %vm6512_vm2, %v6494_v45 }
 0x64b   : > { %8930 = vmatprep.mubr.msk.f32.mxu1 %vm6512_vm2, %v6495_v12 }
 0x64e   : > { %8931 = vmatmul.mubr.msk.f32.gmra.mrb[94].mxu1 %vm6512_vm2, %v6496_v62  ;;  %vm14861_vm2 = vcmask 261120  }
 0x64f   : > { %vm14862_vm0 = vmmov %vm14861_vm2 }
 0x705   : > { %v8911_v25 = vpop.f32.mrb[80].mxu1 }
 0x706   : > { %v7134_v51 = vadd.f32 %v8911_v25, %v14158_v30  ;;  %v7031_v35 = vpop.f32.mrb[81].mxu1 }
 0x707   : > { %v7133_v59 = vadd.f32 %v14158_v30, %v7031_v35 }
 0x708   : > { %v7150_v54 = vmax.f32 %v7134_v51, 0.0 }
 0x709   : > { %v14162_v27 = vmax.f32 %v7133_v59, 0.0  ;;  %v8914_v3 = vpop.f32.mrb[82].mxu1 }
 0x70a   : > { %v7166_v44 = vrot.slane %v7150_v54, 7  ;;  %v7214_v37 = vrot.slane %v7150_v54, 1  ;;  %v7136_v31 = vadd.f32 %v8914_v3, %v14158_v30  ;;  %v7041_v39 = vpop.f32.mrb[83].mxu1 }
 0x70b   : > { %v14592_v6 = vrot.slane %v14162_v27, 7  ;;  %v14591_v22 = vrot.slane %v14162_v27, 1  ;;  %v7135_v19 = vadd.f32 %v14158_v30, %v7041_v39  ;;  %8941 = vmatprep.mubr.msk.f32.mxu0 %vm14861_vm2, %v14162_v27 }
 0x70c   : > { %v7152_v38 = vmax.f32 %v7136_v31, 0.0  ;;  %8942 = vmatmul.mubr.msk.f32.vlgmr.msra.gmra.mrb[64].mxu0 %vm14862_vm0, %v7150_v54 }
 0x70d   : > { %v7151_v33 = vmax.f32 %v7135_v19, 0.0  ;;  %9076 = vmatpush3.bf16.msra.mxu0 %v9073_v47  ;;  %v8917_v8 = vpop.f32.mrb[84].mxu1  ;;  %v14175_v63 = vsel %vm14863_vm1, %v14592_v6, %v7166_v44  ;;  %v14181_v28 = vsel %vm14864_vm3, %v14591_v22, %v7214_v37  ;;  %vm14865_vm1 = vmmov %vm14862_vm0  ;;  %vm14866_vm3 = vcmp.lt.s32.totalorder %v14782_v56, 1 }
 0x70e   : > { %v7168_v45 = vrot.slane %v7152_v38, 7  ;;  %v7138_v12 = vadd.f32 %v8917_v8, %v14158_v30  ;;  %v7051_v62 = vpop.f32.mrb[85].mxu1  ;;  %9078 = vmatprep.subr.bf16.mxu0 %v9077_v13  ;;  %v7216_v51 = vrot.slane %v7152_v38, 1  ;;  %vm14867_vm2 = vmmov %vm14866_vm3  ;;  %v7198_v57 = vsel %vm13779_vm6, %v14175_v63, 0.0 }
 0x70f   : > { %v7167_v14 = vrot.slane %v7151_v33, 7  ;;  %v7215_v47 = vrot.slane %v7151_v33, 1  ;;  %v7137_v25 = vadd.f32 %v14158_v30, %v7051_v62  ;;  %8944 = vmatprep.mubr.msk.f32.mxu0 %vm14862_vm0, %v7151_v33 }
 0x710   : > { %v7154_v35 = vmax.f32 %v7138_v12, 0.0  ;;  %8945 = vmatmul.mubr.msk.f32.gmra.mrb[66].mxu0 %vm14865_vm1, %v7152_v38  ;;  %vm14869_vm1 = vmmov %vm14862_vm0 }
 0x711   : > { %v7153_v59 = vmax.f32 %v7137_v25, 0.0  ;;  %v8920_v32 = vpop.f32.mrb[86].mxu1  ;;  %9080 = vmatpush3.bf16.msra.mxu0 %v9077_v13  ;;  %v14191_v5 = vsel %vm14866_vm3, %v7166_v44, %v7167_v14  ;;  %v14195_v54 = vsel %vm14867_vm2, %v7167_v14, %v7168_v45  ;;  %v14199_v3 = vsel %vm14868_vm4, %v7214_v37, %v7215_v47  ;;  %vm14870_vm3 = vmmov %vm14868_vm4 }
 0x712   : > { %v7170_v31 = vrot.slane %v7154_v35, 7  ;;  %v7140_v39 = vadd.f32 %v8920_v32, %v14158_v30  ;;  %v7061_v19 = vpop.f32.mrb[87].mxu1  ;;  %9082 = vmatprep.subr.bf16.mxu0 %v14184_v24  ;;  %v7218_v44 = vrot.slane %v7154_v35, 1  ;;  %v14208_v37 = vsel %vm14870_vm3, %v7215_v47, %v7216_v51  ;;  %vm14871_vm4 = vmmov %vm14867_vm2 }
 0x713   : > { %v7169_v41 = vrot.slane %v7153_v59, 7  ;;  %v7139_v13 = vadd.f32 %v14158_v30, %v7061_v19  ;;  %8947 = vmatprep.mubr.msk.f32.mxu0 %vm14862_vm0, %v7153_v59  ;;  %v7217_v42 = vrot.slane %v7153_v59, 1  ;;  %v7200_v56 = vsel %vm13848_vm7, %v14195_v54, 0.0 }
 0x714   : > { %v7156_v38 = vmax.f32 %v7140_v39, 0.0  ;;  %8948 = vmatmul.mubr.msk.f32.gmra.mrb[68].mxu0 %vm14869_vm1, %v7154_v35  ;;  %vm14872_vm1 = vmmov %vm14862_vm0 }
 0x715   : > { %v7155_v33 = vmax.f32 %v7139_v13, 0.0  ;;  %v8923_v8 = vpop.f32.mrb[88].mxu1  ;;  %v14212_v12 = vsel %vm14871_vm4, %v7168_v45, %v7169_v41  ;;  %v14216_v62 = vsel %vm14867_vm2, %v7169_v41, %v7170_v31  ;;  %v14224_v45 = vsel %vm14870_vm3, %v7216_v51, %v7217_v42  ;;  %vm14873_vm4 = vmmov %vm14870_vm3 }
 0x716   : > { %v7172_v14 = vrot.slane %v7156_v38, 7  ;;  %v7142_v25 = vadd.f32 %v8923_v8, %v14158_v30  ;;  %v7071_v59 = vpop.f32.mrb[89].mxu1  ;;  %v7220_v32 = vrot.slane %v7156_v38, 1  ;;  %v14228_v41 = vsel %vm14873_vm4, %v7217_v42, %v7218_v44  ;;  %vm14875_vm3 = vmmov %vm14872_vm1 }
 0x717   : > { %v7171_v35 = vrot.slane %v7155_v33, 7  ;;  %v7141_v39 = vadd.f32 %v14158_v30, %v7071_v59  ;;  %8950 = vmatprep.mubr.msk.f32.mxu0 %vm14862_vm0, %v7155_v33  ;;  %v7219_v47 = vrot.slane %v7155_v33, 1  ;;  %vm14874_vm0 = vmmov %vm14867_vm2  ;;  %v7201_v36 = vsel %vm13860_vm8, %v14212_v12, 0.0 }
 0x718   : > { %v7158_v19 = vmax.f32 %v7142_v25, 0.0  ;;  %8951 = vmatmul.mubr.msk.f32.gmra.mrb[70].mxu0 %vm14872_vm1, %v7156_v38  ;;  %v7202_v10 = vsel %vm13877_vm10, %v14216_v62, 0.0  ;;  %v14953_v62 = vld [vmem:[#allocation46_spill] sm:$0xff] }
 0x719   : > { %v7157_v13 = vmax.f32 %v7141_v39, 0.0  ;;  %v8926_v8 = vpop.f32.mrb[90].mxu1  ;;  %v14232_v22 = vsel %vm14867_vm2, %v7170_v31, %v7171_v35  ;;  %v14236_v33 = vsel %vm14874_vm0, %v7171_v35, %v7172_v14  ;;  %v14244_v31 = vsel %vm14873_vm4, %v7218_v44, %v7219_v47  ;;  %vm14876_vm2 = vmmov %vm14873_vm4 }
 0x71a   : > { %v7174_v25 = vrot.slane %v7158_v19, 7  ;;  %v7144_v38 = vadd.f32 %v8926_v8, %v14158_v30  ;;  %v7081_v59 = vpop.f32.mrb[91].mxu1  ;;  %v7222_v51 = vrot.slane %v7158_v19, 1  ;;  %v14248_v35 = vsel %vm14876_vm2, %v7219_v47, %v7220_v32  ;;  %vm14878_vm4 = vmmov %vm14875_vm3 }
 0x71b   : > { %v7173_v6 = vrot.slane %v7157_v13, 7  ;;  %v7143_v17 = vadd.f32 %v14158_v30, %v7081_v59  ;;  %8953 = vmatprep.mubr.msk.f32.mxu0 %vm14872_vm1, %v7157_v13  ;;  %v7221_v42 = vrot.slane %v7157_v13, 1  ;;  %vm14877_vm1 = vmmov %vm14874_vm0  ;;  %v7203_v15 = vsel %vm13888_vm11, %v14232_v22, 0.0  ;;  %v14939_v22 = vld [vmem:[#allocation32_spill] sm:$0xff] }
 0x71c   : > { %v7160_v39 = vmax.f32 %v7144_v38, 0.0  ;;  %8954 = vmatmul.mubr.msk.f32.gmra.mrb[72].mxu0 %vm14875_vm3, %v7158_v19  ;;  %vm14882_vm15 = vmmov %vm14877_vm1  ;;  %v7204_v34 = vsel %vm13908_vm12, %v14236_v33, 0.0  ;;  %vm14909_vm11 = vnez %v14806_v18  ;;  %vm14911_vm12 = vnez %v14808_v11 }
 0x71d   : > { %v7159_v8 = vmax.f32 %v7143_v17, 0.0  ;;  %v8929_v23 = vpop.f32.mrb[92].mxu1  ;;  %v14252_v0 = vsel %vm14874_vm0, %v7172_v14, %v7173_v6  ;;  %v14256_v13 = vsel %vm14877_vm1, %v7173_v6, %v7174_v25  ;;  %v14264_v14 = vsel %vm14876_vm2, %v7220_v32, %v7221_v42  ;;  %vm14880_vm0 = vmmov %vm14876_vm2 }
 0x71e   : > { %v7176_v38 = vrot.slane %v7160_v39, 7  ;;  %v7146_v19 = vadd.f32 %v8929_v23, %v14158_v30  ;;  %v7091_v59 = vpop.f32.mrb[93].mxu1  ;;  %v7224_v44 = vrot.slane %v7160_v39, 1  ;;  %14879 = vst [vmem:[#allocation28_spill] sm:$0xff] %v14264_v14  ;;  %v14268_v6 = vsel %vm14880_vm0, %v7221_v42, %v7222_v51  ;;  %vm14884_vm2 = vmmov %vm14880_vm0 }
 0x71f   : > { %v7175_v40 = vrot.slane %v7159_v8, 7  ;;  %v7145_v2 = vadd.f32 %v14158_v30, %v7091_v59  ;;  %8956 = vmatprep.mubr.msk.f32.mxu0 %vm14875_vm3, %v7159_v8  ;;  %v7223_v17 = vrot.slane %v7159_v8, 1  ;;  %14881 = vst [vmem:[#allocation34_spill] sm:$0xff] %v14268_v6  ;;  %v7205_v63 = vsel %vm13919_vm13, %v14252_v0, 0.0 }
 0x720   : > { %v7162_v47 = vmax.f32 %v7146_v19, 0.0  ;;  %8957 = vmatmul.mubr.msk.f32.gmra.mrb[74].mxu0 %vm14878_vm4, %v7160_v39  ;;  %vm14883_vm4 = vmmov %vm14875_vm3  ;;  %v7206_v52 = vsel %vm13937_vm14, %v14256_v13, 0.0  ;;  %vm14913_vm13 = vnez %v14810_v29  ;;  %v14961_v13 = vld [vmem:[#allocation27_spill] sm:$0xff] }
 0x721   : > { %v7161_v23 = vmax.f32 %v7145_v2, 0.0  ;;  %v8932_v53 = vpop.f32.mrb[94].mxu1  ;;  %v7186_v9 = vsel %vm14877_vm1, %v7174_v25, %v7175_v40  ;;  %v7185_v59 = vsel %vm14882_vm15, %v7175_v40, %v7176_v38  ;;  %v14280_v2 = vsel %vm14884_vm2, %v7222_v51, %v7223_v17  ;;  %vm14886_vm15 = vmmov %vm14880_vm0  ;;  %v7660_v51 = vld [vmem:[#allocation13 + $0x58] sm:$0xff] }
 0x722   : > { %v7178_v8 = vrot.slane %v7162_v47, 7  ;;  %v7148_v19 = vadd.f32 %v8932_v53, %v14158_v30  ;;  %v7101_v39 = vpop.f32.mrb[95].mxu1  ;;  %v7226_v42 = vrot.slane %v7162_v47, 1  ;;  %14885 = vst [vmem:[#allocation35_spill] sm:$0xff] %v14280_v2  ;;  %v14284_v40 = vsel %vm14886_vm15, %v7223_v17, %v7224_v44  ;;  %vm14887_vm0 = vmmov %vm14877_vm1 }
 0x723   : > { %v7177_v55 = vrot.slane %v7161_v23, 7  ;;  %v7225_v46 = vrot.slane %v7161_v23, 1  ;;  %v7147_v32 = vadd.f32 %v14158_v30, %v7101_v39  ;;  %8959 = vmatprep.mubr.msk.f32.mxu0 %vm14875_vm3, %v7161_v23  ;;  %vm14888_vm1 = vmmov %vm14887_vm0  ;;  %v14892_v17 = vrot.slane %v14162_v27, 7 }
 0x724   : > { %v7164_v6 = vmax.f32 %v7148_v19, 0.0  ;;  %8960 = vmatmul.mubr.msk.f32.gmra.mrb[76].mxu0 %vm14883_vm4, %v7162_v47  ;;  %v7659_v47 = vld [vmem:[#allocation13 + $0x50] sm:$0xff]  ;;  %vm14889_vm4 = vmmov %vm14884_vm2  ;;  %v7207_v61 = vsel %vm14909_vm11, %v7186_v9, 0.0  ;;  %v7208_v43 = vsel %vm14911_vm12, %v7185_v59, 0.0  ;;  %vm14925_vm11 = vnez %v14822_v50  ;;  %v8623_v59 = vld [vmem:[#allocation15] ss:$0 sm:$0xff] }
 0x725   : > { %v7163_v53 = vmax.f32 %v7147_v32, 0.0  ;;  %v7184_v25 = vsel %vm14887_vm0, %v7176_v38, %v7177_v55  ;;  %v7183_v30 = vsel %vm14888_vm1, %v7177_v55, %v7178_v8  ;;  %v14293_v2 = vsel %vm14889_vm4, %v7224_v44, %v7225_v46  ;;  %vm14891_vm2 = vmmov %vm14875_vm3  ;;  %v14935_v9 = vld [vmem:[#allocation31_spill] sm:$0xff] }
 0x726   : > { %v7180_v23 = vrot.slane %v7164_v6, 7  ;;  %v7228_v39 = vrot.slane %v7164_v6, 1  ;;  %14890 = vst [vmem:[#allocation43_spill] sm:$0xff] %v14293_v2  ;;  %vm14893_vm15 = vmmov %vm14887_vm0  ;;  %v14895_v32 = vrot.slane %v14162_v27, 1  ;;  %v7209_v48 = vsel %vm14913_vm13, %v7184_v25, 0.0 }
 0x727   : > { %v7179_v19 = vrot.slane %v7163_v53, 7  ;;  %v7227_v14 = vrot.slane %v7163_v53, 1  ;;  %8962 = vmatprep.mubr.msk.f32.mxu0 %vm14875_vm3, %v7163_v53  ;;  %vm14894_vm0 = vmmov %vm14889_vm4  ;;  %vm14927_vm12 = vnez %v14824_v60  ;;  %vm14929_vm13 = vnez %v14826_v16  ;;  %v14934_v60 = vld [vmem:[#allocation28_spill] sm:$0xff]  ;;  %v14938_v16 = vld [vmem:[#allocation34_spill] sm:$0xff] }
 0x728   : > { %8963 = vmatmul.mubr.msk.f32.gmra.mrb[78].mxu0 %vm14891_vm2, %v7164_v6  ;;  %v7196_v38 = vsel %vm14893_vm15, %v7180_v23, %v14892_v17  ;;  %v14302_v55 = vsel %vm14894_vm0, %v7225_v46, %v7226_v42  ;;  %vm14896_vm1 = vmmov %vm14894_vm0  ;;  %v9085_v17 = vpack.c.bf16 %v7660_v51, %v7659_v47 }
 0x729   : > { %v14308_v53 = vsel %vm14896_vm1, %v7228_v39, %v14895_v32  ;;  %v7197_v44 = vsel %vm13773_vm5, %v7196_v38, 0.0  ;;  %vm14897_vm3 = vmmov %vm14893_vm15  ;;  %v14323_v27 = vsel %vm14894_vm0, %v7227_v14, %v7228_v39 }
 0x72a   : > { %v7182_v6 = vsel %vm14897_vm3, %v7178_v8, %v7179_v19  ;;  %vm14898_vm4 = vmmov %vm14897_vm3  ;;  %8973 = vmatprep.mubr.msk.f32.mxu0 %vm14891_vm2, %v7197_v44  ;;  %v7199_v8 = vsel %vm13785_vm9, %v14191_v5, 0.0 }
 0x72b   : > { %v7181_v2 = vsel %vm14898_vm4, %v7179_v19, %v7180_v23  ;;  %vm14899_vm15 = vmmov %vm14894_vm0 }
 0x72c   : > { %v14319_v46 = vsel %vm14899_vm15, %v7226_v42, %v7227_v14  ;;  %vm14900_vm5 = vmmov %vm14891_vm2 }
 0x72d   : > { %8974 = vmatmul.mubr.msk.f32.vlgmr.msra.gmra.mrb[64].mxu0 %vm14900_vm5, %v7198_v57  ;;  %vm14901_vm1 = vmmov %vm14891_vm2  ;;  %vm14915_vm5 = vnez %v14812_v4 }
 0x72e   : > { %9084 = vmatpush3.bf16.msra.mxu0 %v14184_v24  ;;  %8976 = vmatprep.mubr.msk.f32.mxu0 %vm14901_vm1, %v7199_v8  ;;  %vm14902_vm3 = vmmov %vm14901_vm1  ;;  %v7210_v20 = vsel %vm14915_vm5, %v7183_v30, 0.0  ;;  %vm14930_vm5 = vnez %v14828_v58  ;;  %v14942_v58 = vld [vmem:[#allocation35_spill] sm:$0xff]  ;;  %v14943_v24 = vld [vmem:[#allocation41_spill] sm:$0xff] }
 0x72f   : > { %9086 = vmatprep.subr.bf16.mxu0 %v9085_v17  ;;  %vm14903_vm6 = vmmov %vm14901_vm1 }
 0x730   : > { %vm14904_vm9 = vmmov %vm14901_vm1 }
 0x731   : > { %8977 = vmatmul.mubr.msk.f32.gmra.mrb[66].mxu0 %vm14902_vm3, %v7200_v56  ;;  %vm14905_vm7 = vmmov %vm14901_vm1 }
 0x732   : > { %8979 = vmatprep.mubr.msk.f32.mxu0 %vm14903_vm6, %v7201_v36  ;;  %9088 = vmatpush3.bf16.msra.mxu0 %v9085_v17  ;;  %vm14906_vm8 = vmmov %vm14901_vm1  ;;  %vm14919_vm6 = vnez %v14816_v1  ;;  %v7248_v1 = vsel %vm14927_vm12, %v14224_v45, 0.0 }
 0x733   : > { %vm14907_vm4 = vmmov %vm14901_vm1  ;;  %v7212_v11 = vsel %vm14919_vm6, %v7181_v2, 0.0  ;;  %vm14936_vm6 = vnez %v14935_v9 }
 0x734   : > { %vm14908_vm10 = vmmov %vm14901_vm1  ;;  %v7252_v0 = vsel %vm14936_vm6, %v14934_v60, 0.0  ;;  %vm14962_vm6 = vnez %v14961_v13 }
 0x735   : > { %8980 = vmatmul.mubr.msk.f32.gmra.mrb[68].mxu0 %vm14904_vm9, %v7202_v10  ;;  %vm14910_vm2 = vmmov %vm14901_vm1  ;;  %v7260_v14 = vsel %vm14962_vm6, %v14308_v53, 0.0 }
 0x736   : > { %8982 = vmatprep.mubr.msk.f32.mxu0 %vm14905_vm7, %v7203_v15  ;;  %vm14912_vm15 = vmmov %vm14901_vm1  ;;  %vm14921_vm7 = vnez %v14818_v49  ;;  %v7249_v49 = vsel %vm14929_vm13, %v14228_v41, 0.0  ;;  %vm14954_vm13 = vnez %v14953_v62  ;;  %v14955_v41 = vld [vmem:[#allocation50_spill] sm:$0xff] }
 0x737   : > { %vm14914_vm0 = vmmov %vm14901_vm1  ;;  %vm14917_vm1 = vnez %v14814_v21  ;;  %v7245_v29 = vsel %vm14921_vm7, %v14181_v28, 0.0  ;;  %v7247_v21 = vsel %vm14925_vm11, %v14208_v37, 0.0  ;;  %vm14940_vm7 = vnez %v14939_v22  ;;  %v14950_v37 = vld [vmem:[#allocation45_spill] sm:$0xff] }
 0x738   : > { %vm14916_vm14 = vmmov %vm14914_vm0  ;;  %v7211_v18 = vsel %vm14917_vm1, %v7182_v6, 0.0  ;;  %vm14932_vm1 = vnez %v14830_v7  ;;  %v7253_v28 = vsel %vm14940_vm7, %v14938_v16, 0.0  ;;  %v14946_v7 = vld [vmem:[#allocation42_spill] sm:$0xff]  ;;  %vm14951_vm12 = vnez %v14950_v37 }
 0x739   : > { %8983 = vmatmul.mubr.msk.f32.gmra.mrb[70].mxu0 %vm14906_vm8, %v7204_v34  ;;  %vm14918_vm3 = vmmov %vm14914_vm0  ;;  %v7251_v50 = vsel %vm14932_vm1, %v14248_v35, 0.0  ;;  %vm14947_vm11 = vnez %v14946_v7  ;;  %v7257_v45 = vsel %vm14954_vm13, %v14302_v55, 0.0 }
 0x73a   : > { %8985 = vmatprep.mubr.msk.f32.mxu0 %vm14907_vm4, %v7205_v63  ;;  %vm14920_vm9 = vmmov %vm14914_vm0  ;;  %vm14923_vm4 = vnez %v14820_v26  ;;  %v7250_v26 = vsel %vm14930_vm5, %v14244_v31, 0.0  ;;  %v7255_v54 = vsel %vm14947_vm11, %v14284_v40, 0.0  ;;  %vm14956_vm5 = vnez %v14955_v41  ;;  %v14958_v31 = vld [vmem:[#allocation51_spill] sm:$0xff] }
 0x73b   : > { %vm14922_vm8 = vmmov %vm14914_vm0  ;;  %v7246_v4 = vsel %vm14923_vm4, %v14199_v3, 0.0  ;;  %vm14944_vm4 = vnez %v14943_v24  ;;  %v14949_v3 = vld [vmem:[#allocation43_spill] sm:$0xff]  ;;  %v7258_v33 = vsel %vm14956_vm5, %v14319_v46, 0.0  ;;  %vm14959_vm1 = vnez %v14958_v31 }
 0x73c   : > { %v7254_v5 = vsel %vm14944_vm4, %v14942_v58, 0.0  ;;  %v7256_v12 = vsel %vm14951_vm12, %v14949_v3, 0.0  ;;  %v7259_v35 = vsel %vm14959_vm1, %v14323_v27, 0.0  ;;  %vm14965_vm7 = vmmov %vm14914_vm0 }
 0x73d   : > { %8986 = vmatmul.mubr.msk.f32.gmra.mrb[72].mxu0 %vm14908_vm10, %v7206_v52  ;;  %vm14924_vm10 = vmmov %vm14914_vm0 }
 0x73e   : > { %8988 = vmatprep.mubr.msk.f32.mxu0 %vm14910_vm2, %v7207_v61  ;;  %vm14926_vm2 = vmmov %vm14914_vm0 }
 0x73f   : > { %vm14967_vm4 = vmmov %vm14914_vm0 }
 0x740   : > { %vm14969_vm11 = vmmov %vm14914_vm0 }
 0x741   : > { %8989 = vmatmul.mubr.msk.f32.gmra.mrb[74].mxu0 %vm14912_vm15, %v7208_v43  ;;  %vm14928_vm15 = vmmov %vm14914_vm0 }
 0x742   : > { %8991 = vmatprep.mubr.msk.f32.mxu0 %vm14914_vm0, %v7209_v48  ;;  %vm14971_vm12 = vmmov %vm14914_vm0 }
 0x743   : > { %vm14973_vm13 = vmmov %vm14914_vm0 }
 0x744   : > { %vm14974_vm5 = vmmov %vm14914_vm0 }
 0x745   : > { %8992 = vmatmul.mubr.msk.f32.gmra.mrb[76].mxu0 %vm14916_vm14, %v7210_v20  ;;  %vm14931_vm14 = vmmov %vm14914_vm0 }
 0x746   : > { %8994 = vmatprep.mubr.msk.f32.mxu0 %vm14918_vm3, %v7211_v18  ;;  %vm14933_vm3 = vmmov %vm14914_vm0 }
 0x747   : > { %vm14976_vm1 = vmmov %vm14914_vm0 }
 0x748   : > { %vm14978_vm6 = vmmov %vm14914_vm0 }
 0x749   : > { %8995 = vmatmul.mubr.msk.f32.gmra.mrb[78].mxu0 %vm14920_vm9, %v7212_v11  ;;  %vm14937_vm9 = vmmov %vm14914_vm0 }
 0x74a   : > { %9005 = vmatprep.mubr.msk.f32.mxu0 %vm14922_vm8, %v7245_v29  ;;  %vm14941_vm8 = vmmov %vm14914_vm0 }
 0x74d   : > { %9006 = vmatmul.mubr.msk.f32.vlgmr.msra.gmra.mrb[64].mxu0 %vm14924_vm10, %v7246_v4  ;;  %vm14945_vm10 = vmmov %vm14914_vm0 }
 0x74e   : > { %9008 = vmatprep.mubr.msk.f32.mxu0 %vm14926_vm2, %v7247_v21  ;;  %vm14948_vm2 = vmmov %vm14914_vm0 }
 0x751   : > { %9009 = vmatmul.mubr.msk.f32.gmra.mrb[66].mxu0 %vm14928_vm15, %v7248_v1  ;;  %vm14952_vm15 = vmmov %vm14914_vm0 }
 0x752   : > { %9011 = vmatprep.mubr.msk.f32.mxu0 %vm14914_vm0, %v7249_v49 }
 0x755   : > { %9012 = vmatmul.mubr.msk.f32.gmra.mrb[68].mxu0 %vm14931_vm14, %v7250_v26  ;;  %vm14957_vm14 = vmmov %vm14914_vm0 }
 0x756   : > { %9014 = vmatprep.mubr.msk.f32.mxu0 %vm14933_vm3, %v7251_v50  ;;  %vm14960_vm3 = vmmov %vm14914_vm0 }
 0x759   : > { %9015 = vmatmul.mubr.msk.f32.gmra.mrb[70].mxu0 %vm14937_vm9, %v7252_v0  ;;  %vm14963_vm9 = vmmov %vm14914_vm0 }
 0x75a   : > { %9017 = vmatprep.mubr.msk.f32.mxu0 %vm14941_vm8, %v7253_v28  ;;  %vm14966_vm8 = vmmov %vm14914_vm0 }
 0x75d   : > { %9018 = vmatmul.mubr.msk.f32.gmra.mrb[72].mxu0 %vm14945_vm10, %v7254_v5  ;;  %vm14968_vm10 = vmmov %vm14914_vm0 }
 0x75e   : > { %9020 = vmatprep.mubr.msk.f32.mxu0 %vm14948_vm2, %v7255_v54  ;;  %vm14970_vm2 = vmmov %vm14914_vm0 }
 0x761   : > { %9021 = vmatmul.mubr.msk.f32.gmra.mrb[74].mxu0 %vm14952_vm15, %v7256_v12  ;;  %vm14972_vm15 = vmmov %vm14914_vm0 }
 0x762   : > { %9023 = vmatprep.mubr.msk.f32.mxu0 %vm14914_vm0, %v7257_v45 }
 0x765   : > { %9024 = vmatmul.mubr.msk.f32.gmra.mrb[76].mxu0 %vm14957_vm14, %v7258_v33  ;;  %vm14975_vm14 = vmmov %vm14914_vm0 }
 0x766   : > { %9026 = vmatprep.mubr.msk.f32.mxu0 %vm14960_vm3, %v7259_v35  ;;  %vm14977_vm3 = vmmov %vm14914_vm0 }
 0x769   : > { %9027 = vmatmul.mubr.msk.f32.gmra.mrb[78].mxu0 %vm14963_vm9, %v7260_v14  ;;  %vm14979_vm9 = vmmov %vm14914_vm0 }
 0x820   : > { %v9007_v42 = vpop.f32.mrb[64].mxu0 }
 0x821   : > { %v7878_v2 = vadd.f32 %v9007_v42, %v8623_v59  ;;  %v7775_v40 = vpop.f32.mrb[65].mxu0 }
 0x822   : > { %v7877_v25 = vadd.f32 %v8623_v59, %v7775_v40 }
 0x823   : > { %v7894_v30 = vmax.f32 %v7878_v2, 0.0 }
 0x824   : > { %v7893_v23 = vmax.f32 %v7877_v25, 0.0  ;;  %v9010_v39 = vpop.f32.mrb[66].mxu0 }
 0x825   : > { %7910 = vst.msk [vmem:[%s14449_s16 + $0x8] sm:$0xff] %vm14965_vm7, %v7894_v30  ;;  %v7880_v19 = vadd.f32 %v9010_v39, %v8623_v59  ;;  %v7785_v47 = vpop.f32.mrb[67].mxu0 }
 0x826   : > { %7909 = vst.msk [vmem:[%s14449_s16] sm:$0xff] %vm14966_vm8, %v7893_v23  ;;  %v7879_v51 = vadd.f32 %v8623_v59, %v7785_v47 }
 0x827   : > { %v7896_v38 = vmax.f32 %v7880_v19, 0.0 }
 0x828   : > { %v7895_v55 = vmax.f32 %v7879_v51, 0.0  ;;  %v9013_v32 = vpop.f32.mrb[68].mxu0 }
 0x829   : > { %7912 = vst.msk [vmem:[%s14449_s16 + $0x18] sm:$0xff] %vm14967_vm4, %v7896_v38  ;;  %v7882_v53 = vadd.f32 %v9013_v32, %v8623_v59  ;;  %v7795_v44 = vpop.f32.mrb[69].mxu0 }
 0x82a   : > { %7911 = vst.msk [vmem:[%s14449_s16 + $0x10] sm:$0xff] %vm14968_vm10, %v7895_v55  ;;  %v7881_v6 = vadd.f32 %v8623_v59, %v7795_v44 }
 0x82b   : > { %v7898_v17 = vmax.f32 %v7882_v53, 0.0 }
 0x82c   : > { %v7897_v46 = vmax.f32 %v7881_v6, 0.0  ;;  %v9016_v27 = vpop.f32.mrb[70].mxu0 }
 0x82d   : > { %7914 = vst.msk [vmem:[%s14449_s16 + $0x28] sm:$0xff] %vm14969_vm11, %v7898_v17  ;;  %v7884_v57 = vadd.f32 %v9016_v27, %v8623_v59  ;;  %v7805_v8 = vpop.f32.mrb[71].mxu0 }
 0x82e   : > { %7913 = vst.msk [vmem:[%s14449_s16 + $0x20] sm:$0xff] %vm14970_vm2, %v7897_v46  ;;  %v7883_v56 = vadd.f32 %v8623_v59, %v7805_v8 }
 0x82f   : > { %v7900_v36 = vmax.f32 %v7884_v57, 0.0 }
 0x830   : > { %v7899_v10 = vmax.f32 %v7883_v56, 0.0  ;;  %v9019_v15 = vpop.f32.mrb[72].mxu0 }
 0x831   : > { %7916 = vst.msk [vmem:[%s14449_s16 + $0x38] sm:$0xff] %vm14971_vm12, %v7900_v36  ;;  %v7886_v34 = vadd.f32 %v9019_v15, %v8623_v59  ;;  %v7815_v63 = vpop.f32.mrb[73].mxu0 }
 0x832   : > { %7915 = vst.msk [vmem:[%s14449_s16 + $0x30] sm:$0xff] %vm14972_vm15, %v7899_v10  ;;  %v7885_v52 = vadd.f32 %v8623_v59, %v7815_v63 }
 0x833   : > { %v7902_v61 = vmax.f32 %v7886_v34, 0.0 }
 0x834   : > { %v7901_v43 = vmax.f32 %v7885_v52, 0.0  ;;  %v9022_v48 = vpop.f32.mrb[74].mxu0 }
 0x835   : > { %7918 = vst.msk [vmem:[%s14449_s16 + $0x48] sm:$0xff] %vm14973_vm13, %v7902_v61  ;;  %v7888_v20 = vadd.f32 %v9022_v48, %v8623_v59  ;;  %v7825_v18 = vpop.f32.mrb[75].mxu0 }
 0x836   : > { %7917 = vst.msk [vmem:[%s14449_s16 + $0x40] sm:$0xff] %vm14914_vm0, %v7901_v43  ;;  %v7887_v11 = vadd.f32 %v8623_v59, %v7825_v18 }
 0x837   : > { %v7904_v29 = vmax.f32 %v7888_v20, 0.0 }
 0x838   : > { %v7903_v4 = vmax.f32 %v7887_v11, 0.0  ;;  %v9025_v21 = vpop.f32.mrb[76].mxu0 }
 0x839   : > { %7920 = vst.msk [vmem:[%s14449_s16 + $0x58] sm:$0xff] %vm14974_vm5, %v7904_v29  ;;  %v7890_v1 = vadd.f32 %v9025_v21, %v8623_v59  ;;  %v7835_v49 = vpop.f32.mrb[77].mxu0 }
 0x83a   : > { %7919 = vst.msk [vmem:[%s14449_s16 + $0x50] sm:$0xff] %vm14975_vm14, %v7903_v4  ;;  %v7889_v26 = vadd.f32 %v8623_v59, %v7835_v49 }
 0x83b   : > { %v7906_v50 = vmax.f32 %v7890_v1, 0.0 }
 0x83c   : > { %v7905_v60 = vmax.f32 %v7889_v26, 0.0  ;;  %v9028_v9 = vpop.f32.mrb[78].mxu0 }
 0x83d   : > { %7922 = vst.msk [vmem:[%s14449_s16 + $0x68] sm:$0xff] %vm14976_vm1, %v7906_v50  ;;  %v7892_v0 = vadd.f32 %v9028_v9, %v8623_v59  ;;  %v7845_v16 = vpop.f32.mrb[79].mxu0 }
 0x83e   : > { %7921 = vst.msk [vmem:[%s14449_s16 + $0x60] sm:$0xff] %vm14977_vm3, %v7905_v60  ;;  %v7891_v22 = vadd.f32 %v8623_v59, %v7845_v16 }
 0x83f   : > { %v7908_v28 = vmax.f32 %v7892_v0, 0.0 }
 0x840   : > { %v7907_v58 = vmax.f32 %v7891_v22, 0.0 }
 0x841   : > { %7924 = vst.msk [vmem:[%s14449_s16 + $0x78] sm:$0xff] %vm14978_vm6, %v7908_v28 }
 0x842   : > { %7923 = vst.msk [vmem:[%s14449_s16 + $0x70] sm:$0xff] %vm14979_vm9, %v7907_v58 }
 0x843 PF: > { %p26_p5 = scmp.ge.s32.totalorder %s11085_s30, 4   ;;  %s14980_s21 = smov %s10779_s22 }
 0x844   : > { %s14981_s22 = smov %s10783_s23  ;;  %s14982_s23 = smov %s11097_s6 }
 0x845   : > { %s14983_s24 = smov %s11085_s30  ;;  %28 = sbr.rel (!%p26_p5) target bundleno = 12 (0xc), region = 147 }
 0x84c   :  { %7947 = vsyncpa [#allocation3], 1 }
 0x84d   :  { %7949 = vsyncpa [#allocation3 + $0x1], 1 }
 0x84e   :  { %7950 = vsyncpa [#allocation5], 1 }
 0x84f   :  { %7951 = vsyncpa [#allocation8], 1 }
 0x850   :  { %7952 = vsyncpa [#allocation11], 1 }
 0x851   :  { %7953 = vsyncpa [#allocation14], 1 }

</bundles_post_ra>
